<compile_context>
chip_gen: v6e
topology: v6e:2x2x1
jax: 0.10.0
libtpu: 0.0.40
codegen_flags: <defaults>
</compile_context>

<pallas_src>
import functools
import math

import jax
import jax.numpy as jnp
import numpy as np
from jax import lax
from jax.experimental import pallas as pl
from jax.experimental.pallas import tpu as pltpu

_EPS = 1e-5


# --------------------------- tiling helpers ---------------------------------------- #

def _round_up(x, m):
    return (x + m - 1) // m * m


def _fold_factor(m, c):
    """Lane-dense fold factor f: view (M, C) as (M/f, f*C) with f*C >= 128."""
    if c >= 128 or 128 % c != 0:
        return 1
    f = 128 // c
    while f > 1 and m % f != 0:
        f //= 2
    return f


def _m_tile(mp, f, cap=512):
    """Largest row tile <= cap dividing mp whose folded sublane extent stays a
    multiple of 8 (tile must be a multiple of 8*f).  Single tile when mp fits."""
    step = 8 * f
    t = (min(mp, cap) // step) * step
    while t >= step:
        if mp % t == 0:
            return t
        t -= step
    return mp


def _row_tile(mf, cap=1024):
    t = (min(mf, cap) // 8) * 8
    while t >= 8:
        if mf % t == 0:
            return t
        t -= 8
    return mf


@functools.lru_cache(maxsize=None)
def _lane_fold_supported():
    """Probe whether Mosaic supports the in-kernel sublane->lane fold
    (reshape (tm, C) -> (tm/f, f*C)) used to make conv output stores lane-dense.
    Falls back to unfolded (masked) stores if the relayout is unsupported."""
    def probe_kernel(x_ref, o_ref):
        o_ref[...] = x_ref[...].reshape(8, 128).astype(o_ref.dtype)

    try:
        fn = pl.pallas_call(
            probe_kernel,
            out_shape=jax.ShapeDtypeStruct((8, 128), jnp.bfloat16))
        jax.jit(fn).lower(jax.ShapeDtypeStruct((32, 32), jnp.float32)).compile()
        return True
    except Exception:
        return False


# --------------------- conv matmul kernels (MXU + fused BN stats) ------------------- #

def _conv_mm_bias_kernel(a_ref, w_ref, b_ref, o_ref, *, fold):
    # Single full-K dot; weight block is resident (same block every grid step).
    acc = jnp.dot(a_ref[...], w_ref[...], preferred_element_type=jnp.float32)
    acc = acc + b_ref[...]
    tm, c = acc.shape
    o_ref[...] = acc.reshape(tm // fold, fold * c).astype(o_ref.dtype)


def _conv_mm_stats_kernel(a_ref, w_ref, o_ref, sum_ref, ssq_ref, *, fold):
    acc = jnp.dot(a_ref[...], w_ref[...], preferred_element_type=jnp.float32)
    tm, c = acc.shape
    accf = acc.reshape(tm // fold, fold * c)          # lane-dense fold (no-op if fold=1)
    o_ref[...] = accf.astype(o_ref.dtype)
    # fused BN-stats epilogue: per-lane partial sum / sum-of-squares for this M tile
    # (row 0 of an 8-row slab; remaining rows zero so consumers just sum everything).
    s = jnp.sum(accf, axis=0, keepdims=True)
    q = jnp.sum(accf * accf, axis=0, keepdims=True)
    rows = lax.broadcasted_iota(jnp.int32, sum_ref.shape, 0)
    sum_ref[...] = jnp.where(rows == 0, s, 0.0)
    ssq_ref[...] = jnp.where(rows == 0, q, 0.0)


def _conv_matmul(patches, w2, bias, emit_stats):
    """patches: (M, K) bf16, w2: (K, Cout) f32, bias: (Cout,) f32 or None.
    Returns y (Mp, Cout) bf16 (logical row-major view of the folded store),
    per-tile BN partial stats (sum, sumsq) or None, and Mp."""
    M, K = patches.shape
    Cout = w2.shape[1]
    f = _fold_factor(M, Cout) if _lane_fold_supported() else 1
    Kp = _round_up(K, 128)
    Mp = _round_up(M, 8 * f)
    tm = _m_tile(Mp, f)
    n_m = Mp // tm
    cf = f * Cout

    a = patches
    if Mp != M or Kp != K:
        a = jnp.pad(a, ((0, Mp - M), (0, Kp - K)))      # zero rows/cols are stats-safe
    w = w2.astype(jnp.bfloat16)
    if Kp != K:
        w = jnp.pad(w, ((0, Kp - K), (0, 0)))

    inputs = [a, w]
    in_specs = [
        pl.BlockSpec((tm, Kp), lambda i: (i, 0)),
        pl.BlockSpec((Kp, Cout), lambda i: (0, 0)),     # resident: fetched once per call
    ]
    out_shape = [jax.ShapeDtypeStruct((Mp // f, cf), jnp.bfloat16)]
    out_specs = [pl.BlockSpec((tm // f, cf), lambda i: (i, 0))]

    if emit_stats:
        assert bias is None
        kernel = functools.partial(_conv_mm_stats_kernel, fold=f)
        out_shape += [jax.ShapeDtypeStruct((n_m * 8, cf), jnp.float32)] * 2
        out_specs += [pl.BlockSpec((8, cf), lambda i: (i, 0)),
                      pl.BlockSpec((8, cf), lambda i: (i, 0))]
    else:
        assert bias is not None
        kernel = functools.partial(_conv_mm_bias_kernel, fold=f)
        inputs.append(bias.reshape(1, Cout).astype(jnp.float32))
        in_specs.append(pl.BlockSpec((1, Cout), lambda i: (0, 0)))

    res = pl.pallas_call(
        kernel,
        out_shape=tuple(out_shape),
        grid_spec=pltpu.PrefetchScalarGridSpec(
            num_scalar_prefetch=0,
            grid=(n_m,),
            in_specs=in_specs,
            out_specs=tuple(out_specs),
        ),
        compiler_params=pltpu.CompilerParams(dimension_semantics=("parallel",)),
    )(*inputs)

    if emit_stats:
        yf, s_part, q_part = res
        stats = (s_part, q_part)
    else:
        yf = res[0] if isinstance(res, (tuple, list)) else res
        stats = None
    # The lane fold is a pure row-major reshape -> free logical view back to (Mp, Cout).
    return yf.reshape(Mp, Cout), stats, Mp


# ------------------- hoisted BN scale/shift + fused pointwise kernels --------------- #

def _bn_affine(stats, gamma, beta, m_true):
    """Reduce per-tile BN partials to per-channel (scale, shift) once per BatchNorm
    (tiny XLA op), hoisted out of the per-row-tile pointwise kernels."""
    s_part, q_part = stats
    c = gamma.shape[0]
    f_stat = s_part.shape[1] // c
    tot_s = jnp.sum(s_part, axis=0).reshape(f_stat, c).sum(axis=0)
    tot_q = jnp.sum(q_part, axis=0).reshape(f_stat, c).sum(axis=0)
    mean = tot_s / m_true
    var = jnp.maximum(tot_q / m_true - mean * mean, 0.0)
    scale = gamma * lax.rsqrt(var + _EPS)
    shift = beta - mean * scale
    return scale, shift


def _bn_relu_kernel(y_ref, sc_ref, sh_ref, o_ref):
    y = y_ref[...].astype(jnp.float32)
    o_ref[...] = jnp.maximum(y * sc_ref[...] + sh_ref[...], 0.0).astype(o_ref.dtype)


def _bn_add_relu_kernel(y2_ref, x_ref, sc2_ref, sh2_ref, o_ref):
    res = y2_ref[...].astype(jnp.float32) * sc2_ref[...] + sh2_ref[...]
    o_ref[...] = jnp.maximum(x_ref[...].astype(jnp.float32) + res, 0.0).astype(o_ref.dtype)


def _bn_bn_add_relu_kernel(y2_ref, yd_ref, sc2_ref, sh2_ref, scd_ref, shd_ref, o_ref):
    res = y2_ref[...].astype(jnp.float32) * sc2_ref[...] + sh2_ref[...]
    sc = yd_ref[...].astype(jnp.float32) * scd_ref[...] + shd_ref[...]
    o_ref[...] = jnp.maximum(sc + res, 0.0).astype(o_ref.dtype)


def _launch_pointwise(kernel, blocked, vectors, mp, c):
    """blocked: (Mp, C) bf16 activations (fed lane-dense folded to (Mp/f, f*C));
    vectors: (C,) f32 per-channel params (tiled once to a single (1, f*C) row).
    Kernel argument order: all blocked refs, then all vector refs, then output."""
    f = _fold_factor(mp, c)
    mf, cf = mp // f, f * c
    tmf = _row_tile(mf)
    arrays, in_specs = [], []
    for arr in blocked:
        arrays.append(arr.reshape(mf, cf))              # free row-major reshape
        in_specs.append(pl.BlockSpec((tmf, cf), lambda i: (i, 0)))
    for v in vectors:
        arrays.append(jnp.tile(v.astype(jnp.float32), (f,)).reshape(1, cf))
        in_specs.append(pl.BlockSpec((1, cf), lambda i: (0, 0)))
    out = pl.pallas_call(
        kernel,
        out_shape=jax.ShapeDtypeStruct((mf, cf), jnp.bfloat16),
        grid_spec=pltpu.PrefetchScalarGridSpec(
            num_scalar_prefetch=0,
            grid=(mf // tmf,),
            in_specs=in_specs,
            out_specs=pl.BlockSpec((tmf, cf), lambda i: (i, 0)),
        ),
        compiler_params=pltpu.CompilerParams(dimension_semantics=("parallel",)),
    )(*arrays)
    return out.reshape(mp, c)


# ------------------------------- conv wrapper --------------------------------------- #

def _extract_patches(x, k, stride, padding):
    """im2col glue (XLA): x (B, H, W, C) bf16 -> (B*Hout*Wout, k*k*C), order (kh, kw, ci)."""
    B, H, W, C = x.shape
    xp = jnp.pad(x, ((0, 0), (padding, padding), (padding, padding), (0, 0)))
    Hp, Wp = H + 2 * padding, W + 2 * padding
    Hout = (Hp - k) // stride + 1
    Wout = (Wp - k) // stride + 1
    cols = []
    for kh in range(k):
        for kw in range(k):
            sl = xp[:,
                    kh:kh + stride * (Hout - 1) + 1:stride,
                    kw:kw + stride * (Wout - 1) + 1:stride,
                    :]
            cols.append(sl)
    patches = jnp.concatenate(cols, axis=-1)
    return patches.reshape(B * Hout * Wout, k * k * C), Hout, Wout


def conv2d(x, p, stride, padding, use_bias):
    """Spatial conv (temporal kernel = 1).  x: (B, H, W, Cin) bf16.
    Returns y (Mp, Cout) bf16, BN partial stats (None when use_bias), (B, Hout, Wout),
    the true row count M and padded row count Mp."""
    B, H, W, Cin = x.shape
    k = p["w"].shape[0]
    Cout = p["w"].shape[-1]
    patches, Hout, Wout = _extract_patches(x, k, stride, padding)
    w2 = p["w"].reshape(k * k * Cin, Cout)
    bias = p["b"] if use_bias else None  # bias is a no-op before training-mode BN
    y, stats, Mp = _conv_matmul(patches, w2, bias, emit_stats=not use_bias)
    return y, stats, (B, Hout, Wout), B * Hout * Wout, Mp


# ----------------------------- parameter init --------------------------------------- #

def _init_conv(key, cin, cout, k):
    kw_, kb_ = jax.random.split(key)
    fan_in = cin * k * k
    bound = 1.0 / math.sqrt(fan_in)
    w = jax.random.uniform(kw_, (k, k, cin, cout), jnp.float32, -bound, bound)
    b = jax.random.uniform(kb_, (cout,), jnp.float32, -bound, bound)
    return {"w": w, "b": b}


def _init_bn(c):
    return {"gamma": jnp.ones((c,), jnp.float32), "beta": jnp.zeros((c,), jnp.float32)}


def _init_block(key, cin, cout, k, downsample):
    keys = jax.random.split(key, 3)
    p = {
        "conv1": _init_conv(keys[0], cin, cout, k),
        "bn1": _init_bn(cout),
        "conv2": _init_conv(keys[1], cout, cout, k),
        "bn2": _init_bn(cout),
    }
    if downsample:
        p["dsconv"] = _init_conv(keys[2], cin, cout, 1)
        p["dsbn"] = _init_bn(cout)
    return p


def _init_layer(key, cin, cout, k, layer_size, downsample):
    keys = jax.random.split(key, layer_size)
    blocks = [_init_block(keys[0], cin, cout, k, downsample)]
    for i in range(1, layer_size):
        blocks.append(_init_block(keys[i], cout, cout, k, False))
    return blocks


def init_resnet(key, layer_sizes=(3, 3, 3, 3)):
    keys = jax.random.split(key, 5)
    return {
        "conv1": _init_conv(keys[0], 3, 32, 7),
        "conv2": _init_layer(keys[1], 32, 32, 3, layer_sizes[0], False),
        "conv3": _init_layer(keys[2], 32, 64, 3, layer_sizes[1], True),
        "conv4": _init_layer(keys[3], 64, 128, 3, layer_sizes[2], True),
        "conv5": _init_layer(keys[4], 128, 256, 3, layer_sizes[3], True),
    }


# ------------------------------- forward pass --------------------------------------- #

def block_forward(p, x, k, downsample):
    pad = k // 2
    stride = 2 if downsample else 1
    cout = p["conv1"]["w"].shape[-1]

    y1, st1, (B, Ho, Wo), M, Mp = conv2d(x, p["conv1"], stride, pad, use_bias=False)
    sc1, sh1 = _bn_affine(st1, p["bn1"]["gamma"], p["bn1"]["beta"], M)
    r1 = _launch_pointwise(_bn_relu_kernel, [y1], [sc1, sh1], Mp, cout)
    r1 = (r1[:M] if Mp != M else r1).reshape(B, Ho, Wo, cout)
    # TODO(synk): assemble conv2's patch tile in-kernel from a halo'd activation slab
    # (memory_space=pl.ANY + manual DMA) and fold bn1+ReLU into that A-tile build,
    # removing this HBM round trip and the k*k im2col read amplification.

    y2, st2, _, _, _ = conv2d(r1, p["conv2"], 1, pad, use_bias=False)
    sc2, sh2 = _bn_affine(st2, p["bn2"]["gamma"], p["bn2"]["beta"], M)

    if downsample:
        yd, std, _, _, _ = conv2d(x, p["dsconv"], 2, 0, use_bias=False)
        scd, shd = _bn_affine(std, p["dsbn"]["gamma"], p["dsbn"]["beta"], M)
        out = _launch_pointwise(_bn_bn_add_relu_kernel, [y2, yd],
                                [sc2, sh2, scd, shd], Mp, cout)
    else:
        x_flat = x.reshape(M, cout)
        if Mp != M:
            x_flat = jnp.pad(x_flat, ((0, Mp - M), (0, 0)))
        out = _launch_pointwise(_bn_add_relu_kernel, [y2, x_flat],
                                [sc2, sh2], Mp, cout)
    out = out[:M] if Mp != M else out
    return out.reshape(B, Ho, Wo, cout)


def layer_forward(blocks, x, k, downsample):
    x = block_forward(blocks[0], x, k, downsample)
    for bp in blocks[1:]:
        x = block_forward(bp, x, k, False)
    return x


def resnet_forward(params, x):
    # x: (B, H, W, C) with B = N * T; activations kept bf16 end-to-end.
    x = x.astype(jnp.bfloat16)
    y, _, (B, Ho, Wo), M, Mp = conv2d(x, params["conv1"], 2, 3, use_bias=True)
    y = y[:M] if Mp != M else y
    x = y.reshape(B, Ho, Wo, 32)
    x = layer_forward(params["conv2"], x, 3, downsample=False)
    x = layer_forward(params["conv3"], x, 3, downsample=True)
    x = layer_forward(params["conv4"], x, 3, downsample=True)
    x = layer_forward(params["conv5"], x, 3, downsample=True)
    return x


# ----------------------- pure-JAX reference (for validation) ------------------------ #

def _ref_conv(x, p, stride, padding):
    y = lax.conv_general_dilated(
        x.astype(jnp.bfloat16), p["w"].astype(jnp.bfloat16),
        window_strides=(stride, stride),
        padding=[(padding, padding), (padding, padding)],
        dimension_numbers=("NHWC", "HWIO", "NHWC"),
        preferred_element_type=jnp.float32)
    return y + p["b"].reshape(1, 1, 1, -1)


def _ref_bn(x, p, relu):
    mean = jnp.mean(x, axis=(0, 1, 2), keepdims=True)
    var = jnp.mean((x - mean) ** 2, axis=(0, 1, 2), keepdims=True)
    y = (x - mean) * lax.rsqrt(var + _EPS) * p["gamma"] + p["beta"]
    return jnp.maximum(y, 0.0) if relu else y


def _ref_block(p, x, k, downsample):
    pad = k // 2
    stride = 2 if downsample else 1
    r = _ref_bn(_ref_conv(x, p["conv1"], stride, pad), p["bn1"], True)
    r = _ref_bn(_ref_conv(r, p["conv2"], 1, pad), p["bn2"], False)
    if downsample:
        x = _ref_bn(_ref_conv(x, p["dsconv"], 2, 0), p["dsbn"], False)
    return jnp.maximum(x + r, 0.0)


def ref_forward(params, x):
    x = _ref_conv(x, params["conv1"], 2, 3)
    for name, ds in (("conv2", False), ("conv3", True), ("conv4", True), ("conv5", True)):
        blocks = params[name]
        x = _ref_block(blocks[0], x, 3, ds)
        for bp in blocks[1:]:
            x = _ref_block(bp, x, 3, False)
    return x


# ------------------------------------ main ------------------------------------------ #

if __name__ == "__main__":
    N, C, T, H, W = 1, 3, 4, 16, 16
    key = jax.random.PRNGKey(0)
    kx, kp = jax.random.split(key)

    # PyTorch-convention input (N, C, T, H, W); fold time into batch, channels last.
    x_ncthw = jax.random.normal(kx, (N, C, T, H, W), jnp.float32)
    x = jnp.transpose(x_ncthw, (0, 2, 3, 4, 1)).reshape(N * T, H, W, C)

    params = init_resnet(kp)

    # Probe the lane-fold capability once before tracing the full forward.
    _lane_fold_supported()

    out = jax.jit(resnet_forward)(params, x)      # (N*T, 1, 1, 256) bf16
    jax.block_until_ready(out)

    # back to PyTorch layout (N, C_out, T, H', W')
    Hf, Wf, Cf = out.shape[1], out.shape[2], out.shape[3]
    out_ncthw = jnp.transpose(out.reshape(N, T, Hf, Wf, Cf), (0, 4, 1, 2, 3))
    assert out_ncthw.shape == (N, 256, T, 1, 1), out_ncthw.shape
    assert bool(jnp.all(jnp.isfinite(out_ncthw.astype(jnp.float32))))

    # loose numerical sanity check against a plain-JAX reference (bf16 conv operands /
    # bf16 activation storage in the kernel path, f32 accumulation, training-mode BN)
    # -- catches wiring/logic bugs, tolerant of tiling order and bf16 rounding through
    # 25 conv layers.
    ref = jax.jit(ref_forward)(params, x)
    out_np = np.asarray(out, dtype=np.float32)
    ref_np = np.asarray(ref, dtype=np.float32)
    rel_err = np.linalg.norm(out_np - ref_np) / (np.linalg.norm(ref_np) + 1e-6)
    assert rel_err < 0.25, f"relative error too large: {rel_err}"

    print("KERNEL_OK")
</pallas_src>

<mosaic_0001>
module attributes {stable_mosaic.version = 11 : i64} {
  func.func @_conv_mm_bias_kernel(%arg0: i32, %arg1: memref<256x256xbf16, #tpu.memory_space<vmem>>, %arg2: memref<256x32xbf16, #tpu.memory_space<vmem>>, %arg3: memref<1x32xf32, #tpu.memory_space<vmem>>, %arg4: memref<256x32xbf16, #tpu.memory_space<vmem>>) attributes {dimension_semantics = [#tpu.dimension_semantics<parallel>], iteration_bounds = array<i64: 1>, scalar_prefetch = 0 : i64, scratch_operands = 0 : i64, tpu.core_type = #tpu.core_type<tc>, window_params = [{transform_indices = @transform_0, window_bounds = array<i64: 256, 256>}, {pipeline_mode = #tpu.pipeline_mode<synchronous>, transform_indices = @transform_1, window_bounds = array<i64: 256, 32>}, {pipeline_mode = #tpu.pipeline_mode<synchronous>, transform_indices = @transform_2, window_bounds = array<i64: 1, 32>}, {transform_indices = @transform_3, window_bounds = array<i64: 256, 32>}]} {
    %c0 = arith.constant 0 : index
    %c0_0 = arith.constant 0 : index
    %0 = vector.load %arg1[%c0, %c0_0] : memref<256x256xbf16, #tpu.memory_space<vmem>>, vector<256x256xbf16>
    %c0_1 = arith.constant 0 : index
    %c0_2 = arith.constant 0 : index
    %1 = vector.load %arg2[%c0_1, %c0_2] : memref<256x32xbf16, #tpu.memory_space<vmem>>, vector<256x32xbf16>
    %cst = arith.constant dense<0.000000e+00> : vector<256x32xf32>
    %2 = tpu.matmul %0, %1, %cst {dimension_numbers = #tpu.dot_dimension_numbers<[1], [0], [0], [1], [0, 0, 1, 1], [], []>} : vector<256x256xbf16>, vector<256x32xbf16>, vector<256x32xf32> -> vector<256x32xf32>
    %c0_3 = arith.constant 0 : index
    %c0_4 = arith.constant 0 : index
    %3 = vector.load %arg3[%c0_3, %c0_4] : memref<1x32xf32, #tpu.memory_space<vmem>>, vector<1x32xf32>
    %4 = vector.broadcast %3 : vector<1x32xf32> to vector<256x32xf32>
    %5 = arith.addf %2, %4 : vector<256x32xf32>
    %6 = arith.truncf %5 : vector<256x32xf32> to vector<256x32xbf16>
    %c0_5 = arith.constant 0 : index
    %c0_6 = arith.constant 0 : index
    %7 = vector.load %arg4[%c0_5, %c0_6] : memref<256x32xbf16, #tpu.memory_space<vmem>>, vector<256x32xbf16>
    tpu.vector_store %arg4[%c0_5, %c0_6], %6 {strides = array<i32>} : memref<256x32xbf16, #tpu.memory_space<vmem>>, vector<256x32xbf16>,
    return
  }
  func.func @transform_0(%arg0: i32) -> (i32, i32) {
    %c0_i32 = arith.constant 0 : i32
    %c0_i32_0 = arith.constant 0 : i32
    return %arg0, %c0_i32 : i32, i32
  }
  func.func @transform_1(%arg0: i32) -> (i32, i32) {
    %c0_i32 = arith.constant 0 : i32
    %c0_i32_0 = arith.constant 0 : i32
    %c0_i32_1 = arith.constant 0 : i32
    return %c0_i32, %c0_i32_0 : i32, i32
  }
  func.func @transform_2(%arg0: i32) -> (i32, i32) {
    %c0_i32 = arith.constant 0 : i32
    %c0_i32_0 = arith.constant 0 : i32
    %c0_i32_1 = arith.constant 0 : i32
    return %c0_i32, %c0_i32_0 : i32, i32
  }
  func.func @transform_3(%arg0: i32) -> (i32, i32) {
    %c0_i32 = arith.constant 0 : i32
    %c0_i32_0 = arith.constant 0 : i32
    return %arg0, %c0_i32 : i32, i32
  }
}

module attributes {stable_mosaic.version = 11 : i64} {
  func.func @_conv_mm_stats_kernel(%arg0: i32, %arg1: memref<256x384xbf16, #tpu.memory_space<vmem>>, %arg2: memref<384x32xbf16, #tpu.memory_space<vmem>>, %arg3: memref<256x32xbf16, #tpu.memory_space<vmem>>, %arg4: memref<8x32xf32, #tpu.memory_space<vmem>>, %arg5: memref<8x32xf32, #tpu.memory_space<vmem>>) attributes {dimension_semantics = [#tpu.dimension_semantics<parallel>], iteration_bounds = array<i64: 1>, scalar_prefetch = 0 : i64, scratch_operands = 0 : i64, tpu.core_type = #tpu.core_type<tc>, window_params = [{transform_indices = @transform_0, window_bounds = array<i64: 256, 384>}, {pipeline_mode = #tpu.pipeline_mode<synchronous>, transform_indices = @transform_1, window_bounds = array<i64: 384, 32>}, {transform_indices = @transform_2, window_bounds = array<i64: 256, 32>}, {transform_indices = @transform_3, window_bounds = array<i64: 8, 32>}, {transform_indices = @transform_4, window_bounds = array<i64: 8, 32>}]} {
    %c0 = arith.constant 0 : index
    %c0_0 = arith.constant 0 : index
    %0 = vector.load %arg1[%c0, %c0_0] : memref<256x384xbf16, #tpu.memory_space<vmem>>, vector<256x384xbf16>
    %c0_1 = arith.constant 0 : index
    %c0_2 = arith.constant 0 : index
    %1 = vector.load %arg2[%c0_1, %c0_2] : memref<384x32xbf16, #tpu.memory_space<vmem>>, vector<384x32xbf16>
    %cst = arith.constant dense<0.000000e+00> : vector<256x32xf32>
    %2 = tpu.matmul %0, %1, %cst {dimension_numbers = #tpu.dot_dimension_numbers<[1], [0], [0], [1], [0, 0, 1, 1], [], []>} : vector<256x384xbf16>, vector<384x32xbf16>, vector<256x32xf32> -> vector<256x32xf32>
    %3 = arith.truncf %2 : vector<256x32xf32> to vector<256x32xbf16>
    %c0_3 = arith.constant 0 : index
    %c0_4 = arith.constant 0 : index
    %4 = vector.load %arg3[%c0_3, %c0_4] : memref<256x32xbf16, #tpu.memory_space<vmem>>, vector<256x32xbf16>
    tpu.vector_store %arg3[%c0_3, %c0_4], %3 {strides = array<i32>} : memref<256x32xbf16, #tpu.memory_space<vmem>>, vector<256x32xbf16>,
    %cst_5 = arith.constant dense<0.000000e+00> : vector<32xf32>
    %5 = vector.multi_reduction <add>, %2, %cst_5 [0] : vector<256x32xf32> to vector<32xf32>
    %6 = vector.shape_cast %5 : vector<32xf32> to vector<1x32xf32>
    %7 = arith.mulf %2, %2 : vector<256x32xf32>
    %cst_6 = arith.constant dense<0.000000e+00> : vector<32xf32>
    %8 = vector.multi_reduction <add>, %7, %cst_6 [0] : vector<256x32xf32> to vector<32xf32>
    %9 = vector.shape_cast %8 : vector<32xf32> to vector<1x32xf32>
    %10 = tpu.iota {dimensions = array<i32: 0>} : vector<8x32xi32>
    %c0_i32 = arith.constant 0 : i32
    %11 = vector.broadcast %c0_i32 : i32 to vector<8x32xi32>
    %12 = arith.cmpi eq, %10, %11 : vector<8x32xi32>
    %cst_7 = arith.constant 0.000000e+00 : f32
    %13 = vector.shape_cast %6 : vector<1x32xf32> to vector<1x32xf32>
    %14 = vector.broadcast %13 : vector<1x32xf32> to vector<8x32xf32>
    %15 = vector.broadcast %cst_7 : f32 to vector<8x32xf32>
    %16 = arith.select %12, %14, %15 : vector<8x32xi1>, vector<8x32xf32>
    %c0_8 = arith.constant 0 : index
    %c0_9 = arith.constant 0 : index
    %17 = vector.load %arg4[%c0_8, %c0_9] : memref<8x32xf32, #tpu.memory_space<vmem>>, vector<8x32xf32>
    tpu.vector_store %arg4[%c0_8, %c0_9], %16 {strides = array<i32>} : memref<8x32xf32, #tpu.memory_space<vmem>>, vector<8x32xf32>,
    %c0_i32_10 = arith.constant 0 : i32
    %18 = vector.broadcast %c0_i32_10 : i32 to vector<8x32xi32>
    %19 = arith.cmpi eq, %10, %18 : vector<8x32xi32>
    %cst_11 = arith.constant 0.000000e+00 : f32
    %20 = vector.shape_cast %9 : vector<1x32xf32> to vector<1x32xf32>
    %21 = vector.broadcast %20 : vector<1x32xf32> to vector<8x32xf32>
    %22 = vector.broadcast %cst_11 : f32 to vector<8x32xf32>
    %23 = arith.select %19, %21, %22 : vector<8x32xi1>, vector<8x32xf32>
    %c0_12 = arith.constant 0 : index
    %c0_13 = arith.constant 0 : index
    %24 = vector.load %arg5[%c0_12, %c0_13] : memref<8x32xf32, #tpu.memory_space<vmem>>, vector<8x32xf32>
    tpu.vector_store %arg5[%c0_12, %c0_13], %23 {strides = array<i32>} : memref<8x32xf32, #tpu.memory_space<vmem>>, vector<8x32xf32>,
    return
  }
  func.func @transform_0(%arg0: i32) -> (i32, i32) {
    %c0_i32 = arith.constant 0 : i32
    %c0_i32_0 = arith.constant 0 : i32
    return %arg0, %c0_i32 : i32, i32
  }
  func.func @transform_1(%arg0: i32) -> (i32, i32) {
    %c0_i32 = arith.constant 0 : i32
    %c0_i32_0 = arith.constant 0 : i32
    %c0_i32_1 = arith.constant 0 : i32
    return %c0_i32, %c0_i32_0 : i32, i32
  }
  func.func @transform_2(%arg0: i32) -> (i32, i32) {
    %c0_i32 = arith.constant 0 : i32
    %c0_i32_0 = arith.constant 0 : i32
    return %arg0, %c0_i32 : i32, i32
  }
  func.func @transform_3(%arg0: i32) -> (i32, i32) {
    %c0_i32 = arith.constant 0 : i32
    %c0_i32_0 = arith.constant 0 : i32
    return %arg0, %c0_i32 : i32, i32
  }
  func.func @transform_4(%arg0: i32) -> (i32, i32) {
    %c0_i32 = arith.constant 0 : i32
    %c0_i32_0 = arith.constant 0 : i32
    return %arg0, %c0_i32 : i32, i32
  }
}

module attributes {stable_mosaic.version = 11 : i64} {
  func.func @_bn_relu_kernel(%arg0: i32, %arg1: memref<64x128xbf16, #tpu.memory_space<vmem>>, %arg2: memref<1x128xf32, #tpu.memory_space<vmem>>, %arg3: memref<1x128xf32, #tpu.memory_space<vmem>>, %arg4: memref<64x128xbf16, #tpu.memory_space<vmem>>) attributes {dimension_semantics = [#tpu.dimension_semantics<parallel>], iteration_bounds = array<i64: 1>, scalar_prefetch = 0 : i64, scratch_operands = 0 : i64, tpu.core_type = #tpu.core_type<tc>, window_params = [{transform_indices = @transform_0, window_bounds = array<i64: 64, 128>}, {pipeline_mode = #tpu.pipeline_mode<synchronous>, transform_indices = @transform_1, window_bounds = array<i64: 1, 128>}, {pipeline_mode = #tpu.pipeline_mode<synchronous>, transform_indices = @transform_2, window_bounds = array<i64: 1, 128>}, {transform_indices = @transform_3, window_bounds = array<i64: 64, 128>}]} {
    %c0 = arith.constant 0 : index
    %c0_0 = arith.constant 0 : index
    %0 = vector.load %arg1[%c0, %c0_0] : memref<64x128xbf16, #tpu.memory_space<vmem>>, vector<64x128xbf16>
    %1 = arith.extf %0 : vector<64x128xbf16> to vector<64x128xf32>
    %c0_1 = arith.constant 0 : index
    %c0_2 = arith.constant 0 : index
    %2 = vector.load %arg2[%c0_1, %c0_2] : memref<1x128xf32, #tpu.memory_space<vmem>>, vector<1x128xf32>
    %3 = vector.broadcast %2 : vector<1x128xf32> to vector<64x128xf32>
    %4 = arith.mulf %1, %3 : vector<64x128xf32>
    %c0_3 = arith.constant 0 : index
    %c0_4 = arith.constant 0 : index
    %5 = vector.load %arg3[%c0_3, %c0_4] : memref<1x128xf32, #tpu.memory_space<vmem>>, vector<1x128xf32>
    %6 = vector.broadcast %5 : vector<1x128xf32> to vector<64x128xf32>
    %7 = arith.addf %4, %6 : vector<64x128xf32>
    %cst = arith.constant 0.000000e+00 : f32
    %8 = vector.broadcast %cst : f32 to vector<64x128xf32>
    %9 = arith.maximumf %7, %8 : vector<64x128xf32>
    %10 = arith.truncf %9 : vector<64x128xf32> to vector<64x128xbf16>
    %c0_5 = arith.constant 0 : index
    %c0_6 = arith.constant 0 : index
    %11 = vector.load %arg4[%c0_5, %c0_6] : memref<64x128xbf16, #tpu.memory_space<vmem>>, vector<64x128xbf16>
    tpu.vector_store %arg4[%c0_5, %c0_6], %10 {strides = array<i32>} : memref<64x128xbf16, #tpu.memory_space<vmem>>, vector<64x128xbf16>,
    return
  }
  func.func @transform_0(%arg0: i32) -> (i32, i32) {
    %c0_i32 = arith.constant 0 : i32
    %c0_i32_0 = arith.constant 0 : i32
    return %arg0, %c0_i32 : i32, i32
  }
  func.func @transform_1(%arg0: i32) -> (i32, i32) {
    %c0_i32 = arith.constant 0 : i32
    %c0_i32_0 = arith.constant 0 : i32
    %c0_i32_1 = arith.constant 0 : i32
    return %c0_i32, %c0_i32_0 : i32, i32
  }
  func.func @transform_2(%arg0: i32) -> (i32, i32) {
    %c0_i32 = arith.constant 0 : i32
    %c0_i32_0 = arith.constant 0 : i32
    %c0_i32_1 = arith.constant 0 : i32
    return %c0_i32, %c0_i32_0 : i32, i32
  }
  func.func @transform_3(%arg0: i32) -> (i32, i32) {
    %c0_i32 = arith.constant 0 : i32
    %c0_i32_0 = arith.constant 0 : i32
    return %arg0, %c0_i32 : i32, i32
  }
}

module attributes {stable_mosaic.version = 11 : i64} {
  func.func @_bn_add_relu_kernel(%arg0: i32, %arg1: memref<64x128xbf16, #tpu.memory_space<vmem>>, %arg2: memref<64x128xbf16, #tpu.memory_space<vmem>>, %arg3: memref<1x128xf32, #tpu.memory_space<vmem>>, %arg4: memref<1x128xf32, #tpu.memory_space<vmem>>, %arg5: memref<64x128xbf16, #tpu.memory_space<vmem>>) attributes {dimension_semantics = [#tpu.dimension_semantics<parallel>], iteration_bounds = array<i64: 1>, scalar_prefetch = 0 : i64, scratch_operands = 0 : i64, tpu.core_type = #tpu.core_type<tc>, window_params = [{transform_indices = @transform_0, window_bounds = array<i64: 64, 128>}, {transform_indices = @transform_1, window_bounds = array<i64: 64, 128>}, {pipeline_mode = #tpu.pipeline_mode<synchronous>, transform_indices = @transform_2, window_bounds = array<i64: 1, 128>}, {pipeline_mode = #tpu.pipeline_mode<synchronous>, transform_indices = @transform_3, window_bounds = array<i64: 1, 128>}, {transform_indices = @transform_4, window_bounds = array<i64: 64, 128>}]} {
    %c0 = arith.constant 0 : index
    %c0_0 = arith.constant 0 : index
    %0 = vector.load %arg1[%c0, %c0_0] : memref<64x128xbf16, #tpu.memory_space<vmem>>, vector<64x128xbf16>
    %1 = arith.extf %0 : vector<64x128xbf16> to vector<64x128xf32>
    %c0_1 = arith.constant 0 : index
    %c0_2 = arith.constant 0 : index
    %2 = vector.load %arg3[%c0_1, %c0_2] : memref<1x128xf32, #tpu.memory_space<vmem>>, vector<1x128xf32>
    %3 = vector.broadcast %2 : vector<1x128xf32> to vector<64x128xf32>
    %4 = arith.mulf %1, %3 : vector<64x128xf32>
    %c0_3 = arith.constant 0 : index
    %c0_4 = arith.constant 0 : index
    %5 = vector.load %arg4[%c0_3, %c0_4] : memref<1x128xf32, #tpu.memory_space<vmem>>, vector<1x128xf32>
    %6 = vector.broadcast %5 : vector<1x128xf32> to vector<64x128xf32>
    %7 = arith.addf %4, %6 : vector<64x128xf32>
    %c0_5 = arith.constant 0 : index
    %c0_6 = arith.constant 0 : index
    %8 = vector.load %arg2[%c0_5, %c0_6] : memref<64x128xbf16, #tpu.memory_space<vmem>>, vector<64x128xbf16>
    %9 = arith.extf %8 : vector<64x128xbf16> to vector<64x128xf32>
    %10 = arith.addf %9, %7 : vector<64x128xf32>
    %cst = arith.constant 0.000000e+00 : f32
    %11 = vector.broadcast %cst : f32 to vector<64x128xf32>
    %12 = arith.maximumf %10, %11 : vector<64x128xf32>
    %13 = arith.truncf %12 : vector<64x128xf32> to vector<64x128xbf16>
    %c0_7 = arith.constant 0 : index
    %c0_8 = arith.constant 0 : index
    %14 = vector.load %arg5[%c0_7, %c0_8] : memref<64x128xbf16, #tpu.memory_space<vmem>>, vector<64x128xbf16>
    tpu.vector_store %arg5[%c0_7, %c0_8], %13 {strides = array<i32>} : memref<64x128xbf16, #tpu.memory_space<vmem>>, vector<64x128xbf16>,
    return
  }
  func.func @transform_0(%arg0: i32) -> (i32, i32) {
    %c0_i32 = arith.constant 0 : i32
    %c0_i32_0 = arith.constant 0 : i32
    return %arg0, %c0_i32 : i32, i32
  }
  func.func @transform_1(%arg0: i32) -> (i32, i32) {
    %c0_i32 = arith.constant 0 : i32
    %c0_i32_0 = arith.constant 0 : i32
    return %arg0, %c0_i32 : i32, i32
  }
  func.func @transform_2(%arg0: i32) -> (i32, i32) {
    %c0_i32 = arith.constant 0 : i32
    %c0_i32_0 = arith.constant 0 : i32
    %c0_i32_1 = arith.constant 0 : i32
    return %c0_i32, %c0_i32_0 : i32, i32
  }
  func.func @transform_3(%arg0: i32) -> (i32, i32) {
    %c0_i32 = arith.constant 0 : i32
    %c0_i32_0 = arith.constant 0 : i32
    %c0_i32_1 = arith.constant 0 : i32
    return %c0_i32, %c0_i32_0 : i32, i32
  }
  func.func @transform_4(%arg0: i32) -> (i32, i32) {
    %c0_i32 = arith.constant 0 : i32
    %c0_i32_0 = arith.constant 0 : i32
    return %arg0, %c0_i32 : i32, i32
  }
}

module attributes {stable_mosaic.version = 11 : i64} {
  func.func @_conv_mm_stats_kernel(%arg0: i32, %arg1: memref<64x128xbf16, #tpu.memory_space<vmem>>, %arg2: memref<128x64xbf16, #tpu.memory_space<vmem>>, %arg3: memref<64x64xbf16, #tpu.memory_space<vmem>>, %arg4: memref<8x64xf32, #tpu.memory_space<vmem>>, %arg5: memref<8x64xf32, #tpu.memory_space<vmem>>) attributes {dimension_semantics = [#tpu.dimension_semantics<parallel>], iteration_bounds = array<i64: 1>, scalar_prefetch = 0 : i64, scratch_operands = 0 : i64, tpu.core_type = #tpu.core_type<tc>, window_params = [{transform_indices = @transform_0, window_bounds = array<i64: 64, 128>}, {pipeline_mode = #tpu.pipeline_mode<synchronous>, transform_indices = @transform_1, window_bounds = array<i64: 128, 64>}, {transform_indices = @transform_2, window_bounds = array<i64: 64, 64>}, {transform_indices = @transform_3, window_bounds = array<i64: 8, 64>}, {transform_indices = @transform_4, window_bounds = array<i64: 8, 64>}]} {
    %c0 = arith.constant 0 : index
    %c0_0 = arith.constant 0 : index
    %0 = vector.load %arg1[%c0, %c0_0] : memref<64x128xbf16, #tpu.memory_space<vmem>>, vector<64x128xbf16>
    %c0_1 = arith.constant 0 : index
    %c0_2 = arith.constant 0 : index
    %1 = vector.load %arg2[%c0_1, %c0_2] : memref<128x64xbf16, #tpu.memory_space<vmem>>, vector<128x64xbf16>
    %cst = arith.constant dense<0.000000e+00> : vector<64x64xf32>
    %2 = tpu.matmul %0, %1, %cst {dimension_numbers = #tpu.dot_dimension_numbers<[1], [0], [0], [1], [0, 0, 1, 1], [], []>} : vector<64x128xbf16>, vector<128x64xbf16>, vector<64x64xf32> -> vector<64x64xf32>
    %3 = arith.truncf %2 : vector<64x64xf32> to vector<64x64xbf16>
    %c0_3 = arith.constant 0 : index
    %c0_4 = arith.constant 0 : index
    %4 = vector.load %arg3[%c0_3, %c0_4] : memref<64x64xbf16, #tpu.memory_space<vmem>>, vector<64x64xbf16>
    tpu.vector_store %arg3[%c0_3, %c0_4], %3 {strides = array<i32>} : memref<64x64xbf16, #tpu.memory_space<vmem>>, vector<64x64xbf16>,
    %cst_5 = arith.constant dense<0.000000e+00> : vector<64xf32>
    %5 = vector.multi_reduction <add>, %2, %cst_5 [0] : vector<64x64xf32> to vector<64xf32>
    %6 = vector.shape_cast %5 : vector<64xf32> to vector<1x64xf32>
    %7 = arith.mulf %2, %2 : vector<64x64xf32>
    %cst_6 = arith.constant dense<0.000000e+00> : vector<64xf32>
    %8 = vector.multi_reduction <add>, %7, %cst_6 [0] : vector<64x64xf32> to vector<64xf32>
    %9 = vector.shape_cast %8 : vector<64xf32> to vector<1x64xf32>
    %10 = tpu.iota {dimensions = array<i32: 0>} : vector<8x64xi32>
    %c0_i32 = arith.constant 0 : i32
    %11 = vector.broadcast %c0_i32 : i32 to vector<8x64xi32>
    %12 = arith.cmpi eq, %10, %11 : vector<8x64xi32>
    %cst_7 = arith.constant 0.000000e+00 : f32
    %13 = vector.shape_cast %6 : vector<1x64xf32> to vector<1x64xf32>
    %14 = vector.broadcast %13 : vector<1x64xf32> to vector<8x64xf32>
    %15 = vector.broadcast %cst_7 : f32 to vector<8x64xf32>
    %16 = arith.select %12, %14, %15 : vector<8x64xi1>, vector<8x64xf32>
    %c0_8 = arith.constant 0 : index
    %c0_9 = arith.constant 0 : index
    %17 = vector.load %arg4[%c0_8, %c0_9] : memref<8x64xf32, #tpu.memory_space<vmem>>, vector<8x64xf32>
    tpu.vector_store %arg4[%c0_8, %c0_9], %16 {strides = array<i32>} : memref<8x64xf32, #tpu.memory_space<vmem>>, vector<8x64xf32>,
    %c0_i32_10 = arith.constant 0 : i32
    %18 = vector.broadcast %c0_i32_10 : i32 to vector<8x64xi32>
    %19 = arith.cmpi eq, %10, %18 : vector<8x64xi32>
    %cst_11 = arith.constant 0.000000e+00 : f32
    %20 = vector.shape_cast %9 : vector<1x64xf32> to vector<1x64xf32>
    %21 = vector.broadcast %20 : vector<1x64xf32> to vector<8x64xf32>
    %22 = vector.broadcast %cst_11 : f32 to vector<8x64xf32>
    %23 = arith.select %19, %21, %22 : vector<8x64xi1>, vector<8x64xf32>
    %c0_12 = arith.constant 0 : index
    %c0_13 = arith.constant 0 : index
    %24 = vector.load %arg5[%c0_12, %c0_13] : memref<8x64xf32, #tpu.memory_space<vmem>>, vector<8x64xf32>
    tpu.vector_store %arg5[%c0_12, %c0_13], %23 {strides = array<i32>} : memref<8x64xf32, #tpu.memory_space<vmem>>, vector<8x64xf32>,
    return
  }
  func.func @transform_0(%arg0: i32) -> (i32, i32) {
    %c0_i32 = arith.constant 0 : i32
    %c0_i32_0 = arith.constant 0 : i32
    return %arg0, %c0_i32 : i32, i32
  }
  func.func @transform_1(%arg0: i32) -> (i32, i32) {
    %c0_i32 = arith.constant 0 : i32
    %c0_i32_0 = arith.constant 0 : i32
    %c0_i32_1 = arith.constant 0 : i32
    return %c0_i32, %c0_i32_0 : i32, i32
  }
  func.func @transform_2(%arg0: i32) -> (i32, i32) {
    %c0_i32 = arith.constant 0 : i32
    %c0_i32_0 = arith.constant 0 : i32
    return %arg0, %c0_i32 : i32, i32
  }
  func.func @transform_3(%arg0: i32) -> (i32, i32) {
    %c0_i32 = arith.constant 0 : i32
    %c0_i32_0 = arith.constant 0 : i32
    return %arg0, %c0_i32 : i32, i32
  }
  func.func @transform_4(%arg0: i32) -> (i32, i32) {
    %c0_i32 = arith.constant 0 : i32
    %c0_i32_0 = arith.constant 0 : i32
    return %arg0, %c0_i32 : i32, i32
  }
}

module attributes {stable_mosaic.version = 11 : i64} {
  func.func @_conv_mm_stats_kernel(%arg0: i32, %arg1: memref<64x384xbf16, #tpu.memory_space<vmem>>, %arg2: memref<384x64xbf16, #tpu.memory_space<vmem>>, %arg3: memref<64x64xbf16, #tpu.memory_space<vmem>>, %arg4: memref<8x64xf32, #tpu.memory_space<vmem>>, %arg5: memref<8x64xf32, #tpu.memory_space<vmem>>) attributes {dimension_semantics = [#tpu.dimension_semantics<parallel>], iteration_bounds = array<i64: 1>, scalar_prefetch = 0 : i64, scratch_operands = 0 : i64, tpu.core_type = #tpu.core_type<tc>, window_params = [{transform_indices = @transform_0, window_bounds = array<i64: 64, 384>}, {pipeline_mode = #tpu.pipeline_mode<synchronous>, transform_indices = @transform_1, window_bounds = array<i64: 384, 64>}, {transform_indices = @transform_2, window_bounds = array<i64: 64, 64>}, {transform_indices = @transform_3, window_bounds = array<i64: 8, 64>}, {transform_indices = @transform_4, window_bounds = array<i64: 8, 64>}]} {
    %c0 = arith.constant 0 : index
    %c0_0 = arith.constant 0 : index
    %0 = vector.load %arg1[%c0, %c0_0] : memref<64x384xbf16, #tpu.memory_space<vmem>>, vector<64x384xbf16>
    %c0_1 = arith.constant 0 : index
    %c0_2 = arith.constant 0 : index
    %1 = vector.load %arg2[%c0_1, %c0_2] : memref<384x64xbf16, #tpu.memory_space<vmem>>, vector<384x64xbf16>
    %cst = arith.constant dense<0.000000e+00> : vector<64x64xf32>
    %2 = tpu.matmul %0, %1, %cst {dimension_numbers = #tpu.dot_dimension_numbers<[1], [0], [0], [1], [0, 0, 1, 1], [], []>} : vector<64x384xbf16>, vector<384x64xbf16>, vector<64x64xf32> -> vector<64x64xf32>
    %3 = arith.truncf %2 : vector<64x64xf32> to vector<64x64xbf16>
    %c0_3 = arith.constant 0 : index
    %c0_4 = arith.constant 0 : index
    %4 = vector.load %arg3[%c0_3, %c0_4] : memref<64x64xbf16, #tpu.memory_space<vmem>>, vector<64x64xbf16>
    tpu.vector_store %arg3[%c0_3, %c0_4], %3 {strides = array<i32>} : memref<64x64xbf16, #tpu.memory_space<vmem>>, vector<64x64xbf16>,
    %cst_5 = arith.constant dense<0.000000e+00> : vector<64xf32>
    %5 = vector.multi_reduction <add>, %2, %cst_5 [0] : vector<64x64xf32> to vector<64xf32>
    %6 = vector.shape_cast %5 : vector<64xf32> to vector<1x64xf32>
    %7 = arith.mulf %2, %2 : vector<64x64xf32>
    %cst_6 = arith.constant dense<0.000000e+00> : vector<64xf32>
    %8 = vector.multi_reduction <add>, %7, %cst_6 [0] : vector<64x64xf32> to vector<64xf32>
    %9 = vector.shape_cast %8 : vector<64xf32> to vector<1x64xf32>
    %10 = tpu.iota {dimensions = array<i32: 0>} : vector<8x64xi32>
    %c0_i32 = arith.constant 0 : i32
    %11 = vector.broadcast %c0_i32 : i32 to vector<8x64xi32>
    %12 = arith.cmpi eq, %10, %11 : vector<8x64xi32>
    %cst_7 = arith.constant 0.000000e+00 : f32
    %13 = vector.shape_cast %6 : vector<1x64xf32> to vector<1x64xf32>
    %14 = vector.broadcast %13 : vector<1x64xf32> to vector<8x64xf32>
    %15 = vector.broadcast %cst_7 : f32 to vector<8x64xf32>
    %16 = arith.select %12, %14, %15 : vector<8x64xi1>, vector<8x64xf32>
    %c0_8 = arith.constant 0 : index
    %c0_9 = arith.constant 0 : index
    %17 = vector.load %arg4[%c0_8, %c0_9] : memref<8x64xf32, #tpu.memory_space<vmem>>, vector<8x64xf32>
    tpu.vector_store %arg4[%c0_8, %c0_9], %16 {strides = array<i32>} : memref<8x64xf32, #tpu.memory_space<vmem>>, vector<8x64xf32>,
    %c0_i32_10 = arith.constant 0 : i32
    %18 = vector.broadcast %c0_i32_10 : i32 to vector<8x64xi32>
    %19 = arith.cmpi eq, %10, %18 : vector<8x64xi32>
    %cst_11 = arith.constant 0.000000e+00 : f32
    %20 = vector.shape_cast %9 : vector<1x64xf32> to vector<1x64xf32>
    %21 = vector.broadcast %20 : vector<1x64xf32> to vector<8x64xf32>
    %22 = vector.broadcast %cst_11 : f32 to vector<8x64xf32>
    %23 = arith.select %19, %21, %22 : vector<8x64xi1>, vector<8x64xf32>
    %c0_12 = arith.constant 0 : index
    %c0_13 = arith.constant 0 : index
    %24 = vector.load %arg5[%c0_12, %c0_13] : memref<8x64xf32, #tpu.memory_space<vmem>>, vector<8x64xf32>
    tpu.vector_store %arg5[%c0_12, %c0_13], %23 {strides = array<i32>} : memref<8x64xf32, #tpu.memory_space<vmem>>, vector<8x64xf32>,
    return
  }
  func.func @transform_0(%arg0: i32) -> (i32, i32) {
    %c0_i32 = arith.constant 0 : i32
    %c0_i32_0 = arith.constant 0 : i32
    return %arg0, %c0_i32 : i32, i32
  }
  func.func @transform_1(%arg0: i32) -> (i32, i32) {
    %c0_i32 = arith.constant 0 : i32
    %c0_i32_0 = arith.constant 0 : i32
    %c0_i32_1 = arith.constant 0 : i32
    return %c0_i32, %c0_i32_0 : i32, i32
  }
  func.func @transform_2(%arg0: i32) -> (i32, i32) {
    %c0_i32 = arith.constant 0 : i32
    %c0_i32_0 = arith.constant 0 : i32
    return %arg0, %c0_i32 : i32, i32
  }
  func.func @transform_3(%arg0: i32) -> (i32, i32) {
    %c0_i32 = arith.constant 0 : i32
    %c0_i32_0 = arith.constant 0 : i32
    return %arg0, %c0_i32 : i32, i32
  }
  func.func @transform_4(%arg0: i32) -> (i32, i32) {
    %c0_i32 = arith.constant 0 : i32
    %c0_i32_0 = arith.constant 0 : i32
    return %arg0, %c0_i32 : i32, i32
  }
}

module attributes {stable_mosaic.version = 11 : i64} {
  func.func @_bn_relu_kernel(%arg0: i32, %arg1: memref<32x128xbf16, #tpu.memory_space<vmem>>, %arg2: memref<1x128xf32, #tpu.memory_space<vmem>>, %arg3: memref<1x128xf32, #tpu.memory_space<vmem>>, %arg4: memref<32x128xbf16, #tpu.memory_space<vmem>>) attributes {dimension_semantics = [#tpu.dimension_semantics<parallel>], iteration_bounds = array<i64: 1>, scalar_prefetch = 0 : i64, scratch_operands = 0 : i64, tpu.core_type = #tpu.core_type<tc>, window_params = [{transform_indices = @transform_0, window_bounds = array<i64: 32, 128>}, {pipeline_mode = #tpu.pipeline_mode<synchronous>, transform_indices = @transform_1, window_bounds = array<i64: 1, 128>}, {pipeline_mode = #tpu.pipeline_mode<synchronous>, transform_indices = @transform_2, window_bounds = array<i64: 1, 128>}, {transform_indices = @transform_3, window_bounds = array<i64: 32, 128>}]} {
    %c0 = arith.constant 0 : index
    %c0_0 = arith.constant 0 : index
    %0 = vector.load %arg1[%c0, %c0_0] : memref<32x128xbf16, #tpu.memory_space<vmem>>, vector<32x128xbf16>
    %1 = arith.extf %0 : vector<32x128xbf16> to vector<32x128xf32>
    %c0_1 = arith.constant 0 : index
    %c0_2 = arith.constant 0 : index
    %2 = vector.load %arg2[%c0_1, %c0_2] : memref<1x128xf32, #tpu.memory_space<vmem>>, vector<1x128xf32>
    %3 = vector.broadcast %2 : vector<1x128xf32> to vector<32x128xf32>
    %4 = arith.mulf %1, %3 : vector<32x128xf32>
    %c0_3 = arith.constant 0 : index
    %c0_4 = arith.constant 0 : index
    %5 = vector.load %arg3[%c0_3, %c0_4] : memref<1x128xf32, #tpu.memory_space<vmem>>, vector<1x128xf32>
    %6 = vector.broadcast %5 : vector<1x128xf32> to vector<32x128xf32>
    %7 = arith.addf %4, %6 : vector<32x128xf32>
    %cst = arith.constant 0.000000e+00 : f32
    %8 = vector.broadcast %cst : f32 to vector<32x128xf32>
    %9 = arith.maximumf %7, %8 : vector<32x128xf32>
    %10 = arith.truncf %9 : vector<32x128xf32> to vector<32x128xbf16>
    %c0_5 = arith.constant 0 : index
    %c0_6 = arith.constant 0 : index
    %11 = vector.load %arg4[%c0_5, %c0_6] : memref<32x128xbf16, #tpu.memory_space<vmem>>, vector<32x128xbf16>
    tpu.vector_store %arg4[%c0_5, %c0_6], %10 {strides = array<i32>} : memref<32x128xbf16, #tpu.memory_space<vmem>>, vector<32x128xbf16>,
    return
  }
  func.func @transform_0(%arg0: i32) -> (i32, i32) {
    %c0_i32 = arith.constant 0 : i32
    %c0_i32_0 = arith.constant 0 : i32
    return %arg0, %c0_i32 : i32, i32
  }
  func.func @transform_1(%arg0: i32) -> (i32, i32) {
    %c0_i32 = arith.constant 0 : i32
    %c0_i32_0 = arith.constant 0 : i32
    %c0_i32_1 = arith.constant 0 : i32
    return %c0_i32, %c0_i32_0 : i32, i32
  }
  func.func @transform_2(%arg0: i32) -> (i32, i32) {
    %c0_i32 = arith.constant 0 : i32
    %c0_i32_0 = arith.constant 0 : i32
    %c0_i32_1 = arith.constant 0 : i32
    return %c0_i32, %c0_i32_0 : i32, i32
  }
  func.func @transform_3(%arg0: i32) -> (i32, i32) {
    %c0_i32 = arith.constant 0 : i32
    %c0_i32_0 = arith.constant 0 : i32
    return %arg0, %c0_i32 : i32, i32
  }
}

module attributes {stable_mosaic.version = 11 : i64} {
  func.func @_bn_bn_add_relu_kernel(%arg0: i32, %arg1: memref<32x128xbf16, #tpu.memory_space<vmem>>, %arg2: memref<32x128xbf16, #tpu.memory_space<vmem>>, %arg3: memref<1x128xf32, #tpu.memory_space<vmem>>, %arg4: memref<1x128xf32, #tpu.memory_space<vmem>>, %arg5: memref<1x128xf32, #tpu.memory_space<vmem>>, %arg6: memref<1x128xf32, #tpu.memory_space<vmem>>, %arg7: memref<32x128xbf16, #tpu.memory_space<vmem>>) attributes {dimension_semantics = [#tpu.dimension_semantics<parallel>], iteration_bounds = array<i64: 1>, scalar_prefetch = 0 : i64, scratch_operands = 0 : i64, tpu.core_type = #tpu.core_type<tc>, window_params = [{transform_indices = @transform_0, window_bounds = array<i64: 32, 128>}, {transform_indices = @transform_1, window_bounds = array<i64: 32, 128>}, {pipeline_mode = #tpu.pipeline_mode<synchronous>, transform_indices = @transform_2, window_bounds = array<i64: 1, 128>}, {pipeline_mode = #tpu.pipeline_mode<synchronous>, transform_indices = @transform_3, window_bounds = array<i64: 1, 128>}, {pipeline_mode = #tpu.pipeline_mode<synchronous>, transform_indices = @transform_4, window_bounds = array<i64: 1, 128>}, {pipeline_mode = #tpu.pipeline_mode<synchronous>, transform_indices = @transform_5, window_bounds = array<i64: 1, 128>}, {transform_indices = @transform_6, window_bounds = array<i64: 32, 128>}]} {
    %c0 = arith.constant 0 : index
    %c0_0 = arith.constant 0 : index
    %0 = vector.load %arg1[%c0, %c0_0] : memref<32x128xbf16, #tpu.memory_space<vmem>>, vector<32x128xbf16>
    %1 = arith.extf %0 : vector<32x128xbf16> to vector<32x128xf32>
    %c0_1 = arith.constant 0 : index
    %c0_2 = arith.constant 0 : index
    %2 = vector.load %arg3[%c0_1, %c0_2] : memref<1x128xf32, #tpu.memory_space<vmem>>, vector<1x128xf32>
    %3 = vector.broadcast %2 : vector<1x128xf32> to vector<32x128xf32>
    %4 = arith.mulf %1, %3 : vector<32x128xf32>
    %c0_3 = arith.constant 0 : index
    %c0_4 = arith.constant 0 : index
    %5 = vector.load %arg4[%c0_3, %c0_4] : memref<1x128xf32, #tpu.memory_space<vmem>>, vector<1x128xf32>
    %6 = vector.broadcast %5 : vector<1x128xf32> to vector<32x128xf32>
    %7 = arith.addf %4, %6 : vector<32x128xf32>
    %c0_5 = arith.constant 0 : index
    %c0_6 = arith.constant 0 : index
    %8 = vector.load %arg2[%c0_5, %c0_6] : memref<32x128xbf16, #tpu.memory_space<vmem>>, vector<32x128xbf16>
    %9 = arith.extf %8 : vector<32x128xbf16> to vector<32x128xf32>
    %c0_7 = arith.constant 0 : index
    %c0_8 = arith.constant 0 : index
    %10 = vector.load %arg5[%c0_7, %c0_8] : memref<1x128xf32, #tpu.memory_space<vmem>>, vector<1x128xf32>
    %11 = vector.broadcast %10 : vector<1x128xf32> to vector<32x128xf32>
    %12 = arith.mulf %9, %11 : vector<32x128xf32>
    %c0_9 = arith.constant 0 : index
    %c0_10 = arith.constant 0 : index
    %13 = vector.load %arg6[%c0_9, %c0_10] : memref<1x128xf32, #tpu.memory_space<vmem>>, vector<1x128xf32>
    %14 = vector.broadcast %13 : vector<1x128xf32> to vector<32x128xf32>
    %15 = arith.addf %12, %14 : vector<32x128xf32>
    %16 = arith.addf %15, %7 : vector<32x128xf32>
    %cst = arith.constant 0.000000e+00 : f32
    %17 = vector.broadcast %cst : f32 to vector<32x128xf32>
    %18 = arith.maximumf %16, %17 : vector<32x128xf32>
    %19 = arith.truncf %18 : vector<32x128xf32> to vector<32x128xbf16>
    %c0_11 = arith.constant 0 : index
    %c0_12 = arith.constant 0 : index
    %20 = vector.load %arg7[%c0_11, %c0_12] : memref<32x128xbf16, #tpu.memory_space<vmem>>, vector<32x128xbf16>
    tpu.vector_store %arg7[%c0_11, %c0_12], %19 {strides = array<i32>} : memref<32x128xbf16, #tpu.memory_space<vmem>>, vector<32x128xbf16>,
    return
  }
  func.func @transform_0(%arg0: i32) -> (i32, i32) {
    %c0_i32 = arith.constant 0 : i32
    %c0_i32_0 = arith.constant 0 : i32
    return %arg0, %c0_i32 : i32, i32
  }
  func.func @transform_1(%arg0: i32) -> (i32, i32) {
    %c0_i32 = arith.constant 0 : i32
    %c0_i32_0 = arith.constant 0 : i32
    return %arg0, %c0_i32 : i32, i32
  }
  func.func @transform_2(%arg0: i32) -> (i32, i32) {
    %c0_i32 = arith.constant 0 : i32
    %c0_i32_0 = arith.constant 0 : i32
    %c0_i32_1 = arith.constant 0 : i32
    return %c0_i32, %c0_i32_0 : i32, i32
  }
  func.func @transform_3(%arg0: i32) -> (i32, i32) {
    %c0_i32 = arith.constant 0 : i32
    %c0_i32_0 = arith.constant 0 : i32
    %c0_i32_1 = arith.constant 0 : i32
    return %c0_i32, %c0_i32_0 : i32, i32
  }
  func.func @transform_4(%arg0: i32) -> (i32, i32) {
    %c0_i32 = arith.constant 0 : i32
    %c0_i32_0 = arith.constant 0 : i32
    %c0_i32_1 = arith.constant 0 : i32
    return %c0_i32, %c0_i32_0 : i32, i32
  }
  func.func @transform_5(%arg0: i32) -> (i32, i32) {
    %c0_i32 = arith.constant 0 : i32
    %c0_i32_0 = arith.constant 0 : i32
    %c0_i32_1 = arith.constant 0 : i32
    return %c0_i32, %c0_i32_0 : i32, i32
  }
  func.func @transform_6(%arg0: i32) -> (i32, i32) {
    %c0_i32 = arith.constant 0 : i32
    %c0_i32_0 = arith.constant 0 : i32
    return %arg0, %c0_i32 : i32, i32
  }
}

module attributes {stable_mosaic.version = 11 : i64} {
  func.func @_bn_add_relu_kernel(%arg0: i32, %arg1: memref<32x128xbf16, #tpu.memory_space<vmem>>, %arg2: memref<32x128xbf16, #tpu.memory_space<vmem>>, %arg3: memref<1x128xf32, #tpu.memory_space<vmem>>, %arg4: memref<1x128xf32, #tpu.memory_space<vmem>>, %arg5: memref<32x128xbf16, #tpu.memory_space<vmem>>) attributes {dimension_semantics = [#tpu.dimension_semantics<parallel>], iteration_bounds = array<i64: 1>, scalar_prefetch = 0 : i64, scratch_operands = 0 : i64, tpu.core_type = #tpu.core_type<tc>, window_params = [{transform_indices = @transform_0, window_bounds = array<i64: 32, 128>}, {transform_indices = @transform_1, window_bounds = array<i64: 32, 128>}, {pipeline_mode = #tpu.pipeline_mode<synchronous>, transform_indices = @transform_2, window_bounds = array<i64: 1, 128>}, {pipeline_mode = #tpu.pipeline_mode<synchronous>, transform_indices = @transform_3, window_bounds = array<i64: 1, 128>}, {transform_indices = @transform_4, window_bounds = array<i64: 32, 128>}]} {
    %c0 = arith.constant 0 : index
    %c0_0 = arith.constant 0 : index
    %0 = vector.load %arg1[%c0, %c0_0] : memref<32x128xbf16, #tpu.memory_space<vmem>>, vector<32x128xbf16>
    %1 = arith.extf %0 : vector<32x128xbf16> to vector<32x128xf32>
    %c0_1 = arith.constant 0 : index
    %c0_2 = arith.constant 0 : index
    %2 = vector.load %arg3[%c0_1, %c0_2] : memref<1x128xf32, #tpu.memory_space<vmem>>, vector<1x128xf32>
    %3 = vector.broadcast %2 : vector<1x128xf32> to vector<32x128xf32>
    %4 = arith.mulf %1, %3 : vector<32x128xf32>
    %c0_3 = arith.constant 0 : index
    %c0_4 = arith.constant 0 : index
    %5 = vector.load %arg4[%c0_3, %c0_4] : memref<1x128xf32, #tpu.memory_space<vmem>>, vector<1x128xf32>
    %6 = vector.broadcast %5 : vector<1x128xf32> to vector<32x128xf32>
    %7 = arith.addf %4, %6 : vector<32x128xf32>
    %c0_5 = arith.constant 0 : index
    %c0_6 = arith.constant 0 : index
    %8 = vector.load %arg2[%c0_5, %c0_6] : memref<32x128xbf16, #tpu.memory_space<vmem>>, vector<32x128xbf16>
    %9 = arith.extf %8 : vector<32x128xbf16> to vector<32x128xf32>
    %10 = arith.addf %9, %7 : vector<32x128xf32>
    %cst = arith.constant 0.000000e+00 : f32
    %11 = vector.broadcast %cst : f32 to vector<32x128xf32>
    %12 = arith.maximumf %10, %11 : vector<32x128xf32>
    %13 = arith.truncf %12 : vector<32x128xf32> to vector<32x128xbf16>
    %c0_7 = arith.constant 0 : index
    %c0_8 = arith.constant 0 : index
    %14 = vector.load %arg5[%c0_7, %c0_8] : memref<32x128xbf16, #tpu.memory_space<vmem>>, vector<32x128xbf16>
    tpu.vector_store %arg5[%c0_7, %c0_8], %13 {strides = array<i32>} : memref<32x128xbf16, #tpu.memory_space<vmem>>, vector<32x128xbf16>,
    return
  }
  func.func @transform_0(%arg0: i32) -> (i32, i32) {
    %c0_i32 = arith.constant 0 : i32
    %c0_i32_0 = arith.constant 0 : i32
    return %arg0, %c0_i32 : i32, i32
  }
  func.func @transform_1(%arg0: i32) -> (i32, i32) {
    %c0_i32 = arith.constant 0 : i32
    %c0_i32_0 = arith.constant 0 : i32
    return %arg0, %c0_i32 : i32, i32
  }
  func.func @transform_2(%arg0: i32) -> (i32, i32) {
    %c0_i32 = arith.constant 0 : i32
    %c0_i32_0 = arith.constant 0 : i32
    %c0_i32_1 = arith.constant 0 : i32
    return %c0_i32, %c0_i32_0 : i32, i32
  }
  func.func @transform_3(%arg0: i32) -> (i32, i32) {
    %c0_i32 = arith.constant 0 : i32
    %c0_i32_0 = arith.constant 0 : i32
    %c0_i32_1 = arith.constant 0 : i32
    return %c0_i32, %c0_i32_0 : i32, i32
  }
  func.func @transform_4(%arg0: i32) -> (i32, i32) {
    %c0_i32 = arith.constant 0 : i32
    %c0_i32_0 = arith.constant 0 : i32
    return %arg0, %c0_i32 : i32, i32
  }
}

module attributes {stable_mosaic.version = 11 : i64} {
  func.func @_conv_mm_stats_kernel(%arg0: i32, %arg1: memref<64x640xbf16, #tpu.memory_space<vmem>>, %arg2: memref<640x64xbf16, #tpu.memory_space<vmem>>, %arg3: memref<64x64xbf16, #tpu.memory_space<vmem>>, %arg4: memref<8x64xf32, #tpu.memory_space<vmem>>, %arg5: memref<8x64xf32, #tpu.memory_space<vmem>>) attributes {dimension_semantics = [#tpu.dimension_semantics<parallel>], iteration_bounds = array<i64: 1>, scalar_prefetch = 0 : i64, scratch_operands = 0 : i64, tpu.core_type = #tpu.core_type<tc>, window_params = [{transform_indices = @transform_0, window_bounds = array<i64: 64, 640>}, {pipeline_mode = #tpu.pipeline_mode<synchronous>, transform_indices = @transform_1, window_bounds = array<i64: 640, 64>}, {transform_indices = @transform_2, window_bounds = array<i64: 64, 64>}, {transform_indices = @transform_3, window_bounds = array<i64: 8, 64>}, {transform_indices = @transform_4, window_bounds = array<i64: 8, 64>}]} {
    %c0 = arith.constant 0 : index
    %c0_0 = arith.constant 0 : index
    %0 = vector.load %arg1[%c0, %c0_0] : memref<64x640xbf16, #tpu.memory_space<vmem>>, vector<64x640xbf16>
    %c0_1 = arith.constant 0 : index
    %c0_2 = arith.constant 0 : index
    %1 = vector.load %arg2[%c0_1, %c0_2] : memref<640x64xbf16, #tpu.memory_space<vmem>>, vector<640x64xbf16>
    %cst = arith.constant dense<0.000000e+00> : vector<64x64xf32>
    %2 = tpu.matmul %0, %1, %cst {dimension_numbers = #tpu.dot_dimension_numbers<[1], [0], [0], [1], [0, 0, 1, 1], [], []>} : vector<64x640xbf16>, vector<640x64xbf16>, vector<64x64xf32> -> vector<64x64xf32>
    %3 = arith.truncf %2 : vector<64x64xf32> to vector<64x64xbf16>
    %c0_3 = arith.constant 0 : index
    %c0_4 = arith.constant 0 : index
    %4 = vector.load %arg3[%c0_3, %c0_4] : memref<64x64xbf16, #tpu.memory_space<vmem>>, vector<64x64xbf16>
    tpu.vector_store %arg3[%c0_3, %c0_4], %3 {strides = array<i32>} : memref<64x64xbf16, #tpu.memory_space<vmem>>, vector<64x64xbf16>,
    %cst_5 = arith.constant dense<0.000000e+00> : vector<64xf32>
    %5 = vector.multi_reduction <add>, %2, %cst_5 [0] : vector<64x64xf32> to vector<64xf32>
    %6 = vector.shape_cast %5 : vector<64xf32> to vector<1x64xf32>
    %7 = arith.mulf %2, %2 : vector<64x64xf32>
    %cst_6 = arith.constant dense<0.000000e+00> : vector<64xf32>
    %8 = vector.multi_reduction <add>, %7, %cst_6 [0] : vector<64x64xf32> to vector<64xf32>
    %9 = vector.shape_cast %8 : vector<64xf32> to vector<1x64xf32>
    %10 = tpu.iota {dimensions = array<i32: 0>} : vector<8x64xi32>
    %c0_i32 = arith.constant 0 : i32
    %11 = vector.broadcast %c0_i32 : i32 to vector<8x64xi32>
    %12 = arith.cmpi eq, %10, %11 : vector<8x64xi32>
    %cst_7 = arith.constant 0.000000e+00 : f32
    %13 = vector.shape_cast %6 : vector<1x64xf32> to vector<1x64xf32>
    %14 = vector.broadcast %13 : vector<1x64xf32> to vector<8x64xf32>
    %15 = vector.broadcast %cst_7 : f32 to vector<8x64xf32>
    %16 = arith.select %12, %14, %15 : vector<8x64xi1>, vector<8x64xf32>
    %c0_8 = arith.constant 0 : index
    %c0_9 = arith.constant 0 : index
    %17 = vector.load %arg4[%c0_8, %c0_9] : memref<8x64xf32, #tpu.memory_space<vmem>>, vector<8x64xf32>
    tpu.vector_store %arg4[%c0_8, %c0_9], %16 {strides = array<i32>} : memref<8x64xf32, #tpu.memory_space<vmem>>, vector<8x64xf32>,
    %c0_i32_10 = arith.constant 0 : i32
    %18 = vector.broadcast %c0_i32_10 : i32 to vector<8x64xi32>
    %19 = arith.cmpi eq, %10, %18 : vector<8x64xi32>
    %cst_11 = arith.constant 0.000000e+00 : f32
    %20 = vector.shape_cast %9 : vector<1x64xf32> to vector<1x64xf32>
    %21 = vector.broadcast %20 : vector<1x64xf32> to vector<8x64xf32>
    %22 = vector.broadcast %cst_11 : f32 to vector<8x64xf32>
    %23 = arith.select %19, %21, %22 : vector<8x64xi1>, vector<8x64xf32>
    %c0_12 = arith.constant 0 : index
    %c0_13 = arith.constant 0 : index
    %24 = vector.load %arg5[%c0_12, %c0_13] : memref<8x64xf32, #tpu.memory_space<vmem>>, vector<8x64xf32>
    tpu.vector_store %arg5[%c0_12, %c0_13], %23 {strides = array<i32>} : memref<8x64xf32, #tpu.memory_space<vmem>>, vector<8x64xf32>,
    return
  }
  func.func @transform_0(%arg0: i32) -> (i32, i32) {
    %c0_i32 = arith.constant 0 : i32
    %c0_i32_0 = arith.constant 0 : i32
    return %arg0, %c0_i32 : i32, i32
  }
  func.func @transform_1(%arg0: i32) -> (i32, i32) {
    %c0_i32 = arith.constant 0 : i32
    %c0_i32_0 = arith.constant 0 : i32
    %c0_i32_1 = arith.constant 0 : i32
    return %c0_i32, %c0_i32_0 : i32, i32
  }
  func.func @transform_2(%arg0: i32) -> (i32, i32) {
    %c0_i32 = arith.constant 0 : i32
    %c0_i32_0 = arith.constant 0 : i32
    return %arg0, %c0_i32 : i32, i32
  }
  func.func @transform_3(%arg0: i32) -> (i32, i32) {
    %c0_i32 = arith.constant 0 : i32
    %c0_i32_0 = arith.constant 0 : i32
    return %arg0, %c0_i32 : i32, i32
  }
  func.func @transform_4(%arg0: i32) -> (i32, i32) {
    %c0_i32 = arith.constant 0 : i32
    %c0_i32_0 = arith.constant 0 : i32
    return %arg0, %c0_i32 : i32, i32
  }
}

module attributes {stable_mosaic.version = 11 : i64} {
  func.func @_conv_mm_stats_kernel(%arg0: i32, %arg1: memref<16x640xbf16, #tpu.memory_space<vmem>>, %arg2: memref<640x128xbf16, #tpu.memory_space<vmem>>, %arg3: memref<16x128xbf16, #tpu.memory_space<vmem>>, %arg4: memref<8x128xf32, #tpu.memory_space<vmem>>, %arg5: memref<8x128xf32, #tpu.memory_space<vmem>>) attributes {dimension_semantics = [#tpu.dimension_semantics<parallel>], iteration_bounds = array<i64: 1>, scalar_prefetch = 0 : i64, scratch_operands = 0 : i64, tpu.core_type = #tpu.core_type<tc>, window_params = [{transform_indices = @transform_0, window_bounds = array<i64: 16, 640>}, {pipeline_mode = #tpu.pipeline_mode<synchronous>, transform_indices = @transform_1, window_bounds = array<i64: 640, 128>}, {transform_indices = @transform_2, window_bounds = array<i64: 16, 128>}, {transform_indices = @transform_3, window_bounds = array<i64: 8, 128>}, {transform_indices = @transform_4, window_bounds = array<i64: 8, 128>}]} {
    %c0 = arith.constant 0 : index
    %c0_0 = arith.constant 0 : index
    %0 = vector.load %arg1[%c0, %c0_0] : memref<16x640xbf16, #tpu.memory_space<vmem>>, vector<16x640xbf16>
    %c0_1 = arith.constant 0 : index
    %c0_2 = arith.constant 0 : index
    %1 = vector.load %arg2[%c0_1, %c0_2] : memref<640x128xbf16, #tpu.memory_space<vmem>>, vector<640x128xbf16>
    %cst = arith.constant dense<0.000000e+00> : vector<16x128xf32>
    %2 = tpu.matmul %0, %1, %cst {dimension_numbers = #tpu.dot_dimension_numbers<[1], [0], [0], [1], [0, 0, 1, 1], [], []>} : vector<16x640xbf16>, vector<640x128xbf16>, vector<16x128xf32> -> vector<16x128xf32>
    %3 = arith.truncf %2 : vector<16x128xf32> to vector<16x128xbf16>
    %c0_3 = arith.constant 0 : index
    %c0_4 = arith.constant 0 : index
    %4 = vector.load %arg3[%c0_3, %c0_4] : memref<16x128xbf16, #tpu.memory_space<vmem>>, vector<16x128xbf16>
    tpu.vector_store %arg3[%c0_3, %c0_4], %3 {strides = array<i32>} : memref<16x128xbf16, #tpu.memory_space<vmem>>, vector<16x128xbf16>,
    %cst_5 = arith.constant dense<0.000000e+00> : vector<128xf32>
    %5 = vector.multi_reduction <add>, %2, %cst_5 [0] : vector<16x128xf32> to vector<128xf32>
    %6 = vector.shape_cast %5 : vector<128xf32> to vector<1x128xf32>
    %7 = arith.mulf %2, %2 : vector<16x128xf32>
    %cst_6 = arith.constant dense<0.000000e+00> : vector<128xf32>
    %8 = vector.multi_reduction <add>, %7, %cst_6 [0] : vector<16x128xf32> to vector<128xf32>
    %9 = vector.shape_cast %8 : vector<128xf32> to vector<1x128xf32>
    %10 = tpu.iota {dimensions = array<i32: 0>} : vector<8x128xi32>
    %c0_i32 = arith.constant 0 : i32
    %11 = vector.broadcast %c0_i32 : i32 to vector<8x128xi32>
    %12 = arith.cmpi eq, %10, %11 : vector<8x128xi32>
    %cst_7 = arith.constant 0.000000e+00 : f32
    %13 = vector.shape_cast %6 : vector<1x128xf32> to vector<1x128xf32>
    %14 = vector.broadcast %13 : vector<1x128xf32> to vector<8x128xf32>
    %15 = vector.broadcast %cst_7 : f32 to vector<8x128xf32>
    %16 = arith.select %12, %14, %15 : vector<8x128xi1>, vector<8x128xf32>
    %c0_8 = arith.constant 0 : index
    %c0_9 = arith.constant 0 : index
    %17 = vector.load %arg4[%c0_8, %c0_9] : memref<8x128xf32, #tpu.memory_space<vmem>>, vector<8x128xf32>
    tpu.vector_store %arg4[%c0_8, %c0_9], %16 {strides = array<i32>} : memref<8x128xf32, #tpu.memory_space<vmem>>, vector<8x128xf32>,
    %c0_i32_10 = arith.constant 0 : i32
    %18 = vector.broadcast %c0_i32_10 : i32 to vector<8x128xi32>
    %19 = arith.cmpi eq, %10, %18 : vector<8x128xi32>
    %cst_11 = arith.constant 0.000000e+00 : f32
    %20 = vector.shape_cast %9 : vector<1x128xf32> to vector<1x128xf32>
    %21 = vector.broadcast %20 : vector<1x128xf32> to vector<8x128xf32>
    %22 = vector.broadcast %cst_11 : f32 to vector<8x128xf32>
    %23 = arith.select %19, %21, %22 : vector<8x128xi1>, vector<8x128xf32>
    %c0_12 = arith.constant 0 : index
    %c0_13 = arith.constant 0 : index
    %24 = vector.load %arg5[%c0_12, %c0_13] : memref<8x128xf32, #tpu.memory_space<vmem>>, vector<8x128xf32>
    tpu.vector_store %arg5[%c0_12, %c0_13], %23 {strides = array<i32>} : memref<8x128xf32, #tpu.memory_space<vmem>>, vector<8x128xf32>,
    return
  }
  func.func @transform_0(%arg0: i32) -> (i32, i32) {
    %c0_i32 = arith.constant 0 : i32
    %c0_i32_0 = arith.constant 0 : i32
    return %arg0, %c0_i32 : i32, i32
  }
  func.func @transform_1(%arg0: i32) -> (i32, i32) {
    %c0_i32 = arith.constant 0 : i32
    %c0_i32_0 = arith.constant 0 : i32
    %c0_i32_1 = arith.constant 0 : i32
    return %c0_i32, %c0_i32_0 : i32, i32
  }
  func.func @transform_2(%arg0: i32) -> (i32, i32) {
    %c0_i32 = arith.constant 0 : i32
    %c0_i32_0 = arith.constant 0 : i32
    return %arg0, %c0_i32 : i32, i32
  }
  func.func @transform_3(%arg0: i32) -> (i32, i32) {
    %c0_i32 = arith.constant 0 : i32
    %c0_i32_0 = arith.constant 0 : i32
    return %arg0, %c0_i32 : i32, i32
  }
  func.func @transform_4(%arg0: i32) -> (i32, i32) {
    %c0_i32 = arith.constant 0 : i32
    %c0_i32_0 = arith.constant 0 : i32
    return %arg0, %c0_i32 : i32, i32
  }
}

module attributes {stable_mosaic.version = 11 : i64} {
  func.func @_bn_relu_kernel(%arg0: i32, %arg1: memref<16x128xbf16, #tpu.memory_space<vmem>>, %arg2: memref<1x128xf32, #tpu.memory_space<vmem>>, %arg3: memref<1x128xf32, #tpu.memory_space<vmem>>, %arg4: memref<16x128xbf16, #tpu.memory_space<vmem>>) attributes {dimension_semantics = [#tpu.dimension_semantics<parallel>], iteration_bounds = array<i64: 1>, scalar_prefetch = 0 : i64, scratch_operands = 0 : i64, tpu.core_type = #tpu.core_type<tc>, window_params = [{transform_indices = @transform_0, window_bounds = array<i64: 16, 128>}, {pipeline_mode = #tpu.pipeline_mode<synchronous>, transform_indices = @transform_1, window_bounds = array<i64: 1, 128>}, {pipeline_mode = #tpu.pipeline_mode<synchronous>, transform_indices = @transform_2, window_bounds = array<i64: 1, 128>}, {transform_indices = @transform_3, window_bounds = array<i64: 16, 128>}]} {
    %c0 = arith.constant 0 : index
    %c0_0 = arith.constant 0 : index
    %0 = vector.load %arg1[%c0, %c0_0] : memref<16x128xbf16, #tpu.memory_space<vmem>>, vector<16x128xbf16>
    %1 = arith.extf %0 : vector<16x128xbf16> to vector<16x128xf32>
    %c0_1 = arith.constant 0 : index
    %c0_2 = arith.constant 0 : index
    %2 = vector.load %arg2[%c0_1, %c0_2] : memref<1x128xf32, #tpu.memory_space<vmem>>, vector<1x128xf32>
    %3 = vector.broadcast %2 : vector<1x128xf32> to vector<16x128xf32>
    %4 = arith.mulf %1, %3 : vector<16x128xf32>
    %c0_3 = arith.constant 0 : index
    %c0_4 = arith.constant 0 : index
    %5 = vector.load %arg3[%c0_3, %c0_4] : memref<1x128xf32, #tpu.memory_space<vmem>>, vector<1x128xf32>
    %6 = vector.broadcast %5 : vector<1x128xf32> to vector<16x128xf32>
    %7 = arith.addf %4, %6 : vector<16x128xf32>
    %cst = arith.constant 0.000000e+00 : f32
    %8 = vector.broadcast %cst : f32 to vector<16x128xf32>
    %9 = arith.maximumf %7, %8 : vector<16x128xf32>
    %10 = arith.truncf %9 : vector<16x128xf32> to vector<16x128xbf16>
    %c0_5 = arith.constant 0 : index
    %c0_6 = arith.constant 0 : index
    %11 = vector.load %arg4[%c0_5, %c0_6] : memref<16x128xbf16, #tpu.memory_space<vmem>>, vector<16x128xbf16>
    tpu.vector_store %arg4[%c0_5, %c0_6], %10 {strides = array<i32>} : memref<16x128xbf16, #tpu.memory_space<vmem>>, vector<16x128xbf16>,
    return
  }
  func.func @transform_0(%arg0: i32) -> (i32, i32) {
    %c0_i32 = arith.constant 0 : i32
    %c0_i32_0 = arith.constant 0 : i32
    return %arg0, %c0_i32 : i32, i32
  }
  func.func @transform_1(%arg0: i32) -> (i32, i32) {
    %c0_i32 = arith.constant 0 : i32
    %c0_i32_0 = arith.constant 0 : i32
    %c0_i32_1 = arith.constant 0 : i32
    return %c0_i32, %c0_i32_0 : i32, i32
  }
  func.func @transform_2(%arg0: i32) -> (i32, i32) {
    %c0_i32 = arith.constant 0 : i32
    %c0_i32_0 = arith.constant 0 : i32
    %c0_i32_1 = arith.constant 0 : i32
    return %c0_i32, %c0_i32_0 : i32, i32
  }
  func.func @transform_3(%arg0: i32) -> (i32, i32) {
    %c0_i32 = arith.constant 0 : i32
    %c0_i32_0 = arith.constant 0 : i32
    return %arg0, %c0_i32 : i32, i32
  }
}

module attributes {stable_mosaic.version = 11 : i64} {
  func.func @_conv_mm_stats_kernel(%arg0: i32, %arg1: memref<16x1152xbf16, #tpu.memory_space<vmem>>, %arg2: memref<1152x128xbf16, #tpu.memory_space<vmem>>, %arg3: memref<16x128xbf16, #tpu.memory_space<vmem>>, %arg4: memref<8x128xf32, #tpu.memory_space<vmem>>, %arg5: memref<8x128xf32, #tpu.memory_space<vmem>>) attributes {dimension_semantics = [#tpu.dimension_semantics<parallel>], iteration_bounds = array<i64: 1>, scalar_prefetch = 0 : i64, scratch_operands = 0 : i64, tpu.core_type = #tpu.core_type<tc>, window_params = [{transform_indices = @transform_0, window_bounds = array<i64: 16, 1152>}, {pipeline_mode = #tpu.pipeline_mode<synchronous>, transform_indices = @transform_1, window_bounds = array<i64: 1152, 128>}, {transform_indices = @transform_2, window_bounds = array<i64: 16, 128>}, {transform_indices = @transform_3, window_bounds = array<i64: 8, 128>}, {transform_indices = @transform_4, window_bounds = array<i64: 8, 128>}]} {
    %c0 = arith.constant 0 : index
    %c0_0 = arith.constant 0 : index
    %0 = vector.load %arg1[%c0, %c0_0] : memref<16x1152xbf16, #tpu.memory_space<vmem>>, vector<16x1152xbf16>
    %c0_1 = arith.constant 0 : index
    %c0_2 = arith.constant 0 : index
    %1 = vector.load %arg2[%c0_1, %c0_2] : memref<1152x128xbf16, #tpu.memory_space<vmem>>, vector<1152x128xbf16>
    %cst = arith.constant dense<0.000000e+00> : vector<16x128xf32>
    %2 = tpu.matmul %0, %1, %cst {dimension_numbers = #tpu.dot_dimension_numbers<[1], [0], [0], [1], [0, 0, 1, 1], [], []>} : vector<16x1152xbf16>, vector<1152x128xbf16>, vector<16x128xf32> -> vector<16x128xf32>
    %3 = arith.truncf %2 : vector<16x128xf32> to vector<16x128xbf16>
    %c0_3 = arith.constant 0 : index
    %c0_4 = arith.constant 0 : index
    %4 = vector.load %arg3[%c0_3, %c0_4] : memref<16x128xbf16, #tpu.memory_space<vmem>>, vector<16x128xbf16>
    tpu.vector_store %arg3[%c0_3, %c0_4], %3 {strides = array<i32>} : memref<16x128xbf16, #tpu.memory_space<vmem>>, vector<16x128xbf16>,
    %cst_5 = arith.constant dense<0.000000e+00> : vector<128xf32>
    %5 = vector.multi_reduction <add>, %2, %cst_5 [0] : vector<16x128xf32> to vector<128xf32>
    %6 = vector.shape_cast %5 : vector<128xf32> to vector<1x128xf32>
    %7 = arith.mulf %2, %2 : vector<16x128xf32>
    %cst_6 = arith.constant dense<0.000000e+00> : vector<128xf32>
    %8 = vector.multi_reduction <add>, %7, %cst_6 [0] : vector<16x128xf32> to vector<128xf32>
    %9 = vector.shape_cast %8 : vector<128xf32> to vector<1x128xf32>
    %10 = tpu.iota {dimensions = array<i32: 0>} : vector<8x128xi32>
    %c0_i32 = arith.constant 0 : i32
    %11 = vector.broadcast %c0_i32 : i32 to vector<8x128xi32>
    %12 = arith.cmpi eq, %10, %11 : vector<8x128xi32>
    %cst_7 = arith.constant 0.000000e+00 : f32
    %13 = vector.shape_cast %6 : vector<1x128xf32> to vector<1x128xf32>
    %14 = vector.broadcast %13 : vector<1x128xf32> to vector<8x128xf32>
    %15 = vector.broadcast %cst_7 : f32 to vector<8x128xf32>
    %16 = arith.select %12, %14, %15 : vector<8x128xi1>, vector<8x128xf32>
    %c0_8 = arith.constant 0 : index
    %c0_9 = arith.constant 0 : index
    %17 = vector.load %arg4[%c0_8, %c0_9] : memref<8x128xf32, #tpu.memory_space<vmem>>, vector<8x128xf32>
    tpu.vector_store %arg4[%c0_8, %c0_9], %16 {strides = array<i32>} : memref<8x128xf32, #tpu.memory_space<vmem>>, vector<8x128xf32>,
    %c0_i32_10 = arith.constant 0 : i32
    %18 = vector.broadcast %c0_i32_10 : i32 to vector<8x128xi32>
    %19 = arith.cmpi eq, %10, %18 : vector<8x128xi32>
    %cst_11 = arith.constant 0.000000e+00 : f32
    %20 = vector.shape_cast %9 : vector<1x128xf32> to vector<1x128xf32>
    %21 = vector.broadcast %20 : vector<1x128xf32> to vector<8x128xf32>
    %22 = vector.broadcast %cst_11 : f32 to vector<8x128xf32>
    %23 = arith.select %19, %21, %22 : vector<8x128xi1>, vector<8x128xf32>
    %c0_12 = arith.constant 0 : index
    %c0_13 = arith.constant 0 : index
    %24 = vector.load %arg5[%c0_12, %c0_13] : memref<8x128xf32, #tpu.memory_space<vmem>>, vector<8x128xf32>
    tpu.vector_store %arg5[%c0_12, %c0_13], %23 {strides = array<i32>} : memref<8x128xf32, #tpu.memory_space<vmem>>, vector<8x128xf32>,
    return
  }
  func.func @transform_0(%arg0: i32) -> (i32, i32) {
    %c0_i32 = arith.constant 0 : i32
    %c0_i32_0 = arith.constant 0 : i32
    return %arg0, %c0_i32 : i32, i32
  }
  func.func @transform_1(%arg0: i32) -> (i32, i32) {
    %c0_i32 = arith.constant 0 : i32
    %c0_i32_0 = arith.constant 0 : i32
    %c0_i32_1 = arith.constant 0 : i32
    return %c0_i32, %c0_i32_0 : i32, i32
  }
  func.func @transform_2(%arg0: i32) -> (i32, i32) {
    %c0_i32 = arith.constant 0 : i32
    %c0_i32_0 = arith.constant 0 : i32
    return %arg0, %c0_i32 : i32, i32
  }
  func.func @transform_3(%arg0: i32) -> (i32, i32) {
    %c0_i32 = arith.constant 0 : i32
    %c0_i32_0 = arith.constant 0 : i32
    return %arg0, %c0_i32 : i32, i32
  }
  func.func @transform_4(%arg0: i32) -> (i32, i32) {
    %c0_i32 = arith.constant 0 : i32
    %c0_i32_0 = arith.constant 0 : i32
    return %arg0, %c0_i32 : i32, i32
  }
}

module attributes {stable_mosaic.version = 11 : i64} {
  func.func @_bn_add_relu_kernel(%arg0: i32, %arg1: memref<16x128xbf16, #tpu.memory_space<vmem>>, %arg2: memref<16x128xbf16, #tpu.memory_space<vmem>>, %arg3: memref<1x128xf32, #tpu.memory_space<vmem>>, %arg4: memref<1x128xf32, #tpu.memory_space<vmem>>, %arg5: memref<16x128xbf16, #tpu.memory_space<vmem>>) attributes {dimension_semantics = [#tpu.dimension_semantics<parallel>], iteration_bounds = array<i64: 1>, scalar_prefetch = 0 : i64, scratch_operands = 0 : i64, tpu.core_type = #tpu.core_type<tc>, window_params = [{transform_indices = @transform_0, window_bounds = array<i64: 16, 128>}, {transform_indices = @transform_1, window_bounds = array<i64: 16, 128>}, {pipeline_mode = #tpu.pipeline_mode<synchronous>, transform_indices = @transform_2, window_bounds = array<i64: 1, 128>}, {pipeline_mode = #tpu.pipeline_mode<synchronous>, transform_indices = @transform_3, window_bounds = array<i64: 1, 128>}, {transform_indices = @transform_4, window_bounds = array<i64: 16, 128>}]} {
    %c0 = arith.constant 0 : index
    %c0_0 = arith.constant 0 : index
    %0 = vector.load %arg1[%c0, %c0_0] : memref<16x128xbf16, #tpu.memory_space<vmem>>, vector<16x128xbf16>
    %1 = arith.extf %0 : vector<16x128xbf16> to vector<16x128xf32>
    %c0_1 = arith.constant 0 : index
    %c0_2 = arith.constant 0 : index
    %2 = vector.load %arg3[%c0_1, %c0_2] : memref<1x128xf32, #tpu.memory_space<vmem>>, vector<1x128xf32>
    %3 = vector.broadcast %2 : vector<1x128xf32> to vector<16x128xf32>
    %4 = arith.mulf %1, %3 : vector<16x128xf32>
    %c0_3 = arith.constant 0 : index
    %c0_4 = arith.constant 0 : index
    %5 = vector.load %arg4[%c0_3, %c0_4] : memref<1x128xf32, #tpu.memory_space<vmem>>, vector<1x128xf32>
    %6 = vector.broadcast %5 : vector<1x128xf32> to vector<16x128xf32>
    %7 = arith.addf %4, %6 : vector<16x128xf32>
    %c0_5 = arith.constant 0 : index
    %c0_6 = arith.constant 0 : index
    %8 = vector.load %arg2[%c0_5, %c0_6] : memref<16x128xbf16, #tpu.memory_space<vmem>>, vector<16x128xbf16>
    %9 = arith.extf %8 : vector<16x128xbf16> to vector<16x128xf32>
    %10 = arith.addf %9, %7 : vector<16x128xf32>
    %cst = arith.constant 0.000000e+00 : f32
    %11 = vector.broadcast %cst : f32 to vector<16x128xf32>
    %12 = arith.maximumf %10, %11 : vector<16x128xf32>
    %13 = arith.truncf %12 : vector<16x128xf32> to vector<16x128xbf16>
    %c0_7 = arith.constant 0 : index
    %c0_8 = arith.constant 0 : index
    %14 = vector.load %arg5[%c0_7, %c0_8] : memref<16x128xbf16, #tpu.memory_space<vmem>>, vector<16x128xbf16>
    tpu.vector_store %arg5[%c0_7, %c0_8], %13 {strides = array<i32>} : memref<16x128xbf16, #tpu.memory_space<vmem>>, vector<16x128xbf16>,
    return
  }
  func.func @transform_0(%arg0: i32) -> (i32, i32) {
    %c0_i32 = arith.constant 0 : i32
    %c0_i32_0 = arith.constant 0 : i32
    return %arg0, %c0_i32 : i32, i32
  }
  func.func @transform_1(%arg0: i32) -> (i32, i32) {
    %c0_i32 = arith.constant 0 : i32
    %c0_i32_0 = arith.constant 0 : i32
    return %arg0, %c0_i32 : i32, i32
  }
  func.func @transform_2(%arg0: i32) -> (i32, i32) {
    %c0_i32 = arith.constant 0 : i32
    %c0_i32_0 = arith.constant 0 : i32
    %c0_i32_1 = arith.constant 0 : i32
    return %c0_i32, %c0_i32_0 : i32, i32
  }
  func.func @transform_3(%arg0: i32) -> (i32, i32) {
    %c0_i32 = arith.constant 0 : i32
    %c0_i32_0 = arith.constant 0 : i32
    %c0_i32_1 = arith.constant 0 : i32
    return %c0_i32, %c0_i32_0 : i32, i32
  }
  func.func @transform_4(%arg0: i32) -> (i32, i32) {
    %c0_i32 = arith.constant 0 : i32
    %c0_i32_0 = arith.constant 0 : i32
    return %arg0, %c0_i32 : i32, i32
  }
}

module attributes {stable_mosaic.version = 11 : i64} {
  func.func @_conv_mm_stats_kernel(%arg0: i32, %arg1: memref<16x128xbf16, #tpu.memory_space<vmem>>, %arg2: memref<128x128xbf16, #tpu.memory_space<vmem>>, %arg3: memref<16x128xbf16, #tpu.memory_space<vmem>>, %arg4: memref<8x128xf32, #tpu.memory_space<vmem>>, %arg5: memref<8x128xf32, #tpu.memory_space<vmem>>) attributes {dimension_semantics = [#tpu.dimension_semantics<parallel>], iteration_bounds = array<i64: 1>, scalar_prefetch = 0 : i64, scratch_operands = 0 : i64, tpu.core_type = #tpu.core_type<tc>, window_params = [{transform_indices = @transform_0, window_bounds = array<i64: 16, 128>}, {pipeline_mode = #tpu.pipeline_mode<synchronous>, transform_indices = @transform_1, window_bounds = array<i64: 128, 128>}, {transform_indices = @transform_2, window_bounds = array<i64: 16, 128>}, {transform_indices = @transform_3, window_bounds = array<i64: 8, 128>}, {transform_indices = @transform_4, window_bounds = array<i64: 8, 128>}]} {
    %c0 = arith.constant 0 : index
    %c0_0 = arith.constant 0 : index
    %0 = vector.load %arg1[%c0, %c0_0] : memref<16x128xbf16, #tpu.memory_space<vmem>>, vector<16x128xbf16>
    %c0_1 = arith.constant 0 : index
    %c0_2 = arith.constant 0 : index
    %1 = vector.load %arg2[%c0_1, %c0_2] : memref<128x128xbf16, #tpu.memory_space<vmem>>, vector<128x128xbf16>
    %cst = arith.constant dense<0.000000e+00> : vector<16x128xf32>
    %2 = tpu.matmul %0, %1, %cst {dimension_numbers = #tpu.dot_dimension_numbers<[1], [0], [0], [1], [0, 0, 1, 1], [], []>} : vector<16x128xbf16>, vector<128x128xbf16>, vector<16x128xf32> -> vector<16x128xf32>
    %3 = arith.truncf %2 : vector<16x128xf32> to vector<16x128xbf16>
    %c0_3 = arith.constant 0 : index
    %c0_4 = arith.constant 0 : index
    %4 = vector.load %arg3[%c0_3, %c0_4] : memref<16x128xbf16, #tpu.memory_space<vmem>>, vector<16x128xbf16>
    tpu.vector_store %arg3[%c0_3, %c0_4], %3 {strides = array<i32>} : memref<16x128xbf16, #tpu.memory_space<vmem>>, vector<16x128xbf16>,
    %cst_5 = arith.constant dense<0.000000e+00> : vector<128xf32>
    %5 = vector.multi_reduction <add>, %2, %cst_5 [0] : vector<16x128xf32> to vector<128xf32>
    %6 = vector.shape_cast %5 : vector<128xf32> to vector<1x128xf32>
    %7 = arith.mulf %2, %2 : vector<16x128xf32>
    %cst_6 = arith.constant dense<0.000000e+00> : vector<128xf32>
    %8 = vector.multi_reduction <add>, %7, %cst_6 [0] : vector<16x128xf32> to vector<128xf32>
    %9 = vector.shape_cast %8 : vector<128xf32> to vector<1x128xf32>
    %10 = tpu.iota {dimensions = array<i32: 0>} : vector<8x128xi32>
    %c0_i32 = arith.constant 0 : i32
    %11 = vector.broadcast %c0_i32 : i32 to vector<8x128xi32>
    %12 = arith.cmpi eq, %10, %11 : vector<8x128xi32>
    %cst_7 = arith.constant 0.000000e+00 : f32
    %13 = vector.shape_cast %6 : vector<1x128xf32> to vector<1x128xf32>
    %14 = vector.broadcast %13 : vector<1x128xf32> to vector<8x128xf32>
    %15 = vector.broadcast %cst_7 : f32 to vector<8x128xf32>
    %16 = arith.select %12, %14, %15 : vector<8x128xi1>, vector<8x128xf32>
    %c0_8 = arith.constant 0 : index
    %c0_9 = arith.constant 0 : index
    %17 = vector.load %arg4[%c0_8, %c0_9] : memref<8x128xf32, #tpu.memory_space<vmem>>, vector<8x128xf32>
    tpu.vector_store %arg4[%c0_8, %c0_9], %16 {strides = array<i32>} : memref<8x128xf32, #tpu.memory_space<vmem>>, vector<8x128xf32>,
    %c0_i32_10 = arith.constant 0 : i32
    %18 = vector.broadcast %c0_i32_10 : i32 to vector<8x128xi32>
    %19 = arith.cmpi eq, %10, %18 : vector<8x128xi32>
    %cst_11 = arith.constant 0.000000e+00 : f32
    %20 = vector.shape_cast %9 : vector<1x128xf32> to vector<1x128xf32>
    %21 = vector.broadcast %20 : vector<1x128xf32> to vector<8x128xf32>
    %22 = vector.broadcast %cst_11 : f32 to vector<8x128xf32>
    %23 = arith.select %19, %21, %22 : vector<8x128xi1>, vector<8x128xf32>
    %c0_12 = arith.constant 0 : index
    %c0_13 = arith.constant 0 : index
    %24 = vector.load %arg5[%c0_12, %c0_13] : memref<8x128xf32, #tpu.memory_space<vmem>>, vector<8x128xf32>
    tpu.vector_store %arg5[%c0_12, %c0_13], %23 {strides = array<i32>} : memref<8x128xf32, #tpu.memory_space<vmem>>, vector<8x128xf32>,
    return
  }
  func.func @transform_0(%arg0: i32) -> (i32, i32) {
    %c0_i32 = arith.constant 0 : i32
    %c0_i32_0 = arith.constant 0 : i32
    return %arg0, %c0_i32 : i32, i32
  }
  func.func @transform_1(%arg0: i32) -> (i32, i32) {
    %c0_i32 = arith.constant 0 : i32
    %c0_i32_0 = arith.constant 0 : i32
    %c0_i32_1 = arith.constant 0 : i32
    return %c0_i32, %c0_i32_0 : i32, i32
  }
  func.func @transform_2(%arg0: i32) -> (i32, i32) {
    %c0_i32 = arith.constant 0 : i32
    %c0_i32_0 = arith.constant 0 : i32
    return %arg0, %c0_i32 : i32, i32
  }
  func.func @transform_3(%arg0: i32) -> (i32, i32) {
    %c0_i32 = arith.constant 0 : i32
    %c0_i32_0 = arith.constant 0 : i32
    return %arg0, %c0_i32 : i32, i32
  }
  func.func @transform_4(%arg0: i32) -> (i32, i32) {
    %c0_i32 = arith.constant 0 : i32
    %c0_i32_0 = arith.constant 0 : i32
    return %arg0, %c0_i32 : i32, i32
  }
}

module attributes {stable_mosaic.version = 11 : i64} {
  func.func @_bn_bn_add_relu_kernel(%arg0: i32, %arg1: memref<16x128xbf16, #tpu.memory_space<vmem>>, %arg2: memref<16x128xbf16, #tpu.memory_space<vmem>>, %arg3: memref<1x128xf32, #tpu.memory_space<vmem>>, %arg4: memref<1x128xf32, #tpu.memory_space<vmem>>, %arg5: memref<1x128xf32, #tpu.memory_space<vmem>>, %arg6: memref<1x128xf32, #tpu.memory_space<vmem>>, %arg7: memref<16x128xbf16, #tpu.memory_space<vmem>>) attributes {dimension_semantics = [#tpu.dimension_semantics<parallel>], iteration_bounds = array<i64: 1>, scalar_prefetch = 0 : i64, scratch_operands = 0 : i64, tpu.core_type = #tpu.core_type<tc>, window_params = [{transform_indices = @transform_0, window_bounds = array<i64: 16, 128>}, {transform_indices = @transform_1, window_bounds = array<i64: 16, 128>}, {pipeline_mode = #tpu.pipeline_mode<synchronous>, transform_indices = @transform_2, window_bounds = array<i64: 1, 128>}, {pipeline_mode = #tpu.pipeline_mode<synchronous>, transform_indices = @transform_3, window_bounds = array<i64: 1, 128>}, {pipeline_mode = #tpu.pipeline_mode<synchronous>, transform_indices = @transform_4, window_bounds = array<i64: 1, 128>}, {pipeline_mode = #tpu.pipeline_mode<synchronous>, transform_indices = @transform_5, window_bounds = array<i64: 1, 128>}, {transform_indices = @transform_6, window_bounds = array<i64: 16, 128>}]} {
    %c0 = arith.constant 0 : index
    %c0_0 = arith.constant 0 : index
    %0 = vector.load %arg1[%c0, %c0_0] : memref<16x128xbf16, #tpu.memory_space<vmem>>, vector<16x128xbf16>
    %1 = arith.extf %0 : vector<16x128xbf16> to vector<16x128xf32>
    %c0_1 = arith.constant 0 : index
    %c0_2 = arith.constant 0 : index
    %2 = vector.load %arg3[%c0_1, %c0_2] : memref<1x128xf32, #tpu.memory_space<vmem>>, vector<1x128xf32>
    %3 = vector.broadcast %2 : vector<1x128xf32> to vector<16x128xf32>
    %4 = arith.mulf %1, %3 : vector<16x128xf32>
    %c0_3 = arith.constant 0 : index
    %c0_4 = arith.constant 0 : index
    %5 = vector.load %arg4[%c0_3, %c0_4] : memref<1x128xf32, #tpu.memory_space<vmem>>, vector<1x128xf32>
    %6 = vector.broadcast %5 : vector<1x128xf32> to vector<16x128xf32>
    %7 = arith.addf %4, %6 : vector<16x128xf32>
    %c0_5 = arith.constant 0 : index
    %c0_6 = arith.constant 0 : index
    %8 = vector.load %arg2[%c0_5, %c0_6] : memref<16x128xbf16, #tpu.memory_space<vmem>>, vector<16x128xbf16>
    %9 = arith.extf %8 : vector<16x128xbf16> to vector<16x128xf32>
    %c0_7 = arith.constant 0 : index
    %c0_8 = arith.constant 0 : index
    %10 = vector.load %arg5[%c0_7, %c0_8] : memref<1x128xf32, #tpu.memory_space<vmem>>, vector<1x128xf32>
    %11 = vector.broadcast %10 : vector<1x128xf32> to vector<16x128xf32>
    %12 = arith.mulf %9, %11 : vector<16x128xf32>
    %c0_9 = arith.constant 0 : index
    %c0_10 = arith.constant 0 : index
    %13 = vector.load %arg6[%c0_9, %c0_10] : memref<1x128xf32, #tpu.memory_space<vmem>>, vector<1x128xf32>
    %14 = vector.broadcast %13 : vector<1x128xf32> to vector<16x128xf32>
    %15 = arith.addf %12, %14 : vector<16x128xf32>
    %16 = arith.addf %15, %7 : vector<16x128xf32>
    %cst = arith.constant 0.000000e+00 : f32
    %17 = vector.broadcast %cst : f32 to vector<16x128xf32>
    %18 = arith.maximumf %16, %17 : vector<16x128xf32>
    %19 = arith.truncf %18 : vector<16x128xf32> to vector<16x128xbf16>
    %c0_11 = arith.constant 0 : index
    %c0_12 = arith.constant 0 : index
    %20 = vector.load %arg7[%c0_11, %c0_12] : memref<16x128xbf16, #tpu.memory_space<vmem>>, vector<16x128xbf16>
    tpu.vector_store %arg7[%c0_11, %c0_12], %19 {strides = array<i32>} : memref<16x128xbf16, #tpu.memory_space<vmem>>, vector<16x128xbf16>,
    return
  }
  func.func @transform_0(%arg0: i32) -> (i32, i32) {
    %c0_i32 = arith.constant 0 : i32
    %c0_i32_0 = arith.constant 0 : i32
    return %arg0, %c0_i32 : i32, i32
  }
  func.func @transform_1(%arg0: i32) -> (i32, i32) {
    %c0_i32 = arith.constant 0 : i32
    %c0_i32_0 = arith.constant 0 : i32
    return %arg0, %c0_i32 : i32, i32
  }
  func.func @transform_2(%arg0: i32) -> (i32, i32) {
    %c0_i32 = arith.constant 0 : i32
    %c0_i32_0 = arith.constant 0 : i32
    %c0_i32_1 = arith.constant 0 : i32
    return %c0_i32, %c0_i32_0 : i32, i32
  }
  func.func @transform_3(%arg0: i32) -> (i32, i32) {
    %c0_i32 = arith.constant 0 : i32
    %c0_i32_0 = arith.constant 0 : i32
    %c0_i32_1 = arith.constant 0 : i32
    return %c0_i32, %c0_i32_0 : i32, i32
  }
  func.func @transform_4(%arg0: i32) -> (i32, i32) {
    %c0_i32 = arith.constant 0 : i32
    %c0_i32_0 = arith.constant 0 : i32
    %c0_i32_1 = arith.constant 0 : i32
    return %c0_i32, %c0_i32_0 : i32, i32
  }
  func.func @transform_5(%arg0: i32) -> (i32, i32) {
    %c0_i32 = arith.constant 0 : i32
    %c0_i32_0 = arith.constant 0 : i32
    %c0_i32_1 = arith.constant 0 : i32
    return %c0_i32, %c0_i32_0 : i32, i32
  }
  func.func @transform_6(%arg0: i32) -> (i32, i32) {
    %c0_i32 = arith.constant 0 : i32
    %c0_i32_0 = arith.constant 0 : i32
    return %arg0, %c0_i32 : i32, i32
  }
}

module attributes {stable_mosaic.version = 11 : i64} {
  func.func @_conv_mm_stats_kernel(%arg0: i32, %arg1: memref<8x128xbf16, #tpu.memory_space<vmem>>, %arg2: memref<128x256xbf16, #tpu.memory_space<vmem>>, %arg3: memref<8x256xbf16, #tpu.memory_space<vmem>>, %arg4: memref<8x256xf32, #tpu.memory_space<vmem>>, %arg5: memref<8x256xf32, #tpu.memory_space<vmem>>) attributes {dimension_semantics = [#tpu.dimension_semantics<parallel>], iteration_bounds = array<i64: 1>, scalar_prefetch = 0 : i64, scratch_operands = 0 : i64, tpu.core_type = #tpu.core_type<tc>, window_params = [{transform_indices = @transform_0, window_bounds = array<i64: 8, 128>}, {pipeline_mode = #tpu.pipeline_mode<synchronous>, transform_indices = @transform_1, window_bounds = array<i64: 128, 256>}, {transform_indices = @transform_2, window_bounds = array<i64: 8, 256>}, {transform_indices = @transform_3, window_bounds = array<i64: 8, 256>}, {transform_indices = @transform_4, window_bounds = array<i64: 8, 256>}]} {
    %c0 = arith.constant 0 : index
    %c0_0 = arith.constant 0 : index
    %0 = vector.load %arg1[%c0, %c0_0] : memref<8x128xbf16, #tpu.memory_space<vmem>>, vector<8x128xbf16>
    %c0_1 = arith.constant 0 : index
    %c0_2 = arith.constant 0 : index
    %1 = vector.load %arg2[%c0_1, %c0_2] : memref<128x256xbf16, #tpu.memory_space<vmem>>, vector<128x256xbf16>
    %cst = arith.constant dense<0.000000e+00> : vector<8x256xf32>
    %2 = tpu.matmul %0, %1, %cst {dimension_numbers = #tpu.dot_dimension_numbers<[1], [0], [0], [1], [0, 0, 1, 1], [], []>} : vector<8x128xbf16>, vector<128x256xbf16>, vector<8x256xf32> -> vector<8x256xf32>
    %3 = arith.truncf %2 : vector<8x256xf32> to vector<8x256xbf16>
    %c0_3 = arith.constant 0 : index
    %c0_4 = arith.constant 0 : index
    %4 = vector.load %arg3[%c0_3, %c0_4] : memref<8x256xbf16, #tpu.memory_space<vmem>>, vector<8x256xbf16>
    tpu.vector_store %arg3[%c0_3, %c0_4], %3 {strides = array<i32>} : memref<8x256xbf16, #tpu.memory_space<vmem>>, vector<8x256xbf16>,
    %cst_5 = arith.constant dense<0.000000e+00> : vector<256xf32>
    %5 = vector.multi_reduction <add>, %2, %cst_5 [0] : vector<8x256xf32> to vector<256xf32>
    %6 = vector.shape_cast %5 : vector<256xf32> to vector<1x256xf32>
    %7 = arith.mulf %2, %2 : vector<8x256xf32>
    %cst_6 = arith.constant dense<0.000000e+00> : vector<256xf32>
    %8 = vector.multi_reduction <add>, %7, %cst_6 [0] : vector<8x256xf32> to vector<256xf32>
    %9 = vector.shape_cast %8 : vector<256xf32> to vector<1x256xf32>
    %10 = tpu.iota {dimensions = array<i32: 0>} : vector<8x256xi32>
    %c0_i32 = arith.constant 0 : i32
    %11 = vector.broadcast %c0_i32 : i32 to vector<8x256xi32>
    %12 = arith.cmpi eq, %10, %11 : vector<8x256xi32>
    %cst_7 = arith.constant 0.000000e+00 : f32
    %13 = vector.shape_cast %6 : vector<1x256xf32> to vector<1x256xf32>
    %14 = vector.broadcast %13 : vector<1x256xf32> to vector<8x256xf32>
    %15 = vector.broadcast %cst_7 : f32 to vector<8x256xf32>
    %16 = arith.select %12, %14, %15 : vector<8x256xi1>, vector<8x256xf32>
    %c0_8 = arith.constant 0 : index
    %c0_9 = arith.constant 0 : index
    %17 = vector.load %arg4[%c0_8, %c0_9] : memref<8x256xf32, #tpu.memory_space<vmem>>, vector<8x256xf32>
    tpu.vector_store %arg4[%c0_8, %c0_9], %16 {strides = array<i32>} : memref<8x256xf32, #tpu.memory_space<vmem>>, vector<8x256xf32>,
    %c0_i32_10 = arith.constant 0 : i32
    %18 = vector.broadcast %c0_i32_10 : i32 to vector<8x256xi32>
    %19 = arith.cmpi eq, %10, %18 : vector<8x256xi32>
    %cst_11 = arith.constant 0.000000e+00 : f32
    %20 = vector.shape_cast %9 : vector<1x256xf32> to vector<1x256xf32>
    %21 = vector.broadcast %20 : vector<1x256xf32> to vector<8x256xf32>
    %22 = vector.broadcast %cst_11 : f32 to vector<8x256xf32>
    %23 = arith.select %19, %21, %22 : vector<8x256xi1>, vector<8x256xf32>
    %c0_12 = arith.constant 0 : index
    %c0_13 = arith.constant 0 : index
    %24 = vector.load %arg5[%c0_12, %c0_13] : memref<8x256xf32, #tpu.memory_space<vmem>>, vector<8x256xf32>
    tpu.vector_store %arg5[%c0_12, %c0_13], %23 {strides = array<i32>} : memref<8x256xf32, #tpu.memory_space<vmem>>, vector<8x256xf32>,
    return
  }
  func.func @transform_0(%arg0: i32) -> (i32, i32) {
    %c0_i32 = arith.constant 0 : i32
    %c0_i32_0 = arith.constant 0 : i32
    return %arg0, %c0_i32 : i32, i32
  }
  func.func @transform_1(%arg0: i32) -> (i32, i32) {
    %c0_i32 = arith.constant 0 : i32
    %c0_i32_0 = arith.constant 0 : i32
    %c0_i32_1 = arith.constant 0 : i32
    return %c0_i32, %c0_i32_0 : i32, i32
  }
  func.func @transform_2(%arg0: i32) -> (i32, i32) {
    %c0_i32 = arith.constant 0 : i32
    %c0_i32_0 = arith.constant 0 : i32
    return %arg0, %c0_i32 : i32, i32
  }
  func.func @transform_3(%arg0: i32) -> (i32, i32) {
    %c0_i32 = arith.constant 0 : i32
    %c0_i32_0 = arith.constant 0 : i32
    return %arg0, %c0_i32 : i32, i32
  }
  func.func @transform_4(%arg0: i32) -> (i32, i32) {
    %c0_i32 = arith.constant 0 : i32
    %c0_i32_0 = arith.constant 0 : i32
    return %arg0, %c0_i32 : i32, i32
  }
}

module attributes {stable_mosaic.version = 11 : i64} {
  func.func @_bn_relu_kernel(%arg0: i32, %arg1: memref<8x256xbf16, #tpu.memory_space<vmem>>, %arg2: memref<1x256xf32, #tpu.memory_space<vmem>>, %arg3: memref<1x256xf32, #tpu.memory_space<vmem>>, %arg4: memref<8x256xbf16, #tpu.memory_space<vmem>>) attributes {dimension_semantics = [#tpu.dimension_semantics<parallel>], iteration_bounds = array<i64: 1>, scalar_prefetch = 0 : i64, scratch_operands = 0 : i64, tpu.core_type = #tpu.core_type<tc>, window_params = [{transform_indices = @transform_0, window_bounds = array<i64: 8, 256>}, {pipeline_mode = #tpu.pipeline_mode<synchronous>, transform_indices = @transform_1, window_bounds = array<i64: 1, 256>}, {pipeline_mode = #tpu.pipeline_mode<synchronous>, transform_indices = @transform_2, window_bounds = array<i64: 1, 256>}, {transform_indices = @transform_3, window_bounds = array<i64: 8, 256>}]} {
    %c0 = arith.constant 0 : index
    %c0_0 = arith.constant 0 : index
    %0 = vector.load %arg1[%c0, %c0_0] : memref<8x256xbf16, #tpu.memory_space<vmem>>, vector<8x256xbf16>
    %1 = arith.extf %0 : vector<8x256xbf16> to vector<8x256xf32>
    %c0_1 = arith.constant 0 : index
    %c0_2 = arith.constant 0 : index
    %2 = vector.load %arg2[%c0_1, %c0_2] : memref<1x256xf32, #tpu.memory_space<vmem>>, vector<1x256xf32>
    %3 = vector.broadcast %2 : vector<1x256xf32> to vector<8x256xf32>
    %4 = arith.mulf %1, %3 : vector<8x256xf32>
    %c0_3 = arith.constant 0 : index
    %c0_4 = arith.constant 0 : index
    %5 = vector.load %arg3[%c0_3, %c0_4] : memref<1x256xf32, #tpu.memory_space<vmem>>, vector<1x256xf32>
    %6 = vector.broadcast %5 : vector<1x256xf32> to vector<8x256xf32>
    %7 = arith.addf %4, %6 : vector<8x256xf32>
    %cst = arith.constant 0.000000e+00 : f32
    %8 = vector.broadcast %cst : f32 to vector<8x256xf32>
    %9 = arith.maximumf %7, %8 : vector<8x256xf32>
    %10 = arith.truncf %9 : vector<8x256xf32> to vector<8x256xbf16>
    %c0_5 = arith.constant 0 : index
    %c0_6 = arith.constant 0 : index
    %11 = vector.load %arg4[%c0_5, %c0_6] : memref<8x256xbf16, #tpu.memory_space<vmem>>, vector<8x256xbf16>
    tpu.vector_store %arg4[%c0_5, %c0_6], %10 {strides = array<i32>} : memref<8x256xbf16, #tpu.memory_space<vmem>>, vector<8x256xbf16>,
    return
  }
  func.func @transform_0(%arg0: i32) -> (i32, i32) {
    %c0_i32 = arith.constant 0 : i32
    %c0_i32_0 = arith.constant 0 : i32
    return %arg0, %c0_i32 : i32, i32
  }
  func.func @transform_1(%arg0: i32) -> (i32, i32) {
    %c0_i32 = arith.constant 0 : i32
    %c0_i32_0 = arith.constant 0 : i32
    %c0_i32_1 = arith.constant 0 : i32
    return %c0_i32, %c0_i32_0 : i32, i32
  }
  func.func @transform_2(%arg0: i32) -> (i32, i32) {
    %c0_i32 = arith.constant 0 : i32
    %c0_i32_0 = arith.constant 0 : i32
    %c0_i32_1 = arith.constant 0 : i32
    return %c0_i32, %c0_i32_0 : i32, i32
  }
  func.func @transform_3(%arg0: i32) -> (i32, i32) {
    %c0_i32 = arith.constant 0 : i32
    %c0_i32_0 = arith.constant 0 : i32
    return %arg0, %c0_i32 : i32, i32
  }
}

module attributes {stable_mosaic.version = 11 : i64} {
  func.func @_conv_mm_stats_kernel(%arg0: i32, %arg1: memref<8x1152xbf16, #tpu.memory_space<vmem>>, %arg2: memref<1152x256xbf16, #tpu.memory_space<vmem>>, %arg3: memref<8x256xbf16, #tpu.memory_space<vmem>>, %arg4: memref<8x256xf32, #tpu.memory_space<vmem>>, %arg5: memref<8x256xf32, #tpu.memory_space<vmem>>) attributes {dimension_semantics = [#tpu.dimension_semantics<parallel>], iteration_bounds = array<i64: 1>, scalar_prefetch = 0 : i64, scratch_operands = 0 : i64, tpu.core_type = #tpu.core_type<tc>, window_params = [{transform_indices = @transform_0, window_bounds = array<i64: 8, 1152>}, {pipeline_mode = #tpu.pipeline_mode<synchronous>, transform_indices = @transform_1, window_bounds = array<i64: 1152, 256>}, {transform_indices = @transform_2, window_bounds = array<i64: 8, 256>}, {transform_indices = @transform_3, window_bounds = array<i64: 8, 256>}, {transform_indices = @transform_4, window_bounds = array<i64: 8, 256>}]} {
    %c0 = arith.constant 0 : index
    %c0_0 = arith.constant 0 : index
    %0 = vector.load %arg1[%c0, %c0_0] : memref<8x1152xbf16, #tpu.memory_space<vmem>>, vector<8x1152xbf16>
    %c0_1 = arith.constant 0 : index
    %c0_2 = arith.constant 0 : index
    %1 = vector.load %arg2[%c0_1, %c0_2] : memref<1152x256xbf16, #tpu.memory_space<vmem>>, vector<1152x256xbf16>
    %cst = arith.constant dense<0.000000e+00> : vector<8x256xf32>
    %2 = tpu.matmul %0, %1, %cst {dimension_numbers = #tpu.dot_dimension_numbers<[1], [0], [0], [1], [0, 0, 1, 1], [], []>} : vector<8x1152xbf16>, vector<1152x256xbf16>, vector<8x256xf32> -> vector<8x256xf32>
    %3 = arith.truncf %2 : vector<8x256xf32> to vector<8x256xbf16>
    %c0_3 = arith.constant 0 : index
    %c0_4 = arith.constant 0 : index
    %4 = vector.load %arg3[%c0_3, %c0_4] : memref<8x256xbf16, #tpu.memory_space<vmem>>, vector<8x256xbf16>
    tpu.vector_store %arg3[%c0_3, %c0_4], %3 {strides = array<i32>} : memref<8x256xbf16, #tpu.memory_space<vmem>>, vector<8x256xbf16>,
    %cst_5 = arith.constant dense<0.000000e+00> : vector<256xf32>
    %5 = vector.multi_reduction <add>, %2, %cst_5 [0] : vector<8x256xf32> to vector<256xf32>
    %6 = vector.shape_cast %5 : vector<256xf32> to vector<1x256xf32>
    %7 = arith.mulf %2, %2 : vector<8x256xf32>
    %cst_6 = arith.constant dense<0.000000e+00> : vector<256xf32>
    %8 = vector.multi_reduction <add>, %7, %cst_6 [0] : vector<8x256xf32> to vector<256xf32>
    %9 = vector.shape_cast %8 : vector<256xf32> to vector<1x256xf32>
    %10 = tpu.iota {dimensions = array<i32: 0>} : vector<8x256xi32>
    %c0_i32 = arith.constant 0 : i32
    %11 = vector.broadcast %c0_i32 : i32 to vector<8x256xi32>
    %12 = arith.cmpi eq, %10, %11 : vector<8x256xi32>
    %cst_7 = arith.constant 0.000000e+00 : f32
    %13 = vector.shape_cast %6 : vector<1x256xf32> to vector<1x256xf32>
    %14 = vector.broadcast %13 : vector<1x256xf32> to vector<8x256xf32>
    %15 = vector.broadcast %cst_7 : f32 to vector<8x256xf32>
    %16 = arith.select %12, %14, %15 : vector<8x256xi1>, vector<8x256xf32>
    %c0_8 = arith.constant 0 : index
    %c0_9 = arith.constant 0 : index
    %17 = vector.load %arg4[%c0_8, %c0_9] : memref<8x256xf32, #tpu.memory_space<vmem>>, vector<8x256xf32>
    tpu.vector_store %arg4[%c0_8, %c0_9], %16 {strides = array<i32>} : memref<8x256xf32, #tpu.memory_space<vmem>>, vector<8x256xf32>,
    %c0_i32_10 = arith.constant 0 : i32
    %18 = vector.broadcast %c0_i32_10 : i32 to vector<8x256xi32>
    %19 = arith.cmpi eq, %10, %18 : vector<8x256xi32>
    %cst_11 = arith.constant 0.000000e+00 : f32
    %20 = vector.shape_cast %9 : vector<1x256xf32> to vector<1x256xf32>
    %21 = vector.broadcast %20 : vector<1x256xf32> to vector<8x256xf32>
    %22 = vector.broadcast %cst_11 : f32 to vector<8x256xf32>
    %23 = arith.select %19, %21, %22 : vector<8x256xi1>, vector<8x256xf32>
    %c0_12 = arith.constant 0 : index
    %c0_13 = arith.constant 0 : index
    %24 = vector.load %arg5[%c0_12, %c0_13] : memref<8x256xf32, #tpu.memory_space<vmem>>, vector<8x256xf32>
    tpu.vector_store %arg5[%c0_12, %c0_13], %23 {strides = array<i32>} : memref<8x256xf32, #tpu.memory_space<vmem>>, vector<8x256xf32>,
    return
  }
  func.func @transform_0(%arg0: i32) -> (i32, i32) {
    %c0_i32 = arith.constant 0 : i32
    %c0_i32_0 = arith.constant 0 : i32
    return %arg0, %c0_i32 : i32, i32
  }
  func.func @transform_1(%arg0: i32) -> (i32, i32) {
    %c0_i32 = arith.constant 0 : i32
    %c0_i32_0 = arith.constant 0 : i32
    %c0_i32_1 = arith.constant 0 : i32
    return %c0_i32, %c0_i32_0 : i32, i32
  }
  func.func @transform_2(%arg0: i32) -> (i32, i32) {
    %c0_i32 = arith.constant 0 : i32
    %c0_i32_0 = arith.constant 0 : i32
    return %arg0, %c0_i32 : i32, i32
  }
  func.func @transform_3(%arg0: i32) -> (i32, i32) {
    %c0_i32 = arith.constant 0 : i32
    %c0_i32_0 = arith.constant 0 : i32
    return %arg0, %c0_i32 : i32, i32
  }
  func.func @transform_4(%arg0: i32) -> (i32, i32) {
    %c0_i32 = arith.constant 0 : i32
    %c0_i32_0 = arith.constant 0 : i32
    return %arg0, %c0_i32 : i32, i32
  }
}

module attributes {stable_mosaic.version = 11 : i64} {
  func.func @_conv_mm_stats_kernel(%arg0: i32, %arg1: memref<8x2304xbf16, #tpu.memory_space<vmem>>, %arg2: memref<2304x256xbf16, #tpu.memory_space<vmem>>, %arg3: memref<8x256xbf16, #tpu.memory_space<vmem>>, %arg4: memref<8x256xf32, #tpu.memory_space<vmem>>, %arg5: memref<8x256xf32, #tpu.memory_space<vmem>>) attributes {dimension_semantics = [#tpu.dimension_semantics<parallel>], iteration_bounds = array<i64: 1>, scalar_prefetch = 0 : i64, scratch_operands = 0 : i64, tpu.core_type = #tpu.core_type<tc>, window_params = [{transform_indices = @transform_0, window_bounds = array<i64: 8, 2304>}, {pipeline_mode = #tpu.pipeline_mode<synchronous>, transform_indices = @transform_1, window_bounds = array<i64: 2304, 256>}, {transform_indices = @transform_2, window_bounds = array<i64: 8, 256>}, {transform_indices = @transform_3, window_bounds = array<i64: 8, 256>}, {transform_indices = @transform_4, window_bounds = array<i64: 8, 256>}]} {
    %c0 = arith.constant 0 : index
    %c0_0 = arith.constant 0 : index
    %0 = vector.load %arg1[%c0, %c0_0] : memref<8x2304xbf16, #tpu.memory_space<vmem>>, vector<8x2304xbf16>
    %c0_1 = arith.constant 0 : index
    %c0_2 = arith.constant 0 : index
    %1 = vector.load %arg2[%c0_1, %c0_2] : memref<2304x256xbf16, #tpu.memory_space<vmem>>, vector<2304x256xbf16>
    %cst = arith.constant dense<0.000000e+00> : vector<8x256xf32>
    %2 = tpu.matmul %0, %1, %cst {dimension_numbers = #tpu.dot_dimension_numbers<[1], [0], [0], [1], [0, 0, 1, 1], [], []>} : vector<8x2304xbf16>, vector<2304x256xbf16>, vector<8x256xf32> -> vector<8x256xf32>
    %3 = arith.truncf %2 : vector<8x256xf32> to vector<8x256xbf16>
    %c0_3 = arith.constant 0 : index
    %c0_4 = arith.constant 0 : index
    %4 = vector.load %arg3[%c0_3, %c0_4] : memref<8x256xbf16, #tpu.memory_space<vmem>>, vector<8x256xbf16>
    tpu.vector_store %arg3[%c0_3, %c0_4], %3 {strides = array<i32>} : memref<8x256xbf16, #tpu.memory_space<vmem>>, vector<8x256xbf16>,
    %cst_5 = arith.constant dense<0.000000e+00> : vector<256xf32>
    %5 = vector.multi_reduction <add>, %2, %cst_5 [0] : vector<8x256xf32> to vector<256xf32>
    %6 = vector.shape_cast %5 : vector<256xf32> to vector<1x256xf32>
    %7 = arith.mulf %2, %2 : vector<8x256xf32>
    %cst_6 = arith.constant dense<0.000000e+00> : vector<256xf32>
    %8 = vector.multi_reduction <add>, %7, %cst_6 [0] : vector<8x256xf32> to vector<256xf32>
    %9 = vector.shape_cast %8 : vector<256xf32> to vector<1x256xf32>
    %10 = tpu.iota {dimensions = array<i32: 0>} : vector<8x256xi32>
    %c0_i32 = arith.constant 0 : i32
    %11 = vector.broadcast %c0_i32 : i32 to vector<8x256xi32>
    %12 = arith.cmpi eq, %10, %11 : vector<8x256xi32>
    %cst_7 = arith.constant 0.000000e+00 : f32
    %13 = vector.shape_cast %6 : vector<1x256xf32> to vector<1x256xf32>
    %14 = vector.broadcast %13 : vector<1x256xf32> to vector<8x256xf32>
    %15 = vector.broadcast %cst_7 : f32 to vector<8x256xf32>
    %16 = arith.select %12, %14, %15 : vector<8x256xi1>, vector<8x256xf32>
    %c0_8 = arith.constant 0 : index
    %c0_9 = arith.constant 0 : index
    %17 = vector.load %arg4[%c0_8, %c0_9] : memref<8x256xf32, #tpu.memory_space<vmem>>, vector<8x256xf32>
    tpu.vector_store %arg4[%c0_8, %c0_9], %16 {strides = array<i32>} : memref<8x256xf32, #tpu.memory_space<vmem>>, vector<8x256xf32>,
    %c0_i32_10 = arith.constant 0 : i32
    %18 = vector.broadcast %c0_i32_10 : i32 to vector<8x256xi32>
    %19 = arith.cmpi eq, %10, %18 : vector<8x256xi32>
    %cst_11 = arith.constant 0.000000e+00 : f32
    %20 = vector.shape_cast %9 : vector<1x256xf32> to vector<1x256xf32>
    %21 = vector.broadcast %20 : vector<1x256xf32> to vector<8x256xf32>
    %22 = vector.broadcast %cst_11 : f32 to vector<8x256xf32>
    %23 = arith.select %19, %21, %22 : vector<8x256xi1>, vector<8x256xf32>
    %c0_12 = arith.constant 0 : index
    %c0_13 = arith.constant 0 : index
    %24 = vector.load %arg5[%c0_12, %c0_13] : memref<8x256xf32, #tpu.memory_space<vmem>>, vector<8x256xf32>
    tpu.vector_store %arg5[%c0_12, %c0_13], %23 {strides = array<i32>} : memref<8x256xf32, #tpu.memory_space<vmem>>, vector<8x256xf32>,
    return
  }
  func.func @transform_0(%arg0: i32) -> (i32, i32) {
    %c0_i32 = arith.constant 0 : i32
    %c0_i32_0 = arith.constant 0 : i32
    return %arg0, %c0_i32 : i32, i32
  }
  func.func @transform_1(%arg0: i32) -> (i32, i32) {
    %c0_i32 = arith.constant 0 : i32
    %c0_i32_0 = arith.constant 0 : i32
    %c0_i32_1 = arith.constant 0 : i32
    return %c0_i32, %c0_i32_0 : i32, i32
  }
  func.func @transform_2(%arg0: i32) -> (i32, i32) {
    %c0_i32 = arith.constant 0 : i32
    %c0_i32_0 = arith.constant 0 : i32
    return %arg0, %c0_i32 : i32, i32
  }
  func.func @transform_3(%arg0: i32) -> (i32, i32) {
    %c0_i32 = arith.constant 0 : i32
    %c0_i32_0 = arith.constant 0 : i32
    return %arg0, %c0_i32 : i32, i32
  }
  func.func @transform_4(%arg0: i32) -> (i32, i32) {
    %c0_i32 = arith.constant 0 : i32
    %c0_i32_0 = arith.constant 0 : i32
    return %arg0, %c0_i32 : i32, i32
  }
}

module attributes {stable_mosaic.version = 11 : i64} {
  func.func @_bn_bn_add_relu_kernel(%arg0: i32, %arg1: memref<8x256xbf16, #tpu.memory_space<vmem>>, %arg2: memref<8x256xbf16, #tpu.memory_space<vmem>>, %arg3: memref<1x256xf32, #tpu.memory_space<vmem>>, %arg4: memref<1x256xf32, #tpu.memory_space<vmem>>, %arg5: memref<1x256xf32, #tpu.memory_space<vmem>>, %arg6: memref<1x256xf32, #tpu.memory_space<vmem>>, %arg7: memref<8x256xbf16, #tpu.memory_space<vmem>>) attributes {dimension_semantics = [#tpu.dimension_semantics<parallel>], iteration_bounds = array<i64: 1>, scalar_prefetch = 0 : i64, scratch_operands = 0 : i64, tpu.core_type = #tpu.core_type<tc>, window_params = [{transform_indices = @transform_0, window_bounds = array<i64: 8, 256>}, {transform_indices = @transform_1, window_bounds = array<i64: 8, 256>}, {pipeline_mode = #tpu.pipeline_mode<synchronous>, transform_indices = @transform_2, window_bounds = array<i64: 1, 256>}, {pipeline_mode = #tpu.pipeline_mode<synchronous>, transform_indices = @transform_3, window_bounds = array<i64: 1, 256>}, {pipeline_mode = #tpu.pipeline_mode<synchronous>, transform_indices = @transform_4, window_bounds = array<i64: 1, 256>}, {pipeline_mode = #tpu.pipeline_mode<synchronous>, transform_indices = @transform_5, window_bounds = array<i64: 1, 256>}, {transform_indices = @transform_6, window_bounds = array<i64: 8, 256>}]} {
    %c0 = arith.constant 0 : index
    %c0_0 = arith.constant 0 : index
    %0 = vector.load %arg1[%c0, %c0_0] : memref<8x256xbf16, #tpu.memory_space<vmem>>, vector<8x256xbf16>
    %1 = arith.extf %0 : vector<8x256xbf16> to vector<8x256xf32>
    %c0_1 = arith.constant 0 : index
    %c0_2 = arith.constant 0 : index
    %2 = vector.load %arg3[%c0_1, %c0_2] : memref<1x256xf32, #tpu.memory_space<vmem>>, vector<1x256xf32>
    %3 = vector.broadcast %2 : vector<1x256xf32> to vector<8x256xf32>
    %4 = arith.mulf %1, %3 : vector<8x256xf32>
    %c0_3 = arith.constant 0 : index
    %c0_4 = arith.constant 0 : index
    %5 = vector.load %arg4[%c0_3, %c0_4] : memref<1x256xf32, #tpu.memory_space<vmem>>, vector<1x256xf32>
    %6 = vector.broadcast %5 : vector<1x256xf32> to vector<8x256xf32>
    %7 = arith.addf %4, %6 : vector<8x256xf32>
    %c0_5 = arith.constant 0 : index
    %c0_6 = arith.constant 0 : index
    %8 = vector.load %arg2[%c0_5, %c0_6] : memref<8x256xbf16, #tpu.memory_space<vmem>>, vector<8x256xbf16>
    %9 = arith.extf %8 : vector<8x256xbf16> to vector<8x256xf32>
    %c0_7 = arith.constant 0 : index
    %c0_8 = arith.constant 0 : index
    %10 = vector.load %arg5[%c0_7, %c0_8] : memref<1x256xf32, #tpu.memory_space<vmem>>, vector<1x256xf32>
    %11 = vector.broadcast %10 : vector<1x256xf32> to vector<8x256xf32>
    %12 = arith.mulf %9, %11 : vector<8x256xf32>
    %c0_9 = arith.constant 0 : index
    %c0_10 = arith.constant 0 : index
    %13 = vector.load %arg6[%c0_9, %c0_10] : memref<1x256xf32, #tpu.memory_space<vmem>>, vector<1x256xf32>
    %14 = vector.broadcast %13 : vector<1x256xf32> to vector<8x256xf32>
    %15 = arith.addf %12, %14 : vector<8x256xf32>
    %16 = arith.addf %15, %7 : vector<8x256xf32>
    %cst = arith.constant 0.000000e+00 : f32
    %17 = vector.broadcast %cst : f32 to vector<8x256xf32>
    %18 = arith.maximumf %16, %17 : vector<8x256xf32>
    %19 = arith.truncf %18 : vector<8x256xf32> to vector<8x256xbf16>
    %c0_11 = arith.constant 0 : index
    %c0_12 = arith.constant 0 : index
    %20 = vector.load %arg7[%c0_11, %c0_12] : memref<8x256xbf16, #tpu.memory_space<vmem>>, vector<8x256xbf16>
    tpu.vector_store %arg7[%c0_11, %c0_12], %19 {strides = array<i32>} : memref<8x256xbf16, #tpu.memory_space<vmem>>, vector<8x256xbf16>,
    return
  }
  func.func @transform_0(%arg0: i32) -> (i32, i32) {
    %c0_i32 = arith.constant 0 : i32
    %c0_i32_0 = arith.constant 0 : i32
    return %arg0, %c0_i32 : i32, i32
  }
  func.func @transform_1(%arg0: i32) -> (i32, i32) {
    %c0_i32 = arith.constant 0 : i32
    %c0_i32_0 = arith.constant 0 : i32
    return %arg0, %c0_i32 : i32, i32
  }
  func.func @transform_2(%arg0: i32) -> (i32, i32) {
    %c0_i32 = arith.constant 0 : i32
    %c0_i32_0 = arith.constant 0 : i32
    %c0_i32_1 = arith.constant 0 : i32
    return %c0_i32, %c0_i32_0 : i32, i32
  }
  func.func @transform_3(%arg0: i32) -> (i32, i32) {
    %c0_i32 = arith.constant 0 : i32
    %c0_i32_0 = arith.constant 0 : i32
    %c0_i32_1 = arith.constant 0 : i32
    return %c0_i32, %c0_i32_0 : i32, i32
  }
  func.func @transform_4(%arg0: i32) -> (i32, i32) {
    %c0_i32 = arith.constant 0 : i32
    %c0_i32_0 = arith.constant 0 : i32
    %c0_i32_1 = arith.constant 0 : i32
    return %c0_i32, %c0_i32_0 : i32, i32
  }
  func.func @transform_5(%arg0: i32) -> (i32, i32) {
    %c0_i32 = arith.constant 0 : i32
    %c0_i32_0 = arith.constant 0 : i32
    %c0_i32_1 = arith.constant 0 : i32
    return %c0_i32, %c0_i32_0 : i32, i32
  }
  func.func @transform_6(%arg0: i32) -> (i32, i32) {
    %c0_i32 = arith.constant 0 : i32
    %c0_i32_0 = arith.constant 0 : i32
    return %arg0, %c0_i32 : i32, i32
  }
}

module attributes {stable_mosaic.version = 11 : i64} {
  func.func @_bn_add_relu_kernel(%arg0: i32, %arg1: memref<8x256xbf16, #tpu.memory_space<vmem>>, %arg2: memref<8x256xbf16, #tpu.memory_space<vmem>>, %arg3: memref<1x256xf32, #tpu.memory_space<vmem>>, %arg4: memref<1x256xf32, #tpu.memory_space<vmem>>, %arg5: memref<8x256xbf16, #tpu.memory_space<vmem>>) attributes {dimension_semantics = [#tpu.dimension_semantics<parallel>], iteration_bounds = array<i64: 1>, scalar_prefetch = 0 : i64, scratch_operands = 0 : i64, tpu.core_type = #tpu.core_type<tc>, window_params = [{transform_indices = @transform_0, window_bounds = array<i64: 8, 256>}, {transform_indices = @transform_1, window_bounds = array<i64: 8, 256>}, {pipeline_mode = #tpu.pipeline_mode<synchronous>, transform_indices = @transform_2, window_bounds = array<i64: 1, 256>}, {pipeline_mode = #tpu.pipeline_mode<synchronous>, transform_indices = @transform_3, window_bounds = array<i64: 1, 256>}, {transform_indices = @transform_4, window_bounds = array<i64: 8, 256>}]} {
    %c0 = arith.constant 0 : index
    %c0_0 = arith.constant 0 : index
    %0 = vector.load %arg1[%c0, %c0_0] : memref<8x256xbf16, #tpu.memory_space<vmem>>, vector<8x256xbf16>
    %1 = arith.extf %0 : vector<8x256xbf16> to vector<8x256xf32>
    %c0_1 = arith.constant 0 : index
    %c0_2 = arith.constant 0 : index
    %2 = vector.load %arg3[%c0_1, %c0_2] : memref<1x256xf32, #tpu.memory_space<vmem>>, vector<1x256xf32>
    %3 = vector.broadcast %2 : vector<1x256xf32> to vector<8x256xf32>
    %4 = arith.mulf %1, %3 : vector<8x256xf32>
    %c0_3 = arith.constant 0 : index
    %c0_4 = arith.constant 0 : index
    %5 = vector.load %arg4[%c0_3, %c0_4] : memref<1x256xf32, #tpu.memory_space<vmem>>, vector<1x256xf32>
    %6 = vector.broadcast %5 : vector<1x256xf32> to vector<8x256xf32>
    %7 = arith.addf %4, %6 : vector<8x256xf32>
    %c0_5 = arith.constant 0 : index
    %c0_6 = arith.constant 0 : index
    %8 = vector.load %arg2[%c0_5, %c0_6] : memref<8x256xbf16, #tpu.memory_space<vmem>>, vector<8x256xbf16>
    %9 = arith.extf %8 : vector<8x256xbf16> to vector<8x256xf32>
    %10 = arith.addf %9, %7 : vector<8x256xf32>
    %cst = arith.constant 0.000000e+00 : f32
    %11 = vector.broadcast %cst : f32 to vector<8x256xf32>
    %12 = arith.maximumf %10, %11 : vector<8x256xf32>
    %13 = arith.truncf %12 : vector<8x256xf32> to vector<8x256xbf16>
    %c0_7 = arith.constant 0 : index
    %c0_8 = arith.constant 0 : index
    %14 = vector.load %arg5[%c0_7, %c0_8] : memref<8x256xbf16, #tpu.memory_space<vmem>>, vector<8x256xbf16>
    tpu.vector_store %arg5[%c0_7, %c0_8], %13 {strides = array<i32>} : memref<8x256xbf16, #tpu.memory_space<vmem>>, vector<8x256xbf16>,
    return
  }
  func.func @transform_0(%arg0: i32) -> (i32, i32) {
    %c0_i32 = arith.constant 0 : i32
    %c0_i32_0 = arith.constant 0 : i32
    return %arg0, %c0_i32 : i32, i32
  }
  func.func @transform_1(%arg0: i32) -> (i32, i32) {
    %c0_i32 = arith.constant 0 : i32
    %c0_i32_0 = arith.constant 0 : i32
    return %arg0, %c0_i32 : i32, i32
  }
  func.func @transform_2(%arg0: i32) -> (i32, i32) {
    %c0_i32 = arith.constant 0 : i32
    %c0_i32_0 = arith.constant 0 : i32
    %c0_i32_1 = arith.constant 0 : i32
    return %c0_i32, %c0_i32_0 : i32, i32
  }
  func.func @transform_3(%arg0: i32) -> (i32, i32) {
    %c0_i32 = arith.constant 0 : i32
    %c0_i32_0 = arith.constant 0 : i32
    %c0_i32_1 = arith.constant 0 : i32
    return %c0_i32, %c0_i32_0 : i32, i32
  }
  func.func @transform_4(%arg0: i32) -> (i32, i32) {
    %c0_i32 = arith.constant 0 : i32
    %c0_i32_0 = arith.constant 0 : i32
    return %arg0, %c0_i32 : i32, i32
  }
}

</mosaic_0001>

<bundles_post_ra>
// kernel: tile.161
= control target key start
LH: loop header
LB: loop body
LE: loop exit
PB: predicated region body
PF: predicated region fallthrough
CT: control target
= control target key end

     0   :  { %s22_s0 = inlined_call_operand.vmem [shape: f32[32], index: 0, kind: input, shape index: {}]   ;;  %s23_s1 = inlined_call_operand.vmem [shape: f32[4,32], index: 1, kind: output, shape index: {}]  }
   0x1   :  { %v4_v0 = vld [vmem:[%s22_s0] ss:$0 sm:$0xff] }
   0x2   :  { %5 = vst [vmem:[%s23_s1] sm:$0xf] %v4_v0 }

// kernel: resnet_forward.52
= control target key start
LH: loop header
LB: loop body
LE: loop exit
PB: predicated region body
PF: predicated region fallthrough
CT: control target
= control target key end

     0   :  { %vm631_vm0 = vcmask 257024   ;;  %s1302_s1 = inlined_call_operand.vmem [shape: bf16[256,32], index: 1, kind: input, shape index: {}]   ;;  %s1303_s0 = inlined_call_operand.vmem [shape: bf16[256,256], index: 0, kind: input, shape index: {}]   ;;  %s1304_s2 = inlined_call_operand.vmem [shape: f32[1,32], index: 2, kind: input, shape index: {}]   ;;  %s1305_s3 = inlined_call_operand.vmem [shape: bf16[256,32], index: 3, kind: output, shape index: {}]  }
   0x1   :  { %v909_v0 = vld [vmem:[%s1302_s1 + $0x78] sm:$0xff]   ;;  %v911_v2 = vld [vmem:[%s1302_s1 + $0x70] sm:$0xff]   ;;  %v913_v4 = vld [vmem:[%s1302_s1 + $0x68] sm:$0xff]  }
   0x2   :  { %v910_v1 = vld [vmem:[%s1302_s1 + $0x38] sm:$0xff]   ;;  %781 = vmatprep.subr.bf16.mxu0 %v909_v0  ;;  %893 = vmatprep.subr.bf16.mxu1 %v909_v0  ;;  %v912_v3 = vld [vmem:[%s1302_s1 + $0x30] sm:$0xff]   ;;  %v914_v5 = vld [vmem:[%s1302_s1 + $0x28] sm:$0xff]  }
   0x3   :  { %782 = vmatpush3.bf16.msra.mxu0 %v910_v1  ;;  %901 = vmatpush3.bf16.msra.mxu1 %v910_v1  ;;  %v915_v6 = vld [vmem:[%s1302_s1 + $0x60] sm:$0xff]   ;;  %v917_v8 = vld [vmem:[%s1302_s1 + $0x58] sm:$0xff]   ;;  %v919_v10 = vld [vmem:[%s1302_s1 + $0x50] sm:$0xff]  }
   0x4   :  { %783 = vmatprep.subr.bf16.mxu0 %v911_v2  ;;  %894 = vmatprep.subr.bf16.mxu1 %v911_v2  ;;  %v916_v7 = vld [vmem:[%s1302_s1 + $0x20] sm:$0xff]   ;;  %v918_v9 = vld [vmem:[%s1302_s1 + $0x18] sm:$0xff]   ;;  %v920_v13 = vld [vmem:[%s1302_s1 + $0x10] sm:$0xff]  }
   0x5   :  { %v927_v11 = vld [vmem:[%s1303_s0 + $0x4] ss:$8 sps:$4 sm:$0xff]   ;;  %v925_v18 = vld [vmem:[%s1303_s0] ss:$8 sps:$4 sm:$0xff]   ;;  %v931_v20 = vld [vmem:[%s1303_s0 + $0x14] ss:$8 sps:$4 sm:$0xff]  }
   0x6   :  { %v930_v12 = vld [vmem:[%s1303_s0 + $0x84] ss:$8 sps:$4 sm:$0xff]   ;;  %374 = vmatprep.mubr.bf16.mxu0 %v927_v11  ;;  %v928_v19 = vld [vmem:[%s1303_s0 + $0x80] ss:$8 sps:$4 sm:$0xff]   ;;  %v933_v21 = vld [vmem:[%s1303_s0 + $0x94] ss:$8 sps:$4 sm:$0xff]  }
   0x7   :  { %784 = vmatpush3.bf16.msra.mxu0 %v912_v3  ;;  %902 = vmatpush3.bf16.msra.mxu1 %v912_v3  ;;  %v921_v14 = vld [vmem:[%s1302_s1 + $0x48] sm:$0xff]   ;;  %v923_v16 = vld [vmem:[%s1302_s1 + $0x40] sm:$0xff]   ;;  %v935_v22 = vld [vmem:[%s1303_s0 + $0x10] ss:$8 sps:$4 sm:$0xff]  }
   0x8   :  { %785 = vmatprep.subr.bf16.mxu0 %v913_v4  ;;  %895 = vmatprep.subr.bf16.mxu1 %v913_v4  ;;  %v922_v15 = vld [vmem:[%s1302_s1 + $0x8] sm:$0xff]   ;;  %v924_v17 = vld [vmem:[%s1302_s1] sm:$0xff]   ;;  %v936_v23 = vld [vmem:[%s1303_s0 + $0x90] ss:$8 sps:$4 sm:$0xff]  }
   0x9   :  { %438 = vmatprep.mubr.bf16.mxu1 %v930_v12  ;;  %v937_v24 = vld [vmem:[%s1303_s0 + $0x24] ss:$8 sps:$4 sm:$0xff]   ;;  %v941_v26 = vld [vmem:[%s1303_s0 + $0x20] ss:$8 sps:$4 sm:$0xff]   ;;  %v943_v28 = vld [vmem:[%s1303_s0 + $0x34] ss:$8 sps:$4 sm:$0xff]  }
   0xa   :  { %v939_v25 = vld [vmem:[%s1303_s0 + $0xa4] ss:$8 sps:$4 sm:$0xff]   ;;  %v942_v27 = vld [vmem:[%s1303_s0 + $0xa0] ss:$8 sps:$4 sm:$0xff]   ;;  %v945_v29 = vld [vmem:[%s1303_s0 + $0xb4] ss:$8 sps:$4 sm:$0xff]  }
   0xb   :  { %786 = vmatpush3.bf16.msra.mxu0 %v914_v5  ;;  %903 = vmatpush3.bf16.msra.mxu1 %v914_v5  ;;  %v947_v30 = vld [vmem:[%s1303_s0 + $0x30] ss:$8 sps:$4 sm:$0xff]   ;;  %v949_v32 = vld [vmem:[%s1303_s0 + $0x44] ss:$8 sps:$4 sm:$0xff]   ;;  %v953_v34 = vld [vmem:[%s1303_s0 + $0x40] ss:$8 sps:$4 sm:$0xff]  }
   0xc   :  { %787 = vmatprep.subr.bf16.mxu0 %v915_v6  ;;  %896 = vmatprep.subr.bf16.mxu1 %v915_v6  ;;  %v948_v31 = vld [vmem:[%s1303_s0 + $0xb0] ss:$8 sps:$4 sm:$0xff]   ;;  %v951_v33 = vld [vmem:[%s1303_s0 + $0xc4] ss:$8 sps:$4 sm:$0xff]   ;;  %v954_v35 = vld [vmem:[%s1303_s0 + $0xc0] ss:$8 sps:$4 sm:$0xff]  }
   0xd   :  { %v955_v36 = vld [vmem:[%s1303_s0 + $0x54] ss:$8 sps:$4 sm:$0xff]   ;;  %v959_v38 = vld [vmem:[%s1303_s0 + $0x50] ss:$8 sps:$4 sm:$0xff]   ;;  %v961_v40 = vld [vmem:[%s1303_s0 + $0x64] ss:$8 sps:$4 sm:$0xff]  }
   0xe   :  { %v957_v37 = vld [vmem:[%s1303_s0 + $0xd4] ss:$8 sps:$4 sm:$0xff]   ;;  %v960_v39 = vld [vmem:[%s1303_s0 + $0xd0] ss:$8 sps:$4 sm:$0xff]   ;;  %v963_v41 = vld [vmem:[%s1303_s0 + $0xe4] ss:$8 sps:$4 sm:$0xff]  }
   0xf   :  { %788 = vmatpush3.bf16.msra.mxu0 %v916_v7  ;;  %904 = vmatpush3.bf16.msra.mxu1 %v916_v7  ;;  %v965_v42 = vld [vmem:[%s1303_s0 + $0x60] ss:$8 sps:$4 sm:$0xff]   ;;  %v967_v44 = vld [vmem:[%s1303_s0 + $0x74] ss:$8 sps:$4 sm:$0xff]   ;;  %v971_v46 = vld [vmem:[%s1303_s0 + $0x70] ss:$8 sps:$4 sm:$0xff]  }
  0x10   :  { %789 = vmatprep.subr.bf16.mxu0 %v917_v8  ;;  %897 = vmatprep.subr.bf16.mxu1 %v917_v8  ;;  %v966_v43 = vld [vmem:[%s1303_s0 + $0xe0] ss:$8 sps:$4 sm:$0xff]   ;;  %v969_v45 = vld [vmem:[%s1303_s0 + $0xf4] ss:$8 sps:$4 sm:$0xff]   ;;  %v972_v47 = vld [vmem:[%s1303_s0 + $0xf0] ss:$8 sps:$4 sm:$0xff]  }
  0x11   :  { %v1140_v50 = vld [vmem:[%s1304_s2] ss:$0 sm:$0xff] }
  0x13   :  { %790 = vmatpush3.bf16.msra.mxu0 %v918_v9  ;;  %905 = vmatpush3.bf16.msra.mxu1 %v918_v9 }
  0x14   :  { %791 = vmatprep.subr.bf16.mxu0 %v919_v10  ;;  %898 = vmatprep.subr.bf16.mxu1 %v919_v10 }
  0x17   :  { %792 = vmatpush3.bf16.msra.mxu0 %v920_v13  ;;  %906 = vmatpush3.bf16.msra.mxu1 %v920_v13 }
  0x18   :  { %793 = vmatprep.subr.bf16.mxu0 %v921_v14  ;;  %899 = vmatprep.subr.bf16.mxu1 %v921_v14 }
  0x1b   :  { %794 = vmatpush3.bf16.msra.mxu0 %v922_v15  ;;  %907 = vmatpush3.bf16.msra.mxu1 %v922_v15 }
  0x1c   :  { %795 = vmatprep.subr.bf16.mxu0 %v923_v16  ;;  %900 = vmatprep.subr.bf16.mxu1 %v923_v16 }
  0x1f   :  { %796 = vmatpush3.bf16.msra.mxu0 %v924_v17  ;;  %908 = vmatpush3.bf16.msra.mxu1 %v924_v17 }
  0x22   :  { %375 = vmatmul.mubr.bf16.vlgmr.msra.gmra.mxu0 %v925_v18  ;;  %439 = vmatmul.mubr.bf16.vlgmr.msra.gmra.mxu1 %v928_v19 }
  0x23   :  { %382 = vmatprep.mubr.bf16.mxu0 %v931_v20  ;;  %446 = vmatprep.mubr.bf16.mxu1 %v933_v21 }
  0x2a   :  { %383 = vmatmul.mubr.bf16.gmra.mxu0 %v935_v22  ;;  %447 = vmatmul.mubr.bf16.gmra.mxu1 %v936_v23 }
  0x2b   :  { %390 = vmatprep.mubr.bf16.mxu0 %v937_v24  ;;  %454 = vmatprep.mubr.bf16.mxu1 %v939_v25 }
  0x32   :  { %391 = vmatmul.mubr.bf16.gmra.mxu0 %v941_v26  ;;  %455 = vmatmul.mubr.bf16.gmra.mxu1 %v942_v27 }
  0x33   :  { %398 = vmatprep.mubr.bf16.mxu0 %v943_v28  ;;  %462 = vmatprep.mubr.bf16.mxu1 %v945_v29 }
  0x3a   :  { %399 = vmatmul.mubr.bf16.gmra.mxu0 %v947_v30  ;;  %463 = vmatmul.mubr.bf16.gmra.mxu1 %v948_v31 }
  0x3b   :  { %406 = vmatprep.mubr.bf16.mxu0 %v949_v32  ;;  %470 = vmatprep.mubr.bf16.mxu1 %v951_v33 }
  0x42   :  { %407 = vmatmul.mubr.bf16.gmra.mxu0 %v953_v34  ;;  %471 = vmatmul.mubr.bf16.gmra.mxu1 %v954_v35 }
  0x43   :  { %414 = vmatprep.mubr.bf16.mxu0 %v955_v36  ;;  %478 = vmatprep.mubr.bf16.mxu1 %v957_v37 }
  0x4a   :  { %415 = vmatmul.mubr.bf16.gmra.mxu0 %v959_v38  ;;  %479 = vmatmul.mubr.bf16.gmra.mxu1 %v960_v39 }
  0x4b   :  { %422 = vmatprep.mubr.bf16.mxu0 %v961_v40  ;;  %486 = vmatprep.mubr.bf16.mxu1 %v963_v41 }
  0x52   :  { %423 = vmatmul.mubr.bf16.gmra.mxu0 %v965_v42  ;;  %487 = vmatmul.mubr.bf16.gmra.mxu1 %v966_v43 }
  0x53   :  { %430 = vmatprep.mubr.bf16.mxu0 %v967_v44  ;;  %494 = vmatprep.mubr.bf16.mxu1 %v969_v45 }
  0x5a   :  { %431 = vmatmul.mubr.bf16.gmra.mxu0 %v971_v46  ;;  %495 = vmatmul.mubr.bf16.gmra.mxu1 %v972_v47 }
  0xe2   :  { %v797_v48 = vpop.f32.mrf.mxu0  ;;  %v845_v49 = vpop.f32.mrf.mxu1 }
  0xe4   :  { %v798_v51 = vpop.f32.mrf.mxu0  ;;  %v846_v52 = vpop.f32.mrf.mxu1 }
  0xe5   :  { %v799_v53 = vadd.f32 %v798_v51, %v797_v48  ;;  %v847_v54 = vadd.f32 %v846_v52, %v845_v49 }
  0xe6   :  { %v800_v55 = vpop.f32.mrf.mxu0  ;;  %v848_v56 = vpop.f32.mrf.mxu1 }
  0xe7   :  { %v377_v57 = vadd.f32 %v799_v53, %v1140_v50  ;;  %v441_v58 = vadd.f32 %v847_v54, %v1140_v50 }
  0xe8   :  { %v801_v59 = vpop.f32.mrf.mxu0  ;;  %v849_v60 = vpop.f32.mrf.mxu1 }
  0xe9   :  { %v749_v61 = vpack.c.bf16 %v377_v57, %v377_v57  ;;  %v765_v62 = vpack.c.bf16 %v441_v58, %v441_v58  ;;  %v802_v63 = vadd.f32 %v801_v59, %v800_v55  ;;  %v850_v0 = vadd.f32 %v849_v60, %v848_v56 }
  0xea   :  { %v803_v1 = vpop.f32.mrf.mxu0  ;;  %v851_v2 = vpop.f32.mrf.mxu1 }
  0xeb   :  { %632 = vst.msk [vmem:[%s1305_s3] sm:$0xf] %vm631_vm0, %v749_v61  ;;  %648 = vst.msk [vmem:[%s1305_s3 + $0x40] sm:$0xf] %vm631_vm0, %v765_v62  ;;  %v380_v3 = vadd.f32 %v802_v63, %v1140_v50  ;;  %v444_v4 = vadd.f32 %v850_v0, %v1140_v50 }
  0xec   :  { %v804_v5 = vpop.f32.mrf.mxu0  ;;  %v852_v6 = vpop.f32.mrf.mxu1 }
  0xed   :  { %v750_v7 = vpack.c.bf16 %v380_v3, %v380_v3  ;;  %v766_v8 = vpack.c.bf16 %v444_v4, %v444_v4  ;;  %v805_v9 = vadd.f32 %v804_v5, %v803_v1  ;;  %v853_v10 = vadd.f32 %v852_v6, %v851_v2 }
  0xee   :  { %v806_v11 = vpop.f32.mrf.mxu0  ;;  %v854_v12 = vpop.f32.mrf.mxu1 }
  0xef   :  { %633 = vst.msk [vmem:[%s1305_s3 + $0x4] sm:$0xf] %vm631_vm0, %v750_v7  ;;  %649 = vst.msk [vmem:[%s1305_s3 + $0x44] sm:$0xf] %vm631_vm0, %v766_v8  ;;  %v385_v13 = vadd.f32 %v805_v9, %v1140_v50  ;;  %v449_v14 = vadd.f32 %v853_v10, %v1140_v50 }
  0xf0   :  { %v807_v15 = vpop.f32.mrf.mxu0  ;;  %v855_v16 = vpop.f32.mrf.mxu1 }
  0xf1   :  { %v751_v17 = vpack.c.bf16 %v385_v13, %v385_v13  ;;  %v767_v18 = vpack.c.bf16 %v449_v14, %v449_v14  ;;  %v808_v19 = vadd.f32 %v807_v15, %v806_v11  ;;  %v856_v20 = vadd.f32 %v855_v16, %v854_v12 }
  0xf2   :  { %v809_v21 = vpop.f32.mrf.mxu0  ;;  %v857_v22 = vpop.f32.mrf.mxu1 }
  0xf3   :  { %634 = vst.msk [vmem:[%s1305_s3 + $0x8] sm:$0xf] %vm631_vm0, %v751_v17  ;;  %650 = vst.msk [vmem:[%s1305_s3 + $0x48] sm:$0xf] %vm631_vm0, %v767_v18  ;;  %v388_v23 = vadd.f32 %v808_v19, %v1140_v50  ;;  %v452_v24 = vadd.f32 %v856_v20, %v1140_v50 }
  0xf4   :  { %v810_v25 = vpop.f32.mrf.mxu0  ;;  %v858_v26 = vpop.f32.mrf.mxu1 }
  0xf5   :  { %v752_v27 = vpack.c.bf16 %v388_v23, %v388_v23  ;;  %v768_v28 = vpack.c.bf16 %v452_v24, %v452_v24  ;;  %v811_v29 = vadd.f32 %v810_v25, %v809_v21  ;;  %v859_v30 = vadd.f32 %v858_v26, %v857_v22 }
  0xf6   :  { %v812_v31 = vpop.f32.mrf.mxu0  ;;  %v860_v32 = vpop.f32.mrf.mxu1 }
  0xf7   :  { %635 = vst.msk [vmem:[%s1305_s3 + $0xc] sm:$0xf] %vm631_vm0, %v752_v27  ;;  %651 = vst.msk [vmem:[%s1305_s3 + $0x4c] sm:$0xf] %vm631_vm0, %v768_v28  ;;  %v393_v33 = vadd.f32 %v811_v29, %v1140_v50  ;;  %v457_v34 = vadd.f32 %v859_v30, %v1140_v50 }
  0xf8   :  { %v813_v35 = vpop.f32.mrf.mxu0  ;;  %v861_v36 = vpop.f32.mrf.mxu1 }
  0xf9   :  { %v753_v37 = vpack.c.bf16 %v393_v33, %v393_v33  ;;  %v769_v38 = vpack.c.bf16 %v457_v34, %v457_v34  ;;  %v814_v39 = vadd.f32 %v813_v35, %v812_v31  ;;  %v862_v40 = vadd.f32 %v861_v36, %v860_v32 }
  0xfa   :  { %v815_v41 = vpop.f32.mrf.mxu0  ;;  %v863_v42 = vpop.f32.mrf.mxu1 }
  0xfb   :  { %636 = vst.msk [vmem:[%s1305_s3 + $0x10] sm:$0xf] %vm631_vm0, %v753_v37  ;;  %652 = vst.msk [vmem:[%s1305_s3 + $0x50] sm:$0xf] %vm631_vm0, %v769_v38  ;;  %v396_v43 = vadd.f32 %v814_v39, %v1140_v50  ;;  %v460_v44 = vadd.f32 %v862_v40, %v1140_v50 }
  0xfc   :  { %v816_v45 = vpop.f32.mrf.mxu0  ;;  %v864_v46 = vpop.f32.mrf.mxu1 }
  0xfd   :  { %v754_v47 = vpack.c.bf16 %v396_v43, %v396_v43  ;;  %v770_v48 = vpack.c.bf16 %v460_v44, %v460_v44  ;;  %v817_v49 = vadd.f32 %v816_v45, %v815_v41  ;;  %v865_v51 = vadd.f32 %v864_v46, %v863_v42 }
  0xfe   :  { %v818_v52 = vpop.f32.mrf.mxu0  ;;  %v866_v53 = vpop.f32.mrf.mxu1 }
  0xff   :  { %637 = vst.msk [vmem:[%s1305_s3 + $0x14] sm:$0xf] %vm631_vm0, %v754_v47  ;;  %653 = vst.msk [vmem:[%s1305_s3 + $0x54] sm:$0xf] %vm631_vm0, %v770_v48  ;;  %v401_v54 = vadd.f32 %v817_v49, %v1140_v50  ;;  %v465_v55 = vadd.f32 %v865_v51, %v1140_v50 }
 0x100   :  { %v819_v56 = vpop.f32.mrf.mxu0  ;;  %v867_v57 = vpop.f32.mrf.mxu1 }
 0x101   :  { %v755_v58 = vpack.c.bf16 %v401_v54, %v401_v54  ;;  %v771_v59 = vpack.c.bf16 %v465_v55, %v465_v55  ;;  %v820_v60 = vadd.f32 %v819_v56, %v818_v52  ;;  %v868_v61 = vadd.f32 %v867_v57, %v866_v53 }
 0x102   :  { %v821_v62 = vpop.f32.mrf.mxu0  ;;  %v869_v63 = vpop.f32.mrf.mxu1 }
 0x103   :  { %638 = vst.msk [vmem:[%s1305_s3 + $0x18] sm:$0xf] %vm631_vm0, %v755_v58  ;;  %654 = vst.msk [vmem:[%s1305_s3 + $0x58] sm:$0xf] %vm631_vm0, %v771_v59  ;;  %v404_v0 = vadd.f32 %v820_v60, %v1140_v50  ;;  %v468_v1 = vadd.f32 %v868_v61, %v1140_v50 }
 0x104   :  { %v822_v2 = vpop.f32.mrf.mxu0  ;;  %v870_v3 = vpop.f32.mrf.mxu1 }
 0x105   :  { %v756_v4 = vpack.c.bf16 %v404_v0, %v404_v0  ;;  %v772_v5 = vpack.c.bf16 %v468_v1, %v468_v1  ;;  %v823_v6 = vadd.f32 %v822_v2, %v821_v62  ;;  %v871_v7 = vadd.f32 %v870_v3, %v869_v63 }
 0x106   :  { %v824_v8 = vpop.f32.mrf.mxu0  ;;  %v872_v9 = vpop.f32.mrf.mxu1 }
 0x107   :  { %639 = vst.msk [vmem:[%s1305_s3 + $0x1c] sm:$0xf] %vm631_vm0, %v756_v4  ;;  %655 = vst.msk [vmem:[%s1305_s3 + $0x5c] sm:$0xf] %vm631_vm0, %v772_v5  ;;  %v409_v10 = vadd.f32 %v823_v6, %v1140_v50  ;;  %v473_v11 = vadd.f32 %v871_v7, %v1140_v50 }
 0x108   :  { %v825_v12 = vpop.f32.mrf.mxu0  ;;  %v873_v13 = vpop.f32.mrf.mxu1 }
 0x109   :  { %v757_v14 = vpack.c.bf16 %v409_v10, %v409_v10  ;;  %v773_v15 = vpack.c.bf16 %v473_v11, %v473_v11  ;;  %v826_v16 = vadd.f32 %v825_v12, %v824_v8  ;;  %v874_v17 = vadd.f32 %v873_v13, %v872_v9 }
 0x10a   :  { %v827_v18 = vpop.f32.mrf.mxu0  ;;  %v875_v19 = vpop.f32.mrf.mxu1 }
 0x10b   :  { %640 = vst.msk [vmem:[%s1305_s3 + $0x20] sm:$0xf] %vm631_vm0, %v757_v14  ;;  %656 = vst.msk [vmem:[%s1305_s3 + $0x60] sm:$0xf] %vm631_vm0, %v773_v15  ;;  %v412_v20 = vadd.f32 %v826_v16, %v1140_v50  ;;  %v476_v21 = vadd.f32 %v874_v17, %v1140_v50 }
 0x10c   :  { %v828_v22 = vpop.f32.mrf.mxu0  ;;  %v876_v23 = vpop.f32.mrf.mxu1 }
 0x10d   :  { %v758_v24 = vpack.c.bf16 %v412_v20, %v412_v20  ;;  %v774_v25 = vpack.c.bf16 %v476_v21, %v476_v21  ;;  %v829_v26 = vadd.f32 %v828_v22, %v827_v18  ;;  %v877_v27 = vadd.f32 %v876_v23, %v875_v19 }
 0x10e   :  { %v830_v28 = vpop.f32.mrf.mxu0  ;;  %v878_v29 = vpop.f32.mrf.mxu1 }
 0x10f   :  { %641 = vst.msk [vmem:[%s1305_s3 + $0x24] sm:$0xf] %vm631_vm0, %v758_v24  ;;  %657 = vst.msk [vmem:[%s1305_s3 + $0x64] sm:$0xf] %vm631_vm0, %v774_v25  ;;  %v417_v30 = vadd.f32 %v829_v26, %v1140_v50  ;;  %v481_v31 = vadd.f32 %v877_v27, %v1140_v50 }
 0x110   :  { %v831_v32 = vpop.f32.mrf.mxu0  ;;  %v879_v33 = vpop.f32.mrf.mxu1 }
 0x111   :  { %v759_v34 = vpack.c.bf16 %v417_v30, %v417_v30  ;;  %v775_v35 = vpack.c.bf16 %v481_v31, %v481_v31  ;;  %v832_v36 = vadd.f32 %v831_v32, %v830_v28  ;;  %v880_v37 = vadd.f32 %v879_v33, %v878_v29 }
 0x112   :  { %v833_v38 = vpop.f32.mrf.mxu0  ;;  %v881_v39 = vpop.f32.mrf.mxu1 }
 0x113   :  { %642 = vst.msk [vmem:[%s1305_s3 + $0x28] sm:$0xf] %vm631_vm0, %v759_v34  ;;  %658 = vst.msk [vmem:[%s1305_s3 + $0x68] sm:$0xf] %vm631_vm0, %v775_v35  ;;  %v420_v40 = vadd.f32 %v832_v36, %v1140_v50  ;;  %v484_v41 = vadd.f32 %v880_v37, %v1140_v50 }
 0x114   :  { %v834_v42 = vpop.f32.mrf.mxu0  ;;  %v882_v43 = vpop.f32.mrf.mxu1 }
 0x115   :  { %v760_v44 = vpack.c.bf16 %v420_v40, %v420_v40  ;;  %v776_v45 = vpack.c.bf16 %v484_v41, %v484_v41  ;;  %v835_v46 = vadd.f32 %v834_v42, %v833_v38  ;;  %v883_v47 = vadd.f32 %v882_v43, %v881_v39 }
 0x116   :  { %v836_v48 = vpop.f32.mrf.mxu0  ;;  %v884_v49 = vpop.f32.mrf.mxu1 }
 0x117   :  { %643 = vst.msk [vmem:[%s1305_s3 + $0x2c] sm:$0xf] %vm631_vm0, %v760_v44  ;;  %659 = vst.msk [vmem:[%s1305_s3 + $0x6c] sm:$0xf] %vm631_vm0, %v776_v45  ;;  %v425_v51 = vadd.f32 %v835_v46, %v1140_v50  ;;  %v489_v52 = vadd.f32 %v883_v47, %v1140_v50 }
 0x118   :  { %v837_v53 = vpop.f32.mrf.mxu0  ;;  %v885_v54 = vpop.f32.mrf.mxu1 }
 0x119   :  { %v761_v55 = vpack.c.bf16 %v425_v51, %v425_v51  ;;  %v777_v56 = vpack.c.bf16 %v489_v52, %v489_v52  ;;  %v838_v57 = vadd.f32 %v837_v53, %v836_v48  ;;  %v886_v58 = vadd.f32 %v885_v54, %v884_v49 }
 0x11a   :  { %v839_v59 = vpop.f32.mrf.mxu0  ;;  %v887_v60 = vpop.f32.mrf.mxu1 }
 0x11b   :  { %644 = vst.msk [vmem:[%s1305_s3 + $0x30] sm:$0xf] %vm631_vm0, %v761_v55  ;;  %660 = vst.msk [vmem:[%s1305_s3 + $0x70] sm:$0xf] %vm631_vm0, %v777_v56  ;;  %v428_v61 = vadd.f32 %v838_v57, %v1140_v50  ;;  %v492_v62 = vadd.f32 %v886_v58, %v1140_v50 }
 0x11c   :  { %v840_v63 = vpop.f32.mrf.mxu0  ;;  %v888_v0 = vpop.f32.mrf.mxu1 }
 0x11d   :  { %v762_v1 = vpack.c.bf16 %v428_v61, %v428_v61  ;;  %v778_v2 = vpack.c.bf16 %v492_v62, %v492_v62  ;;  %v841_v3 = vadd.f32 %v840_v63, %v839_v59  ;;  %v889_v4 = vadd.f32 %v888_v0, %v887_v60 }
 0x11e   :  { %v842_v5 = vpop.f32.mrf.mxu0  ;;  %v890_v6 = vpop.f32.mrf.mxu1 }
 0x11f   :  { %645 = vst.msk [vmem:[%s1305_s3 + $0x34] sm:$0xf] %vm631_vm0, %v762_v1  ;;  %661 = vst.msk [vmem:[%s1305_s3 + $0x74] sm:$0xf] %vm631_vm0, %v778_v2  ;;  %v433_v7 = vadd.f32 %v841_v3, %v1140_v50  ;;  %v497_v8 = vadd.f32 %v889_v4, %v1140_v50 }
 0x120   :  { %v843_v9 = vpop.f32.mrf.mxu0  ;;  %v891_v10 = vpop.f32.mrf.mxu1 }
 0x121   :  { %v763_v11 = vpack.c.bf16 %v433_v7, %v433_v7  ;;  %v779_v12 = vpack.c.bf16 %v497_v8, %v497_v8  ;;  %v844_v13 = vadd.f32 %v843_v9, %v842_v5  ;;  %v892_v14 = vadd.f32 %v891_v10, %v890_v6 }
 0x123   :  { %646 = vst.msk [vmem:[%s1305_s3 + $0x38] sm:$0xf] %vm631_vm0, %v763_v11  ;;  %662 = vst.msk [vmem:[%s1305_s3 + $0x78] sm:$0xf] %vm631_vm0, %v779_v12  ;;  %v436_v15 = vadd.f32 %v844_v13, %v1140_v50  ;;  %v500_v16 = vadd.f32 %v892_v14, %v1140_v50 }
 0x125   :  { %v764_v17 = vpack.c.bf16 %v436_v15, %v436_v15  ;;  %v780_v18 = vpack.c.bf16 %v500_v16, %v500_v16 }
 0x127   :  { %647 = vst.msk [vmem:[%s1305_s3 + $0x3c] sm:$0xf] %vm631_vm0, %v764_v17  ;;  %663 = vst.msk [vmem:[%s1305_s3 + $0x7c] sm:$0xf] %vm631_vm0, %v780_v18 }

// kernel: tile.162
= control target key start
LH: loop header
LB: loop body
LE: loop exit
PB: predicated region body
PF: predicated region fallthrough
CT: control target
= control target key end

     0   :  { %vm8_vm0 = vcmask 261120   ;;  %s40_s8 = smov 32   ;;  %s41_s9 = smov 64   ;;  %vm14_vm1 = vcmask 1048320   ;;  %vm20_vm2 = vcmask 785920   ;;  %vm26_vm3 = vcmask 523520   ;;  %s58_s0 = inlined_call_operand.vmem [shape: f32[4,32], index: 0, kind: input, shape index: {}]   ;;  %s59_s1 = inlined_call_operand.vmem [shape: f32[1,128], index: 1, kind: output, shape index: {}]  }
   0x1   :  { %v5_v0 = vld [vmem:[%s58_s0] sm:$0xf]  ;;  %s39_s0 = smov 96  }
   0x2   :  { %6 = vst [vmem:[#allocation1] sm:$0xf] %v5_v0 }
   0x9   :  { %v11_v1 = vld [vmem:[#allocation1 + $0x3] sm:$0x1]   ;;  %v23_v2 = vld [vmem:[#allocation1 + $0x1] sm:$0x1]   ;;  %v7_v3 = vld [vmem:[#allocation1] sm:$0x1]  }
   0xa   :  { %12 = vrot.lane.b32.xlu0 %v11_v1, %s39_s0  ;;  %24 = vrot.lane.b32.xlu1 %v23_v2, %s40_s8  ;;  %v17_v4 = vld [vmem:[#allocation1 + $0x2] sm:$0x1]   ;;  %9 = vst.msk [vmem:[#allocation0] sm:$0x1] %vm8_vm0, %v7_v3  }
   0xe   :  { %18 = vrot.lane.b32.xlu0 %v17_v4, %s41_s9 }
  0x7c   :  { %v13_v5 = vpop.permute.xlu0 %12   ;;  %v25_v6 = vpop.permute.xlu1 %24  }
  0x7d   :  { %15 = vst.msk [vmem:[#allocation0] sm:$0x1] %vm14_vm1, %v13_v5  }
  0x80   :  { %v19_v7 = vpop.permute.xlu0 %18  }
  0x81   :  { %21 = vst.msk [vmem:[#allocation0] sm:$0x1] %vm20_vm2, %v19_v7  }
  0x82   :  { %27 = vst.msk [vmem:[#allocation0] sm:$0x1] %vm26_vm3, %v25_v6  }
  0x89   :  { %v32_v8 = vld [vmem:[#allocation0] sm:$0x1] }
  0x8a   :  { %35 = vst [vmem:[%s59_s1] sm:$0x1] %v32_v8 }

// kernel: resnet_forward.53
= control target key start
LH: loop header
LB: loop body
LE: loop exit
PB: predicated region body
PF: predicated region fallthrough
CT: control target
= control target key end

     0   :  { %vm977_vm0 = vcmask 257024   ;;  %vm1010_vm1 = vcmask 261120   ;;  %s2159_s1 = inlined_call_operand.vmem [shape: bf16[384,32], index: 1, kind: input, shape index: {}]   ;;  %s2160_s0 = inlined_call_operand.vmem [shape: bf16[256,384], index: 0, kind: input, shape index: {}]   ;;  %s2161_s2 = inlined_call_operand.vmem [shape: bf16[256,32], index: 2, kind: output, shape index: {0}]   ;;  %s2162_s3 = inlined_call_operand.vmem [shape: f32[8,32], index: 3, kind: output, shape index: {1}]   ;;  %s2163_s4 = inlined_call_operand.vmem [shape: f32[8,32], index: 4, kind: output, shape index: {2}]  }
   0x1   :  { %v1536_v0 = vld [vmem:[%s2159_s1 + $0x78] sm:$0xff]   ;;  %v1538_v2 = vld [vmem:[%s2159_s1 + $0x70] sm:$0xff]   ;;  %v1540_v4 = vld [vmem:[%s2159_s1 + $0x68] sm:$0xff]  }
   0x2   :  { %v1537_v1 = vld [vmem:[%s2159_s1 + $0x38] sm:$0xff]   ;;  %1336 = vmatprep.subr.bf16.mxu0 %v1536_v0  ;;  %1520 = vmatprep.subr.bf16.mxu1 %v1536_v0  ;;  %v1539_v3 = vld [vmem:[%s2159_s1 + $0x30] sm:$0xff]   ;;  %v1541_v5 = vld [vmem:[%s2159_s1 + $0x28] sm:$0xff]  }
   0x3   :  { %1337 = vmatpush3.bf16.msra.mxu0 %v1537_v1  ;;  %1528 = vmatpush3.bf16.msra.mxu1 %v1537_v1  ;;  %v1542_v6 = vld [vmem:[%s2159_s1 + $0x60] sm:$0xff]   ;;  %v1544_v8 = vld [vmem:[%s2159_s1 + $0x58] sm:$0xff]   ;;  %v1546_v10 = vld [vmem:[%s2159_s1 + $0x50] sm:$0xff]  }
   0x4   :  { %1338 = vmatprep.subr.bf16.mxu0 %v1538_v2  ;;  %1521 = vmatprep.subr.bf16.mxu1 %v1538_v2  ;;  %v1543_v7 = vld [vmem:[%s2159_s1 + $0x20] sm:$0xff]   ;;  %v1545_v9 = vld [vmem:[%s2159_s1 + $0x18] sm:$0xff]   ;;  %v1547_v13 = vld [vmem:[%s2159_s1 + $0x10] sm:$0xff]  }
   0x5   :  { %v1554_v11 = vld [vmem:[%s2160_s0 + $0x4] ss:$12 sps:$4 sm:$0xff]   ;;  %v1548_v14 = vld [vmem:[%s2159_s1 + $0x48] sm:$0xff]   ;;  %v1558_v18 = vld [vmem:[%s2159_s1 + $0xb8] sm:$0xff]  }
   0x6   :  { %v1557_v12 = vld [vmem:[%s2160_s0 + $0x124] ss:$12 sps:$4 sm:$0xff]   ;;  %559 = vmatprep.mubr.bf16.mxu0 %v1554_v11  ;;  %v1549_v15 = vld [vmem:[%s2159_s1 + $0x8] sm:$0xff]   ;;  %v1568_v28 = vld [vmem:[%s2160_s0 + $0x34] ss:$12 sps:$4 sm:$0xff]  }
   0x7   :  { %1339 = vmatpush3.bf16.msra.mxu0 %v1539_v3  ;;  %1529 = vmatpush3.bf16.msra.mxu1 %v1539_v3  ;;  %v1550_v16 = vld [vmem:[%s2159_s1 + $0x40] sm:$0xff]   ;;  %v1560_v21 = vld [vmem:[%s2160_s0 + $0x1c] ss:$12 sps:$4 sm:$0xff]   ;;  %v1559_v22 = vld [vmem:[%s2159_s1 + $0xb0] sm:$0xff]  }
   0x8   :  { %1340 = vmatprep.subr.bf16.mxu0 %v1540_v4  ;;  %1522 = vmatprep.subr.bf16.mxu1 %v1540_v4  ;;  %v1551_v17 = vld [vmem:[%s2159_s1] sm:$0xff]   ;;  %v1562_v23 = vld [vmem:[%s2160_s0 + $0x13c] ss:$12 sps:$4 sm:$0xff]   ;;  %v1575_v33 = vld [vmem:[%s2159_s1 + $0x90] sm:$0xff]  }
   0x9   :  { %655 = vmatprep.mubr.bf16.mxu1 %v1557_v12  ;;  %v1552_v19 = vld [vmem:[%s2160_s0] ss:$12 sps:$4 sm:$0xff]   ;;  %v1564_v24 = vld [vmem:[%s2160_s0 + $0x18] ss:$12 sps:$4 sm:$0xff]   ;;  %v1572_v31 = vld [vmem:[%s2160_s0 + $0x30] ss:$12 sps:$4 sm:$0xff]  }
   0xa   :  { %v1555_v20 = vld [vmem:[%s2160_s0 + $0x120] ss:$12 sps:$4 sm:$0xff]   ;;  %v1565_v26 = vld [vmem:[%s2160_s0 + $0x138] ss:$12 sps:$4 sm:$0xff]   ;;  %v1573_v32 = vld [vmem:[%s2160_s0 + $0x150] ss:$12 sps:$4 sm:$0xff]  }
   0xb   :  { %1341 = vmatpush3.bf16.msra.mxu0 %v1541_v5  ;;  %1530 = vmatpush3.bf16.msra.mxu1 %v1541_v5  ;;  %v1566_v25 = vld [vmem:[%s2159_s1 + $0xa8] sm:$0xff]   ;;  %v1567_v27 = vld [vmem:[%s2159_s1 + $0xa0] sm:$0xff]   ;;  %v1574_v30 = vld [vmem:[%s2159_s1 + $0x98] sm:$0xff]  }
   0xc   :  { %1342 = vmatprep.subr.bf16.mxu0 %v1542_v6  ;;  %1523 = vmatprep.subr.bf16.mxu1 %v1542_v6  ;;  %v1570_v29 = vld [vmem:[%s2160_s0 + $0x154] ss:$12 sps:$4 sm:$0xff]   ;;  %v1576_v34 = vld [vmem:[%s2160_s0 + $0x4c] ss:$12 sps:$4 sm:$0xff]   ;;  %v1584_v39 = vld [vmem:[%s2160_s0 + $0x64] ss:$12 sps:$4 sm:$0xff]  }
   0xd   :  { %v1578_v35 = vld [vmem:[%s2160_s0 + $0x16c] ss:$12 sps:$4 sm:$0xff]   ;;  %v1580_v37 = vld [vmem:[%s2160_s0 + $0x48] ss:$12 sps:$4 sm:$0xff]   ;;  %v1583_v40 = vld [vmem:[%s2159_s1 + $0x80] sm:$0xff]  }
   0xe   :  { %v1582_v36 = vld [vmem:[%s2159_s1 + $0x88] sm:$0xff]   ;;  %v1591_v45 = vld [vmem:[%s2160_s0 + $0x38] ss:$12 sps:$4 sm:$0xff]   ;;  %v1593_v47 = vld [vmem:[%s2160_s0 + $0x50] ss:$12 sps:$4 sm:$0xff]  }
   0xf   :  { %1343 = vmatpush3.bf16.msra.mxu0 %v1543_v7  ;;  %1531 = vmatpush3.bf16.msra.mxu1 %v1543_v7  ;;  %v1581_v38 = vld [vmem:[%s2160_s0 + $0x168] ss:$12 sps:$4 sm:$0xff]   ;;  %v1587_v42 = vld [vmem:[%s2160_s0 + $0x60] ss:$12 sps:$4 sm:$0xff]   ;;  %v1592_v46 = vld [vmem:[%s2160_s0 + $0x78] ss:$12 sps:$4 sm:$0xff]  }
  0x10   :  { %1344 = vmatprep.subr.bf16.mxu0 %v1544_v8  ;;  %1524 = vmatprep.subr.bf16.mxu1 %v1544_v8  ;;  %v1586_v41 = vld [vmem:[%s2160_s0 + $0x8] ss:$12 sps:$4 sm:$0xff]   ;;  %v1588_v43 = vld [vmem:[%s2160_s0 + $0x20] ss:$12 sps:$4 sm:$0xff]   ;;  %v1597_v50 = vld [vmem:[%s2160_s0 + $0x90] ss:$12 sps:$4 sm:$0xff]  }
  0x11   :  { %v1589_v44 = vld [vmem:[%s2160_s0 + $0x7c] ss:$12 sps:$4 sm:$0xff]   ;;  %v1594_v48 = vld [vmem:[%s2160_s0 + $0x94] ss:$12 sps:$4 sm:$0xff]   ;;  %v1599_v52 = vld [vmem:[%s2160_s0 + $0xac] ss:$12 sps:$4 sm:$0xff]  }
  0x12   :  { %v1596_v49 = vld [vmem:[%s2160_s0 + $0x68] ss:$12 sps:$4 sm:$0xff]   ;;  %v1598_v51 = vld [vmem:[%s2160_s0 + $0x80] ss:$12 sps:$4 sm:$0xff]   ;;  %v1601_v53 = vld [vmem:[%s2160_s0 + $0x98] ss:$12 sps:$4 sm:$0xff]  }
  0x13   :  { %1345 = vmatpush3.bf16.msra.mxu0 %v1545_v9  ;;  %1532 = vmatpush3.bf16.msra.mxu1 %v1545_v9  ;;  %v1602_v54 = vld [vmem:[%s2160_s0 + $0xa8] ss:$12 sps:$4 sm:$0xff]   ;;  %v1603_v55 = vld [vmem:[%s2160_s0 + $0xb0] ss:$12 sps:$4 sm:$0xff]   ;;  %v1607_v58 = vld [vmem:[%s2160_s0 + $0xc0] ss:$12 sps:$4 sm:$0xff]  }
  0x14   :  { %1346 = vmatprep.subr.bf16.mxu0 %v1546_v10  ;;  %1525 = vmatprep.subr.bf16.mxu1 %v1546_v10  ;;  %v1604_v56 = vld [vmem:[%s2160_s0 + $0xc4] ss:$12 sps:$4 sm:$0xff]   ;;  %v1606_v57 = vld [vmem:[%s2160_s0 + $0xc8] ss:$12 sps:$4 sm:$0xff]   ;;  %v1608_v59 = vld [vmem:[%s2160_s0 + $0xe0] ss:$12 sps:$4 sm:$0xff]  }
  0x15   :  { %v1609_v60 = vld [vmem:[%s2160_s0 + $0xdc] ss:$12 sps:$4 sm:$0xff]   ;;  %v1611_v61 = vld [vmem:[%s2160_s0 + $0xf8] ss:$12 sps:$4 sm:$0xff]   ;;  %v1614_v0 = vld [vmem:[%s2160_s0 + $0xf4] ss:$12 sps:$4 sm:$0xff]  }
  0x16   :  { %v1612_v62 = vld [vmem:[%s2160_s0 + $0xd8] ss:$12 sps:$4 sm:$0xff]   ;;  %v1613_v63 = vld [vmem:[%s2160_s0 + $0x110] ss:$12 sps:$4 sm:$0xff]   ;;  %v1616_v1 = vld [vmem:[%s2160_s0 + $0x128] ss:$12 sps:$4 sm:$0xff]  }
  0x17   :  { %1347 = vmatpush3.bf16.msra.mxu0 %v1547_v13  ;;  %1533 = vmatpush3.bf16.msra.mxu1 %v1547_v13  ;;  %v1617_v2 = vld [vmem:[%s2160_s0 + $0xf0] ss:$12 sps:$4 sm:$0xff]   ;;  %v1618_v3 = vld [vmem:[%s2160_s0 + $0x140] ss:$12 sps:$4 sm:$0xff]   ;;  %v1621_v5 = vld [vmem:[%s2160_s0 + $0x158] ss:$12 sps:$4 sm:$0xff]  }
  0x18   :  { %1348 = vmatprep.subr.bf16.mxu0 %v1548_v14  ;;  %1526 = vmatprep.subr.bf16.mxu1 %v1548_v14  ;;  %v1619_v4 = vld [vmem:[%s2160_s0 + $0x10c] ss:$12 sps:$4 sm:$0xff]   ;;  %v1622_v6 = vld [vmem:[%s2160_s0 + $0x108] ss:$12 sps:$4 sm:$0xff]   ;;  %v1623_v7 = vld [vmem:[%s2160_s0 + $0x170] ss:$12 sps:$4 sm:$0xff]  }
  0x1b   :  { %1349 = vmatpush3.bf16.msra.mxu0 %v1549_v15  ;;  %1534 = vmatpush3.bf16.msra.mxu1 %v1549_v15 }
  0x1c   :  { %1350 = vmatprep.subr.bf16.mxu0 %v1550_v16  ;;  %1527 = vmatprep.subr.bf16.mxu1 %v1550_v16 }
  0x1f   :  { %1351 = vmatpush3.bf16.msra.mxu0 %v1551_v17  ;;  %1535 = vmatpush3.bf16.msra.mxu1 %v1551_v17 }
  0x20   :  { %1472 = vmatprep.subr.bf16.mxu1 %v1558_v18 }
  0x22   :  { %560 = vmatmul.mubr.bf16.vlgmr.msra.gmra.mxu0 %v1552_v19  ;;  %656 = vmatmul.mubr.bf16.vlgmr.msra.gmra.mxu1 %v1555_v20 }
  0x23   :  { %1473 = vmatpush3.bf16.msra.mxu1 %v1558_v18  ;;  %567 = vmatprep.mubr.bf16.mxu0 %v1560_v21 }
  0x24   :  { %1474 = vmatprep.subr.bf16.mxu1 %v1559_v22  ;;  %663 = vmatprep.mubr.bf16.mxu1 %v1562_v23 }
  0x27   :  { %1475 = vmatpush3.bf16.msra.mxu1 %v1559_v22 }
  0x28   :  { %1476 = vmatprep.subr.bf16.mxu1 %v1566_v25 }
  0x2a   :  { %568 = vmatmul.mubr.bf16.gmra.mxu0 %v1564_v24  ;;  %664 = vmatmul.mubr.bf16.gmra.mxu1 %v1565_v26 }
  0x2b   :  { %1477 = vmatpush3.bf16.msra.mxu1 %v1566_v25  ;;  %575 = vmatprep.mubr.bf16.mxu0 %v1568_v28 }
  0x2c   :  { %1478 = vmatprep.subr.bf16.mxu1 %v1567_v27  ;;  %671 = vmatprep.mubr.bf16.mxu1 %v1570_v29 }
  0x2f   :  { %1479 = vmatpush3.bf16.msra.mxu1 %v1567_v27 }
  0x30   :  { %1480 = vmatprep.subr.bf16.mxu1 %v1574_v30 }
  0x32   :  { %576 = vmatmul.mubr.bf16.gmra.mxu0 %v1572_v31  ;;  %672 = vmatmul.mubr.bf16.gmra.mxu1 %v1573_v32 }
  0x33   :  { %1481 = vmatpush3.bf16.msra.mxu1 %v1574_v30  ;;  %583 = vmatprep.mubr.bf16.mxu0 %v1576_v34 }
  0x34   :  { %1482 = vmatprep.subr.bf16.mxu1 %v1575_v33  ;;  %679 = vmatprep.mubr.bf16.mxu1 %v1578_v35 }
  0x37   :  { %1483 = vmatpush3.bf16.msra.mxu1 %v1575_v33 }
  0x38   :  { %1484 = vmatprep.subr.bf16.mxu1 %v1582_v36 }
  0x3a   :  { %584 = vmatmul.mubr.bf16.gmra.mxu0 %v1580_v37  ;;  %680 = vmatmul.mubr.bf16.gmra.mxu1 %v1581_v38 }
  0x3b   :  { %1485 = vmatpush3.bf16.msra.mxu1 %v1582_v36  ;;  %591 = vmatprep.mubr.bf16.mxu0 %v1584_v39 }
  0x3c   :  { %1486 = vmatprep.subr.bf16.mxu1 %v1583_v40  ;;  %1488 = vmatprep.mubr.bf16.mxu1 %v1586_v41 }
  0x3f   :  { %1487 = vmatpush3.bf16.msra.mxu1 %v1583_v40 }
  0x42   :  { %592 = vmatmul.mubr.bf16.gmra.mxu0 %v1587_v42  ;;  %1489 = vmatmul.mubr.bf16.vlgmr.msra.gmra.mxu1 %v1588_v43 }
  0x43   :  { %599 = vmatprep.mubr.bf16.mxu0 %v1589_v44  ;;  %1492 = vmatprep.mubr.bf16.mxu1 %v1591_v45 }
  0x4a   :  { %600 = vmatmul.mubr.bf16.gmra.mxu0 %v1592_v46  ;;  %1493 = vmatmul.mubr.bf16.gmra.mxu1 %v1593_v47 }
  0x4b   :  { %607 = vmatprep.mubr.bf16.mxu0 %v1594_v48  ;;  %1496 = vmatprep.mubr.bf16.mxu1 %v1596_v49 }
  0x52   :  { %608 = vmatmul.mubr.bf16.gmra.mxu0 %v1597_v50  ;;  %1497 = vmatmul.mubr.bf16.gmra.mxu1 %v1598_v51 }
  0x53   :  { %615 = vmatprep.mubr.bf16.mxu0 %v1599_v52  ;;  %1500 = vmatprep.mubr.bf16.mxu1 %v1601_v53 }
  0x5a   :  { %616 = vmatmul.mubr.bf16.gmra.mxu0 %v1602_v54  ;;  %1501 = vmatmul.mubr.bf16.gmra.mxu1 %v1603_v55 }
  0x5b   :  { %623 = vmatprep.mubr.bf16.mxu0 %v1604_v56  ;;  %1504 = vmatprep.mubr.bf16.mxu1 %v1606_v57 }
  0x62   :  { %624 = vmatmul.mubr.bf16.gmra.mxu0 %v1607_v58  ;;  %1505 = vmatmul.mubr.bf16.gmra.mxu1 %v1608_v59 }
  0x63   :  { %631 = vmatprep.mubr.bf16.mxu0 %v1609_v60  ;;  %1508 = vmatprep.mubr.bf16.mxu1 %v1611_v61 }
  0x6a   :  { %632 = vmatmul.mubr.bf16.gmra.mxu0 %v1612_v62  ;;  %1509 = vmatmul.mubr.bf16.gmra.mxu1 %v1613_v63 }
  0x6b   :  { %639 = vmatprep.mubr.bf16.mxu0 %v1614_v0  ;;  %1512 = vmatprep.mubr.bf16.mxu1 %v1616_v1 }
  0x72   :  { %640 = vmatmul.mubr.bf16.gmra.mxu0 %v1617_v2  ;;  %1513 = vmatmul.mubr.bf16.gmra.mxu1 %v1618_v3 }
  0x73   :  { %647 = vmatprep.mubr.bf16.mxu0 %v1619_v4  ;;  %1516 = vmatprep.mubr.bf16.mxu1 %v1621_v5 }
  0x7a   :  { %648 = vmatmul.mubr.bf16.gmra.mxu0 %v1622_v6  ;;  %1517 = vmatmul.mubr.bf16.gmra.mxu1 %v1623_v7 }
  0xe2   :  { %v1352_v8 = vpop.f32.mrf.mxu0  ;;  %v1424_v9 = vpop.f32.mrf.mxu1 }
  0xe4   :  { %v1353_v10 = vpop.f32.mrf.mxu0  ;;  %v1425_v11 = vpop.f32.mrf.mxu1 }
  0xe5   :  { %v1865_v12 = vadd.f32 %v1425_v11, %v1424_v9  ;;  %v1354_v50 = vadd.f32 %v1353_v10, %v1352_v8 }
  0xe6   :  { %v1355_v13 = vpop.f32.mrf.mxu0  ;;  %v1427_v14 = vpop.f32.mrf.mxu1 }
  0xe8   :  { %v1356_v15 = vpop.f32.mrf.mxu0  ;;  %v1428_v16 = vpop.f32.mrf.mxu1 }
  0xe9   :  { %v1867_v17 = vadd.f32 %v1428_v16, %v1427_v14  ;;  %v1357_v59 = vadd.f32 %v1356_v15, %v1355_v13 }
  0xea   :  { %v1358_v18 = vpop.f32.mrf.mxu0  ;;  %v1430_v19 = vpop.f32.mrf.mxu1 }
  0xec   :  { %v1359_v20 = vpop.f32.mrf.mxu0  ;;  %v1431_v21 = vpop.f32.mrf.mxu1 }
  0xed   :  { %v1869_v22 = vadd.f32 %v1431_v21, %v1430_v19  ;;  %v1360_v46 = vadd.f32 %v1359_v20, %v1358_v18 }
  0xee   :  { %v1361_v23 = vpop.f32.mrf.mxu0  ;;  %v1433_v24 = vpop.f32.mrf.mxu1 }
  0xf0   :  { %v1362_v25 = vpop.f32.mrf.mxu0  ;;  %v1434_v26 = vpop.f32.mrf.mxu1 }
  0xf1   :  { %v1871_v27 = vadd.f32 %v1434_v26, %v1433_v24  ;;  %v1363_v53 = vadd.f32 %v1362_v25, %v1361_v23 }
  0xf2   :  { %v1364_v28 = vpop.f32.mrf.mxu0  ;;  %v1436_v29 = vpop.f32.mrf.mxu1 }
  0xf4   :  { %v1365_v30 = vpop.f32.mrf.mxu0  ;;  %v1437_v31 = vpop.f32.mrf.mxu1 }
  0xf5   :  { %v1873_v32 = vadd.f32 %v1437_v31, %v1436_v29  ;;  %v1366_v5 = vadd.f32 %v1365_v30, %v1364_v28 }
  0xf6   :  { %v1367_v33 = vpop.f32.mrf.mxu0  ;;  %v1439_v34 = vpop.f32.mrf.mxu1 }
  0xf8   :  { %v1368_v35 = vpop.f32.mrf.mxu0  ;;  %v1440_v36 = vpop.f32.mrf.mxu1 }
  0xf9   :  { %v1875_v37 = vadd.f32 %v1440_v36, %v1439_v34  ;;  %v1369_v28 = vadd.f32 %v1368_v35, %v1367_v33 }
  0xfa   :  { %v1370_v38 = vpop.f32.mrf.mxu0  ;;  %v1877_v39 = vpop.f32.mrf.mxu1 }
  0xfc   :  { %v1371_v40 = vpop.f32.mrf.mxu0  ;;  %v1879_v41 = vpop.f32.mrf.mxu1 }
  0xfd   :  { %v1372_v63 = vadd.f32 %v1371_v40, %v1370_v38 }
  0xfe   :  { %v1373_v42 = vpop.f32.mrf.mxu0  ;;  %v1881_v43 = vpop.f32.mrf.mxu1 }
 0x100   :  { %v1374_v44 = vpop.f32.mrf.mxu0  ;;  %v1883_v45 = vpop.f32.mrf.mxu1 }
 0x101   :  { %v1375_v15 = vadd.f32 %v1374_v44, %v1373_v42 }
 0x102   :  { %v1885_v47 = vpop.f32.mrf.mxu0  ;;  %v1490_v48 = vpop.f32.mrf.mxu1 }
 0x103   :  { %v731_v49 = vadd.f32 %v1490_v48, %v1360_v46 }
 0x104   :  { %v1377_v51 = vpop.f32.mrf.mxu0  ;;  %v722_v52 = vpop.f32.mrf.mxu1 }
 0x105   :  { %v1306_v54 = vpack.c.bf16 %v731_v49, %v731_v49  ;;  %v723_v55 = vadd.f32 %v1354_v50, %v722_v52  ;;  %v1082_v6 = vmul.f32 %v731_v49, %v731_v49  ;;  %v1014_v16 = vsel %vm1010_vm1, %v731_v49, 0.0 }
 0x106   :  { %v1887_v56 = vpop.f32.mrf.mxu0  ;;  %v1491_v57 = vpop.f32.mrf.mxu1  ;;  %v1378_v35 = vadd.f32 %v1377_v51, %v1885_v47 }
 0x107   :  { %980 = vst.msk [vmem:[%s2161_s2 + $0x8] sm:$0xf] %vm977_vm0, %v1306_v54  ;;  %v734_v58 = vadd.f32 %v1491_v57, %v1363_v53  ;;  %v1304_v60 = vpack.c.bf16 %v723_v55, %v723_v55  ;;  %v1080_v1 = vmul.f32 %v723_v55, %v723_v55  ;;  %v1011_v8 = vsel %vm1010_vm1, %v723_v55, 0.0 }
 0x108   :  { %v1893_v61 = vpop.f32.mrf.mxu0  ;;  %v725_v62 = vpop.f32.mrf.mxu1  ;;  %v1115_v34 = vsel %vm1010_vm1, %v1082_v6, 0.0 }
 0x109   :  { %v1307_v0 = vpack.c.bf16 %v734_v58, %v734_v58  ;;  %978 = vst.msk [vmem:[%s2161_s2] sm:$0xf] %vm977_vm0, %v1304_v60  ;;  %v726_v2 = vadd.f32 %v1357_v59, %v725_v62  ;;  %v1112_v20 = vsel %vm1010_vm1, %v1080_v1, 0.0  ;;  %v1083_v21 = vmul.f32 %v734_v58, %v734_v58 }
 0x10a   :  { %v1382_v3 = vpop.f32.mrf.mxu0  ;;  %v1494_v4 = vpop.f32.mrf.mxu1  ;;  %v1016_v36 = vsel %vm1010_vm1, %v734_v58, 0.0 }
 0x10b   :  { %981 = vst.msk [vmem:[%s2161_s2 + $0xc] sm:$0xf] %vm977_vm0, %v1307_v0  ;;  %v747_v7 = vadd.f32 %v1494_v4, %v1372_v63  ;;  %v1305_v9 = vpack.c.bf16 %v726_v2, %v726_v2  ;;  %v1012_v10 = vsel %vm1010_vm1, %v726_v2, 0.0  ;;  %v1081_v11 = vmul.f32 %v726_v2, %v726_v2 }
 0x10c   :  { %v1383_v13 = vpop.f32.mrf.mxu0  ;;  %v738_v14 = vpop.f32.mrf.mxu1  ;;  %v1013_v18 = vadd.f32 %v1012_v10, %v1011_v8  ;;  %v1117_v50 = vsel %vm1010_vm1, %v1083_v21, 0.0 }
 0x10d   :  { %v1310_v19 = vpack.c.bf16 %v747_v7, %v747_v7  ;;  %979 = vst.msk [vmem:[%s2161_s2 + $0x4] sm:$0xf] %vm977_vm0, %v1305_v9  ;;  %v1113_v23 = vsel %vm1010_vm1, %v1081_v11, 0.0  ;;  %v739_v24 = vadd.f32 %v1366_v5, %v738_v14  ;;  %v1384_v48 = vadd.f32 %v1383_v13, %v1382_v3 }
 0x10e   :  { %v1385_v25 = vpop.f32.mrf.mxu0  ;;  %v1495_v26 = vpop.f32.mrf.mxu1  ;;  %v1015_v29 = vadd.f32 %v1014_v16, %v1013_v18  ;;  %v1114_v30 = vadd.f32 %v1113_v23, %v1112_v20  ;;  %v1086_v57 = vmul.f32 %v747_v7, %v747_v7  ;;  %v1022_v6 = vsel %vm1010_vm1, %v747_v7, 0.0 }
 0x10f   :  { %984 = vst.msk [vmem:[%s2161_s2 + $0x18] sm:$0xf] %vm977_vm0, %v1310_v19  ;;  %v750_v31 = vadd.f32 %v1495_v26, %v1375_v15  ;;  %v1308_v38 = vpack.c.bf16 %v739_v24, %v739_v24  ;;  %v1084_v40 = vmul.f32 %v739_v24, %v739_v24  ;;  %v1018_v52 = vsel %vm1010_vm1, %v739_v24, 0.0 }
 0x110   :  { %v1386_v42 = vpop.f32.mrf.mxu0  ;;  %v741_v44 = vpop.f32.mrf.mxu1  ;;  %v1116_v46 = vadd.f32 %v1115_v34, %v1114_v30  ;;  %v1017_v49 = vadd.f32 %v1016_v36, %v1015_v29  ;;  %v1381_v14 = vadd.f32 %v1893_v61, %v1887_v56  ;;  %v1123_v18 = vsel %vm1010_vm1, %v1086_v57, 0.0 }
 0x111   :  { %v1311_v33 = vpack.c.bf16 %v750_v31, %v750_v31  ;;  %982 = vst.msk [vmem:[%s2161_s2 + $0x10] sm:$0xf] %vm977_vm0, %v1308_v38  ;;  %v742_v53 = vadd.f32 %v1369_v28, %v741_v44  ;;  %v1119_v51 = vsel %vm1010_vm1, %v1084_v40, 0.0  ;;  %v1387_v3 = vadd.f32 %v1386_v42, %v1385_v25 }
 0x112   :  { %v1388_v54 = vpop.f32.mrf.mxu0  ;;  %v1498_v55 = vpop.f32.mrf.mxu1  ;;  %v1019_v58 = vadd.f32 %v1018_v52, %v1017_v49  ;;  %v1118_v59 = vadd.f32 %v1117_v50, %v1116_v46  ;;  %v1087_v8 = vmul.f32 %v750_v31, %v750_v31  ;;  %v1024_v19 = vsel %vm1010_vm1, %v750_v31, 0.0 }
 0x113   :  { %985 = vst.msk [vmem:[%s2161_s2 + $0x1c] sm:$0xf] %vm977_vm0, %v1311_v33  ;;  %v1929_v47 = vadd.f32 %v1498_v55, %v1384_v48  ;;  %v1309_v60 = vpack.c.bf16 %v742_v53, %v742_v53  ;;  %v1020_v62 = vsel %vm1010_vm1, %v742_v53, 0.0  ;;  %v1085_v63 = vmul.f32 %v742_v53, %v742_v53 }
 0x114   :  { %v1389_v0 = vpop.f32.mrf.mxu0  ;;  %v754_v1 = vpop.f32.mrf.mxu1  ;;  %v1120_v2 = vadd.f32 %v1119_v51, %v1118_v59  ;;  %v1021_v4 = vadd.f32 %v1020_v62, %v1019_v58  ;;  %v1125_v56 = vsel %vm1010_vm1, %v1087_v8, 0.0 }
 0x115   :  { %v1314_v5 = vpack.c.bf16 %v1929_v47, %v1929_v47  ;;  %983 = vst.msk [vmem:[%s2161_s2 + $0x14] sm:$0xf] %vm977_vm0, %v1309_v60  ;;  %v1121_v9 = vsel %vm1010_vm1, %v1085_v63, 0.0  ;;  %v755_v10 = vadd.f32 %v1378_v35, %v754_v1  ;;  %v1390_v31 = vadd.f32 %v1389_v0, %v1388_v54 }
 0x116   :  { %v1391_v11 = vpop.f32.mrf.mxu0  ;;  %v1499_v13 = vpop.f32.mrf.mxu1  ;;  %v1023_v15 = vadd.f32 %v1022_v6, %v1021_v4  ;;  %v1122_v16 = vadd.f32 %v1121_v9, %v1120_v2  ;;  %v1090_v33 = vmul.f32 %v1929_v47, %v1929_v47  ;;  %v1030_v0 = vsel %vm1010_vm1, %v1929_v47, 0.0 }
 0x117   :  { %988 = vst.msk [vmem:[%s2161_s2 + $0x28] sm:$0xf] %vm977_vm0, %v1314_v5  ;;  %v766_v7 = vadd.f32 %v1499_v13, %v1387_v3  ;;  %v1312_v20 = vpack.c.bf16 %v755_v10, %v755_v10  ;;  %v1088_v21 = vmul.f32 %v755_v10, %v755_v10  ;;  %v1026_v61 = vsel %vm1010_vm1, %v755_v10, 0.0 }
 0x118   :  { %v1392_v23 = vpop.f32.mrf.mxu0  ;;  %v757_v24 = vpop.f32.mrf.mxu1  ;;  %v1124_v25 = vadd.f32 %v1123_v18, %v1122_v16  ;;  %v1025_v26 = vadd.f32 %v1024_v19, %v1023_v15  ;;  %v1131_v1 = vsel %vm1010_vm1, %v1090_v33, 0.0 }
 0x119   :  { %v1315_v28 = vpack.c.bf16 %v766_v7, %v766_v7  ;;  %986 = vst.msk [vmem:[%s2161_s2 + $0x20] sm:$0xf] %vm977_vm0, %v1312_v20  ;;  %v758_v29 = vadd.f32 %v1381_v14, %v757_v24  ;;  %v1127_v40 = vsel %vm1010_vm1, %v1088_v21, 0.0  ;;  %v1393_v60 = vadd.f32 %v1392_v23, %v1391_v11 }
 0x11a   :  { %v1394_v30 = vpop.f32.mrf.mxu0  ;;  %v1502_v34 = vpop.f32.mrf.mxu1  ;;  %v1027_v36 = vadd.f32 %v1026_v61, %v1025_v26  ;;  %v1126_v38 = vadd.f32 %v1125_v56, %v1124_v25  ;;  %v1091_v2 = vmul.f32 %v766_v7, %v766_v7  ;;  %v1032_v15 = vsel %vm1010_vm1, %v766_v7, 0.0 }
 0x11b   :  { %989 = vst.msk [vmem:[%s2161_s2 + $0x2c] sm:$0xf] %vm977_vm0, %v1315_v28  ;;  %v1313_v42 = vpack.c.bf16 %v758_v29, %v758_v29  ;;  %v1028_v44 = vsel %vm1010_vm1, %v758_v29, 0.0  ;;  %v1089_v46 = vmul.f32 %v758_v29, %v758_v29 }
 0x11c   :  { %v1395_v48 = vpop.f32.mrf.mxu0  ;;  %v770_v49 = vpop.f32.mrf.mxu1  ;;  %v1128_v35 = vadd.f32 %v1127_v40, %v1126_v38  ;;  %v1029_v53 = vadd.f32 %v1028_v44, %v1027_v36  ;;  %v1133_v16 = vsel %vm1010_vm1, %v1091_v2, 0.0 }
 0x11d   :  { %v1396_v50 = vadd.f32 %v1395_v48, %v1394_v30  ;;  %v771_v52 = vadd.f32 %v1390_v31, %v770_v49  ;;  %987 = vst.msk [vmem:[%s2161_s2 + $0x24] sm:$0xf] %vm977_vm0, %v1313_v42  ;;  %v1129_v54 = vsel %vm1010_vm1, %v1089_v46, 0.0 }
 0x11e   :  { %v1397_v55 = vpop.f32.mrf.mxu0  ;;  %v1503_v57 = vpop.f32.mrf.mxu1  ;;  %v1130_v58 = vadd.f32 %v1129_v54, %v1128_v35  ;;  %v1031_v4 = vadd.f32 %v1030_v0, %v1029_v53 }
 0x11f   :  { %v779_v59 = vadd.f32 %v1502_v34, %v1396_v50  ;;  %v1316_v51 = vpack.c.bf16 %v771_v52, %v771_v52  ;;  %v1092_v18 = vmul.f32 %v771_v52, %v771_v52  ;;  %v1034_v61 = vsel %vm1010_vm1, %v771_v52, 0.0 }
 0x120   :  { %v1398_v62 = vpop.f32.mrf.mxu0  ;;  %v773_v63 = vpop.f32.mrf.mxu1  ;;  %v1132_v5 = vadd.f32 %v1131_v1, %v1130_v58  ;;  %v1033_v20 = vadd.f32 %v1032_v15, %v1031_v4 }
 0x121   :  { %v1318_v3 = vpack.c.bf16 %v779_v59, %v779_v59  ;;  %990 = vst.msk [vmem:[%s2161_s2 + $0x30] sm:$0xf] %vm977_vm0, %v1316_v51  ;;  %v1399_v6 = vadd.f32 %v1398_v62, %v1397_v55  ;;  %v774_v8 = vadd.f32 %v1393_v60, %v773_v63  ;;  %v1135_v29 = vsel %vm1010_vm1, %v1092_v18, 0.0 }
 0x122   :  { %v1400_v9 = vpop.f32.mrf.mxu0  ;;  %v1506_v10 = vpop.f32.mrf.mxu1  ;;  %v1134_v21 = vadd.f32 %v1133_v16, %v1132_v5  ;;  %v1035_v31 = vadd.f32 %v1034_v61, %v1033_v20  ;;  %v1094_v33 = vmul.f32 %v779_v59, %v779_v59  ;;  %v1038_v58 = vsel %vm1010_vm1, %v779_v59, 0.0 }
 0x123   :  { %992 = vst.msk [vmem:[%s2161_s2 + $0x38] sm:$0xf] %vm977_vm0, %v1318_v3  ;;  %v782_v47 = vadd.f32 %v1503_v57, %v1399_v6  ;;  %v1317_v11 = vpack.c.bf16 %v774_v8, %v774_v8  ;;  %v1093_v26 = vmul.f32 %v774_v8, %v774_v8  ;;  %v1036_v42 = vsel %vm1010_vm1, %v774_v8, 0.0 }
 0x124   :  { %v1401_v13 = vpop.f32.mrf.mxu0  ;;  %v786_v14 = vpop.f32.mrf.mxu1  ;;  %v1136_v36 = vadd.f32 %v1135_v29, %v1134_v21  ;;  %v1037_v52 = vadd.f32 %v1036_v42, %v1035_v31  ;;  %v1139_v62 = vsel %vm1010_vm1, %v1094_v33, 0.0 }
 0x125   :  { %v1402_v19 = vadd.f32 %v1401_v13, %v1400_v9  ;;  %v1319_v23 = vpack.c.bf16 %v782_v47, %v782_v47  ;;  %991 = vst.msk [vmem:[%s2161_s2 + $0x34] sm:$0xf] %vm977_vm0, %v1317_v11  ;;  %v1137_v44 = vsel %vm1010_vm1, %v1093_v26, 0.0  ;;  %v1095_v63 = vmul.f32 %v782_v47, %v782_v47 }
 0x126   :  { %v1403_v24 = vpop.f32.mrf.mxu0  ;;  %v1507_v25 = vpop.f32.mrf.mxu1  ;;  %v1138_v53 = vadd.f32 %v1137_v44, %v1136_v36  ;;  %v1039_v2 = vadd.f32 %v1038_v58, %v1037_v52  ;;  %v1040_v11 = vsel %vm1010_vm1, %v782_v47, 0.0  ;;  %v1444_v26 = vadd.f32 %v1879_v41, %v1877_v39 }
 0x127   :  { %v787_v28 = vadd.f32 %v1402_v19, %v786_v14  ;;  %993 = vst.msk [vmem:[%s2161_s2 + $0x3c] sm:$0xf] %vm977_vm0, %v1319_v23  ;;  %v1141_v13 = vsel %vm1010_vm1, %v1095_v63, 0.0 }
 0x128   :  { %v1404_v7 = vpop.f32.mrf.mxu0  ;;  %v789_v56 = vpop.f32.mrf.mxu1  ;;  %v1140_v3 = vadd.f32 %v1139_v62, %v1138_v53  ;;  %v1041_v16 = vadd.f32 %v1040_v11, %v1039_v2 }
 0x129   :  { %v1320_v30 = vpack.c.bf16 %v787_v28, %v787_v28  ;;  %v1405_v34 = vadd.f32 %v1404_v7, %v1403_v24  ;;  %v1096_v6 = vmul.f32 %v787_v28, %v787_v28  ;;  %v1042_v18 = vsel %vm1010_vm1, %v787_v28, 0.0 }
 0x12a   :  { %v1406_v38 = vpop.f32.mrf.mxu0  ;;  %v1991_v40 = vpop.f32.mrf.mxu1  ;;  %v1142_v19 = vadd.f32 %v1141_v13, %v1140_v3 }
 0x12b   :  { %994 = vst.msk [vmem:[%s2161_s2 + $0x40] sm:$0xf] %vm977_vm0, %v1320_v30  ;;  %v790_v46 = vadd.f32 %v1405_v34, %v789_v56 }
 0x12c   :  { %v1407_v48 = vpop.f32.mrf.mxu0  ;;  %v802_v49 = vpop.f32.mrf.mxu1 }
 0x12d   :  { %v1321_v35 = vpack.c.bf16 %v790_v46, %v790_v46  ;;  %v1408_v50 = vadd.f32 %v1407_v48, %v1406_v38  ;;  %v1097_v24 = vmul.f32 %v790_v46, %v790_v46  ;;  %v1044_v61 = vsel %vm1010_vm1, %v790_v46, 0.0 }
 0x12e   :  { %v1409_v54 = vpop.f32.mrf.mxu0  ;;  %v1999_v55 = vpop.f32.mrf.mxu1 }
 0x12f   :  { %995 = vst.msk [vmem:[%s2161_s2 + $0x44] sm:$0xf] %vm977_vm0, %v1321_v35  ;;  %v795_v57 = vadd.f32 %v1506_v10, %v1408_v50  ;;  %v1145_v41 = vsel %vm1010_vm1, %v1097_v24, 0.0 }
 0x130   :  { %v1410_v51 = vpop.f32.mrf.mxu0  ;;  %v805_v60 = vpop.f32.mrf.mxu1 }
 0x131   :  { %v1322_v0 = vpack.c.bf16 %v795_v57, %v795_v57  ;;  %v1411_v1 = vadd.f32 %v1410_v51, %v1409_v54  ;;  %v1098_v29 = vmul.f32 %v795_v57, %v795_v57  ;;  %v1046_v42 = vsel %vm1010_vm1, %v795_v57, 0.0 }
 0x132   :  { %v1412_v4 = vpop.f32.mrf.mxu0  ;;  %v1514_v5 = vpop.f32.mrf.mxu1 }
 0x133   :  { %996 = vst.msk [vmem:[%s2161_s2 + $0x48] sm:$0xf] %vm977_vm0, %v1322_v0  ;;  %v798_v8 = vadd.f32 %v1507_v25, %v1411_v1  ;;  %v2012_v59 = vadd.f32 %v1514_v5, %v1869_v22  ;;  %v1143_v22 = vsel %vm1010_vm1, %v1096_v6, 0.0  ;;  %v1147_v50 = vsel %vm1010_vm1, %v1098_v29, 0.0 }
 0x134   :  { %v1413_v9 = vpop.f32.mrf.mxu0  ;;  %v818_v10 = vpop.f32.mrf.mxu1  ;;  %v1144_v31 = vadd.f32 %v1143_v22, %v1142_v19 }
 0x135   :  { %v1323_v14 = vpack.c.bf16 %v798_v8, %v798_v8  ;;  %v1330_v15 = vpack.c.bf16 %v2012_v59, %v2012_v59  ;;  %v1414_v20 = vadd.f32 %v1413_v9, %v1412_v4  ;;  %v2029_v47 = vadd.f32 %v1865_v12, %v818_v10 }
 0x136   :  { %v1415_v21 = vpop.f32.mrf.mxu0  ;;  %v1515_v23 = vpop.f32.mrf.mxu1  ;;  %v1447_v12 = vadd.f32 %v1883_v45, %v1881_v43  ;;  %v1099_v44 = vmul.f32 %v798_v8, %v798_v8  ;;  %v1048_v52 = vsel %vm1010_vm1, %v798_v8, 0.0  ;;  %v1146_v57 = vadd.f32 %v1145_v41, %v1144_v31 }
 0x137   :  { %997 = vst.msk [vmem:[%s2161_s2 + $0x4c] sm:$0xf] %vm977_vm0, %v1323_v14  ;;  %1004 = vst.msk [vmem:[%s2161_s2 + $0x68] sm:$0xf] %vm977_vm0, %v1330_v15  ;;  %v2032_v25 = vadd.f32 %v1515_v23, %v1871_v27  ;;  %v803_v28 = vadd.f32 %v1414_v20, %v802_v49  ;;  %v1328_v30 = vpack.c.bf16 %v2029_v47, %v2029_v47 }
 0x138   :  { %v1416_v7 = vpop.f32.mrf.mxu0  ;;  %v821_v56 = vpop.f32.mrf.mxu1  ;;  %v1043_v27 = vadd.f32 %v1042_v18, %v1041_v16  ;;  %v1149_v0 = vsel %vm1010_vm1, %v1099_v44, 0.0  ;;  %v1148_v4 = vadd.f32 %v1147_v50, %v1146_v57 }
 0x139   :  { %v1331_v34 = vpack.c.bf16 %v2032_v25, %v2032_v25  ;;  %v1324_v36 = vpack.c.bf16 %v803_v28, %v803_v28  ;;  %1002 = vst.msk [vmem:[%s2161_s2 + $0x60] sm:$0xf] %vm977_vm0, %v1328_v30  ;;  %v1417_v43 = vadd.f32 %v1416_v7, %v1415_v21  ;;  %v1100_v46 = vmul.f32 %v803_v28, %v803_v28 }
 0x13a   :  { %v1418_v38 = vpop.f32.mrf.mxu0  ;;  %v1518_v39 = vpop.f32.mrf.mxu1  ;;  %v1045_v45 = vadd.f32 %v1044_v61, %v1043_v27  ;;  %v2058_v48 = vadd.f32 %v1867_v17, %v821_v56  ;;  %v1050_v1 = vsel %vm1010_vm1, %v803_v28, 0.0  ;;  %v1150_v14 = vadd.f32 %v1149_v0, %v1148_v4 }
 0x13b   :  { %1005 = vst.msk [vmem:[%s2161_s2 + $0x6c] sm:$0xf] %vm977_vm0, %v1331_v34  ;;  %998 = vst.msk [vmem:[%s2161_s2 + $0x50] sm:$0xf] %vm977_vm0, %v1324_v36  ;;  %v2060_v49 = vadd.f32 %v1518_v39, %v1444_v26  ;;  %v806_v53 = vadd.f32 %v1417_v43, %v805_v60  ;;  %v1151_v60 = vsel %vm1010_vm1, %v1100_v46, 0.0  ;;  %v1104_v7 = vmul.f32 %v2029_v47, %v2029_v47 }
 0x13c   :  { %v1419_v33 = vpop.f32.mrf.mxu0  ;;  %v834_v35 = vpop.f32.mrf.mxu1  ;;  %v1047_v58 = vadd.f32 %v1046_v42, %v1045_v45  ;;  %v1329_v51 = vpack.c.bf16 %v2058_v48, %v2058_v48  ;;  %v1152_v23 = vadd.f32 %v1151_v60, %v1150_v14  ;;  %v1060_v42 = vsel %vm1010_vm1, %v2058_v48, 0.0 }
 0x13d   :  { %v1420_v54 = vadd.f32 %v1419_v33, %v1418_v38  ;;  %v1334_v62 = vpack.c.bf16 %v2060_v49, %v2060_v49  ;;  %v1325_v2 = vpack.c.bf16 %v806_v53, %v806_v53  ;;  %v1101_v3 = vmul.f32 %v806_v53, %v806_v53 }
 0x13e   :  { %v1421_v17 = vpop.f32.mrf.mxu0  ;;  %v1519_v63 = vpop.f32.mrf.mxu1  ;;  %v1049_v5 = vadd.f32 %v1048_v52, %v1047_v58  ;;  %1003 = vst.msk [vmem:[%s2161_s2 + $0x64] sm:$0xf] %vm977_vm0, %v1329_v51  ;;  %v1052_v9 = vsel %vm1010_vm1, %v806_v53, 0.0  ;;  %v835_v10 = vadd.f32 %v1873_v32, %v834_v35  ;;  %v1159_v41 = vsel %vm1010_vm1, %v1104_v7, 0.0 }
 0x13f   :  { %1008 = vst.msk [vmem:[%s2161_s2 + $0x78] sm:$0xf] %vm977_vm0, %v1334_v62  ;;  %v811_v6 = vadd.f32 %v1991_v40, %v1420_v54  ;;  %999 = vst.msk [vmem:[%s2161_s2 + $0x54] sm:$0xf] %vm977_vm0, %v1325_v2  ;;  %v2086_v11 = vadd.f32 %v1519_v63, %v1447_v12  ;;  %v1153_v19 = vsel %vm1010_vm1, %v1101_v3, 0.0  ;;  %v1062_v45 = vsel %vm1010_vm1, %v2012_v59, 0.0 }
 0x140   :  { %v1422_v8 = vpop.f32.mrf.mxu0  ;;  %v1051_v15 = vadd.f32 %v1050_v1, %v1049_v5  ;;  %v837_v18 = vpop.f32.mrf.mxu1  ;;  %v1332_v21 = vpack.c.bf16 %v835_v10, %v835_v10  ;;  %v1154_v56 = vadd.f32 %v1153_v19, %v1152_v23  ;;  %v1107_v46 = vmul.f32 %v2032_v25, %v2032_v25 }
 0x141   :  { %v1423_v13 = vadd.f32 %v1422_v8, %v1421_v17  ;;  %v1326_v16 = vpack.c.bf16 %v811_v6, %v811_v6  ;;  %v1054_v40 = vsel %vm1010_vm1, %v811_v6, 0.0  ;;  %v1102_v20 = vmul.f32 %v811_v6, %v811_v6 }
 0x142   :  { %v1053_v22 = vadd.f32 %v1052_v9, %v1051_v15  ;;  %v1335_v32 = vpack.c.bf16 %v2086_v11, %v2086_v11  ;;  %1006 = vst.msk [vmem:[%s2161_s2 + $0x70] sm:$0xf] %vm977_vm0, %v1332_v21  ;;  %v838_v28 = vadd.f32 %v1875_v37, %v837_v18  ;;  %v1058_v37 = vsel %vm1010_vm1, %v2029_v47, 0.0 }
 0x143   :  { %1000 = vst.msk [vmem:[%s2161_s2 + $0x58] sm:$0xf] %vm977_vm0, %v1326_v16  ;;  %v1155_v24 = vsel %vm1010_vm1, %v1102_v20, 0.0  ;;  %v814_v26 = vadd.f32 %v1999_v55, %v1423_v13  ;;  %v1105_v55 = vmul.f32 %v2058_v48, %v2058_v48  ;;  %v1106_v47 = vmul.f32 %v2012_v59, %v2012_v59 }
 0x144   :  { %v1055_v61 = vadd.f32 %v1054_v40, %v1053_v22  ;;  %1009 = vst.msk [vmem:[%s2161_s2 + $0x7c] sm:$0xf] %vm977_vm0, %v1335_v32  ;;  %v1333_v12 = vpack.c.bf16 %v838_v28, %v838_v28  ;;  %v1156_v27 = vadd.f32 %v1155_v24, %v1154_v56  ;;  %v1064_v53 = vsel %vm1010_vm1, %v2032_v25, 0.0 }
 0x145   :  { %v1327_v29 = vpack.c.bf16 %v814_v26, %v814_v26  ;;  %v1056_v30 = vsel %vm1010_vm1, %v814_v26, 0.0  ;;  %v1103_v34 = vmul.f32 %v814_v26, %v814_v26  ;;  %v1161_v33 = vsel %vm1010_vm1, %v1105_v55, 0.0 }
 0x146   :  { %v1057_v31 = vadd.f32 %v1056_v30, %v1055_v61  ;;  %1007 = vst.msk [vmem:[%s2161_s2 + $0x74] sm:$0xf] %vm977_vm0, %v1333_v12  ;;  %v1163_v52 = vsel %vm1010_vm1, %v1106_v47, 0.0  ;;  %v1108_v54 = vmul.f32 %v835_v10, %v835_v10  ;;  %v1165_v58 = vsel %vm1010_vm1, %v1107_v46, 0.0 }
 0x147   :  { %1001 = vst.msk [vmem:[%s2161_s2 + $0x5c] sm:$0xf] %vm977_vm0, %v1327_v29  ;;  %v1157_v36 = vsel %vm1010_vm1, %v1103_v34, 0.0  ;;  %v1066_v51 = vsel %vm1010_vm1, %v835_v10, 0.0  ;;  %v1109_v59 = vmul.f32 %v838_v28, %v838_v28  ;;  %v1110_v63 = vmul.f32 %v2060_v49, %v2060_v49 }
 0x148   :  { %v1059_v38 = vadd.f32 %v1058_v37, %v1057_v31  ;;  %v1158_v39 = vadd.f32 %v1157_v36, %v1156_v27  ;;  %v1167_v0 = vsel %vm1010_vm1, %v1108_v54, 0.0  ;;  %v1068_v1 = vsel %vm1010_vm1, %v838_v28, 0.0 }
 0x149   :  { %v1070_v25 = vsel %vm1010_vm1, %v2060_v49, 0.0  ;;  %v1111_v4 = vmul.f32 %v2086_v11, %v2086_v11  ;;  %v1169_v5 = vsel %vm1010_vm1, %v1109_v59, 0.0  ;;  %v1171_v8 = vsel %vm1010_vm1, %v1110_v63, 0.0 }
 0x14a   :  { %v1061_v44 = vadd.f32 %v1060_v42, %v1059_v38  ;;  %v1160_v43 = vadd.f32 %v1159_v41, %v1158_v39  ;;  %v1072_v9 = vsel %vm1010_vm1, %v2086_v11, 0.0  ;;  %v1181_v18 = vlaneseq }
 0x14b   :  { %v1173_v14 = vsel %vm1010_vm1, %v1111_v4, 0.0 }
 0x14c   :  { %v1162_v35 = vadd.f32 %v1161_v33, %v1160_v43  ;;  %v1063_v50 = vadd.f32 %v1062_v45, %v1061_v44  ;;  %v1182_v21 = vshrl.u32 %v1181_v18, 7 }
 0x14e   :  { %v1065_v57 = vadd.f32 %v1064_v53, %v1063_v50  ;;  %v1164_v48 = vadd.f32 %v1163_v52, %v1162_v35  ;;  %vm1183_vm2 = vcmp.eq.s32.totalorder %v1182_v21, 0 }
 0x150   :  { %v1067_v62 = vadd.f32 %v1066_v51, %v1065_v57  ;;  %v1166_v17 = vadd.f32 %v1165_v58, %v1164_v48 }
 0x152   :  { %v1069_v2 = vadd.f32 %v1068_v1, %v1067_v62  ;;  %v1168_v3 = vadd.f32 %v1167_v0, %v1166_v17 }
 0x154   :  { %v1071_v60 = vadd.f32 %v1070_v25, %v1069_v2  ;;  %v1170_v6 = vadd.f32 %v1169_v5, %v1168_v3 }
 0x156   :  { %v1073_v10 = vadd.f32 %v1072_v9, %v1071_v60  ;;  %v1172_v13 = vadd.f32 %v1171_v8, %v1170_v6 }
 0x158   :  { %v1074_v15 = vrot.slane %v1073_v10, 4  ;;  %v1174_v16 = vadd.f32 %v1173_v14, %v1172_v13 }
 0x15a   :  { %v1075_v49 = vadd.f32 %v1074_v15, %v1073_v10  ;;  %v1175_v19 = vrot.slane %v1174_v16, 4 }
 0x15c   :  { %v1076_v40 = vrot.slane %v1075_v49, 2  ;;  %v1176_v20 = vadd.f32 %v1175_v19, %v1174_v16 }
 0x15e   :  { %v1077_v23 = vadd.f32 %v1076_v40, %v1075_v49  ;;  %v1177_v22 = vrot.slane %v1176_v20, 2 }
 0x160   :  { %v1078_v32 = vrot.slane %v1077_v23, 1  ;;  %v1178_v24 = vadd.f32 %v1177_v22, %v1176_v20 }
 0x162   :  { %v1079_v26 = vadd.f32 %v1078_v32, %v1077_v23  ;;  %v1179_v28 = vrot.slane %v1178_v24, 1 }
 0x164   :  { %v1180_v11 = vadd.f32 %v1179_v28, %v1178_v24  ;;  %v1184_v7 = vsel %vm1183_vm2, %v1079_v26, 0.0 }
 0x165   :  { %1185 = vst.msk [vmem:[%s2162_s3] sm:$0xff] %vm1010_vm1, %v1184_v7 }
 0x166   :  { %v1186_v56 = vsel %vm1183_vm2, %v1180_v11, 0.0 }
 0x167   :  { %1187 = vst.msk [vmem:[%s2163_s4] sm:$0xff] %vm1010_vm1, %v1186_v56 }

// kernel: resnet_forward.54
= control target key start
LH: loop header
LB: loop body
LE: loop exit
PB: predicated region body
PF: predicated region fallthrough
CT: control target
= control target key end

     0   :  { %s222_s0 = inlined_call_operand.vmem [shape: bf16[64,128], index: 0, kind: input, shape index: {}]   ;;  %s223_s1 = inlined_call_operand.vmem [shape: f32[1,128], index: 1, kind: input, shape index: {}]   ;;  %s224_s2 = inlined_call_operand.vmem [shape: f32[1,128], index: 2, kind: input, shape index: {}]   ;;  %s225_s3 = inlined_call_operand.vmem [shape: bf16[64,128], index: 3, kind: output, shape index: {}]  }
   0x1   :  { %v131_v0 = vld [vmem:[%s222_s0] sm:$0xff]   ;;  %v166_v4 = vld [vmem:[%s222_s0 + $0x8] sm:$0xff]   ;;  %v167_v5 = vld [vmem:[%s222_s0 + $0x10] sm:$0xff]  }
   0x2   :  { %v112_v1 = vld [vmem:[%s223_s1] ss:$0 sm:$0xff]  ;;  %v132_v2 = vunpack.c.l.bf16 %v131_v0  ;;  %v133_v3 = vunpack.c.h.bf16 %v131_v0  ;;  %v168_v6 = vld [vmem:[%s222_s0 + $0x18] sm:$0xff]   ;;  %v136_v8 = vunpack.c.l.bf16 %v166_v4  ;;  %v137_v9 = vunpack.c.h.bf16 %v166_v4 }
   0x3   :  { %v113_v7 = vld [vmem:[%s224_s2] ss:$0 sm:$0xff]  ;;  %v140_v10 = vunpack.c.l.bf16 %v167_v5  ;;  %v141_v11 = vunpack.c.h.bf16 %v167_v5  ;;  %v144_v14 = vunpack.c.l.bf16 %v168_v6  ;;  %v145_v15 = vunpack.c.h.bf16 %v168_v6 }
   0x4   :  { %v37_v12 = vmul.f32 %v132_v2, %v112_v1  ;;  %v38_v13 = vmul.f32 %v133_v3, %v112_v1  ;;  %v39_v16 = vmul.f32 %v136_v8, %v112_v1  ;;  %v40_v17 = vmul.f32 %v137_v9, %v112_v1 }
   0x5   :  { %v41_v18 = vmul.f32 %v140_v10, %v112_v1  ;;  %v42_v19 = vmul.f32 %v141_v11, %v112_v1  ;;  %v43_v22 = vmul.f32 %v144_v14, %v112_v1  ;;  %v44_v23 = vmul.f32 %v145_v15, %v112_v1 }
   0x6   :  { %v52_v20 = vadd.f32 %v113_v7, %v37_v12  ;;  %v53_v21 = vadd.f32 %v113_v7, %v38_v13  ;;  %v54_v24 = vadd.f32 %v113_v7, %v39_v16  ;;  %v55_v25 = vadd.f32 %v113_v7, %v40_v17 }
   0x7   :  { %v56_v26 = vadd.f32 %v113_v7, %v41_v18  ;;  %v57_v27 = vadd.f32 %v113_v7, %v42_v19  ;;  %v58_v30 = vadd.f32 %v113_v7, %v43_v22  ;;  %v59_v31 = vadd.f32 %v113_v7, %v44_v23 }
   0x8   :  { %v60_v28 = vmax.f32 %v52_v20, 0.0  ;;  %v61_v29 = vmax.f32 %v53_v21, 0.0  ;;  %v62_v32 = vmax.f32 %v54_v24, 0.0  ;;  %v63_v33 = vmax.f32 %v55_v25, 0.0 }
   0x9   :  { %v64_v34 = vmax.f32 %v56_v26, 0.0  ;;  %v65_v35 = vmax.f32 %v57_v27, 0.0  ;;  %v66_v37 = vmax.f32 %v58_v30, 0.0  ;;  %v67_v38 = vmax.f32 %v59_v31, 0.0 }
   0xa   :  { %v149_v36 = vpack.c.bf16 %v61_v29, %v60_v28  ;;  %v154_v39 = vpack.c.bf16 %v63_v33, %v62_v32 }
   0xb   :  { %v159_v40 = vpack.c.bf16 %v65_v35, %v64_v34  ;;  %v164_v41 = vpack.c.bf16 %v67_v38, %v66_v37 }
   0xc   :  { %150 = vst [vmem:[%s225_s3] sm:$0xff] %v149_v36   ;;  %169 = vst [vmem:[%s225_s3 + $0x8] sm:$0xff] %v154_v39  }
   0xd   :  { %170 = vst [vmem:[%s225_s3 + $0x10] sm:$0xff] %v159_v40   ;;  %171 = vst [vmem:[%s225_s3 + $0x18] sm:$0xff] %v164_v41  }

// kernel: tile.241
= control target key start
LH: loop header
LB: loop body
LE: loop exit
PB: predicated region body
PF: predicated region fallthrough
CT: control target
= control target key end

     0   :  { %s22_s0 = inlined_call_operand.vmem [shape: f32[64], index: 0, kind: input, shape index: {}]   ;;  %s23_s1 = inlined_call_operand.vmem [shape: f32[2,64], index: 1, kind: output, shape index: {}]  }
   0x1   :  { %v4_v0 = vld [vmem:[%s22_s0] ss:$0 sm:$0xff] }
   0x2   :  { %5 = vst [vmem:[%s23_s1] sm:$0x3] %v4_v0 }

// kernel: tile.242
= control target key start
LH: loop header
LB: loop body
LE: loop exit
PB: predicated region body
PF: predicated region fallthrough
CT: control target
= control target key end

     0   :  { %vm8_vm0 = vcmask 523264   ;;  %vm14_vm1 = vcmask 1048064   ;;  %s42_s0 = inlined_call_operand.vmem [shape: f32[2,64], index: 0, kind: input, shape index: {}]   ;;  %s43_s1 = inlined_call_operand.vmem [shape: f32[1,128], index: 1, kind: output, shape index: {}]  }
   0x1   :  { %v5_v0 = vld [vmem:[%s42_s0] sm:$0x3]  ;;  %s25_s0 = smov 64  }
   0x2   :  { %6 = vst [vmem:[#allocation1] sm:$0x3] %v5_v0 }
   0x9   :  { %v11_v1 = vld [vmem:[#allocation1 + $0x1] sm:$0x1]   ;;  %v7_v2 = vld [vmem:[#allocation1] sm:$0x1]  }
   0xa   :  { %12 = vrot.lane.b32.xlu0 %v11_v1, %s25_s0  ;;  %9 = vst.msk [vmem:[#allocation0] sm:$0x1] %vm8_vm0, %v7_v2  }
  0x7c   :  { %v13_v3 = vpop.permute.xlu0 %12  }
  0x7d   :  { %15 = vst.msk [vmem:[#allocation0] sm:$0x1] %vm14_vm1, %v13_v3  }
  0x84   :  { %v20_v4 = vld [vmem:[#allocation0] sm:$0x1] }
  0x85   :  { %23 = vst [vmem:[%s43_s1] sm:$0x1] %v20_v4 }

// kernel: resnet_forward.56
= control target key start
LH: loop header
LB: loop body
LE: loop exit
PB: predicated region body
PF: predicated region fallthrough
CT: control target
= control target key end

     0   :  { %s285_s0 = inlined_call_operand.vmem [shape: bf16[64,128], index: 0, kind: input, shape index: {}]   ;;  %s286_s1 = inlined_call_operand.vmem [shape: bf16[64,128], index: 1, kind: input, shape index: {}]   ;;  %s287_s2 = inlined_call_operand.vmem [shape: f32[1,128], index: 2, kind: input, shape index: {}]   ;;  %s288_s3 = inlined_call_operand.vmem [shape: f32[1,128], index: 3, kind: input, shape index: {}]   ;;  %s289_s4 = inlined_call_operand.vmem [shape: bf16[64,128], index: 4, kind: output, shape index: {}]  }
   0x1   :  { %v158_v0 = vld [vmem:[%s285_s0] sm:$0xff]   ;;  %v209_v5 = vld [vmem:[%s285_s0 + $0x8] sm:$0xff]   ;;  %v210_v12 = vld [vmem:[%s285_s0 + $0x10] sm:$0xff]  }
   0x2   :  { %v139_v1 = vld [vmem:[%s287_s2] ss:$0 sm:$0xff]  ;;  %v159_v2 = vunpack.c.l.bf16 %v158_v0  ;;  %v160_v3 = vunpack.c.h.bf16 %v158_v0  ;;  %v212_v6 = vld [vmem:[%s286_s1 + $0x8] sm:$0xff]   ;;  %v163_v10 = vunpack.c.l.bf16 %v209_v5  ;;  %v164_v11 = vunpack.c.h.bf16 %v209_v5  ;;  %v213_v13 = vld [vmem:[%s286_s1 + $0x10] sm:$0xff]  }
   0x3   :  { %v174_v4 = vld [vmem:[%s286_s1] sm:$0xff]   ;;  %v179_v16 = vunpack.c.l.bf16 %v212_v6  ;;  %v180_v17 = vunpack.c.h.bf16 %v212_v6  ;;  %v167_v20 = vunpack.c.l.bf16 %v210_v12  ;;  %v168_v21 = vunpack.c.h.bf16 %v210_v12  ;;  %v211_v22 = vld [vmem:[%s285_s0 + $0x18] sm:$0xff]  }
   0x4   :  { %v140_v7 = vld [vmem:[%s288_s3] ss:$0 sm:$0xff]  ;;  %v175_v8 = vunpack.c.l.bf16 %v174_v4  ;;  %v176_v9 = vunpack.c.h.bf16 %v174_v4  ;;  %v40_v14 = vmul.f32 %v159_v2, %v139_v1  ;;  %v41_v15 = vmul.f32 %v160_v3, %v139_v1  ;;  %v214_v39 = vld [vmem:[%s286_s1 + $0x18] sm:$0xff]  }
   0x5   :  { %v42_v18 = vmul.f32 %v163_v10, %v139_v1  ;;  %v43_v19 = vmul.f32 %v164_v11, %v139_v1  ;;  %v183_v25 = vunpack.c.l.bf16 %v213_v13  ;;  %v184_v26 = vunpack.c.h.bf16 %v213_v13 }
   0x6   :  { %v55_v23 = vadd.f32 %v140_v7, %v40_v14  ;;  %v56_v24 = vadd.f32 %v140_v7, %v41_v15  ;;  %v44_v29 = vmul.f32 %v167_v20, %v139_v1  ;;  %v45_v30 = vmul.f32 %v168_v21, %v139_v1 }
   0x7   :  { %v57_v27 = vadd.f32 %v140_v7, %v42_v18  ;;  %v58_v28 = vadd.f32 %v140_v7, %v43_v19  ;;  %v171_v33 = vunpack.c.l.bf16 %v211_v22  ;;  %v172_v34 = vunpack.c.h.bf16 %v211_v22 }
   0x8   :  { %v79_v31 = vadd.f32 %v175_v8, %v55_v23  ;;  %v80_v32 = vadd.f32 %v176_v9, %v56_v24  ;;  %v59_v37 = vadd.f32 %v140_v7, %v44_v29  ;;  %v60_v38 = vadd.f32 %v140_v7, %v45_v30 }
   0x9   :  { %v81_v35 = vadd.f32 %v179_v16, %v57_v27  ;;  %v82_v36 = vadd.f32 %v180_v17, %v58_v28  ;;  %v46_v42 = vmul.f32 %v171_v33, %v139_v1  ;;  %v47_v43 = vmul.f32 %v172_v34, %v139_v1 }
   0xa   :  { %v87_v40 = vmax.f32 %v79_v31, 0.0  ;;  %v88_v41 = vmax.f32 %v80_v32, 0.0  ;;  %v83_v46 = vadd.f32 %v183_v25, %v59_v37  ;;  %v84_v47 = vadd.f32 %v184_v26, %v60_v38 }
   0xb   :  { %v89_v44 = vmax.f32 %v81_v35, 0.0  ;;  %v90_v45 = vmax.f32 %v82_v36, 0.0  ;;  %v61_v49 = vadd.f32 %v140_v7, %v46_v42  ;;  %v62_v50 = vadd.f32 %v140_v7, %v47_v43 }
   0xc   :  { %v192_v48 = vpack.c.bf16 %v88_v41, %v87_v40  ;;  %v187_v51 = vunpack.c.l.bf16 %v214_v39  ;;  %v91_v53 = vmax.f32 %v83_v46, 0.0  ;;  %v92_v54 = vmax.f32 %v84_v47, 0.0 }
   0xd   :  { %v197_v52 = vpack.c.bf16 %v90_v45, %v89_v44  ;;  %v188_v55 = vunpack.c.h.bf16 %v214_v39 }
   0xe   :  { %193 = vst [vmem:[%s289_s4] sm:$0xff] %v192_v48   ;;  %v85_v56 = vadd.f32 %v187_v51, %v61_v49  ;;  %v202_v57 = vpack.c.bf16 %v92_v54, %v91_v53 }
   0xf   :  { %215 = vst [vmem:[%s289_s4 + $0x8] sm:$0xff] %v197_v52   ;;  %v86_v58 = vadd.f32 %v188_v55, %v62_v50 }
  0x10   :  { %v93_v59 = vmax.f32 %v85_v56, 0.0  ;;  %216 = vst [vmem:[%s289_s4 + $0x10] sm:$0xff] %v202_v57  }
  0x11   :  { %v94_v60 = vmax.f32 %v86_v58, 0.0 }
  0x13   :  { %v207_v61 = vpack.c.bf16 %v94_v60, %v93_v59 }
  0x15   :  { %217 = vst [vmem:[%s289_s4 + $0x18] sm:$0xff] %v207_v61  }

// kernel: resnet_forward.68
= control target key start
LH: loop header
LB: loop body
LE: loop exit
PB: predicated region body
PF: predicated region fallthrough
CT: control target
= control target key end

     0   :  { %vm208_vm0 = vcmask 519168   ;;  %vm217_vm1 = vcmask 523264   ;;  %s496_s1 = inlined_call_operand.vmem [shape: bf16[128,64], index: 1, kind: input, shape index: {}]   ;;  %s497_s0 = inlined_call_operand.vmem [shape: bf16[64,128], index: 0, kind: input, shape index: {}]   ;;  %s498_s2 = inlined_call_operand.vmem [shape: bf16[64,64], index: 2, kind: output, shape index: {0}]   ;;  %s499_s3 = inlined_call_operand.vmem [shape: f32[8,64], index: 3, kind: output, shape index: {1}]   ;;  %s500_s4 = inlined_call_operand.vmem [shape: f32[8,64], index: 4, kind: output, shape index: {2}]  }
   0x1   :  { %v367_v0 = vld [vmem:[%s496_s1 + $0x38] sm:$0xff]   ;;  %v368_v1 = vld [vmem:[%s496_s1 + $0x30] sm:$0xff]   ;;  %v369_v2 = vld [vmem:[%s496_s1 + $0x28] sm:$0xff]  }
   0x2   :  { %327 = vmatprep.subr.bf16.mxu0 %v367_v0  ;;  %351 = vmatprep.subr.bf16.mxu1 %v367_v0  ;;  %v370_v3 = vld [vmem:[%s496_s1 + $0x20] sm:$0xff]   ;;  %v377_v5 = vld [vmem:[%s497_s0 + $0x10] sm:$0xff]   ;;  %v371_v6 = vld [vmem:[%s496_s1 + $0x18] sm:$0xff]  }
   0x3   :  { %328 = vmatpush3.bf16.msra.mxu0 %v367_v0  ;;  %359 = vmatpush3.bf16.msra.mxu1 %v367_v0  ;;  %v375_v4 = vld [vmem:[%s497_s0] sm:$0xff]   ;;  %v372_v7 = vld [vmem:[%s496_s1 + $0x10] sm:$0xff]   ;;  %v373_v8 = vld [vmem:[%s496_s1 + $0x8] sm:$0xff]  }
   0x4   :  { %329 = vmatprep.subr.bf16.mxu0 %v368_v1  ;;  %352 = vmatprep.subr.bf16.mxu1 %v368_v1  ;;  %v374_v9 = vld [vmem:[%s496_s1] sm:$0xff]   ;;  %v376_v10 = vld [vmem:[%s497_s0 + $0x8] sm:$0xff]   ;;  %v378_v11 = vld [vmem:[%s497_s0 + $0x18] sm:$0xff]  }
   0x5   :  { %343 = vmatprep.mubr.bf16.mxu0 %v375_v4  ;;  %347 = vmatprep.mubr.bf16.mxu1 %v377_v5 }
   0x7   :  { %330 = vmatpush3.bf16.msra.mxu0 %v368_v1  ;;  %360 = vmatpush3.bf16.msra.mxu1 %v368_v1 }
   0x8   :  { %331 = vmatprep.subr.bf16.mxu0 %v369_v2  ;;  %353 = vmatprep.subr.bf16.mxu1 %v369_v2 }
   0xb   :  { %332 = vmatpush3.bf16.msra.mxu0 %v369_v2  ;;  %361 = vmatpush3.bf16.msra.mxu1 %v369_v2 }
   0xc   :  { %333 = vmatprep.subr.bf16.mxu0 %v370_v3  ;;  %354 = vmatprep.subr.bf16.mxu1 %v370_v3 }
   0xf   :  { %334 = vmatpush3.bf16.msra.mxu0 %v370_v3  ;;  %362 = vmatpush3.bf16.msra.mxu1 %v370_v3  ;;  %v268_v3 = vlaneseq }
  0x10   :  { %335 = vmatprep.subr.bf16.mxu0 %v371_v6  ;;  %355 = vmatprep.subr.bf16.mxu1 %v371_v6 }
  0x13   :  { %336 = vmatpush3.bf16.msra.mxu0 %v371_v6  ;;  %363 = vmatpush3.bf16.msra.mxu1 %v371_v6 }
  0x14   :  { %337 = vmatprep.subr.bf16.mxu0 %v372_v7  ;;  %356 = vmatprep.subr.bf16.mxu1 %v372_v7 }
  0x17   :  { %338 = vmatpush3.bf16.msra.mxu0 %v372_v7  ;;  %364 = vmatpush3.bf16.msra.mxu1 %v372_v7 }
  0x18   :  { %339 = vmatprep.subr.bf16.mxu0 %v373_v8  ;;  %357 = vmatprep.subr.bf16.mxu1 %v373_v8 }
  0x1b   :  { %340 = vmatpush3.bf16.msra.mxu0 %v373_v8  ;;  %365 = vmatpush3.bf16.msra.mxu1 %v373_v8  ;;  %v269_v8 = vshrl.u32 %v268_v3, 7 }
  0x1c   :  { %341 = vmatprep.subr.bf16.mxu0 %v374_v9  ;;  %358 = vmatprep.subr.bf16.mxu1 %v374_v9 }
  0x1d   :  { %vm270_vm2 = vcmp.eq.s32.totalorder %v269_v8, 0 }
  0x1f   :  { %342 = vmatpush3.bf16.msra.mxu0 %v374_v9  ;;  %366 = vmatpush3.bf16.msra.mxu1 %v374_v9 }
  0x22   :  { %344 = vmatmul.mubr.bf16.vlgmr.msra.gmra.mxu0 %v376_v10  ;;  %348 = vmatmul.mubr.bf16.vlgmr.msra.gmra.mxu1 %v378_v11 }
  0xe2   :  { %v345_v12 = vpop.f32.mrf.mxu0  ;;  %v349_v13 = vpop.f32.mrf.mxu1 }
  0xe3   :  { %v309_v14 = vpack.c.bf16 %v345_v12, %v345_v12  ;;  %v313_v15 = vpack.c.bf16 %v349_v13, %v349_v13  ;;  %v241_v24 = vmul.f32 %v345_v12, %v345_v12  ;;  %v221_v34 = vsel %vm217_vm1, %v345_v12, 0.0 }
  0xe4   :  { %v145_v16 = vpop.f32.mrf.mxu0  ;;  %v161_v17 = vpop.f32.mrf.mxu1  ;;  %v245_v50 = vmul.f32 %v349_v13, %v349_v13  ;;  %v229_v55 = vsel %vm217_vm1, %v349_v13, 0.0 }
  0xe5   :  { %211 = vst.msk [vmem:[%s498_s2 + $0x8] sm:$0xf] %vm208_vm0, %v309_v14  ;;  %v307_v18 = vpack.c.bf16 %v145_v16, %v145_v16  ;;  %215 = vst.msk [vmem:[%s498_s2 + $0x18] sm:$0xf] %vm208_vm0, %v313_v15  ;;  %v311_v20 = vpack.c.bf16 %v161_v17, %v161_v17  ;;  %v239_v22 = vmul.f32 %v145_v16, %v145_v16  ;;  %v218_v28 = vsel %vm217_vm1, %v145_v16, 0.0 }
  0xe6   :  { %v346_v19 = vpop.f32.mrf.mxu0  ;;  %v350_v21 = vpop.f32.mrf.mxu1  ;;  %v250_v40 = vsel %vm217_vm1, %v241_v24, 0.0  ;;  %v243_v42 = vmul.f32 %v161_v17, %v161_v17  ;;  %v225_v46 = vsel %vm217_vm1, %v161_v17, 0.0  ;;  %v258_v60 = vsel %vm217_vm1, %v245_v50, 0.0 }
  0xe7   :  { %209 = vst.msk [vmem:[%s498_s2] sm:$0xf] %vm208_vm0, %v307_v18  ;;  %v310_v23 = vpack.c.bf16 %v346_v19, %v346_v19  ;;  %213 = vst.msk [vmem:[%s498_s2 + $0x10] sm:$0xf] %vm208_vm0, %v311_v20  ;;  %v314_v26 = vpack.c.bf16 %v350_v21, %v350_v21  ;;  %v247_v35 = vsel %vm217_vm1, %v239_v22, 0.0  ;;  %v242_v36 = vmul.f32 %v346_v19, %v346_v19 }
  0xe8   :  { %v148_v25 = vpop.f32.mrf.mxu0  ;;  %v164_v27 = vpop.f32.mrf.mxu1  ;;  %v223_v41 = vsel %vm217_vm1, %v346_v19, 0.0  ;;  %v254_v51 = vsel %vm217_vm1, %v243_v42, 0.0  ;;  %v246_v56 = vmul.f32 %v350_v21, %v350_v21  ;;  %v231_v61 = vsel %vm217_vm1, %v350_v21, 0.0 }
  0xe9   :  { %212 = vst.msk [vmem:[%s498_s2 + $0xc] sm:$0xf] %vm208_vm0, %v310_v23  ;;  %v308_v29 = vpack.c.bf16 %v148_v25, %v148_v25  ;;  %v219_v30 = vsel %vm217_vm1, %v148_v25, 0.0  ;;  %v240_v31 = vmul.f32 %v148_v25, %v148_v25  ;;  %216 = vst.msk [vmem:[%s498_s2 + $0x1c] sm:$0xf] %vm208_vm0, %v314_v26  ;;  %v312_v33 = vpack.c.bf16 %v164_v27, %v164_v27 }
  0xea   :  { %v220_v32 = vadd.f32 %v219_v30, %v218_v28  ;;  %v252_v45 = vsel %vm217_vm1, %v242_v36, 0.0  ;;  %v244_v47 = vmul.f32 %v164_v27, %v164_v27  ;;  %v227_v52 = vsel %vm217_vm1, %v164_v27, 0.0 }
  0xeb   :  { %210 = vst.msk [vmem:[%s498_s2 + $0x4] sm:$0xf] %vm208_vm0, %v308_v29  ;;  %v248_v37 = vsel %vm217_vm1, %v240_v31, 0.0  ;;  %214 = vst.msk [vmem:[%s498_s2 + $0x14] sm:$0xf] %vm208_vm0, %v312_v33  ;;  %v260_v0 = vsel %vm217_vm1, %v246_v56, 0.0 }
  0xec   :  { %v222_v38 = vadd.f32 %v221_v34, %v220_v32  ;;  %v249_v39 = vadd.f32 %v248_v37, %v247_v35  ;;  %v256_v57 = vsel %vm217_vm1, %v244_v47, 0.0 }
  0xee   :  { %v251_v43 = vadd.f32 %v250_v40, %v249_v39  ;;  %v224_v44 = vadd.f32 %v223_v41, %v222_v38 }
  0xf0   :  { %v226_v48 = vadd.f32 %v225_v46, %v224_v44  ;;  %v253_v49 = vadd.f32 %v252_v45, %v251_v43 }
  0xf2   :  { %v228_v53 = vadd.f32 %v227_v52, %v226_v48  ;;  %v255_v54 = vadd.f32 %v254_v51, %v253_v49 }
  0xf4   :  { %v230_v58 = vadd.f32 %v229_v55, %v228_v53  ;;  %v257_v59 = vadd.f32 %v256_v57, %v255_v54 }
  0xf6   :  { %v232_v62 = vadd.f32 %v231_v61, %v230_v58  ;;  %v259_v63 = vadd.f32 %v258_v60, %v257_v59 }
  0xf8   :  { %v233_v1 = vrot.slane %v232_v62, 4  ;;  %v261_v2 = vadd.f32 %v260_v0, %v259_v63 }
  0xfa   :  { %v234_v4 = vadd.f32 %v233_v1, %v232_v62  ;;  %v262_v5 = vrot.slane %v261_v2, 4 }
  0xfc   :  { %v235_v6 = vrot.slane %v234_v4, 2  ;;  %v263_v7 = vadd.f32 %v262_v5, %v261_v2 }
  0xfe   :  { %v236_v9 = vadd.f32 %v235_v6, %v234_v4  ;;  %v264_v10 = vrot.slane %v263_v7, 2 }
 0x100   :  { %v237_v11 = vrot.slane %v236_v9, 1  ;;  %v265_v12 = vadd.f32 %v264_v10, %v263_v7 }
 0x102   :  { %v238_v13 = vadd.f32 %v237_v11, %v236_v9  ;;  %v266_v14 = vrot.slane %v265_v12, 1 }
 0x104   :  { %v267_v15 = vadd.f32 %v266_v14, %v265_v12  ;;  %v271_v16 = vsel %vm270_vm2, %v238_v13, 0.0 }
 0x105   :  { %272 = vst.msk [vmem:[%s499_s3] sm:$0xff] %vm217_vm1, %v271_v16 }
 0x106   :  { %v273_v17 = vsel %vm270_vm2, %v267_v15, 0.0 }
 0x107   :  { %274 = vst.msk [vmem:[%s500_s4] sm:$0xff] %vm217_vm1, %v273_v17 }

// kernel: resnet_forward.66
= control target key start
LH: loop header
LB: loop body
LE: loop exit
PB: predicated region body
PF: predicated region fallthrough
CT: control target
= control target key end

     0   :  { %s140_s0 = inlined_call_operand.vmem [shape: bf16[32,128], index: 0, kind: input, shape index: {}]   ;;  %s141_s1 = inlined_call_operand.vmem [shape: f32[1,128], index: 1, kind: input, shape index: {}]   ;;  %s142_s2 = inlined_call_operand.vmem [shape: f32[1,128], index: 2, kind: input, shape index: {}]   ;;  %s143_s3 = inlined_call_operand.vmem [shape: bf16[32,128], index: 3, kind: output, shape index: {}]  }
   0x1   :  { %v83_v0 = vld [vmem:[%s140_s0] sm:$0xff]   ;;  %v100_v4 = vld [vmem:[%s140_s0 + $0x8] sm:$0xff]  }
   0x2   :  { %v72_v1 = vld [vmem:[%s141_s1] ss:$0 sm:$0xff]  ;;  %v84_v2 = vunpack.c.l.bf16 %v83_v0  ;;  %v85_v3 = vunpack.c.h.bf16 %v83_v0  ;;  %v88_v6 = vunpack.c.l.bf16 %v100_v4  ;;  %v89_v7 = vunpack.c.h.bf16 %v100_v4 }
   0x3   :  { %v73_v5 = vld [vmem:[%s142_s2] ss:$0 sm:$0xff] }
   0x4   :  { %v29_v8 = vmul.f32 %v84_v2, %v72_v1  ;;  %v30_v9 = vmul.f32 %v85_v3, %v72_v1  ;;  %v31_v10 = vmul.f32 %v88_v6, %v72_v1  ;;  %v32_v11 = vmul.f32 %v89_v7, %v72_v1 }
   0x6   :  { %v40_v12 = vadd.f32 %v73_v5, %v29_v8  ;;  %v41_v13 = vadd.f32 %v73_v5, %v30_v9  ;;  %v42_v14 = vadd.f32 %v73_v5, %v31_v10  ;;  %v43_v15 = vadd.f32 %v73_v5, %v32_v11 }
   0x8   :  { %v44_v16 = vmax.f32 %v40_v12, 0.0  ;;  %v45_v17 = vmax.f32 %v41_v13, 0.0  ;;  %v46_v18 = vmax.f32 %v42_v14, 0.0  ;;  %v47_v19 = vmax.f32 %v43_v15, 0.0 }
   0xa   :  { %v93_v20 = vpack.c.bf16 %v45_v17, %v44_v16  ;;  %v98_v21 = vpack.c.bf16 %v47_v19, %v46_v18 }
   0xc   :  { %94 = vst [vmem:[%s143_s3] sm:$0xff] %v93_v20   ;;  %101 = vst [vmem:[%s143_s3 + $0x8] sm:$0xff] %v98_v21  }

// kernel: resnet_forward.65
= control target key start
LH: loop header
LB: loop body
LE: loop exit
PB: predicated region body
PF: predicated region fallthrough
CT: control target
= control target key end

     0   :  { %vm449_vm0 = vcmask 519168   ;;  %vm458_vm1 = vcmask 523264   ;;  %s885_s1 = inlined_call_operand.vmem [shape: bf16[384,64], index: 1, kind: input, shape index: {}]   ;;  %s886_s0 = inlined_call_operand.vmem [shape: bf16[64,384], index: 0, kind: input, shape index: {}]   ;;  %s887_s2 = inlined_call_operand.vmem [shape: bf16[64,64], index: 2, kind: output, shape index: {0}]   ;;  %s888_s3 = inlined_call_operand.vmem [shape: f32[8,64], index: 3, kind: output, shape index: {1}]   ;;  %s889_s4 = inlined_call_operand.vmem [shape: f32[8,64], index: 4, kind: output, shape index: {2}]  }
   0x1   :  { %v656_v0 = vld [vmem:[%s885_s1 + $0x78] sm:$0xff]   ;;  %v659_v3 = vld [vmem:[%s885_s1 + $0x70] sm:$0xff]   ;;  %v662_v6 = vld [vmem:[%s885_s1 + $0x68] sm:$0xff]  }
   0x2   :  { %v657_v1 = vld [vmem:[%s885_s1 + $0x38] sm:$0xff]   ;;  %580 = vmatprep.subr.bf16.mxu0 %v656_v0  ;;  %v660_v4 = vld [vmem:[%s885_s1 + $0x30] sm:$0xff]   ;;  %v663_v7 = vld [vmem:[%s885_s1 + $0x28] sm:$0xff]  }
   0x3   :  { %v658_v2 = vld [vmem:[%s885_s1 + $0xb8] sm:$0xff]   ;;  %581 = vmatpush3.bf16.msra.mxu0 %v657_v1  ;;  %v661_v5 = vld [vmem:[%s885_s1 + $0xb0] sm:$0xff]   ;;  %v664_v8 = vld [vmem:[%s885_s1 + $0xa8] sm:$0xff]  }
   0x4   :  { %632 = vmatprep.subr.bf16.mxu1 %v658_v2  ;;  %582 = vmatprep.subr.bf16.mxu0 %v659_v3  ;;  %v665_v9 = vld [vmem:[%s885_s1 + $0x60] sm:$0xff]   ;;  %v668_v12 = vld [vmem:[%s885_s1 + $0x58] sm:$0xff]   ;;  %v671_v15 = vld [vmem:[%s885_s1 + $0x50] sm:$0xff]  }
   0x5   :  { %633 = vmatpush3.bf16.msra.mxu1 %v658_v2  ;;  %v666_v10 = vld [vmem:[%s885_s1 + $0x20] sm:$0xff]   ;;  %v670_v13 = vld [vmem:[%s885_s1 + $0x98] sm:$0xff]   ;;  %v673_v16 = vld [vmem:[%s885_s1 + $0x90] sm:$0xff]  }
   0x6   :  { %634 = vmatprep.subr.bf16.mxu1 %v661_v5  ;;  %v667_v11 = vld [vmem:[%s885_s1 + $0xa0] sm:$0xff]   ;;  %v669_v14 = vld [vmem:[%s885_s1 + $0x18] sm:$0xff]   ;;  %v672_v17 = vld [vmem:[%s885_s1 + $0x10] sm:$0xff]  }
   0x7   :  { %583 = vmatpush3.bf16.msra.mxu0 %v660_v4  ;;  %v674_v18 = vld [vmem:[%s885_s1 + $0x48] sm:$0xff]   ;;  %v677_v21 = vld [vmem:[%s885_s1 + $0x40] sm:$0xff]   ;;  %v692_v32 = vld [vmem:[%s886_s0 + $0x50] ss:$12 sps:$4 sm:$0xff]  }
   0x8   :  { %584 = vmatprep.subr.bf16.mxu0 %v662_v6  ;;  %v675_v19 = vld [vmem:[%s885_s1 + $0x8] sm:$0xff]   ;;  %v679_v22 = vld [vmem:[%s885_s1 + $0x80] sm:$0xff]   ;;  %v691_v33 = vld [vmem:[%s886_s0 + $0x30] ss:$12 sps:$4 sm:$0xff]  }
   0x9   :  { %635 = vmatpush3.bf16.msra.mxu1 %v661_v5  ;;  %v676_v20 = vld [vmem:[%s885_s1 + $0x88] sm:$0xff]   ;;  %v682_v23 = vld [vmem:[%s886_s0 + $0x4] ss:$12 sps:$4 sm:$0xff]   ;;  %v688_v31 = vld [vmem:[%s886_s0 + $0x34] ss:$12 sps:$4 sm:$0xff]  }
   0xa   :  { %636 = vmatprep.subr.bf16.mxu1 %v664_v8  ;;  %v683_v24 = vld [vmem:[%s886_s0 + $0x8] ss:$12 sps:$4 sm:$0xff]   ;;  %v678_v25 = vld [vmem:[%s885_s1] sm:$0xff]   ;;  %319 = vmatprep.mubr.bf16.mxu0 %v682_v23  ;;  %v693_v34 = vld [vmem:[%s886_s0 + $0x4c] ss:$12 sps:$4 sm:$0xff]  }
   0xb   :  { %585 = vmatpush3.bf16.msra.mxu0 %v663_v7  ;;  %648 = vmatprep.mubr.bf16.mxu1 %v683_v24  ;;  %v680_v26 = vld [vmem:[%s886_s0] ss:$12 sps:$4 sm:$0xff]   ;;  %v685_v27 = vld [vmem:[%s886_s0 + $0x1c] ss:$12 sps:$4 sm:$0xff]   ;;  %v690_v29 = vld [vmem:[%s886_s0 + $0x38] ss:$12 sps:$4 sm:$0xff]  }
   0xc   :  { %586 = vmatprep.subr.bf16.mxu0 %v665_v9  ;;  %v684_v28 = vld [vmem:[%s886_s0 + $0x20] ss:$12 sps:$4 sm:$0xff]   ;;  %v687_v30 = vld [vmem:[%s886_s0 + $0x18] ss:$12 sps:$4 sm:$0xff]   ;;  %v695_v35 = vld [vmem:[%s886_s0 + $0x48] ss:$12 sps:$4 sm:$0xff]  }
   0xd   :  { %637 = vmatpush3.bf16.msra.mxu1 %v664_v8 }
   0xe   :  { %638 = vmatprep.subr.bf16.mxu1 %v667_v11 }
   0xf   :  { %587 = vmatpush3.bf16.msra.mxu0 %v666_v10 }
  0x10   :  { %588 = vmatprep.subr.bf16.mxu0 %v668_v12 }
  0x11   :  { %639 = vmatpush3.bf16.msra.mxu1 %v667_v11 }
  0x12   :  { %640 = vmatprep.subr.bf16.mxu1 %v670_v13 }
  0x13   :  { %589 = vmatpush3.bf16.msra.mxu0 %v669_v14 }
  0x14   :  { %590 = vmatprep.subr.bf16.mxu0 %v671_v15 }
  0x15   :  { %641 = vmatpush3.bf16.msra.mxu1 %v670_v13 }
  0x16   :  { %642 = vmatprep.subr.bf16.mxu1 %v673_v16 }
  0x17   :  { %591 = vmatpush3.bf16.msra.mxu0 %v672_v17 }
  0x18   :  { %592 = vmatprep.subr.bf16.mxu0 %v674_v18 }
  0x19   :  { %643 = vmatpush3.bf16.msra.mxu1 %v673_v16 }
  0x1a   :  { %644 = vmatprep.subr.bf16.mxu1 %v676_v20 }
  0x1b   :  { %593 = vmatpush3.bf16.msra.mxu0 %v675_v19 }
  0x1c   :  { %594 = vmatprep.subr.bf16.mxu0 %v677_v21 }
  0x1d   :  { %645 = vmatpush3.bf16.msra.mxu1 %v676_v20 }
  0x1e   :  { %646 = vmatprep.subr.bf16.mxu1 %v679_v22 }
  0x1f   :  { %595 = vmatpush3.bf16.msra.mxu0 %v678_v25 }
  0x21   :  { %647 = vmatpush3.bf16.msra.mxu1 %v679_v22 }
  0x22   :  { %320 = vmatmul.mubr.bf16.vlgmr.msra.gmra.mxu0 %v680_v26 }
  0x23   :  { %327 = vmatprep.mubr.bf16.mxu0 %v685_v27 }
  0x24   :  { %649 = vmatmul.mubr.bf16.vlgmr.msra.gmra.mxu1 %v684_v28 }
  0x25   :  { %652 = vmatprep.mubr.bf16.mxu1 %v690_v29 }
  0x2a   :  { %328 = vmatmul.mubr.bf16.gmra.mxu0 %v687_v30 }
  0x2b   :  { %335 = vmatprep.mubr.bf16.mxu0 %v688_v31 }
  0x2c   :  { %653 = vmatmul.mubr.bf16.gmra.mxu1 %v692_v32 }
  0x32   :  { %336 = vmatmul.mubr.bf16.gmra.mxu0 %v691_v33 }
  0x33   :  { %343 = vmatprep.mubr.bf16.mxu0 %v693_v34 }
  0x3a   :  { %344 = vmatmul.mubr.bf16.gmra.mxu0 %v695_v35 }
  0xe2   :  { %v596_v36 = vpop.f32.mrf.mxu0 }
  0xe4   :  { %v597_v37 = vpop.f32.mrf.mxu0  ;;  %v650_v38 = vpop.f32.mrf.mxu1 }
  0xe5   :  { %v598_v39 = vadd.f32 %v597_v37, %v596_v36 }
  0xe6   :  { %v599_v40 = vpop.f32.mrf.mxu0  ;;  %v386_v41 = vpop.f32.mrf.mxu1 }
  0xe7   :  { %v387_v42 = vadd.f32 %v598_v39, %v386_v41 }
  0xe8   :  { %v600_v43 = vpop.f32.mrf.mxu0  ;;  %v651_v44 = vpop.f32.mrf.mxu1 }
  0xe9   :  { %v572_v45 = vpack.c.bf16 %v387_v42, %v387_v42  ;;  %v601_v46 = vadd.f32 %v600_v43, %v599_v40  ;;  %v480_v2 = vmul.f32 %v387_v42, %v387_v42  ;;  %v459_v8 = vsel %vm458_vm1, %v387_v42, 0.0 }
  0xea   :  { %v602_v47 = vpop.f32.mrf.mxu0  ;;  %v389_v48 = vpop.f32.mrf.mxu1 }
  0xeb   :  { %450 = vst.msk [vmem:[%s887_s2] sm:$0xf] %vm449_vm0, %v572_v45  ;;  %v390_v49 = vadd.f32 %v601_v46, %v389_v48  ;;  %v488_v15 = vsel %vm458_vm1, %v480_v2, 0.0 }
  0xec   :  { %v603_v50 = vpop.f32.mrf.mxu0  ;;  %v654_v54 = vpop.f32.mrf.mxu1 }
  0xed   :  { %v573_v51 = vpack.c.bf16 %v390_v49, %v390_v49  ;;  %v604_v52 = vadd.f32 %v603_v50, %v602_v47  ;;  %v481_v63 = vmul.f32 %v390_v49, %v390_v49  ;;  %v460_v5 = vsel %vm458_vm1, %v390_v49, 0.0 }
  0xee   :  { %v605_v53 = vpop.f32.mrf.mxu0  ;;  %v402_v60 = vpop.f32.mrf.mxu1  ;;  %v461_v16 = vadd.f32 %v460_v5, %v459_v8 }
  0xef   :  { %451 = vst.msk [vmem:[%s887_s2 + $0x4] sm:$0xf] %vm449_vm0, %v573_v51  ;;  %v395_v55 = vadd.f32 %v650_v38, %v604_v52  ;;  %v489_v11 = vsel %vm458_vm1, %v481_v63, 0.0 }
  0xf0   :  { %v606_v56 = vpop.f32.mrf.mxu0  ;;  %v655_v4 = vpop.f32.mrf.mxu1  ;;  %v490_v23 = vadd.f32 %v489_v11, %v488_v15 }
  0xf1   :  { %v574_v57 = vpack.c.bf16 %v395_v55, %v395_v55  ;;  %v607_v58 = vadd.f32 %v606_v56, %v605_v53  ;;  %v482_v6 = vmul.f32 %v395_v55, %v395_v55  ;;  %v462_v12 = vsel %vm458_vm1, %v395_v55, 0.0 }
  0xf2   :  { %v608_v59 = vpop.f32.mrf.mxu0  ;;  %v405_v17 = vpop.f32.mrf.mxu1  ;;  %v463_v24 = vadd.f32 %v462_v12, %v461_v16 }
  0xf3   :  { %452 = vst.msk [vmem:[%s887_s2 + $0x8] sm:$0xf] %vm449_vm0, %v574_v57  ;;  %v398_v61 = vadd.f32 %v651_v44, %v607_v58  ;;  %v491_v19 = vsel %vm458_vm1, %v482_v6, 0.0 }
  0xf4   :  { %v609_v62 = vpop.f32.mrf.mxu0  ;;  %v492_v31 = vadd.f32 %v491_v19, %v490_v23 }
  0xf5   :  { %v575_v0 = vpack.c.bf16 %v398_v61, %v398_v61  ;;  %v610_v1 = vadd.f32 %v609_v62, %v608_v59  ;;  %v483_v9 = vmul.f32 %v398_v61, %v398_v61  ;;  %v464_v20 = vsel %vm458_vm1, %v398_v61, 0.0 }
  0xf6   :  { %v611_v3 = vpop.f32.mrf.mxu0  ;;  %v465_v32 = vadd.f32 %v464_v20, %v463_v24  ;;  %v509_v59 = vlaneseq }
  0xf7   :  { %453 = vst.msk [vmem:[%s887_s2 + $0xc] sm:$0xf] %vm449_vm0, %v575_v0  ;;  %v403_v7 = vadd.f32 %v610_v1, %v402_v60  ;;  %v493_v25 = vsel %vm458_vm1, %v483_v9, 0.0 }
  0xf8   :  { %v612_v10 = vpop.f32.mrf.mxu0  ;;  %v494_v38 = vadd.f32 %v493_v25, %v492_v31  ;;  %v510_v0 = vshrl.u32 %v509_v59, 7 }
  0xf9   :  { %v576_v13 = vpack.c.bf16 %v403_v7, %v403_v7  ;;  %v613_v14 = vadd.f32 %v612_v10, %v611_v3  ;;  %v484_v21 = vmul.f32 %v403_v7, %v403_v7  ;;  %v466_v27 = vsel %vm458_vm1, %v403_v7, 0.0 }
  0xfa   :  { %v614_v18 = vpop.f32.mrf.mxu0  ;;  %v467_v37 = vadd.f32 %v466_v27, %v465_v32  ;;  %vm511_vm2 = vcmp.eq.s32.totalorder %v510_v0, 0 }
  0xfb   :  { %454 = vst.msk [vmem:[%s887_s2 + $0x10] sm:$0xf] %vm449_vm0, %v576_v13  ;;  %v406_v22 = vadd.f32 %v613_v14, %v405_v17  ;;  %v495_v34 = vsel %vm458_vm1, %v484_v21, 0.0 }
  0xfc   :  { %v615_v26 = vpop.f32.mrf.mxu0  ;;  %v496_v45 = vadd.f32 %v495_v34, %v494_v38 }
  0xfd   :  { %v577_v28 = vpack.c.bf16 %v406_v22, %v406_v22  ;;  %v485_v29 = vmul.f32 %v406_v22, %v406_v22  ;;  %v616_v30 = vadd.f32 %v615_v26, %v614_v18  ;;  %v468_v35 = vsel %vm458_vm1, %v406_v22, 0.0 }
  0xfe   :  { %v617_v33 = vpop.f32.mrf.mxu0  ;;  %v469_v46 = vadd.f32 %v468_v35, %v467_v37 }
  0xff   :  { %455 = vst.msk [vmem:[%s887_s2 + $0x14] sm:$0xf] %vm449_vm0, %v577_v28  ;;  %v411_v36 = vadd.f32 %v654_v54, %v616_v30  ;;  %v497_v39 = vsel %vm458_vm1, %v485_v29, 0.0 }
 0x100   :  { %v618_v40 = vpop.f32.mrf.mxu0  ;;  %v498_v49 = vadd.f32 %v497_v39, %v496_v45 }
 0x101   :  { %v578_v41 = vpack.c.bf16 %v411_v36, %v411_v36  ;;  %v470_v42 = vsel %vm458_vm1, %v411_v36, 0.0  ;;  %v486_v43 = vmul.f32 %v411_v36, %v411_v36  ;;  %v619_v44 = vadd.f32 %v618_v40, %v617_v33 }
 0x102   :  { %v471_v50 = vadd.f32 %v470_v42, %v469_v46 }
 0x103   :  { %456 = vst.msk [vmem:[%s887_s2 + $0x18] sm:$0xf] %vm449_vm0, %v578_v41  ;;  %v499_v47 = vsel %vm458_vm1, %v486_v43, 0.0  ;;  %v414_v48 = vadd.f32 %v655_v4, %v619_v44 }
 0x104   :  { %v500_v54 = vadd.f32 %v499_v47, %v498_v49 }
 0x105   :  { %v579_v51 = vpack.c.bf16 %v414_v48, %v414_v48  ;;  %v472_v52 = vsel %vm458_vm1, %v414_v48, 0.0  ;;  %v487_v53 = vmul.f32 %v414_v48, %v414_v48 }
 0x106   :  { %v473_v55 = vadd.f32 %v472_v52, %v471_v50 }
 0x107   :  { %457 = vst.msk [vmem:[%s887_s2 + $0x1c] sm:$0xf] %vm449_vm0, %v579_v51  ;;  %v501_v56 = vsel %vm458_vm1, %v487_v53, 0.0 }
 0x108   :  { %v474_v57 = vrot.slane %v473_v55, 4  ;;  %v502_v58 = vadd.f32 %v501_v56, %v500_v54 }
 0x10a   :  { %v475_v60 = vadd.f32 %v474_v57, %v473_v55  ;;  %v503_v61 = vrot.slane %v502_v58, 4 }
 0x10c   :  { %v476_v62 = vrot.slane %v475_v60, 2  ;;  %v504_v63 = vadd.f32 %v503_v61, %v502_v58 }
 0x10e   :  { %v477_v1 = vadd.f32 %v476_v62, %v475_v60  ;;  %v505_v2 = vrot.slane %v504_v63, 2 }
 0x110   :  { %v478_v3 = vrot.slane %v477_v1, 1  ;;  %v506_v4 = vadd.f32 %v505_v2, %v504_v63 }
 0x112   :  { %v479_v5 = vadd.f32 %v478_v3, %v477_v1  ;;  %v507_v6 = vrot.slane %v506_v4, 1 }
 0x114   :  { %v508_v7 = vadd.f32 %v507_v6, %v506_v4  ;;  %v512_v8 = vsel %vm511_vm2, %v479_v5, 0.0 }
 0x115   :  { %513 = vst.msk [vmem:[%s888_s3] sm:$0xff] %vm458_vm1, %v512_v8 }
 0x116   :  { %v514_v9 = vsel %vm511_vm2, %v508_v7, 0.0 }
 0x117   :  { %515 = vst.msk [vmem:[%s889_s4] sm:$0xff] %vm458_vm1, %v514_v9 }

// kernel: resnet_forward.73
= control target key start
LH: loop header
LB: loop body
LE: loop exit
PB: predicated region body
PF: predicated region fallthrough
CT: control target
= control target key end

     0   :  { %s175_s0 = inlined_call_operand.vmem [shape: bf16[32,128], index: 0, kind: input, shape index: {}]   ;;  %s176_s1 = inlined_call_operand.vmem [shape: bf16[32,128], index: 1, kind: input, shape index: {}]   ;;  %s177_s2 = inlined_call_operand.vmem [shape: f32[1,128], index: 2, kind: input, shape index: {}]   ;;  %s178_s3 = inlined_call_operand.vmem [shape: f32[1,128], index: 3, kind: input, shape index: {}]   ;;  %s179_s4 = inlined_call_operand.vmem [shape: bf16[32,128], index: 4, kind: output, shape index: {}]  }
   0x1   :  { %v98_v0 = vld [vmem:[%s175_s0] sm:$0xff]   ;;  %v123_v5 = vld [vmem:[%s175_s0 + $0x8] sm:$0xff]  }
   0x2   :  { %v87_v1 = vld [vmem:[%s177_s2] ss:$0 sm:$0xff]  ;;  %v99_v2 = vunpack.c.l.bf16 %v98_v0  ;;  %v100_v3 = vunpack.c.h.bf16 %v98_v0  ;;  %v124_v6 = vld [vmem:[%s176_s1 + $0x8] sm:$0xff]   ;;  %v103_v8 = vunpack.c.l.bf16 %v123_v5  ;;  %v104_v9 = vunpack.c.h.bf16 %v123_v5 }
   0x3   :  { %v106_v4 = vld [vmem:[%s176_s1] sm:$0xff]   ;;  %v111_v16 = vunpack.c.l.bf16 %v124_v6  ;;  %v112_v17 = vunpack.c.h.bf16 %v124_v6 }
   0x4   :  { %v88_v7 = vld [vmem:[%s178_s3] ss:$0 sm:$0xff]  ;;  %v32_v10 = vmul.f32 %v99_v2, %v87_v1  ;;  %v33_v11 = vmul.f32 %v100_v3, %v87_v1  ;;  %v107_v12 = vunpack.c.l.bf16 %v106_v4  ;;  %v108_v13 = vunpack.c.h.bf16 %v106_v4 }
   0x5   :  { %v34_v14 = vmul.f32 %v103_v8, %v87_v1  ;;  %v35_v15 = vmul.f32 %v104_v9, %v87_v1 }
   0x6   :  { %v43_v18 = vadd.f32 %v88_v7, %v32_v10  ;;  %v44_v19 = vadd.f32 %v88_v7, %v33_v11 }
   0x7   :  { %v45_v20 = vadd.f32 %v88_v7, %v34_v14  ;;  %v46_v21 = vadd.f32 %v88_v7, %v35_v15 }
   0x8   :  { %v55_v22 = vadd.f32 %v107_v12, %v43_v18  ;;  %v56_v23 = vadd.f32 %v108_v13, %v44_v19 }
   0x9   :  { %v57_v24 = vadd.f32 %v111_v16, %v45_v20  ;;  %v58_v25 = vadd.f32 %v112_v17, %v46_v21 }
   0xa   :  { %v59_v26 = vmax.f32 %v55_v22, 0.0  ;;  %v60_v27 = vmax.f32 %v56_v23, 0.0 }
   0xb   :  { %v61_v28 = vmax.f32 %v57_v24, 0.0  ;;  %v62_v29 = vmax.f32 %v58_v25, 0.0 }
   0xc   :  { %v116_v30 = vpack.c.bf16 %v60_v27, %v59_v26 }
   0xd   :  { %v121_v31 = vpack.c.bf16 %v62_v29, %v61_v28 }
   0xe   :  { %117 = vst [vmem:[%s179_s4] sm:$0xff] %v116_v30  }
   0xf   :  { %125 = vst [vmem:[%s179_s4 + $0x8] sm:$0xff] %v121_v31  }

// kernel: resnet_forward.69
= control target key start
LH: loop header
LB: loop body
LE: loop exit
PB: predicated region body
PF: predicated region fallthrough
CT: control target
= control target key end

     0   :  { %s221_s0 = inlined_call_operand.vmem [shape: bf16[32,128], index: 0, kind: input, shape index: {}]   ;;  %s222_s1 = inlined_call_operand.vmem [shape: bf16[32,128], index: 1, kind: input, shape index: {}]   ;;  %s223_s2 = inlined_call_operand.vmem [shape: f32[1,128], index: 2, kind: input, shape index: {}]   ;;  %s224_s3 = inlined_call_operand.vmem [shape: f32[1,128], index: 3, kind: input, shape index: {}]   ;;  %s225_s4 = inlined_call_operand.vmem [shape: f32[1,128], index: 4, kind: input, shape index: {}]   ;;  %s226_s5 = inlined_call_operand.vmem [shape: f32[1,128], index: 5, kind: input, shape index: {}]   ;;  %s227_s6 = inlined_call_operand.vmem [shape: bf16[32,128], index: 6, kind: output, shape index: {}]  }
   0x1   :  { %v128_v0 = vld [vmem:[%s221_s0] sm:$0xff]   ;;  %v153_v9 = vld [vmem:[%s221_s0 + $0x8] sm:$0xff]  }
   0x2   :  { %v115_v1 = vld [vmem:[%s223_s2] ss:$0 sm:$0xff]  ;;  %v129_v2 = vunpack.c.l.bf16 %v128_v0  ;;  %v130_v3 = vunpack.c.h.bf16 %v128_v0  ;;  %v154_v10 = vld [vmem:[%s222_s1 + $0x8] sm:$0xff]   ;;  %v133_v14 = vunpack.c.l.bf16 %v153_v9  ;;  %v134_v15 = vunpack.c.h.bf16 %v153_v9 }
   0x3   :  { %v136_v4 = vld [vmem:[%s222_s1] sm:$0xff]   ;;  %v141_v18 = vunpack.c.l.bf16 %v154_v10  ;;  %v142_v19 = vunpack.c.h.bf16 %v154_v10 }
   0x4   :  { %v117_v5 = vld [vmem:[%s225_s4] ss:$0 sm:$0xff]  ;;  %v137_v7 = vunpack.c.l.bf16 %v136_v4  ;;  %v138_v8 = vunpack.c.h.bf16 %v136_v4  ;;  %v38_v11 = vmul.f32 %v129_v2, %v115_v1  ;;  %v39_v12 = vmul.f32 %v130_v3, %v115_v1 }
   0x5   :  { %v116_v6 = vld [vmem:[%s224_s3] ss:$0 sm:$0xff]  ;;  %v40_v22 = vmul.f32 %v133_v14, %v115_v1  ;;  %v41_v23 = vmul.f32 %v134_v15, %v115_v1  ;;  %v70_v26 = vmul.f32 %v141_v18, %v117_v5  ;;  %v71_v27 = vmul.f32 %v142_v19, %v117_v5 }
   0x6   :  { %v118_v13 = vld [vmem:[%s226_s5] ss:$0 sm:$0xff]  ;;  %v68_v16 = vmul.f32 %v137_v7, %v117_v5  ;;  %v69_v17 = vmul.f32 %v138_v8, %v117_v5  ;;  %v49_v20 = vadd.f32 %v116_v6, %v38_v11  ;;  %v50_v21 = vadd.f32 %v116_v6, %v39_v12 }
   0x7   :  { %v51_v28 = vadd.f32 %v116_v6, %v40_v22  ;;  %v52_v29 = vadd.f32 %v116_v6, %v41_v23  ;;  %v81_v32 = vadd.f32 %v118_v13, %v70_v26  ;;  %v82_v33 = vadd.f32 %v118_v13, %v71_v27 }
   0x8   :  { %v79_v24 = vadd.f32 %v118_v13, %v68_v16  ;;  %v80_v25 = vadd.f32 %v118_v13, %v69_v17 }
   0x9   :  { %v85_v36 = vadd.f32 %v81_v32, %v51_v28  ;;  %v86_v37 = vadd.f32 %v82_v33, %v52_v29 }
   0xa   :  { %v83_v30 = vadd.f32 %v79_v24, %v49_v20  ;;  %v84_v31 = vadd.f32 %v80_v25, %v50_v21 }
   0xb   :  { %v89_v39 = vmax.f32 %v85_v36, 0.0  ;;  %v90_v40 = vmax.f32 %v86_v37, 0.0 }
   0xc   :  { %v87_v34 = vmax.f32 %v83_v30, 0.0  ;;  %v88_v35 = vmax.f32 %v84_v31, 0.0 }
   0xd   :  { %v151_v41 = vpack.c.bf16 %v90_v40, %v89_v39 }
   0xe   :  { %v146_v38 = vpack.c.bf16 %v88_v35, %v87_v34 }
   0xf   :  { %155 = vst [vmem:[%s227_s6 + $0x8] sm:$0xff] %v151_v41  }
  0x10   :  { %147 = vst [vmem:[%s227_s6] sm:$0xff] %v146_v38  }

// kernel: resnet_forward.67
= control target key start
LH: loop header
LB: loop body
LE: loop exit
PB: predicated region body
PF: predicated region fallthrough
CT: control target
= control target key end

     0   :  { %vm690_vm0 = vcmask 519168   ;;  %vm699_vm1 = vcmask 523264   ;;  %s1306_s1 = inlined_call_operand.vmem [shape: bf16[640,64], index: 1, kind: input, shape index: {}]   ;;  %s1307_s0 = inlined_call_operand.vmem [shape: bf16[64,640], index: 0, kind: input, shape index: {}]   ;;  %s1308_s2 = inlined_call_operand.vmem [shape: bf16[64,64], index: 2, kind: output, shape index: {0}]   ;;  %s1309_s3 = inlined_call_operand.vmem [shape: f32[8,64], index: 3, kind: output, shape index: {1}]   ;;  %s1310_s4 = inlined_call_operand.vmem [shape: f32[8,64], index: 4, kind: output, shape index: {2}]  }
   0x1   :  { %v977_v0 = vld [vmem:[%s1306_s1 + $0x78] sm:$0xff]   ;;  %v981_v4 = vld [vmem:[%s1306_s1 + $0x70] sm:$0xff]   ;;  %v985_v8 = vld [vmem:[%s1306_s1 + $0x68] sm:$0xff]  }
   0x2   :  { %v978_v1 = vld [vmem:[%s1306_s1 + $0xf8] sm:$0xff]   ;;  %845 = vmatprep.subr.bf16.mxu0 %v977_v0  ;;  %v982_v5 = vld [vmem:[%s1306_s1 + $0xf0] sm:$0xff]   ;;  %v986_v9 = vld [vmem:[%s1306_s1 + $0xe8] sm:$0xff]  }
   0x3   :  { %v979_v2 = vld [vmem:[%s1306_s1 + $0x38] sm:$0xff]   ;;  %885 = vmatprep.subr.bf16.mxu1 %v978_v1  ;;  %v983_v6 = vld [vmem:[%s1306_s1 + $0x30] sm:$0xff]   ;;  %v987_v10 = vld [vmem:[%s1306_s1 + $0x28] sm:$0xff]  }
   0x4   :  { %v980_v3 = vld [vmem:[%s1306_s1 + $0xb8] sm:$0xff]   ;;  %846 = vmatpush3.bf16.msra.mxu0 %v979_v2  ;;  %v984_v7 = vld [vmem:[%s1306_s1 + $0xb0] sm:$0xff]   ;;  %v988_v11 = vld [vmem:[%s1306_s1 + $0xa8] sm:$0xff]  }
   0x5   :  { %886 = vmatpush3.bf16.msra.mxu1 %v980_v3  ;;  %847 = vmatprep.subr.bf16.mxu0 %v981_v4  ;;  %v989_v12 = vld [vmem:[%s1306_s1 + $0x60] sm:$0xff]   ;;  %v993_v16 = vld [vmem:[%s1306_s1 + $0x58] sm:$0xff]   ;;  %v997_v20 = vld [vmem:[%s1306_s1 + $0x50] sm:$0xff]  }
   0x6   :  { %887 = vmatprep.subr.bf16.mxu1 %v982_v5  ;;  %v990_v13 = vld [vmem:[%s1306_s1 + $0xe0] sm:$0xff]   ;;  %v994_v17 = vld [vmem:[%s1306_s1 + $0xd8] sm:$0xff]   ;;  %v998_v21 = vld [vmem:[%s1306_s1 + $0xd0] sm:$0xff]  }
   0x7   :  { %v991_v14 = vld [vmem:[%s1306_s1 + $0x20] sm:$0xff]   ;;  %v995_v18 = vld [vmem:[%s1306_s1 + $0x18] sm:$0xff]   ;;  %v999_v22 = vld [vmem:[%s1306_s1 + $0x10] sm:$0xff]  }
   0x8   :  { %848 = vmatpush3.bf16.msra.mxu0 %v983_v6  ;;  %v992_v15 = vld [vmem:[%s1306_s1 + $0xa0] sm:$0xff]   ;;  %v996_v19 = vld [vmem:[%s1306_s1 + $0x98] sm:$0xff]   ;;  %v1000_v23 = vld [vmem:[%s1306_s1 + $0x90] sm:$0xff]  }
   0x9   :  { %888 = vmatpush3.bf16.msra.mxu1 %v984_v7  ;;  %849 = vmatprep.subr.bf16.mxu0 %v985_v8  ;;  %v1001_v24 = vld [vmem:[%s1306_s1 + $0x48] sm:$0xff]   ;;  %v1005_v28 = vld [vmem:[%s1306_s1 + $0x40] sm:$0xff]   ;;  %v1015_v36 = vld [vmem:[%s1306_s1 + $0x138] sm:$0xff]  }
   0xa   :  { %889 = vmatprep.subr.bf16.mxu1 %v986_v9  ;;  %v1002_v25 = vld [vmem:[%s1306_s1 + $0xc8] sm:$0xff]   ;;  %v1006_v29 = vld [vmem:[%s1306_s1 + $0xc0] sm:$0xff]   ;;  %v1016_v37 = vld [vmem:[%s1306_s1 + $0x130] sm:$0xff]  }
   0xb   :  { %v1003_v26 = vld [vmem:[%s1306_s1 + $0x8] sm:$0xff]   ;;  %v1007_v30 = vld [vmem:[%s1306_s1] sm:$0xff]   ;;  %v1027_v45 = vld [vmem:[%s1307_s0 + $0x5c] ss:$20 sps:$4 sm:$0xff]  }
   0xc   :  { %850 = vmatpush3.bf16.msra.mxu0 %v987_v10  ;;  %v1004_v27 = vld [vmem:[%s1306_s1 + $0x88] sm:$0xff]   ;;  %v1008_v31 = vld [vmem:[%s1306_s1 + $0x80] sm:$0xff]   ;;  %v1031_v46 = vld [vmem:[%s1306_s1 + $0x118] sm:$0xff]  }
   0xd   :  { %890 = vmatpush3.bf16.msra.mxu1 %v988_v11  ;;  %851 = vmatprep.subr.bf16.mxu0 %v989_v12  ;;  %v1009_v32 = vld [vmem:[%s1307_s0] ss:$20 sps:$4 sm:$0xff]   ;;  %v1011_v33 = vld [vmem:[%s1307_s0 + $0x4] ss:$20 sps:$4 sm:$0xff]   ;;  %v1012_v34 = vld [vmem:[%s1307_s0 + $0x8] ss:$20 sps:$4 sm:$0xff]  }
   0xe   :  { %891 = vmatprep.subr.bf16.mxu1 %v990_v13  ;;  %v1014_v35 = vld [vmem:[%s1307_s0 + $0xc] ss:$20 sps:$4 sm:$0xff]   ;;  %495 = vmatprep.mubr.bf16.mxu0 %v1011_v33  ;;  %v1019_v39 = vld [vmem:[%s1307_s0 + $0x34] ss:$20 sps:$4 sm:$0xff]   ;;  %v1022_v42 = vld [vmem:[%s1307_s0 + $0x30] ss:$20 sps:$4 sm:$0xff]  }
   0xf   :  { %560 = vmatprep.mubr.bf16.mxu1 %v1014_v35  ;;  %v1017_v38 = vld [vmem:[%s1307_s0 + $0x2c] ss:$20 sps:$4 sm:$0xff]   ;;  %v1021_v40 = vld [vmem:[%s1307_s0 + $0x28] ss:$20 sps:$4 sm:$0xff]   ;;  %v1029_v47 = vld [vmem:[%s1307_s0 + $0x50] ss:$20 sps:$4 sm:$0xff]  }
  0x10   :  { %852 = vmatpush3.bf16.msra.mxu0 %v991_v14  ;;  %v1023_v41 = vld [vmem:[%s1306_s1 + $0x128] sm:$0xff]   ;;  %v1024_v44 = vld [vmem:[%s1306_s1 + $0x120] sm:$0xff]   ;;  %v1033_v49 = vld [vmem:[%s1307_s0 + $0x7c] ss:$20 sps:$4 sm:$0xff]  }
  0x11   :  { %892 = vmatpush3.bf16.msra.mxu1 %v992_v15  ;;  %853 = vmatprep.subr.bf16.mxu0 %v993_v16  ;;  %v1025_v43 = vld [vmem:[%s1307_s0 + $0x54] ss:$20 sps:$4 sm:$0xff]   ;;  %v1030_v48 = vld [vmem:[%s1307_s0 + $0x58] ss:$20 sps:$4 sm:$0xff]   ;;  %v1041_v55 = vld [vmem:[%s1307_s0 + $0x10] ss:$20 sps:$4 sm:$0xff]  }
  0x12   :  { %893 = vmatprep.subr.bf16.mxu1 %v994_v17  ;;  %v1035_v50 = vld [vmem:[%s1307_s0 + $0x84] ss:$20 sps:$4 sm:$0xff]   ;;  %v1032_v51 = vld [vmem:[%s1306_s1 + $0x110] sm:$0xff]   ;;  %v1039_v52 = vld [vmem:[%s1306_s1 + $0x108] sm:$0xff]  }
  0x13   :  { %v1037_v53 = vld [vmem:[%s1307_s0 + $0x78] ss:$20 sps:$4 sm:$0xff]   ;;  %v1038_v54 = vld [vmem:[%s1307_s0 + $0x80] ss:$20 sps:$4 sm:$0xff]   ;;  %v1044_v59 = vld [vmem:[%s1307_s0 + $0x88] ss:$20 sps:$4 sm:$0xff]  }
  0x14   :  { %854 = vmatpush3.bf16.msra.mxu0 %v995_v18  ;;  %v1042_v56 = vld [vmem:[%s1307_s0 + $0x60] ss:$20 sps:$4 sm:$0xff]   ;;  %v1043_v58 = vld [vmem:[%s1307_s0 + $0x38] ss:$20 sps:$4 sm:$0xff]  }
  0x15   :  { %894 = vmatpush3.bf16.msra.mxu1 %v996_v19  ;;  %855 = vmatprep.subr.bf16.mxu0 %v997_v20  ;;  %v1040_v57 = vld [vmem:[%s1306_s1 + $0x100] sm:$0xff]  }
  0x16   :  { %895 = vmatprep.subr.bf16.mxu1 %v998_v21 }
  0x18   :  { %856 = vmatpush3.bf16.msra.mxu0 %v999_v22 }
  0x19   :  { %896 = vmatpush3.bf16.msra.mxu1 %v1000_v23  ;;  %857 = vmatprep.subr.bf16.mxu0 %v1001_v24 }
  0x1a   :  { %897 = vmatprep.subr.bf16.mxu1 %v1002_v25 }
  0x1c   :  { %858 = vmatpush3.bf16.msra.mxu0 %v1003_v26 }
  0x1d   :  { %898 = vmatpush3.bf16.msra.mxu1 %v1004_v27  ;;  %859 = vmatprep.subr.bf16.mxu0 %v1005_v28 }
  0x1e   :  { %899 = vmatprep.subr.bf16.mxu1 %v1006_v29 }
  0x20   :  { %860 = vmatpush3.bf16.msra.mxu0 %v1007_v30 }
  0x21   :  { %900 = vmatpush3.bf16.msra.mxu1 %v1008_v31  ;;  %937 = vmatprep.subr.bf16.mxu0 %v1015_v36 }
  0x22   :  { %961 = vmatprep.subr.bf16.mxu1 %v1015_v36 }
  0x23   :  { %496 = vmatmul.mubr.bf16.vlgmr.msra.gmra.mxu0 %v1009_v32 }
  0x24   :  { %561 = vmatmul.mubr.bf16.vlgmr.msra.gmra.mxu1 %v1012_v34  ;;  %938 = vmatpush3.bf16.msra.mxu0 %v1015_v36 }
  0x25   :  { %969 = vmatpush3.bf16.msra.mxu1 %v1015_v36  ;;  %939 = vmatprep.subr.bf16.mxu0 %v1016_v37 }
  0x26   :  { %962 = vmatprep.subr.bf16.mxu1 %v1016_v37  ;;  %503 = vmatprep.mubr.bf16.mxu0 %v1017_v38 }
  0x27   :  { %568 = vmatprep.mubr.bf16.mxu1 %v1019_v39 }
  0x28   :  { %940 = vmatpush3.bf16.msra.mxu0 %v1016_v37 }
  0x29   :  { %970 = vmatpush3.bf16.msra.mxu1 %v1016_v37  ;;  %941 = vmatprep.subr.bf16.mxu0 %v1023_v41 }
  0x2a   :  { %963 = vmatprep.subr.bf16.mxu1 %v1023_v41 }
  0x2b   :  { %504 = vmatmul.mubr.bf16.gmra.mxu0 %v1021_v40 }
  0x2c   :  { %569 = vmatmul.mubr.bf16.gmra.mxu1 %v1022_v42  ;;  %511 = vmatprep.mubr.bf16.mxu0 %v1025_v43 }
  0x2d   :  { %942 = vmatpush3.bf16.msra.mxu0 %v1023_v41  ;;  %576 = vmatprep.mubr.bf16.mxu1 %v1027_v45 }
  0x2e   :  { %971 = vmatpush3.bf16.msra.mxu1 %v1023_v41  ;;  %943 = vmatprep.subr.bf16.mxu0 %v1024_v44 }
  0x2f   :  { %964 = vmatprep.subr.bf16.mxu1 %v1024_v44 }
  0x31   :  { %944 = vmatpush3.bf16.msra.mxu0 %v1024_v44 }
  0x32   :  { %972 = vmatpush3.bf16.msra.mxu1 %v1024_v44  ;;  %945 = vmatprep.subr.bf16.mxu0 %v1031_v46 }
  0x33   :  { %512 = vmatmul.mubr.bf16.gmra.mxu0 %v1029_v47  ;;  %965 = vmatprep.subr.bf16.mxu1 %v1031_v46 }
  0x34   :  { %577 = vmatmul.mubr.bf16.gmra.mxu1 %v1030_v48  ;;  %519 = vmatprep.mubr.bf16.mxu0 %v1033_v49 }
  0x35   :  { %946 = vmatpush3.bf16.msra.mxu0 %v1031_v46  ;;  %584 = vmatprep.mubr.bf16.mxu1 %v1035_v50 }
  0x36   :  { %973 = vmatpush3.bf16.msra.mxu1 %v1031_v46  ;;  %947 = vmatprep.subr.bf16.mxu0 %v1032_v51 }
  0x37   :  { %966 = vmatprep.subr.bf16.mxu1 %v1032_v51 }
  0x39   :  { %948 = vmatpush3.bf16.msra.mxu0 %v1032_v51 }
  0x3a   :  { %974 = vmatpush3.bf16.msra.mxu1 %v1032_v51  ;;  %949 = vmatprep.subr.bf16.mxu0 %v1039_v52 }
  0x3b   :  { %520 = vmatmul.mubr.bf16.gmra.mxu0 %v1037_v53  ;;  %967 = vmatprep.subr.bf16.mxu1 %v1039_v52 }
  0x3c   :  { %585 = vmatmul.mubr.bf16.gmra.mxu1 %v1038_v54  ;;  %953 = vmatprep.mubr.bf16.mxu0 %v1041_v55 }
  0x3d   :  { %950 = vmatpush3.bf16.msra.mxu0 %v1039_v52  ;;  %957 = vmatprep.mubr.bf16.mxu1 %v1042_v56 }
  0x3e   :  { %975 = vmatpush3.bf16.msra.mxu1 %v1039_v52  ;;  %951 = vmatprep.subr.bf16.mxu0 %v1040_v57 }
  0x3f   :  { %968 = vmatprep.subr.bf16.mxu1 %v1040_v57 }
  0x41   :  { %952 = vmatpush3.bf16.msra.mxu0 %v1040_v57 }
  0x42   :  { %976 = vmatpush3.bf16.msra.mxu1 %v1040_v57 }
  0x44   :  { %954 = vmatmul.mubr.bf16.vlgmr.msra.gmra.mxu0 %v1043_v58 }
  0x45   :  { %958 = vmatmul.mubr.bf16.vlgmr.msra.gmra.mxu1 %v1044_v59 }
  0xe3   :  { %v861_v60 = vpop.f32.mrf.mxu0 }
  0xe4   :  { %v901_v61 = vpop.f32.mrf.mxu1 }
  0xe5   :  { %v862_v62 = vpop.f32.mrf.mxu0 }
  0xe6   :  { %v902_v63 = vpop.f32.mrf.mxu1  ;;  %v863_v24 = vadd.f32 %v862_v62, %v861_v60 }
  0xe7   :  { %v864_v0 = vpop.f32.mrf.mxu0  ;;  %v903_v25 = vadd.f32 %v902_v63, %v901_v61 }
  0xe8   :  { %v904_v1 = vpop.f32.mrf.mxu1 }
  0xe9   :  { %v865_v2 = vpop.f32.mrf.mxu0  ;;  %v563_v37 = vadd.f32 %v903_v25, %v863_v24 }
  0xea   :  { %v905_v3 = vpop.f32.mrf.mxu1  ;;  %v866_v38 = vadd.f32 %v865_v2, %v864_v0 }
  0xeb   :  { %v867_v4 = vpop.f32.mrf.mxu0  ;;  %v906_v39 = vadd.f32 %v905_v3, %v904_v1 }
  0xec   :  { %v907_v5 = vpop.f32.mrf.mxu1 }
  0xed   :  { %v868_v6 = vpop.f32.mrf.mxu0  ;;  %v566_v63 = vadd.f32 %v906_v39, %v866_v38 }
  0xee   :  { %v908_v7 = vpop.f32.mrf.mxu1  ;;  %v869_v26 = vadd.f32 %v868_v6, %v867_v4 }
  0xef   :  { %v870_v8 = vpop.f32.mrf.mxu0  ;;  %v909_v27 = vadd.f32 %v908_v7, %v907_v5 }
  0xf0   :  { %v910_v9 = vpop.f32.mrf.mxu1 }
  0xf1   :  { %v871_v10 = vpop.f32.mrf.mxu0  ;;  %v571_v36 = vadd.f32 %v909_v27, %v869_v26 }
  0xf2   :  { %v911_v11 = vpop.f32.mrf.mxu1  ;;  %v872_v40 = vadd.f32 %v871_v10, %v870_v8 }
  0xf3   :  { %v873_v12 = vpop.f32.mrf.mxu0  ;;  %v912_v43 = vadd.f32 %v911_v11, %v910_v9 }
  0xf4   :  { %v913_v13 = vpop.f32.mrf.mxu1 }
  0xf5   :  { %v874_v14 = vpop.f32.mrf.mxu0  ;;  %v574_v60 = vadd.f32 %v912_v43, %v872_v40 }
  0xf6   :  { %v914_v15 = vpop.f32.mrf.mxu1  ;;  %v875_v33 = vadd.f32 %v874_v14, %v873_v12 }
  0xf7   :  { %v876_v16 = vpop.f32.mrf.mxu0  ;;  %v915_v34 = vadd.f32 %v914_v15, %v913_v13 }
  0xf8   :  { %v916_v17 = vpop.f32.mrf.mxu1 }
  0xf9   :  { %v877_v18 = vpop.f32.mrf.mxu0  ;;  %v579_v52 = vadd.f32 %v915_v34, %v875_v33 }
  0xfa   :  { %v917_v19 = vpop.f32.mrf.mxu1  ;;  %v878_v48 = vadd.f32 %v877_v18, %v876_v16 }
  0xfb   :  { %v879_v20 = vpop.f32.mrf.mxu0  ;;  %v918_v49 = vadd.f32 %v917_v19, %v916_v17 }
  0xfc   :  { %v919_v21 = vpop.f32.mrf.mxu1 }
  0xfd   :  { %v880_v22 = vpop.f32.mrf.mxu0  ;;  %v582_v2 = vadd.f32 %v918_v49, %v878_v48 }
  0xfe   :  { %v920_v23 = vpop.f32.mrf.mxu1  ;;  %v881_v29 = vadd.f32 %v880_v22, %v879_v20 }
  0xff   :  { %v882_v28 = vpop.f32.mrf.mxu0  ;;  %v921_v30 = vadd.f32 %v920_v23, %v919_v21 }
 0x100   :  { %v922_v31 = vpop.f32.mrf.mxu1 }
 0x101   :  { %v883_v32 = vpop.f32.mrf.mxu0  ;;  %v587_v42 = vadd.f32 %v921_v30, %v881_v29 }
 0x102   :  { %v923_v35 = vpop.f32.mrf.mxu1  ;;  %v884_v44 = vadd.f32 %v883_v32, %v882_v28 }
 0x103   :  { %v924_v45 = vadd.f32 %v923_v35, %v922_v31 }
 0x104   :  { %v955_v41 = vpop.f32.mrf.mxu0 }
 0x105   :  { %v636_v46 = vadd.f32 %v955_v41, %v571_v36  ;;  %v959_v47 = vpop.f32.mrf.mxu1  ;;  %v590_v61 = vadd.f32 %v924_v45, %v884_v44 }
 0x106   :  { %v652_v50 = vadd.f32 %v959_v47, %v587_v42  ;;  %v627_v51 = vpop.f32.mrf.mxu0 }
 0x107   :  { %v839_v53 = vpack.c.bf16 %v636_v46, %v636_v46  ;;  %v628_v54 = vadd.f32 %v627_v51, %v563_v37  ;;  %v643_v55 = vpop.f32.mrf.mxu1  ;;  %v723_v14 = vmul.f32 %v636_v46, %v636_v46  ;;  %v703_v18 = vsel %vm699_vm1, %v636_v46, 0.0 }
 0x108   :  { %v843_v56 = vpack.c.bf16 %v652_v50, %v652_v50  ;;  %v644_v57 = vadd.f32 %v643_v55, %v579_v52  ;;  %v956_v58 = vpop.f32.mrf.mxu0  ;;  %v727_v35 = vmul.f32 %v652_v50, %v652_v50  ;;  %v711_v38 = vsel %vm699_vm1, %v652_v50, 0.0 }
 0x109   :  { %693 = vst.msk [vmem:[%s1308_s2 + $0x8] sm:$0xf] %vm690_vm0, %v839_v53  ;;  %v837_v59 = vpack.c.bf16 %v628_v54, %v628_v54  ;;  %v960_v62 = vpop.f32.mrf.mxu1  ;;  %v639_v3 = vadd.f32 %v956_v58, %v574_v60  ;;  %v721_v8 = vmul.f32 %v628_v54, %v628_v54  ;;  %v700_v11 = vsel %vm699_vm1, %v628_v54, 0.0 }
 0x10a   :  { %697 = vst.msk [vmem:[%s1308_s2 + $0x18] sm:$0xf] %vm690_vm0, %v843_v56  ;;  %v841_v0 = vpack.c.bf16 %v644_v57, %v644_v57  ;;  %v630_v1 = vpop.f32.mrf.mxu0  ;;  %v655_v4 = vadd.f32 %v960_v62, %v590_v61  ;;  %v732_v25 = vsel %vm699_vm1, %v723_v14, 0.0  ;;  %v725_v26 = vmul.f32 %v644_v57, %v644_v57 }
 0x10b   :  { %691 = vst.msk [vmem:[%s1308_s2] sm:$0xf] %vm690_vm0, %v837_v59  ;;  %v631_v5 = vadd.f32 %v630_v1, %v566_v63  ;;  %v646_v6 = vpop.f32.mrf.mxu1  ;;  %v840_v9 = vpack.c.bf16 %v639_v3, %v639_v3  ;;  %v729_v19 = vsel %vm699_vm1, %v721_v8, 0.0  ;;  %v724_v20 = vmul.f32 %v639_v3, %v639_v3 }
 0x10c   :  { %695 = vst.msk [vmem:[%s1308_s2 + $0x10] sm:$0xf] %vm690_vm0, %v841_v0  ;;  %v647_v7 = vadd.f32 %v646_v6, %v582_v2  ;;  %v844_v10 = vpack.c.bf16 %v655_v4, %v655_v4  ;;  %v705_v23 = vsel %vm699_vm1, %v639_v3, 0.0  ;;  %v707_v28 = vsel %vm699_vm1, %v644_v57, 0.0 }
 0x10d   :  { %v838_v12 = vpack.c.bf16 %v631_v5, %v631_v5  ;;  %v701_v13 = vsel %vm699_vm1, %v631_v5, 0.0  ;;  %694 = vst.msk [vmem:[%s1308_s2 + $0xc] sm:$0xf] %vm690_vm0, %v840_v9  ;;  %v722_v16 = vmul.f32 %v631_v5, %v631_v5  ;;  %v734_v30 = vsel %vm699_vm1, %v724_v20, 0.0 }
 0x10e   :  { %698 = vst.msk [vmem:[%s1308_s2 + $0x1c] sm:$0xf] %vm690_vm0, %v844_v10  ;;  %v702_v15 = vadd.f32 %v701_v13, %v700_v11  ;;  %v842_v17 = vpack.c.bf16 %v647_v7, %v647_v7  ;;  %v726_v32 = vmul.f32 %v647_v7, %v647_v7  ;;  %v709_v33 = vsel %vm699_vm1, %v647_v7, 0.0 }
 0x10f   :  { %692 = vst.msk [vmem:[%s1308_s2 + $0x4] sm:$0xf] %vm690_vm0, %v838_v12  ;;  %v730_v22 = vsel %vm699_vm1, %v722_v16, 0.0  ;;  %v736_v36 = vsel %vm699_vm1, %v725_v26, 0.0  ;;  %v728_v40 = vmul.f32 %v655_v4, %v655_v4  ;;  %v713_v43 = vsel %vm699_vm1, %v655_v4, 0.0 }
 0x110   :  { %v704_v21 = vadd.f32 %v703_v18, %v702_v15  ;;  %696 = vst.msk [vmem:[%s1308_s2 + $0x14] sm:$0xf] %vm690_vm0, %v842_v17  ;;  %v731_v24 = vadd.f32 %v730_v22, %v729_v19  ;;  %v738_v42 = vsel %vm699_vm1, %v726_v32, 0.0  ;;  %v740_v45 = vsel %vm699_vm1, %v727_v35, 0.0 }
 0x111   :  { %v742_v48 = vsel %vm699_vm1, %v728_v40, 0.0  ;;  %v750_v52 = vlaneseq }
 0x112   :  { %v706_v27 = vadd.f32 %v705_v23, %v704_v21  ;;  %v733_v29 = vadd.f32 %v732_v25, %v731_v24 }
 0x113   :  { %v751_v56 = vshrl.u32 %v750_v52, 7 }
 0x114   :  { %v708_v31 = vadd.f32 %v707_v28, %v706_v27  ;;  %v735_v34 = vadd.f32 %v734_v30, %v733_v29 }
 0x115   :  { %vm752_vm2 = vcmp.eq.s32.totalorder %v751_v56, 0 }
 0x116   :  { %v710_v37 = vadd.f32 %v709_v33, %v708_v31  ;;  %v737_v39 = vadd.f32 %v736_v36, %v735_v34 }
 0x118   :  { %v712_v41 = vadd.f32 %v711_v38, %v710_v37  ;;  %v739_v44 = vadd.f32 %v738_v42, %v737_v39 }
 0x11a   :  { %v714_v46 = vadd.f32 %v713_v43, %v712_v41  ;;  %v741_v47 = vadd.f32 %v740_v45, %v739_v44 }
 0x11c   :  { %v715_v49 = vrot.slane %v714_v46, 4  ;;  %v743_v51 = vadd.f32 %v742_v48, %v741_v47 }
 0x11e   :  { %v716_v53 = vadd.f32 %v715_v49, %v714_v46  ;;  %v744_v54 = vrot.slane %v743_v51, 4 }
 0x120   :  { %v717_v50 = vrot.slane %v716_v53, 2  ;;  %v745_v55 = vadd.f32 %v744_v54, %v743_v51 }
 0x122   :  { %v718_v57 = vadd.f32 %v717_v50, %v716_v53  ;;  %v746_v58 = vrot.slane %v745_v55, 2 }
 0x124   :  { %v719_v59 = vrot.slane %v718_v57, 1  ;;  %v747_v60 = vadd.f32 %v746_v58, %v745_v55 }
 0x126   :  { %v720_v61 = vadd.f32 %v719_v59, %v718_v57  ;;  %v748_v62 = vrot.slane %v747_v60, 1 }
 0x128   :  { %v753_v63 = vsel %vm752_vm2, %v720_v61, 0.0  ;;  %v749_v0 = vadd.f32 %v748_v62, %v747_v60 }
 0x129   :  { %754 = vst.msk [vmem:[%s1309_s3] sm:$0xff] %vm699_vm1, %v753_v63 }
 0x12a   :  { %v755_v1 = vsel %vm752_vm2, %v749_v0, 0.0 }
 0x12b   :  { %756 = vst.msk [vmem:[%s1310_s4] sm:$0xff] %vm699_vm1, %v755_v1 }

// kernel: resnet_forward.78
= control target key start
LH: loop header
LB: loop body
LE: loop exit
PB: predicated region body
PF: predicated region fallthrough
CT: control target
= control target key end

     0   :  { %v711_v34 = vmov 0.0   ;;  %vm712_vm0 = vmmov 0   ;;  %s882_s1 = inlined_call_operand.vmem [shape: bf16[640,128], index: 1, kind: input, shape index: {}]   ;;  %s883_s0 = inlined_call_operand.vmem [shape: bf16[16,640], index: 0, kind: input, shape index: {}]   ;;  %s884_s2 = inlined_call_operand.vmem [shape: bf16[16,128], index: 2, kind: output, shape index: {0}]   ;;  %s885_s3 = inlined_call_operand.vmem [shape: f32[8,128], index: 3, kind: output, shape index: {1}]   ;;  %s886_s4 = inlined_call_operand.vmem [shape: f32[8,128], index: 4, kind: output, shape index: {2}]  }
   0x1   :  { %v664_v0 = vld [vmem:[%s882_s1 + $0x78] sm:$0xff]   ;;  %v668_v4 = vld [vmem:[%s882_s1 + $0x70] sm:$0xff]   ;;  %v672_v8 = vld [vmem:[%s882_s1 + $0x68] sm:$0xff]  }
   0x2   :  { %v665_v1 = vld [vmem:[%s882_s1 + $0xf8] sm:$0xff]   ;;  %589 = vmatprep.subr.bf16.mxu0 %v664_v0  ;;  %v669_v5 = vld [vmem:[%s882_s1 + $0xf0] sm:$0xff]   ;;  %v673_v9 = vld [vmem:[%s882_s1 + $0xe8] sm:$0xff]  }
   0x3   :  { %v666_v2 = vld [vmem:[%s882_s1 + $0x38] sm:$0xff]   ;;  %611 = vmatprep.subr.bf16.mxu1 %v665_v1  ;;  %v670_v6 = vld [vmem:[%s882_s1 + $0x30] sm:$0xff]   ;;  %v674_v10 = vld [vmem:[%s882_s1 + $0x28] sm:$0xff]  }
   0x4   :  { %v667_v3 = vld [vmem:[%s882_s1 + $0xb8] sm:$0xff]   ;;  %590 = vmatpush3.bf16.msra.mxu0 %v666_v2  ;;  %v671_v7 = vld [vmem:[%s882_s1 + $0xb0] sm:$0xff]   ;;  %v675_v11 = vld [vmem:[%s882_s1 + $0xa8] sm:$0xff]  }
   0x5   :  { %612 = vmatpush3.bf16.msra.mxu1 %v667_v3  ;;  %591 = vmatprep.subr.bf16.mxu0 %v668_v4  ;;  %v676_v12 = vld [vmem:[%s882_s1 + $0x60] sm:$0xff]   ;;  %v680_v16 = vld [vmem:[%s882_s1 + $0x58] sm:$0xff]   ;;  %v684_v20 = vld [vmem:[%s882_s1 + $0x50] sm:$0xff]  }
   0x6   :  { %613 = vmatprep.subr.bf16.mxu1 %v669_v5  ;;  %v677_v13 = vld [vmem:[%s882_s1 + $0xe0] sm:$0xff]   ;;  %v681_v17 = vld [vmem:[%s882_s1 + $0xd8] sm:$0xff]   ;;  %v685_v21 = vld [vmem:[%s882_s1 + $0xd0] sm:$0xff]  }
   0x7   :  { %v678_v14 = vld [vmem:[%s882_s1 + $0x20] sm:$0xff]   ;;  %v682_v18 = vld [vmem:[%s882_s1 + $0x18] sm:$0xff]   ;;  %v686_v22 = vld [vmem:[%s882_s1 + $0x10] sm:$0xff]  }
   0x8   :  { %592 = vmatpush3.bf16.msra.mxu0 %v670_v6  ;;  %v679_v15 = vld [vmem:[%s882_s1 + $0xa0] sm:$0xff]   ;;  %v683_v19 = vld [vmem:[%s882_s1 + $0x98] sm:$0xff]   ;;  %v687_v23 = vld [vmem:[%s882_s1 + $0x90] sm:$0xff]  }
   0x9   :  { %614 = vmatpush3.bf16.msra.mxu1 %v671_v7  ;;  %593 = vmatprep.subr.bf16.mxu0 %v672_v8  ;;  %v688_v24 = vld [vmem:[%s882_s1 + $0x48] sm:$0xff]   ;;  %v692_v28 = vld [vmem:[%s882_s1 + $0x40] sm:$0xff]   ;;  %v702_v37 = vld [vmem:[%s882_s1 + $0x138] sm:$0xff]   ;;  %v516_v8 = vlaneseq }
   0xa   :  { %615 = vmatprep.subr.bf16.mxu1 %v673_v9  ;;  %v689_v25 = vld [vmem:[%s882_s1 + $0xc8] sm:$0xff]   ;;  %v693_v29 = vld [vmem:[%s882_s1 + $0xc0] sm:$0xff]   ;;  %v703_v38 = vld [vmem:[%s882_s1 + $0x130] sm:$0xff]  }
   0xb   :  { %v690_v26 = vld [vmem:[%s882_s1 + $0x8] sm:$0xff]   ;;  %v694_v30 = vld [vmem:[%s882_s1] sm:$0xff]   ;;  %v706_v41 = vld [vmem:[%s882_s1 + $0x118] sm:$0xff]  }
   0xc   :  { %594 = vmatpush3.bf16.msra.mxu0 %v674_v10  ;;  %v691_v27 = vld [vmem:[%s882_s1 + $0x88] sm:$0xff]   ;;  %v695_v31 = vld [vmem:[%s882_s1 + $0x80] sm:$0xff]   ;;  %v707_v42 = vld [vmem:[%s882_s1 + $0x110] sm:$0xff]  }
   0xd   :  { %616 = vmatpush3.bf16.msra.mxu1 %v675_v11  ;;  %595 = vmatprep.subr.bf16.mxu0 %v676_v12  ;;  %v696_v32 = vld [vmem:[%s883_s0] ss:$20 sps:$4 sm:$0xff]   ;;  %v698_v33 = vld [vmem:[%s883_s0 + $0x4] ss:$20 sps:$4 sm:$0xff]   ;;  %v699_v35 = vld [vmem:[%s883_s0 + $0x8] ss:$20 sps:$4 sm:$0xff]  }
   0xe   :  { %617 = vmatprep.subr.bf16.mxu1 %v677_v13  ;;  %v701_v36 = vld [vmem:[%s883_s0 + $0xc] ss:$20 sps:$4 sm:$0xff]   ;;  %399 = vmatprep.mubr.bf16.mxu0 %v698_v33  ;;  %v710_v45 = vld [vmem:[%s883_s0 + $0x10] ss:$20 sps:$4 sm:$0xff]   ;;  %v517_v13 = vshrl.u32 %v516_v8, 7 }
   0xf   :  { %440 = vmatprep.mubr.bf16.mxu1 %v701_v36  ;;  %v704_v39 = vld [vmem:[%s882_s1 + $0x128] sm:$0xff]   ;;  %v705_v40 = vld [vmem:[%s882_s1 + $0x120] sm:$0xff]  }
  0x10   :  { %596 = vmatpush3.bf16.msra.mxu0 %v678_v14  ;;  %v708_v43 = vld [vmem:[%s882_s1 + $0x108] sm:$0xff]   ;;  %v709_v44 = vld [vmem:[%s882_s1 + $0x100] sm:$0xff]   ;;  %vm518_vm1 = vcmp.eq.s32.totalorder %v517_v13, 0 }
  0x11   :  { %618 = vmatpush3.bf16.msra.mxu1 %v679_v15  ;;  %597 = vmatprep.subr.bf16.mxu0 %v680_v16 }
  0x12   :  { %619 = vmatprep.subr.bf16.mxu1 %v681_v17 }
  0x14   :  { %598 = vmatpush3.bf16.msra.mxu0 %v682_v18 }
  0x15   :  { %620 = vmatpush3.bf16.msra.mxu1 %v683_v19  ;;  %599 = vmatprep.subr.bf16.mxu0 %v684_v20 }
  0x16   :  { %621 = vmatprep.subr.bf16.mxu1 %v685_v21 }
  0x18   :  { %600 = vmatpush3.bf16.msra.mxu0 %v686_v22 }
  0x19   :  { %622 = vmatpush3.bf16.msra.mxu1 %v687_v23  ;;  %601 = vmatprep.subr.bf16.mxu0 %v688_v24 }
  0x1a   :  { %623 = vmatprep.subr.bf16.mxu1 %v689_v25 }
  0x1c   :  { %602 = vmatpush3.bf16.msra.mxu0 %v690_v26 }
  0x1d   :  { %624 = vmatpush3.bf16.msra.mxu1 %v691_v27  ;;  %603 = vmatprep.subr.bf16.mxu0 %v692_v28 }
  0x1e   :  { %625 = vmatprep.subr.bf16.mxu1 %v693_v29 }
  0x20   :  { %604 = vmatpush3.bf16.msra.mxu0 %v694_v30 }
  0x21   :  { %626 = vmatpush3.bf16.msra.mxu1 %v695_v31  ;;  %642 = vmatprep.subr.bf16.mxu0 %v711_v34 }
  0x23   :  { %400 = vmatmul.mubr.bf16.vlgmr.msra.gmra.mxu0 %v696_v32 }
  0x24   :  { %441 = vmatmul.mubr.bf16.vlgmr.msra.gmra.mxu1 %v699_v35  ;;  %643 = vmatpush3.bf16.msra.mxu0 %v702_v37 }
  0x25   :  { %644 = vmatprep.subr.bf16.mxu0 %v711_v34  ;;  %658 = vmatprep.mubr.msk.bf16.mxu0 %vm712_vm0, %v711_v34 }
  0x28   :  { %645 = vmatpush3.bf16.msra.mxu0 %v703_v38 }
  0x29   :  { %646 = vmatprep.subr.bf16.mxu0 %v711_v34 }
  0x2c   :  { %647 = vmatpush3.bf16.msra.mxu0 %v704_v39 }
  0x2d   :  { %648 = vmatprep.subr.bf16.mxu0 %v711_v34 }
  0x30   :  { %649 = vmatpush3.bf16.msra.mxu0 %v705_v40 }
  0x31   :  { %650 = vmatprep.subr.bf16.mxu0 %v711_v34 }
  0x34   :  { %651 = vmatpush3.bf16.msra.mxu0 %v706_v41 }
  0x35   :  { %652 = vmatprep.subr.bf16.mxu0 %v711_v34 }
  0x38   :  { %653 = vmatpush3.bf16.msra.mxu0 %v707_v42 }
  0x39   :  { %654 = vmatprep.subr.bf16.mxu0 %v711_v34 }
  0x3c   :  { %655 = vmatpush3.bf16.msra.mxu0 %v708_v43 }
  0x3d   :  { %656 = vmatprep.subr.bf16.mxu0 %v711_v34 }
  0x40   :  { %657 = vmatpush3.bf16.msra.mxu0 %v709_v44 }
  0x43   :  { %659 = vmatmul.mubr.bf16.vlgmr.msra.gmra.mxu0 %v710_v45 }
  0xe3   :  { %v605_v46 = vpop.f32.mrf.mxu0 }
  0xe4   :  { %v627_v47 = vpop.f32.mrf.mxu1 }
  0xe5   :  { %v606_v48 = vpop.f32.mrf.mxu0 }
  0xe6   :  { %v628_v49 = vpop.f32.mrf.mxu1  ;;  %v607_v54 = vadd.f32 %v606_v48, %v605_v46 }
  0xe7   :  { %v608_v50 = vpop.f32.mrf.mxu0  ;;  %v629_v55 = vadd.f32 %v628_v49, %v627_v47 }
  0xe8   :  { %v630_v51 = vpop.f32.mrf.mxu1 }
  0xe9   :  { %v609_v52 = vpop.f32.mrf.mxu0  ;;  %v443_v59 = vadd.f32 %v629_v55, %v607_v54 }
  0xea   :  { %v631_v53 = vpop.f32.mrf.mxu1  ;;  %v610_v56 = vadd.f32 %v609_v52, %v608_v50 }
  0xeb   :  { %v632_v57 = vadd.f32 %v631_v53, %v630_v51 }
  0xed   :  { %v446_v62 = vadd.f32 %v632_v57, %v610_v56 }
 0x103   :  { %v483_v58 = vpop.f32.mrf.mxu0 }
 0x104   :  { %v484_v61 = vadd.f32 %v483_v58, %v443_v59 }
 0x105   :  { %v660_v60 = vpop.f32.mrf.mxu0 }
 0x106   :  { %v507_v2 = vmul.f32 %v484_v61, %v484_v61 }
 0x107   :  { %v486_v63 = vpop.f32.mrf.mxu0 }
 0x108   :  { %v487_v0 = vadd.f32 %v486_v63, %v446_v62 }
 0x109   :  { %v661_v1 = vpop.f32.mrf.mxu0 }
 0x10a   :  { %v587_v3 = vpack.c.bf16 %v487_v0, %v484_v61  ;;  %v500_v4 = vadd.f32 %v487_v0, %v484_v61  ;;  %v508_v5 = vmul.f32 %v487_v0, %v487_v0 }
 0x10c   :  { %588 = vst [vmem:[%s884_s2] sm:$0xff] %v587_v3   ;;  %v501_v6 = vrot.slane %v500_v4, 4  ;;  %v509_v7 = vadd.f32 %v508_v5, %v507_v2 }
 0x10e   :  { %v502_v9 = vadd.f32 %v501_v6, %v500_v4  ;;  %v510_v10 = vrot.slane %v509_v7, 4 }
 0x110   :  { %v503_v11 = vrot.slane %v502_v9, 2  ;;  %v511_v12 = vadd.f32 %v510_v10, %v509_v7 }
 0x112   :  { %v504_v14 = vadd.f32 %v503_v11, %v502_v9  ;;  %v512_v15 = vrot.slane %v511_v12, 2 }
 0x114   :  { %v505_v16 = vrot.slane %v504_v14, 1  ;;  %v513_v17 = vadd.f32 %v512_v15, %v511_v12 }
 0x116   :  { %v506_v18 = vadd.f32 %v505_v16, %v504_v14  ;;  %v514_v19 = vrot.slane %v513_v17, 1 }
 0x118   :  { %v515_v20 = vadd.f32 %v514_v19, %v513_v17  ;;  %v519_v21 = vsel %vm518_vm1, %v506_v18, 0.0 }
 0x119   :  { %520 = vst [vmem:[%s885_s3] sm:$0xff] %v519_v21 }
 0x11a   :  { %v521_v22 = vsel %vm518_vm1, %v515_v20, 0.0 }
 0x11b   :  { %522 = vst [vmem:[%s886_s4] sm:$0xff] %v521_v22 }

// kernel: resnet_forward.79
= control target key start
LH: loop header
LB: loop body
LE: loop exit
PB: predicated region body
PF: predicated region fallthrough
CT: control target
= control target key end

     0   :  { %s99_s0 = inlined_call_operand.vmem [shape: bf16[16,128], index: 0, kind: input, shape index: {}]   ;;  %s100_s1 = inlined_call_operand.vmem [shape: f32[1,128], index: 1, kind: input, shape index: {}]   ;;  %s101_s2 = inlined_call_operand.vmem [shape: f32[1,128], index: 2, kind: input, shape index: {}]   ;;  %s102_s3 = inlined_call_operand.vmem [shape: bf16[16,128], index: 3, kind: output, shape index: {}]  }
   0x1   :  { %v59_v0 = vld [vmem:[%s99_s0] sm:$0xff]  }
   0x2   :  { %v52_v1 = vld [vmem:[%s100_s1] ss:$0 sm:$0xff]  ;;  %v60_v2 = vunpack.c.l.bf16 %v59_v0  ;;  %v61_v3 = vunpack.c.h.bf16 %v59_v0 }
   0x3   :  { %v53_v4 = vld [vmem:[%s101_s2] ss:$0 sm:$0xff] }
   0x4   :  { %v25_v5 = vmul.f32 %v60_v2, %v52_v1  ;;  %v26_v6 = vmul.f32 %v61_v3, %v52_v1 }
   0x6   :  { %v34_v7 = vadd.f32 %v53_v4, %v25_v5  ;;  %v35_v8 = vadd.f32 %v53_v4, %v26_v6 }
   0x8   :  { %v36_v9 = vmax.f32 %v34_v7, 0.0  ;;  %v37_v10 = vmax.f32 %v35_v8, 0.0 }
   0xa   :  { %v65_v11 = vpack.c.bf16 %v37_v10, %v36_v9 }
   0xc   :  { %66 = vst [vmem:[%s102_s3] sm:$0xff] %v65_v11  }

// kernel: resnet_forward.86
= control target key start
LH: loop header
LB: loop body
LE: loop exit
PB: predicated region body
PF: predicated region fallthrough
CT: control target
= control target key end

     0   :  { %s120_s0 = inlined_call_operand.vmem [shape: bf16[16,128], index: 0, kind: input, shape index: {}]   ;;  %s121_s1 = inlined_call_operand.vmem [shape: bf16[16,128], index: 1, kind: input, shape index: {}]   ;;  %s122_s2 = inlined_call_operand.vmem [shape: f32[1,128], index: 2, kind: input, shape index: {}]   ;;  %s123_s3 = inlined_call_operand.vmem [shape: f32[1,128], index: 3, kind: input, shape index: {}]   ;;  %s124_s4 = inlined_call_operand.vmem [shape: bf16[16,128], index: 4, kind: output, shape index: {}]  }
   0x1   :  { %v68_v0 = vld [vmem:[%s120_s0] sm:$0xff]  }
   0x2   :  { %v61_v1 = vld [vmem:[%s122_s2] ss:$0 sm:$0xff]  ;;  %v69_v2 = vunpack.c.l.bf16 %v68_v0  ;;  %v70_v3 = vunpack.c.h.bf16 %v68_v0 }
   0x3   :  { %v72_v4 = vld [vmem:[%s121_s1] sm:$0xff]  }
   0x4   :  { %v62_v5 = vld [vmem:[%s123_s3] ss:$0 sm:$0xff]  ;;  %v28_v6 = vmul.f32 %v69_v2, %v61_v1  ;;  %v29_v7 = vmul.f32 %v70_v3, %v61_v1  ;;  %v73_v8 = vunpack.c.l.bf16 %v72_v4  ;;  %v74_v9 = vunpack.c.h.bf16 %v72_v4 }
   0x6   :  { %v37_v10 = vadd.f32 %v62_v5, %v28_v6  ;;  %v38_v11 = vadd.f32 %v62_v5, %v29_v7 }
   0x8   :  { %v43_v12 = vadd.f32 %v73_v8, %v37_v10  ;;  %v44_v13 = vadd.f32 %v74_v9, %v38_v11 }
   0xa   :  { %v45_v14 = vmax.f32 %v43_v12, 0.0  ;;  %v46_v15 = vmax.f32 %v44_v13, 0.0 }
   0xc   :  { %v78_v16 = vpack.c.bf16 %v46_v15, %v45_v14 }
   0xe   :  { %79 = vst [vmem:[%s124_s4] sm:$0xff] %v78_v16  }

// kernel: resnet_forward.82
= control target key start
LH: loop header
LB: loop body
LE: loop exit
PB: predicated region body
PF: predicated region fallthrough
CT: control target
= control target key end

     0   :  { %s162_s0 = inlined_call_operand.vmem [shape: bf16[16,128], index: 0, kind: input, shape index: {}]   ;;  %s163_s1 = inlined_call_operand.vmem [shape: bf16[16,128], index: 1, kind: input, shape index: {}]   ;;  %s164_s2 = inlined_call_operand.vmem [shape: f32[1,128], index: 2, kind: input, shape index: {}]   ;;  %s165_s3 = inlined_call_operand.vmem [shape: f32[1,128], index: 3, kind: input, shape index: {}]   ;;  %s166_s4 = inlined_call_operand.vmem [shape: f32[1,128], index: 4, kind: input, shape index: {}]   ;;  %s167_s5 = inlined_call_operand.vmem [shape: f32[1,128], index: 5, kind: input, shape index: {}]   ;;  %s168_s6 = inlined_call_operand.vmem [shape: bf16[16,128], index: 6, kind: output, shape index: {}]  }
   0x1   :  { %v94_v0 = vld [vmem:[%s162_s0] sm:$0xff]  }
   0x2   :  { %v85_v1 = vld [vmem:[%s164_s2] ss:$0 sm:$0xff]  ;;  %v95_v2 = vunpack.c.l.bf16 %v94_v0  ;;  %v96_v3 = vunpack.c.h.bf16 %v94_v0 }
   0x3   :  { %v98_v4 = vld [vmem:[%s163_s1] sm:$0xff]  }
   0x4   :  { %v87_v5 = vld [vmem:[%s166_s4] ss:$0 sm:$0xff]  ;;  %v99_v7 = vunpack.c.l.bf16 %v98_v4  ;;  %v100_v8 = vunpack.c.h.bf16 %v98_v4  ;;  %v34_v9 = vmul.f32 %v95_v2, %v85_v1  ;;  %v35_v10 = vmul.f32 %v96_v3, %v85_v1 }
   0x5   :  { %v86_v6 = vld [vmem:[%s165_s3] ss:$0 sm:$0xff] }
   0x6   :  { %v88_v11 = vld [vmem:[%s167_s5] ss:$0 sm:$0xff]  ;;  %v56_v12 = vmul.f32 %v99_v7, %v87_v5  ;;  %v57_v13 = vmul.f32 %v100_v8, %v87_v5  ;;  %v43_v14 = vadd.f32 %v86_v6, %v34_v9  ;;  %v44_v15 = vadd.f32 %v86_v6, %v35_v10 }
   0x8   :  { %v65_v16 = vadd.f32 %v88_v11, %v56_v12  ;;  %v66_v17 = vadd.f32 %v88_v11, %v57_v13 }
   0xa   :  { %v67_v18 = vadd.f32 %v65_v16, %v43_v14  ;;  %v68_v19 = vadd.f32 %v66_v17, %v44_v15 }
   0xc   :  { %v69_v20 = vmax.f32 %v67_v18, 0.0  ;;  %v70_v21 = vmax.f32 %v68_v19, 0.0 }
   0xe   :  { %v104_v22 = vpack.c.bf16 %v70_v21, %v69_v20 }
  0x10   :  { %105 = vst [vmem:[%s168_s6] sm:$0xff] %v104_v22  }

// kernel: resnet_forward.81
= control target key start
LH: loop header
LB: loop body
LE: loop exit
PB: predicated region body
PF: predicated region fallthrough
CT: control target
= control target key end

     0   :  { %v231_v0 = vmov 0.0   ;;  %vm232_vm0 = vmmov 0   ;;  %v154_v20 = vlaneseq  ;;  %s294_s1 = inlined_call_operand.vmem [shape: bf16[128,128], index: 1, kind: input, shape index: {}]   ;;  %s295_s0 = inlined_call_operand.vmem [shape: bf16[16,128], index: 0, kind: input, shape index: {}]   ;;  %s296_s2 = inlined_call_operand.vmem [shape: bf16[16,128], index: 2, kind: output, shape index: {0}]   ;;  %s297_s3 = inlined_call_operand.vmem [shape: f32[8,128], index: 3, kind: output, shape index: {1}]   ;;  %s298_s4 = inlined_call_operand.vmem [shape: f32[8,128], index: 4, kind: output, shape index: {2}]  }
   0x1   :  { %200 = vmatprep.subr.bf16.mxu0 %v231_v0  ;;  %v222_v1 = vld [vmem:[%s294_s1 + $0x38] sm:$0xff]   ;;  %216 = vmatprep.mubr.msk.bf16.mxu0 %vm232_vm0, %v231_v0  ;;  %v223_v2 = vld [vmem:[%s294_s1 + $0x30] sm:$0xff]   ;;  %v224_v3 = vld [vmem:[%s294_s1 + $0x28] sm:$0xff]  }
   0x2   :  { %201 = vmatpush3.bf16.msra.mxu0 %v222_v1  ;;  %v225_v4 = vld [vmem:[%s294_s1 + $0x20] sm:$0xff]   ;;  %v226_v5 = vld [vmem:[%s294_s1 + $0x18] sm:$0xff]   ;;  %v227_v6 = vld [vmem:[%s294_s1 + $0x10] sm:$0xff]   ;;  %v155_v25 = vshrl.u32 %v154_v20, 7 }
   0x3   :  { %202 = vmatprep.subr.bf16.mxu0 %v231_v0  ;;  %v228_v7 = vld [vmem:[%s294_s1 + $0x8] sm:$0xff]   ;;  %v229_v8 = vld [vmem:[%s294_s1] sm:$0xff]  }
   0x4   :  { %v230_v9 = vld [vmem:[%s295_s0] sm:$0xff]   ;;  %vm156_vm1 = vcmp.eq.s32.totalorder %v155_v25, 0 }
   0x6   :  { %203 = vmatpush3.bf16.msra.mxu0 %v223_v2 }
   0x7   :  { %204 = vmatprep.subr.bf16.mxu0 %v231_v0 }
   0xa   :  { %205 = vmatpush3.bf16.msra.mxu0 %v224_v3 }
   0xb   :  { %206 = vmatprep.subr.bf16.mxu0 %v231_v0 }
   0xe   :  { %207 = vmatpush3.bf16.msra.mxu0 %v225_v4 }
   0xf   :  { %208 = vmatprep.subr.bf16.mxu0 %v231_v0 }
  0x12   :  { %209 = vmatpush3.bf16.msra.mxu0 %v226_v5 }
  0x13   :  { %210 = vmatprep.subr.bf16.mxu0 %v231_v0 }
  0x16   :  { %211 = vmatpush3.bf16.msra.mxu0 %v227_v6 }
  0x17   :  { %212 = vmatprep.subr.bf16.mxu0 %v231_v0 }
  0x1a   :  { %213 = vmatpush3.bf16.msra.mxu0 %v228_v7 }
  0x1b   :  { %214 = vmatprep.subr.bf16.mxu0 %v231_v0 }
  0x1e   :  { %215 = vmatpush3.bf16.msra.mxu0 %v229_v8 }
  0x21   :  { %217 = vmatmul.mubr.bf16.vlgmr.msra.gmra.mxu0 %v230_v9 }
  0xe1   :  { %v121_v10 = vpop.f32.mrf.mxu0 }
  0xe2   :  { %v145_v13 = vmul.f32 %v121_v10, %v121_v10 }
  0xe3   :  { %v218_v11 = vpop.f32.mrf.mxu0 }
  0xe5   :  { %v124_v12 = vpop.f32.mrf.mxu0 }
  0xe6   :  { %v189_v14 = vpack.c.bf16 %v124_v12, %v121_v10  ;;  %v138_v15 = vadd.f32 %v124_v12, %v121_v10  ;;  %v146_v16 = vmul.f32 %v124_v12, %v124_v12 }
  0xe7   :  { %v219_v17 = vpop.f32.mrf.mxu0 }
  0xe8   :  { %190 = vst [vmem:[%s296_s2] sm:$0xff] %v189_v14   ;;  %v139_v18 = vrot.slane %v138_v15, 4  ;;  %v147_v19 = vadd.f32 %v146_v16, %v145_v13 }
  0xea   :  { %v140_v21 = vadd.f32 %v139_v18, %v138_v15  ;;  %v148_v22 = vrot.slane %v147_v19, 4 }
  0xec   :  { %v141_v23 = vrot.slane %v140_v21, 2  ;;  %v149_v24 = vadd.f32 %v148_v22, %v147_v19 }
  0xee   :  { %v142_v26 = vadd.f32 %v141_v23, %v140_v21  ;;  %v150_v27 = vrot.slane %v149_v24, 2 }
  0xf0   :  { %v143_v28 = vrot.slane %v142_v26, 1  ;;  %v151_v29 = vadd.f32 %v150_v27, %v149_v24 }
  0xf2   :  { %v144_v30 = vadd.f32 %v143_v28, %v142_v26  ;;  %v152_v31 = vrot.slane %v151_v29, 1 }
  0xf4   :  { %v153_v32 = vadd.f32 %v152_v31, %v151_v29  ;;  %v157_v33 = vsel %vm156_vm1, %v144_v30, 0.0 }
  0xf5   :  { %158 = vst [vmem:[%s297_s3] sm:$0xff] %v157_v33 }
  0xf6   :  { %v159_v34 = vsel %vm156_vm1, %v153_v32, 0.0 }
  0xf7   :  { %160 = vst [vmem:[%s298_s4] sm:$0xff] %v159_v34 }

// kernel: resnet_forward.80
= control target key start
LH: loop header
LB: loop body
LE: loop exit
PB: predicated region body
PF: predicated region fallthrough
CT: control target
= control target key end

     0   :  { %vm1192_vm0 = vmmov 0   ;;  %s1470_s1 = inlined_call_operand.vmem [shape: bf16[1152,128], index: 1, kind: input, shape index: {}]   ;;  %s1471_s0 = inlined_call_operand.vmem [shape: bf16[16,1152], index: 0, kind: input, shape index: {}]   ;;  %s1472_s2 = inlined_call_operand.vmem [shape: bf16[16,128], index: 2, kind: output, shape index: {0}]   ;;  %s1473_s3 = inlined_call_operand.vmem [shape: f32[8,128], index: 3, kind: output, shape index: {1}]   ;;  %s1474_s4 = inlined_call_operand.vmem [shape: f32[8,128], index: 4, kind: output, shape index: {2}]  }
   0x1   :  { %v1106_v0 = vld [vmem:[%s1470_s1 + $0x78] sm:$0xff]   ;;  %v1110_v4 = vld [vmem:[%s1470_s1 + $0x70] sm:$0xff]   ;;  %v1114_v8 = vld [vmem:[%s1470_s1 + $0x68] sm:$0xff]  }
   0x2   :  { %v1107_v1 = vld [vmem:[%s1470_s1 + $0xf8] sm:$0xff]   ;;  %987 = vmatprep.subr.bf16.mxu0 %v1106_v0  ;;  %v1111_v5 = vld [vmem:[%s1470_s1 + $0xf0] sm:$0xff]   ;;  %v1115_v9 = vld [vmem:[%s1470_s1 + $0xe8] sm:$0xff]  }
   0x3   :  { %v1108_v2 = vld [vmem:[%s1470_s1 + $0x38] sm:$0xff]   ;;  %1009 = vmatprep.subr.bf16.mxu1 %v1107_v1  ;;  %v1112_v6 = vld [vmem:[%s1470_s1 + $0x30] sm:$0xff]   ;;  %v1116_v10 = vld [vmem:[%s1470_s1 + $0x28] sm:$0xff]  }
   0x4   :  { %v1109_v3 = vld [vmem:[%s1470_s1 + $0xb8] sm:$0xff]   ;;  %988 = vmatpush3.bf16.msra.mxu0 %v1108_v2  ;;  %v1113_v7 = vld [vmem:[%s1470_s1 + $0xb0] sm:$0xff]   ;;  %v1117_v11 = vld [vmem:[%s1470_s1 + $0xa8] sm:$0xff]  }
   0x5   :  { %1010 = vmatpush3.bf16.msra.mxu1 %v1109_v3  ;;  %989 = vmatprep.subr.bf16.mxu0 %v1110_v4  ;;  %v1118_v12 = vld [vmem:[%s1470_s1 + $0x60] sm:$0xff]   ;;  %v1122_v16 = vld [vmem:[%s1470_s1 + $0x58] sm:$0xff]   ;;  %v1126_v20 = vld [vmem:[%s1470_s1 + $0x50] sm:$0xff]  }
   0x6   :  { %1011 = vmatprep.subr.bf16.mxu1 %v1111_v5  ;;  %v1119_v13 = vld [vmem:[%s1470_s1 + $0xe0] sm:$0xff]   ;;  %v1123_v17 = vld [vmem:[%s1470_s1 + $0xd8] sm:$0xff]   ;;  %v1127_v21 = vld [vmem:[%s1470_s1 + $0xd0] sm:$0xff]  }
   0x7   :  { %v1120_v14 = vld [vmem:[%s1470_s1 + $0x20] sm:$0xff]   ;;  %v1124_v18 = vld [vmem:[%s1470_s1 + $0x18] sm:$0xff]   ;;  %v1128_v22 = vld [vmem:[%s1470_s1 + $0x10] sm:$0xff]  }
   0x8   :  { %990 = vmatpush3.bf16.msra.mxu0 %v1112_v6  ;;  %v1121_v15 = vld [vmem:[%s1470_s1 + $0xa0] sm:$0xff]   ;;  %v1125_v19 = vld [vmem:[%s1470_s1 + $0x98] sm:$0xff]   ;;  %v1129_v23 = vld [vmem:[%s1470_s1 + $0x90] sm:$0xff]   ;;  %v1191_v6 = vmov 0.0  }
   0x9   :  { %1012 = vmatpush3.bf16.msra.mxu1 %v1113_v7  ;;  %991 = vmatprep.subr.bf16.mxu0 %v1114_v8  ;;  %v1130_v24 = vld [vmem:[%s1470_s1 + $0x48] sm:$0xff]   ;;  %v1134_v28 = vld [vmem:[%s1470_s1 + $0x40] sm:$0xff]   ;;  %v1144_v36 = vld [vmem:[%s1470_s1 + $0x178] sm:$0xff]  }
   0xa   :  { %1013 = vmatprep.subr.bf16.mxu1 %v1115_v9  ;;  %v1131_v25 = vld [vmem:[%s1470_s1 + $0xc8] sm:$0xff]   ;;  %v1135_v29 = vld [vmem:[%s1470_s1 + $0xc0] sm:$0xff]   ;;  %v1145_v37 = vld [vmem:[%s1470_s1 + $0x138] sm:$0xff]  }
   0xb   :  { %v1132_v26 = vld [vmem:[%s1470_s1 + $0x8] sm:$0xff]   ;;  %v1136_v30 = vld [vmem:[%s1470_s1] sm:$0xff]   ;;  %v1146_v38 = vld [vmem:[%s1470_s1 + $0x1f8] sm:$0xff]  }
   0xc   :  { %992 = vmatpush3.bf16.msra.mxu0 %v1116_v10  ;;  %v1133_v27 = vld [vmem:[%s1470_s1 + $0x88] sm:$0xff]   ;;  %v1137_v31 = vld [vmem:[%s1470_s1 + $0x80] sm:$0xff]   ;;  %v1147_v39 = vld [vmem:[%s1470_s1 + $0x1b8] sm:$0xff]  }
   0xd   :  { %1014 = vmatpush3.bf16.msra.mxu1 %v1117_v11  ;;  %993 = vmatprep.subr.bf16.mxu0 %v1118_v12  ;;  %v1138_v32 = vld [vmem:[%s1471_s0] ss:$36 sps:$4 sm:$0xff]   ;;  %v1141_v34 = vld [vmem:[%s1471_s0 + $0x8] ss:$36 sps:$4 sm:$0xff]   ;;  %v1148_v40 = vld [vmem:[%s1470_s1 + $0x170] sm:$0xff]  }
   0xe   :  { %1015 = vmatprep.subr.bf16.mxu1 %v1119_v13  ;;  %v1140_v33 = vld [vmem:[%s1471_s0 + $0x4] ss:$36 sps:$4 sm:$0xff]   ;;  %v1143_v35 = vld [vmem:[%s1471_s0 + $0xc] ss:$36 sps:$4 sm:$0xff]   ;;  %v1160_v52 = vld [vmem:[%s1470_s1 + $0x158] sm:$0xff]  }
   0xf   :  { %679 = vmatprep.mubr.bf16.mxu0 %v1140_v33  ;;  %720 = vmatprep.mubr.bf16.mxu1 %v1143_v35  ;;  %v1149_v41 = vld [vmem:[%s1470_s1 + $0x130] sm:$0xff]   ;;  %v1152_v44 = vld [vmem:[%s1470_s1 + $0x168] sm:$0xff]   ;;  %v1156_v48 = vld [vmem:[%s1470_s1 + $0x160] sm:$0xff]  }
  0x10   :  { %994 = vmatpush3.bf16.msra.mxu0 %v1120_v14  ;;  %v1150_v42 = vld [vmem:[%s1470_s1 + $0x1f0] sm:$0xff]   ;;  %v1153_v45 = vld [vmem:[%s1470_s1 + $0x128] sm:$0xff]   ;;  %v1157_v49 = vld [vmem:[%s1470_s1 + $0x120] sm:$0xff]  }
  0x11   :  { %1016 = vmatpush3.bf16.msra.mxu1 %v1121_v15  ;;  %995 = vmatprep.subr.bf16.mxu0 %v1122_v16  ;;  %v1151_v43 = vld [vmem:[%s1470_s1 + $0x1b0] sm:$0xff]   ;;  %v1154_v46 = vld [vmem:[%s1470_s1 + $0x1e8] sm:$0xff]   ;;  %v1158_v50 = vld [vmem:[%s1470_s1 + $0x1e0] sm:$0xff]  }
  0x12   :  { %1017 = vmatprep.subr.bf16.mxu1 %v1123_v17  ;;  %v1155_v47 = vld [vmem:[%s1470_s1 + $0x1a8] sm:$0xff]   ;;  %v1159_v51 = vld [vmem:[%s1470_s1 + $0x1a0] sm:$0xff]   ;;  %v1161_v53 = vld [vmem:[%s1470_s1 + $0x118] sm:$0xff]  }
  0x13   :  { %v1162_v54 = vld [vmem:[%s1470_s1 + $0x1d8] sm:$0xff]   ;;  %v1164_v56 = vld [vmem:[%s1470_s1 + $0x150] sm:$0xff]   ;;  %v1168_v60 = vld [vmem:[%s1470_s1 + $0x148] sm:$0xff]  }
  0x14   :  { %996 = vmatpush3.bf16.msra.mxu0 %v1124_v18  ;;  %v1163_v55 = vld [vmem:[%s1470_s1 + $0x198] sm:$0xff]   ;;  %v1165_v57 = vld [vmem:[%s1470_s1 + $0x110] sm:$0xff]   ;;  %v1169_v61 = vld [vmem:[%s1470_s1 + $0x108] sm:$0xff]  }
  0x15   :  { %1018 = vmatpush3.bf16.msra.mxu1 %v1125_v19  ;;  %997 = vmatprep.subr.bf16.mxu0 %v1126_v20  ;;  %v1166_v58 = vld [vmem:[%s1470_s1 + $0x1d0] sm:$0xff]   ;;  %v1170_v62 = vld [vmem:[%s1470_s1 + $0x1c8] sm:$0xff]   ;;  %v1172_v0 = vld [vmem:[%s1470_s1 + $0x140] sm:$0xff]  }
  0x16   :  { %1019 = vmatprep.subr.bf16.mxu1 %v1127_v21  ;;  %v1167_v59 = vld [vmem:[%s1470_s1 + $0x190] sm:$0xff]   ;;  %v1171_v63 = vld [vmem:[%s1470_s1 + $0x188] sm:$0xff]   ;;  %v1173_v1 = vld [vmem:[%s1470_s1 + $0x100] sm:$0xff]  }
  0x17   :  { %v1174_v2 = vld [vmem:[%s1470_s1 + $0x1c0] sm:$0xff]   ;;  %v1175_v3 = vld [vmem:[%s1471_s0 + $0x10] ss:$36 sps:$4 sm:$0xff]   ;;  %v1179_v7 = vld [vmem:[%s1471_s0 + $0x18] ss:$36 sps:$4 sm:$0xff]  }
  0x18   :  { %998 = vmatpush3.bf16.msra.mxu0 %v1128_v22  ;;  %v1177_v4 = vld [vmem:[%s1471_s0 + $0x14] ss:$36 sps:$4 sm:$0xff]   ;;  %v1178_v5 = vld [vmem:[%s1470_s1 + $0x180] sm:$0xff]   ;;  %v1184_v11 = vld [vmem:[%s1470_s1 + $0x228] sm:$0xff]  }
  0x19   :  { %1020 = vmatpush3.bf16.msra.mxu1 %v1129_v23  ;;  %999 = vmatprep.subr.bf16.mxu0 %v1130_v24  ;;  %v1181_v8 = vld [vmem:[%s1471_s0 + $0x1c] ss:$36 sps:$4 sm:$0xff]   ;;  %v1183_v10 = vld [vmem:[%s1470_s1 + $0x230] sm:$0xff]   ;;  %v1188_v15 = vld [vmem:[%s1470_s1 + $0x208] sm:$0xff]  }
  0x1a   :  { %1021 = vmatprep.subr.bf16.mxu1 %v1131_v25  ;;  %v1182_v9 = vld [vmem:[%s1470_s1 + $0x238] sm:$0xff]   ;;  %v1185_v12 = vld [vmem:[%s1470_s1 + $0x220] sm:$0xff]   ;;  %v1187_v14 = vld [vmem:[%s1470_s1 + $0x210] sm:$0xff]  }
  0x1b   :  { %v1186_v13 = vld [vmem:[%s1470_s1 + $0x218] sm:$0xff]   ;;  %v1189_v16 = vld [vmem:[%s1470_s1 + $0x200] sm:$0xff]  }
  0x1c   :  { %1000 = vmatpush3.bf16.msra.mxu0 %v1132_v26  ;;  %v1190_v17 = vld [vmem:[%s1471_s0 + $0x20] ss:$36 sps:$4 sm:$0xff]  }
  0x1d   :  { %1022 = vmatpush3.bf16.msra.mxu1 %v1133_v27  ;;  %1001 = vmatprep.subr.bf16.mxu0 %v1134_v28 }
  0x1e   :  { %1023 = vmatprep.subr.bf16.mxu1 %v1135_v29 }
  0x20   :  { %1002 = vmatpush3.bf16.msra.mxu0 %v1136_v30 }
  0x21   :  { %1024 = vmatpush3.bf16.msra.mxu1 %v1137_v31  ;;  %1031 = vmatprep.subr.bf16.mxu0 %v1144_v36 }
  0x22   :  { %1053 = vmatprep.subr.bf16.mxu1 %v1146_v38 }
  0x23   :  { %680 = vmatmul.mubr.bf16.vlgmr.msra.gmra.mxu0 %v1138_v32 }
  0x24   :  { %721 = vmatmul.mubr.bf16.vlgmr.msra.gmra.mxu1 %v1141_v34  ;;  %1032 = vmatpush3.bf16.msra.mxu0 %v1145_v37 }
  0x25   :  { %1054 = vmatpush3.bf16.msra.mxu1 %v1147_v39  ;;  %1033 = vmatprep.subr.bf16.mxu0 %v1148_v40 }
  0x26   :  { %1055 = vmatprep.subr.bf16.mxu1 %v1150_v42  ;;  %761 = vmatprep.mubr.bf16.mxu0 %v1177_v4 }
  0x27   :  { %802 = vmatprep.mubr.bf16.mxu1 %v1181_v8 }
  0x28   :  { %1034 = vmatpush3.bf16.msra.mxu0 %v1149_v41 }
  0x29   :  { %1056 = vmatpush3.bf16.msra.mxu1 %v1151_v43  ;;  %1035 = vmatprep.subr.bf16.mxu0 %v1152_v44 }
  0x2a   :  { %1057 = vmatprep.subr.bf16.mxu1 %v1154_v46 }
  0x2c   :  { %1036 = vmatpush3.bf16.msra.mxu0 %v1153_v45 }
  0x2d   :  { %1058 = vmatpush3.bf16.msra.mxu1 %v1155_v47  ;;  %1037 = vmatprep.subr.bf16.mxu0 %v1156_v48 }
  0x2e   :  { %1059 = vmatprep.subr.bf16.mxu1 %v1158_v50 }
  0x30   :  { %1038 = vmatpush3.bf16.msra.mxu0 %v1157_v49 }
  0x31   :  { %1060 = vmatpush3.bf16.msra.mxu1 %v1159_v51  ;;  %1039 = vmatprep.subr.bf16.mxu0 %v1160_v52 }
  0x32   :  { %1061 = vmatprep.subr.bf16.mxu1 %v1162_v54 }
  0x34   :  { %1040 = vmatpush3.bf16.msra.mxu0 %v1161_v53 }
  0x35   :  { %1062 = vmatpush3.bf16.msra.mxu1 %v1163_v55  ;;  %1041 = vmatprep.subr.bf16.mxu0 %v1164_v56 }
  0x36   :  { %1063 = vmatprep.subr.bf16.mxu1 %v1166_v58 }
  0x38   :  { %1042 = vmatpush3.bf16.msra.mxu0 %v1165_v57 }
  0x39   :  { %1064 = vmatpush3.bf16.msra.mxu1 %v1167_v59  ;;  %1043 = vmatprep.subr.bf16.mxu0 %v1168_v60  ;;  %v878_v60 = vlaneseq }
  0x3a   :  { %1065 = vmatprep.subr.bf16.mxu1 %v1170_v62 }
  0x3c   :  { %1044 = vmatpush3.bf16.msra.mxu0 %v1169_v61 }
  0x3d   :  { %1066 = vmatpush3.bf16.msra.mxu1 %v1171_v63  ;;  %1045 = vmatprep.subr.bf16.mxu0 %v1172_v0 }
  0x3e   :  { %1067 = vmatprep.subr.bf16.mxu1 %v1174_v2 }
  0x40   :  { %1046 = vmatpush3.bf16.msra.mxu0 %v1173_v1  ;;  %v879_v1 = vshrl.u32 %v878_v60, 7 }
  0x41   :  { %1084 = vmatprep.subr.bf16.mxu0 %v1191_v6  ;;  %1068 = vmatpush3.bf16.msra.mxu1 %v1178_v5 }
  0x42   :  { %vm880_vm1 = vcmp.eq.s32.totalorder %v879_v1, 0 }
  0x43   :  { %762 = vmatmul.mubr.bf16.vlgmr.msra.gmra.mxu0 %v1175_v3 }
  0x44   :  { %1100 = vmatprep.mubr.msk.bf16.mxu0 %vm1192_vm0, %v1191_v6  ;;  %1085 = vmatpush3.bf16.msra.mxu0 %v1182_v9 }
  0x45   :  { %803 = vmatmul.mubr.bf16.vlgmr.msra.gmra.mxu1 %v1179_v7  ;;  %1086 = vmatprep.subr.bf16.mxu0 %v1191_v6 }
  0x48   :  { %1087 = vmatpush3.bf16.msra.mxu0 %v1183_v10 }
  0x49   :  { %1088 = vmatprep.subr.bf16.mxu0 %v1191_v6 }
  0x4c   :  { %1089 = vmatpush3.bf16.msra.mxu0 %v1184_v11 }
  0x4d   :  { %1090 = vmatprep.subr.bf16.mxu0 %v1191_v6 }
  0x50   :  { %1091 = vmatpush3.bf16.msra.mxu0 %v1185_v12 }
  0x51   :  { %1092 = vmatprep.subr.bf16.mxu0 %v1191_v6 }
  0x54   :  { %1093 = vmatpush3.bf16.msra.mxu0 %v1186_v13 }
  0x55   :  { %1094 = vmatprep.subr.bf16.mxu0 %v1191_v6 }
  0x58   :  { %1095 = vmatpush3.bf16.msra.mxu0 %v1187_v14 }
  0x59   :  { %1096 = vmatprep.subr.bf16.mxu0 %v1191_v6 }
  0x5c   :  { %1097 = vmatpush3.bf16.msra.mxu0 %v1188_v15 }
  0x5d   :  { %1098 = vmatprep.subr.bf16.mxu0 %v1191_v6 }
  0x60   :  { %1099 = vmatpush3.bf16.msra.mxu0 %v1189_v16 }
  0x63   :  { %1101 = vmatmul.mubr.bf16.vlgmr.msra.gmra.mxu0 %v1190_v17 }
  0xe3   :  { %v1003_v18 = vpop.f32.mrf.mxu0 }
  0xe4   :  { %v1025_v19 = vpop.f32.mrf.mxu1 }
  0xe5   :  { %v1004_v20 = vpop.f32.mrf.mxu0 }
  0xe6   :  { %v1026_v21 = vpop.f32.mrf.mxu1  ;;  %v1005_v31 = vadd.f32 %v1004_v20, %v1003_v18 }
  0xe7   :  { %v1006_v22 = vpop.f32.mrf.mxu0  ;;  %v1027_v32 = vadd.f32 %v1026_v21, %v1025_v19 }
  0xe8   :  { %v1028_v23 = vpop.f32.mrf.mxu1 }
  0xe9   :  { %v1007_v24 = vpop.f32.mrf.mxu0  ;;  %v723_v38 = vadd.f32 %v1027_v32, %v1005_v31 }
  0xea   :  { %v1029_v26 = vpop.f32.mrf.mxu1  ;;  %v1008_v35 = vadd.f32 %v1007_v24, %v1006_v22 }
  0xeb   :  { %v1030_v36 = vadd.f32 %v1029_v26, %v1028_v23 }
  0xed   :  { %v726_v41 = vadd.f32 %v1030_v36, %v1008_v35 }
 0x103   :  { %v1047_v25 = vpop.f32.mrf.mxu0 }
 0x105   :  { %v1048_v27 = vpop.f32.mrf.mxu0  ;;  %v1069_v28 = vpop.f32.mrf.mxu1 }
 0x106   :  { %v1049_v37 = vadd.f32 %v1048_v27, %v1047_v25 }
 0x107   :  { %v1050_v29 = vpop.f32.mrf.mxu0  ;;  %v1070_v30 = vpop.f32.mrf.mxu1 }
 0x108   :  { %v764_v42 = vadd.f32 %v1049_v37, %v723_v38  ;;  %v1071_v43 = vadd.f32 %v1070_v30, %v1069_v28 }
 0x109   :  { %v1051_v33 = vpop.f32.mrf.mxu0  ;;  %v1072_v34 = vpop.f32.mrf.mxu1 }
 0x10a   :  { %v1052_v39 = vadd.f32 %v1051_v33, %v1050_v29  ;;  %v805_v47 = vadd.f32 %v1071_v43, %v764_v42 }
 0x10b   :  { %v1073_v40 = vpop.f32.mrf.mxu1 }
 0x10c   :  { %v767_v44 = vadd.f32 %v1052_v39, %v726_v41  ;;  %v1074_v45 = vadd.f32 %v1073_v40, %v1072_v34 }
 0x10e   :  { %v808_v50 = vadd.f32 %v1074_v45, %v767_v44 }
 0x123   :  { %v845_v46 = vpop.f32.mrf.mxu0 }
 0x124   :  { %v846_v49 = vadd.f32 %v845_v46, %v805_v47 }
 0x125   :  { %v1102_v48 = vpop.f32.mrf.mxu0 }
 0x126   :  { %v869_v54 = vmul.f32 %v846_v49, %v846_v49 }
 0x127   :  { %v848_v51 = vpop.f32.mrf.mxu0 }
 0x128   :  { %v849_v52 = vadd.f32 %v848_v51, %v808_v50 }
 0x129   :  { %v1103_v53 = vpop.f32.mrf.mxu0 }
 0x12a   :  { %v985_v55 = vpack.c.bf16 %v849_v52, %v846_v49  ;;  %v862_v56 = vadd.f32 %v849_v52, %v846_v49  ;;  %v870_v57 = vmul.f32 %v849_v52, %v849_v52 }
 0x12c   :  { %986 = vst [vmem:[%s1472_s2] sm:$0xff] %v985_v55   ;;  %v863_v58 = vrot.slane %v862_v56, 4  ;;  %v871_v59 = vadd.f32 %v870_v57, %v869_v54 }
 0x12e   :  { %v864_v61 = vadd.f32 %v863_v58, %v862_v56  ;;  %v872_v62 = vrot.slane %v871_v59, 4 }
 0x130   :  { %v865_v63 = vrot.slane %v864_v61, 2  ;;  %v873_v0 = vadd.f32 %v872_v62, %v871_v59 }
 0x132   :  { %v866_v2 = vadd.f32 %v865_v63, %v864_v61  ;;  %v874_v3 = vrot.slane %v873_v0, 2 }
 0x134   :  { %v867_v4 = vrot.slane %v866_v2, 1  ;;  %v875_v5 = vadd.f32 %v874_v3, %v873_v0 }
 0x136   :  { %v868_v6 = vadd.f32 %v867_v4, %v866_v2  ;;  %v876_v7 = vrot.slane %v875_v5, 1 }
 0x138   :  { %v877_v8 = vadd.f32 %v876_v7, %v875_v5  ;;  %v881_v9 = vsel %vm880_vm1, %v868_v6, 0.0 }
 0x139   :  { %882 = vst [vmem:[%s1473_s3] sm:$0xff] %v881_v9 }
 0x13a   :  { %v883_v10 = vsel %vm880_vm1, %v877_v8, 0.0 }
 0x13b   :  { %884 = vst [vmem:[%s1474_s4] sm:$0xff] %v883_v10 }

// kernel: resnet_forward.92
= control target key start
LH: loop header
LB: loop body
LE: loop exit
PB: predicated region body
PF: predicated region fallthrough
CT: control target
= control target key end

     0   :  { %v19_v0 = vlaneseq  ;;  %s94_s0 = inlined_call_operand.vmem [shape: bf16[8,256], index: 0, kind: input, shape index: {}]   ;;  %s95_s1 = inlined_call_operand.vmem [shape: f32[1,256], index: 1, kind: input, shape index: {}]   ;;  %s96_s2 = inlined_call_operand.vmem [shape: f32[1,256], index: 2, kind: input, shape index: {}]   ;;  %s97_s3 = inlined_call_operand.vmem [shape: bf16[8,256], index: 3, kind: output, shape index: {}]  }
   0x1   :  { %v14_v1 = vld [vmem:[%s94_s0] sm:$0xff] }
   0x2   :  { %v20_v2 = vshrl.u32 %v19_v0, 7  ;;  %v17_v3 = vld [vmem:[%s95_s1] sm:$0x3]  ;;  %v15_v5 = vunpack.c.l.bf16 %v14_v1  ;;  %v16_v6 = vunpack.c.h.bf16 %v14_v1 }
   0x3   :  { %v31_v4 = vld [vmem:[%s96_s2] sm:$0x3] }
   0x4   :  { %v21_v7 = vsub.s32 0, %v20_v2  ;;  %v25_v8 = vsub.s32 1, %v20_v2 }
   0x6   :  { %v22_v9 = vrot.slane %v17_v3, %v21_v7  ;;  %v26_v10 = vrot.slane %v17_v3, %v25_v8  ;;  %v36_v11 = vrot.slane %v31_v4, %v21_v7  ;;  %v40_v12 = vrot.slane %v31_v4, %v25_v8 }
   0x8   :  { %v29_v13 = vmul.f32 %v22_v9, %v15_v5  ;;  %v30_v14 = vmul.f32 %v26_v10, %v16_v6 }
   0xa   :  { %v43_v15 = vadd.f32 %v36_v11, %v29_v13  ;;  %v44_v16 = vadd.f32 %v40_v12, %v30_v14 }
   0xc   :  { %v45_v17 = vmax.f32 %v43_v15, 0.0  ;;  %v46_v18 = vmax.f32 %v44_v16, 0.0 }
   0xe   :  { %v61_v19 = vpack.c.bf16 %v46_v18, %v45_v17 }
  0x10   :  { %55 = vst [vmem:[%s97_s3] sm:$0xff] %v61_v19 }

// kernel: resnet_forward.94
= control target key start
LH: loop header
LB: loop body
LE: loop exit
PB: predicated region body
PF: predicated region fallthrough
CT: control target
= control target key end

     0   :  { %v254_v1 = vmov 0   ;;  %v188_v21 = vlaneseq  ;;  %s350_s1 = inlined_call_operand.vmem [shape: bf16[128,256], index: 1, kind: input, shape index: {}]   ;;  %s351_s0 = inlined_call_operand.vmem [shape: bf16[8,128], index: 0, kind: input, shape index: {}]   ;;  %s352_s2 = inlined_call_operand.vmem [shape: bf16[8,256], index: 2, kind: output, shape index: {0}]   ;;  %s353_s3 = inlined_call_operand.vmem [shape: f32[8,256], index: 3, kind: output, shape index: {1}]   ;;  %s354_s4 = inlined_call_operand.vmem [shape: f32[8,256], index: 4, kind: output, shape index: {2}]  }
   0x1   :  { %v230_v0 = vld [vmem:[%s350_s1 + $0x74] ss:$8 sps:$4 sm:$0xff]   ;;  %144 = vmatprep.mubr.bf16.mxu0 %v254_v1  ;;  %v232_v2 = vld [vmem:[%s350_s1 + $0x70] ss:$8 sps:$4 sm:$0xff]   ;;  %v233_v3 = vld [vmem:[%s350_s1 + $0x64] ss:$8 sps:$4 sm:$0xff]  }
   0x2   :  { %112 = vmatprep.subr.bf16.mxu0 %v230_v0  ;;  %v235_v4 = vld [vmem:[%s350_s1 + $0x60] ss:$8 sps:$4 sm:$0xff]   ;;  %v236_v5 = vld [vmem:[%s350_s1 + $0x54] ss:$8 sps:$4 sm:$0xff]   ;;  %v238_v6 = vld [vmem:[%s350_s1 + $0x50] ss:$8 sps:$4 sm:$0xff]  }
   0x3   :  { %113 = vmatpush1.bf16.msra.mxu0 %v232_v2  ;;  %v239_v7 = vld [vmem:[%s350_s1 + $0x44] ss:$8 sps:$4 sm:$0xff]   ;;  %v241_v8 = vld [vmem:[%s350_s1 + $0x40] ss:$8 sps:$4 sm:$0xff]   ;;  %v242_v9 = vld [vmem:[%s350_s1 + $0x34] ss:$8 sps:$4 sm:$0xff]  }
   0x4   :  { %114 = vmatprep.subr.bf16.mxu0 %v233_v3  ;;  %v244_v10 = vld [vmem:[%s350_s1 + $0x30] ss:$8 sps:$4 sm:$0xff]   ;;  %v245_v11 = vld [vmem:[%s350_s1 + $0x24] ss:$8 sps:$4 sm:$0xff]   ;;  %v247_v12 = vld [vmem:[%s350_s1 + $0x20] ss:$8 sps:$4 sm:$0xff]  }
   0x5   :  { %v248_v13 = vld [vmem:[%s350_s1 + $0x14] ss:$8 sps:$4 sm:$0xff]   ;;  %v250_v14 = vld [vmem:[%s350_s1 + $0x10] ss:$8 sps:$4 sm:$0xff]   ;;  %v251_v15 = vld [vmem:[%s350_s1 + $0x4] ss:$8 sps:$4 sm:$0xff]  }
   0x6   :  { %v253_v16 = vld [vmem:[%s350_s1] ss:$8 sps:$4 sm:$0xff]   ;;  %v189_v32 = vshrl.u32 %v188_v21, 7 }
   0x7   :  { %115 = vmatpush1.bf16.msra.mxu0 %v235_v4  ;;  %v15_v17 = vld [vmem:[%s351_s0] sm:$0xf] }
   0x8   :  { %116 = vmatprep.subr.bf16.mxu0 %v236_v5  ;;  %vm190_vm0 = vcmp.eq.s32.totalorder %v189_v32, 0 }
   0xb   :  { %117 = vmatpush1.bf16.msra.mxu0 %v238_v6 }
   0xc   :  { %118 = vmatprep.subr.bf16.mxu0 %v239_v7 }
   0xf   :  { %119 = vmatpush1.bf16.msra.mxu0 %v241_v8 }
  0x10   :  { %120 = vmatprep.subr.bf16.mxu0 %v242_v9 }
  0x13   :  { %121 = vmatpush1.bf16.msra.mxu0 %v244_v10 }
  0x14   :  { %122 = vmatprep.subr.bf16.mxu0 %v245_v11 }
  0x17   :  { %123 = vmatpush1.bf16.msra.mxu0 %v247_v12 }
  0x18   :  { %124 = vmatprep.subr.bf16.mxu0 %v248_v13 }
  0x1b   :  { %125 = vmatpush1.bf16.msra.mxu0 %v250_v14 }
  0x1c   :  { %126 = vmatprep.subr.bf16.mxu0 %v251_v15 }
  0x1f   :  { %127 = vmatpush1.bf16.msra.mxu0 %v253_v16 }
  0x22   :  { %145 = vmatmul.mubr.bf16.vlgmr.msra.gmra.mxu0 %v15_v17 }
  0xe2   :  { %v146_v18 = vpop.f32.mrf.mxu0 }
  0xe3   :  { %v162_v19 = vrot.slane %v146_v18, 4  ;;  %v174_v20 = vmul.f32 %v146_v18, %v146_v18 }
  0xe4   :  { %v148_v22 = vpop.f32.mrf.mxu0 }
  0xe5   :  { %v163_v23 = vadd.f32 %v162_v19, %v146_v18  ;;  %v176_v24 = vrot.slane %v174_v20, 4  ;;  %v228_v25 = vpack.c.bf16 %v148_v22, %v146_v18  ;;  %v168_v26 = vrot.slane %v148_v22, 4 }
  0xe6   :  { %v175_v27 = vmul.f32 %v148_v22, %v148_v22  ;;  %v150_v28 = vpop.f32.mrf.mxu0 }
  0xe7   :  { %v164_v29 = vrot.slane %v163_v23, 2  ;;  %v177_v30 = vadd.f32 %v176_v24, %v174_v20  ;;  %161 = vst [vmem:[%s352_s2] sm:$0xff] %v228_v25  ;;  %v169_v31 = vadd.f32 %v168_v26, %v148_v22 }
  0xe8   :  { %v182_v33 = vrot.slane %v175_v27, 4  ;;  %v151_v34 = vpop.f32.mrf.mxu0 }
  0xe9   :  { %v165_v35 = vadd.f32 %v164_v29, %v163_v23  ;;  %v178_v36 = vrot.slane %v177_v30, 2  ;;  %v170_v37 = vrot.slane %v169_v31, 2 }
  0xea   :  { %v183_v38 = vadd.f32 %v182_v33, %v175_v27 }
  0xeb   :  { %v166_v39 = vrot.slane %v165_v35, 1  ;;  %v179_v40 = vadd.f32 %v178_v36, %v177_v30  ;;  %v171_v41 = vadd.f32 %v170_v37, %v169_v31 }
  0xec   :  { %v184_v42 = vrot.slane %v183_v38, 2 }
  0xed   :  { %v167_v43 = vadd.f32 %v166_v39, %v165_v35  ;;  %v180_v44 = vrot.slane %v179_v40, 1  ;;  %v172_v45 = vrot.slane %v171_v41, 1 }
  0xee   :  { %v185_v46 = vadd.f32 %v184_v42, %v183_v38 }
  0xef   :  { %v181_v47 = vadd.f32 %v180_v44, %v179_v40  ;;  %v191_v48 = vsel %vm190_vm0, %v167_v43, 0.0  ;;  %v173_v49 = vadd.f32 %v172_v45, %v171_v41 }
  0xf0   :  { %193 = vst [vmem:[%s353_s3] sm:$0xff] %v191_v48  ;;  %v186_v50 = vrot.slane %v185_v46, 1 }
  0xf1   :  { %v195_v51 = vsel %vm190_vm0, %v181_v47, 0.0  ;;  %v192_v52 = vsel %vm190_vm0, %v173_v49, 0.0 }
  0xf2   :  { %197 = vst [vmem:[%s354_s4] sm:$0xff] %v195_v51  ;;  %v187_v53 = vadd.f32 %v186_v50, %v185_v46  ;;  %194 = vst [vmem:[%s353_s3 + $0x8] sm:$0xff] %v192_v52 }
  0xf4   :  { %v196_v54 = vsel %vm190_vm0, %v187_v53, 0.0 }
  0xf5   :  { %198 = vst [vmem:[%s354_s4 + $0x8] sm:$0xff] %v196_v54 }

// kernel: resnet_forward.95
= control target key start
LH: loop header
LB: loop body
LE: loop exit
PB: predicated region body
PF: predicated region fallthrough
CT: control target
= control target key end

     0   :  { %v28_v0 = vlaneseq  ;;  %s160_s0 = inlined_call_operand.vmem [shape: bf16[8,256], index: 0, kind: input, shape index: {}]   ;;  %s161_s1 = inlined_call_operand.vmem [shape: bf16[8,256], index: 1, kind: input, shape index: {}]   ;;  %s162_s2 = inlined_call_operand.vmem [shape: f32[1,256], index: 2, kind: input, shape index: {}]   ;;  %s163_s3 = inlined_call_operand.vmem [shape: f32[1,256], index: 3, kind: input, shape index: {}]   ;;  %s164_s4 = inlined_call_operand.vmem [shape: f32[1,256], index: 4, kind: input, shape index: {}]   ;;  %s165_s5 = inlined_call_operand.vmem [shape: f32[1,256], index: 5, kind: input, shape index: {}]   ;;  %s166_s6 = inlined_call_operand.vmem [shape: bf16[8,256], index: 6, kind: output, shape index: {}]  }
   0x1   :  { %v23_v1 = vld [vmem:[%s160_s0] sm:$0xff] }
   0x2   :  { %v29_v2 = vshrl.u32 %v28_v0, 7  ;;  %v54_v3 = vld [vmem:[%s161_s1] sm:$0xff]  ;;  %v24_v6 = vunpack.c.l.bf16 %v23_v1  ;;  %v25_v7 = vunpack.c.h.bf16 %v23_v1 }
   0x3   :  { %v26_v4 = vld [vmem:[%s162_s2] sm:$0x3]  ;;  %v55_v12 = vunpack.c.l.bf16 %v54_v3  ;;  %v56_v13 = vunpack.c.h.bf16 %v54_v3 }
   0x4   :  { %v40_v5 = vld [vmem:[%s163_s3] sm:$0x3]  ;;  %v30_v8 = vsub.s32 0, %v29_v2  ;;  %v34_v9 = vsub.s32 1, %v29_v2 }
   0x5   :  { %v57_v10 = vld [vmem:[%s164_s4] sm:$0x3] }
   0x6   :  { %v71_v11 = vld [vmem:[%s165_s5] sm:$0x3]  ;;  %v31_v14 = vrot.slane %v26_v4, %v30_v8  ;;  %v35_v15 = vrot.slane %v26_v4, %v34_v9  ;;  %v45_v16 = vrot.slane %v40_v5, %v30_v8  ;;  %v49_v17 = vrot.slane %v40_v5, %v34_v9 }
   0x7   :  { %v62_v18 = vrot.slane %v57_v10, %v30_v8  ;;  %v66_v19 = vrot.slane %v57_v10, %v34_v9  ;;  %v76_v20 = vrot.slane %v71_v11, %v30_v8  ;;  %v80_v21 = vrot.slane %v71_v11, %v34_v9 }
   0x8   :  { %v38_v22 = vmul.f32 %v31_v14, %v24_v6  ;;  %v39_v23 = vmul.f32 %v35_v15, %v25_v7 }
   0x9   :  { %v69_v24 = vmul.f32 %v62_v18, %v55_v12  ;;  %v70_v25 = vmul.f32 %v66_v19, %v56_v13 }
   0xa   :  { %v52_v26 = vadd.f32 %v45_v16, %v38_v22  ;;  %v53_v27 = vadd.f32 %v49_v17, %v39_v23 }
   0xb   :  { %v83_v28 = vadd.f32 %v76_v20, %v69_v24  ;;  %v84_v29 = vadd.f32 %v80_v21, %v70_v25 }
   0xd   :  { %v85_v30 = vadd.f32 %v83_v28, %v52_v26  ;;  %v86_v31 = vadd.f32 %v84_v29, %v53_v27 }
   0xf   :  { %v87_v32 = vmax.f32 %v85_v30, 0.0  ;;  %v88_v33 = vmax.f32 %v86_v31, 0.0 }
  0x11   :  { %v103_v34 = vpack.c.bf16 %v88_v33, %v87_v32 }
  0x13   :  { %97 = vst [vmem:[%s166_s6] sm:$0xff] %v103_v34 }

// kernel: resnet_forward.91
= control target key start
LH: loop header
LB: loop body
LE: loop exit
PB: predicated region body
PF: predicated region fallthrough
CT: control target
= control target key end

     0   :  { %s2064_s1 = inlined_call_operand.vmem [shape: bf16[1152,256], index: 1, kind: input, shape index: {}]   ;;  %s2065_s0 = inlined_call_operand.vmem [shape: bf16[8,1152], index: 0, kind: input, shape index: {}]   ;;  %s2066_s2 = inlined_call_operand.vmem [shape: bf16[8,256], index: 2, kind: output, shape index: {0}]   ;;  %s2067_s3 = inlined_call_operand.vmem [shape: f32[8,256], index: 3, kind: output, shape index: {1}]   ;;  %s2068_s4 = inlined_call_operand.vmem [shape: f32[8,256], index: 4, kind: output, shape index: {2}]  }
   0x1   :  { %v1335_v0 = vld [vmem:[%s2064_s1 + $0x74] ss:$8 sps:$4 sm:$0xff]   ;;  %v1339_v2 = vld [vmem:[%s2064_s1 + $0x70] ss:$8 sps:$4 sm:$0xff]   ;;  %v1341_v4 = vld [vmem:[%s2064_s1 + $0x64] ss:$8 sps:$4 sm:$0xff]  }
   0x2   :  { %v1337_v1 = vld [vmem:[%s2064_s1 + $0x174] ss:$8 sps:$4 sm:$0xff]   ;;  %916 = vmatprep.subr.bf16.mxu0 %v1335_v0  ;;  %v1340_v3 = vld [vmem:[%s2064_s1 + $0x170] ss:$8 sps:$4 sm:$0xff]   ;;  %v1343_v5 = vld [vmem:[%s2064_s1 + $0x164] ss:$8 sps:$4 sm:$0xff]  }
   0x3   :  { %957 = vmatprep.subr.bf16.mxu1 %v1337_v1  ;;  %917 = vmatpush1.bf16.msra.mxu0 %v1339_v2  ;;  %v1345_v6 = vld [vmem:[%s2064_s1 + $0x60] ss:$8 sps:$4 sm:$0xff]   ;;  %v1347_v8 = vld [vmem:[%s2064_s1 + $0x54] ss:$8 sps:$4 sm:$0xff]   ;;  %v1351_v10 = vld [vmem:[%s2064_s1 + $0x50] ss:$8 sps:$4 sm:$0xff]  }
   0x4   :  { %958 = vmatpush1.bf16.msra.mxu1 %v1340_v3  ;;  %918 = vmatprep.subr.bf16.mxu0 %v1341_v4  ;;  %v1346_v7 = vld [vmem:[%s2064_s1 + $0x160] ss:$8 sps:$4 sm:$0xff]   ;;  %v1349_v9 = vld [vmem:[%s2064_s1 + $0x154] ss:$8 sps:$4 sm:$0xff]   ;;  %v1352_v11 = vld [vmem:[%s2064_s1 + $0x150] ss:$8 sps:$4 sm:$0xff]  }
   0x5   :  { %959 = vmatprep.subr.bf16.mxu1 %v1343_v5  ;;  %v1353_v12 = vld [vmem:[%s2064_s1 + $0x44] ss:$8 sps:$4 sm:$0xff]   ;;  %v1357_v14 = vld [vmem:[%s2064_s1 + $0x40] ss:$8 sps:$4 sm:$0xff]   ;;  %v1359_v16 = vld [vmem:[%s2064_s1 + $0x34] ss:$8 sps:$4 sm:$0xff]  }
   0x6   :  { %v1355_v13 = vld [vmem:[%s2064_s1 + $0x144] ss:$8 sps:$4 sm:$0xff]   ;;  %v1358_v15 = vld [vmem:[%s2064_s1 + $0x140] ss:$8 sps:$4 sm:$0xff]   ;;  %v1361_v17 = vld [vmem:[%s2064_s1 + $0x134] ss:$8 sps:$4 sm:$0xff]  }
   0x7   :  { %919 = vmatpush1.bf16.msra.mxu0 %v1345_v6  ;;  %v1363_v18 = vld [vmem:[%s2064_s1 + $0x30] ss:$8 sps:$4 sm:$0xff]   ;;  %v1365_v20 = vld [vmem:[%s2064_s1 + $0x24] ss:$8 sps:$4 sm:$0xff]   ;;  %v1369_v22 = vld [vmem:[%s2064_s1 + $0x20] ss:$8 sps:$4 sm:$0xff]  }
   0x8   :  { %960 = vmatpush1.bf16.msra.mxu1 %v1346_v7  ;;  %920 = vmatprep.subr.bf16.mxu0 %v1347_v8  ;;  %v1364_v19 = vld [vmem:[%s2064_s1 + $0x130] ss:$8 sps:$4 sm:$0xff]   ;;  %v1367_v21 = vld [vmem:[%s2064_s1 + $0x124] ss:$8 sps:$4 sm:$0xff]   ;;  %v1370_v23 = vld [vmem:[%s2064_s1 + $0x120] ss:$8 sps:$4 sm:$0xff]  }
   0x9   :  { %961 = vmatprep.subr.bf16.mxu1 %v1349_v9  ;;  %v1371_v24 = vld [vmem:[%s2064_s1 + $0x14] ss:$8 sps:$4 sm:$0xff]   ;;  %v1375_v26 = vld [vmem:[%s2064_s1 + $0x10] ss:$8 sps:$4 sm:$0xff]   ;;  %v1377_v28 = vld [vmem:[%s2064_s1 + $0x4] ss:$8 sps:$4 sm:$0xff]  }
   0xa   :  { %v1373_v25 = vld [vmem:[%s2064_s1 + $0x114] ss:$8 sps:$4 sm:$0xff]   ;;  %v1376_v27 = vld [vmem:[%s2064_s1 + $0x110] ss:$8 sps:$4 sm:$0xff]   ;;  %v1379_v29 = vld [vmem:[%s2064_s1 + $0x104] ss:$8 sps:$4 sm:$0xff]  }
   0xb   :  { %921 = vmatpush1.bf16.msra.mxu0 %v1351_v10  ;;  %v1381_v30 = vld [vmem:[%s2064_s1] ss:$8 sps:$4 sm:$0xff]   ;;  %v1383_v32 = vld [vmem:[%s2064_s1 + $0xf4] ss:$8 sps:$4 sm:$0xff]   ;;  %v1387_v34 = vld [vmem:[%s2064_s1 + $0xf0] ss:$8 sps:$4 sm:$0xff]  }
   0xc   :  { %962 = vmatpush1.bf16.msra.mxu1 %v1352_v11  ;;  %922 = vmatprep.subr.bf16.mxu0 %v1353_v12  ;;  %v1382_v31 = vld [vmem:[%s2064_s1 + $0x100] ss:$8 sps:$4 sm:$0xff]   ;;  %v1385_v33 = vld [vmem:[%s2064_s1 + $0x1f4] ss:$8 sps:$4 sm:$0xff]   ;;  %v1388_v35 = vld [vmem:[%s2064_s1 + $0x1f0] ss:$8 sps:$4 sm:$0xff]  }
   0xd   :  { %963 = vmatprep.subr.bf16.mxu1 %v1355_v13  ;;  %v1389_v36 = vld [vmem:[%s2064_s1 + $0xe4] ss:$8 sps:$4 sm:$0xff]   ;;  %v1393_v38 = vld [vmem:[%s2064_s1 + $0xe0] ss:$8 sps:$4 sm:$0xff]   ;;  %v1395_v40 = vld [vmem:[%s2064_s1 + $0xd4] ss:$8 sps:$4 sm:$0xff]  }
   0xe   :  { %v1391_v37 = vld [vmem:[%s2064_s1 + $0x1e4] ss:$8 sps:$4 sm:$0xff]   ;;  %v1394_v39 = vld [vmem:[%s2064_s1 + $0x1e0] ss:$8 sps:$4 sm:$0xff]   ;;  %v1397_v41 = vld [vmem:[%s2064_s1 + $0x1d4] ss:$8 sps:$4 sm:$0xff]  }
   0xf   :  { %923 = vmatpush1.bf16.msra.mxu0 %v1357_v14  ;;  %v1399_v42 = vld [vmem:[%s2064_s1 + $0xd0] ss:$8 sps:$4 sm:$0xff]   ;;  %v1401_v44 = vld [vmem:[%s2064_s1 + $0xc4] ss:$8 sps:$4 sm:$0xff]   ;;  %v1405_v49 = vld [vmem:[%s2064_s1 + $0xc0] ss:$8 sps:$4 sm:$0xff]  }
  0x10   :  { %964 = vmatpush1.bf16.msra.mxu1 %v1358_v15  ;;  %924 = vmatprep.subr.bf16.mxu0 %v1359_v16  ;;  %v1400_v43 = vld [vmem:[%s2064_s1 + $0x1d0] ss:$8 sps:$4 sm:$0xff]   ;;  %v1403_v45 = vld [vmem:[%s2064_s1 + $0x1c4] ss:$8 sps:$4 sm:$0xff]   ;;  %v1406_v50 = vld [vmem:[%s2064_s1 + $0x1c0] ss:$8 sps:$4 sm:$0xff]  }
  0x11   :  { %965 = vmatprep.subr.bf16.mxu1 %v1361_v17  ;;  %v15_v46 = vld [vmem:[%s2065_s0] sm:$0xff]  ;;  %v16_v48 = vld [vmem:[%s2065_s0 + $0x8] sm:$0xff]  ;;  %v1407_v52 = vld [vmem:[%s2064_s1 + $0xb4] ss:$8 sps:$4 sm:$0xff]  }
  0x12   :  { %v1180_v47 = vcombine.high %v15_v46, %v15_v46  ;;  %v1182_v51 = vcombine.high %v16_v48, %v16_v48  ;;  %v1409_v53 = vld [vmem:[%s2064_s1 + $0x1b4] ss:$8 sps:$4 sm:$0xff]   ;;  %v1411_v54 = vld [vmem:[%s2064_s1 + $0xb0] ss:$8 sps:$4 sm:$0xff]   ;;  %v1413_v56 = vld [vmem:[%s2064_s1 + $0xa4] ss:$8 sps:$4 sm:$0xff]   ;;  %v1179_v6 = vcombine.low %v15_v46, %v15_v46  ;;  %v1181_v7 = vcombine.low %v16_v48, %v16_v48 }
  0x13   :  { %925 = vmatpush1.bf16.msra.mxu0 %v1363_v18  ;;  %v1412_v55 = vld [vmem:[%s2064_s1 + $0x1b0] ss:$8 sps:$4 sm:$0xff]   ;;  %v1415_v57 = vld [vmem:[%s2064_s1 + $0x1a4] ss:$8 sps:$4 sm:$0xff]   ;;  %v1417_v58 = vld [vmem:[%s2064_s1 + $0xa0] ss:$8 sps:$4 sm:$0xff]  }
  0x14   :  { %966 = vmatpush1.bf16.msra.mxu1 %v1364_v19  ;;  %926 = vmatprep.subr.bf16.mxu0 %v1365_v20  ;;  %v1418_v59 = vld [vmem:[%s2064_s1 + $0x1a0] ss:$8 sps:$4 sm:$0xff]   ;;  %v1419_v60 = vld [vmem:[%s2064_s1 + $0x94] ss:$8 sps:$4 sm:$0xff]   ;;  %v1423_v62 = vld [vmem:[%s2064_s1 + $0x90] ss:$8 sps:$4 sm:$0xff]  }
  0x15   :  { %967 = vmatprep.subr.bf16.mxu1 %v1367_v21  ;;  %948 = vmatprep.mubr.bf16.mxu0 %v1180_v47  ;;  %v1421_v61 = vld [vmem:[%s2064_s1 + $0x194] ss:$8 sps:$4 sm:$0xff]   ;;  %v1424_v63 = vld [vmem:[%s2064_s1 + $0x190] ss:$8 sps:$4 sm:$0xff]   ;;  %v1425_v0 = vld [vmem:[%s2064_s1 + $0x84] ss:$8 sps:$4 sm:$0xff]  }
  0x16   :  { %989 = vmatprep.mubr.bf16.mxu1 %v1182_v51  ;;  %v1427_v1 = vld [vmem:[%s2064_s1 + $0x184] ss:$8 sps:$4 sm:$0xff]   ;;  %v1429_v2 = vld [vmem:[%s2064_s1 + $0x80] ss:$8 sps:$4 sm:$0xff]   ;;  %v1437_v4 = vld [vmem:[%s2064_s1 + $0x274] ss:$8 sps:$4 sm:$0xff]  }
  0x17   :  { %927 = vmatpush1.bf16.msra.mxu0 %v1369_v22  ;;  %v1430_v3 = vld [vmem:[%s2064_s1 + $0x180] ss:$8 sps:$4 sm:$0xff]   ;;  %v1440_v5 = vld [vmem:[%s2064_s1 + $0x374] ss:$8 sps:$4 sm:$0xff]   ;;  %v1435_v8 = vld [vmem:[%s2064_s1 + $0x270] ss:$8 sps:$4 sm:$0xff]  }
  0x18   :  { %968 = vmatpush1.bf16.msra.mxu1 %v1370_v23  ;;  %928 = vmatprep.subr.bf16.mxu0 %v1371_v24  ;;  %v1438_v9 = vld [vmem:[%s2064_s1 + $0x370] ss:$8 sps:$4 sm:$0xff]   ;;  %v1443_v10 = vld [vmem:[%s2064_s1 + $0x264] ss:$8 sps:$4 sm:$0xff]   ;;  %v1441_v12 = vld [vmem:[%s2064_s1 + $0x260] ss:$8 sps:$4 sm:$0xff]  }
  0x19   :  { %969 = vmatprep.subr.bf16.mxu1 %v1373_v25  ;;  %v1446_v11 = vld [vmem:[%s2064_s1 + $0x364] ss:$8 sps:$4 sm:$0xff]   ;;  %v1444_v13 = vld [vmem:[%s2064_s1 + $0x360] ss:$8 sps:$4 sm:$0xff]   ;;  %v1449_v14 = vld [vmem:[%s2064_s1 + $0x254] ss:$8 sps:$4 sm:$0xff]  }
  0x1a   :  { %v1452_v15 = vld [vmem:[%s2064_s1 + $0x354] ss:$8 sps:$4 sm:$0xff]   ;;  %v1447_v16 = vld [vmem:[%s2064_s1 + $0x250] ss:$8 sps:$4 sm:$0xff]   ;;  %v1455_v18 = vld [vmem:[%s2064_s1 + $0x244] ss:$8 sps:$4 sm:$0xff]  }
  0x1b   :  { %929 = vmatpush1.bf16.msra.mxu0 %v1375_v26  ;;  %v1450_v17 = vld [vmem:[%s2064_s1 + $0x350] ss:$8 sps:$4 sm:$0xff]   ;;  %v1458_v19 = vld [vmem:[%s2064_s1 + $0x344] ss:$8 sps:$4 sm:$0xff]   ;;  %v1453_v20 = vld [vmem:[%s2064_s1 + $0x240] ss:$8 sps:$4 sm:$0xff]  }
  0x1c   :  { %970 = vmatpush1.bf16.msra.mxu1 %v1376_v27  ;;  %930 = vmatprep.subr.bf16.mxu0 %v1377_v28  ;;  %v1456_v21 = vld [vmem:[%s2064_s1 + $0x340] ss:$8 sps:$4 sm:$0xff]   ;;  %v1461_v22 = vld [vmem:[%s2064_s1 + $0x234] ss:$8 sps:$4 sm:$0xff]   ;;  %v1459_v24 = vld [vmem:[%s2064_s1 + $0x230] ss:$8 sps:$4 sm:$0xff]  }
  0x1d   :  { %971 = vmatprep.subr.bf16.mxu1 %v1379_v29  ;;  %v1464_v23 = vld [vmem:[%s2064_s1 + $0x334] ss:$8 sps:$4 sm:$0xff]   ;;  %v1462_v25 = vld [vmem:[%s2064_s1 + $0x330] ss:$8 sps:$4 sm:$0xff]   ;;  %v1467_v26 = vld [vmem:[%s2064_s1 + $0x224] ss:$8 sps:$4 sm:$0xff]  }
  0x1e   :  { %v1470_v27 = vld [vmem:[%s2064_s1 + $0x324] ss:$8 sps:$4 sm:$0xff]   ;;  %v1465_v28 = vld [vmem:[%s2064_s1 + $0x220] ss:$8 sps:$4 sm:$0xff]   ;;  %v1500_v51 = vld [vmem:[%s2064_s1 + $0x3d4] ss:$8 sps:$4 sm:$0xff]  }
  0x1f   :  { %931 = vmatpush1.bf16.msra.mxu0 %v1381_v30  ;;  %v1468_v29 = vld [vmem:[%s2064_s1 + $0x320] ss:$8 sps:$4 sm:$0xff]   ;;  %v1473_v30 = vld [vmem:[%s2064_s1 + $0x214] ss:$8 sps:$4 sm:$0xff]   ;;  %v1491_v46 = vld [vmem:[%s2064_s1 + $0x2e4] ss:$8 sps:$4 sm:$0xff]  }
  0x20   :  { %972 = vmatpush1.bf16.msra.mxu1 %v1382_v31  ;;  %932 = vmatprep.subr.bf16.mxu0 %v1383_v32  ;;  %v1476_v31 = vld [vmem:[%s2064_s1 + $0x314] ss:$8 sps:$4 sm:$0xff]   ;;  %v1494_v47 = vld [vmem:[%s2064_s1 + $0x3e4] ss:$8 sps:$4 sm:$0xff]   ;;  %v1489_v48 = vld [vmem:[%s2064_s1 + $0x2e0] ss:$8 sps:$4 sm:$0xff]  }
  0x21   :  { %973 = vmatprep.subr.bf16.mxu1 %v1385_v33  ;;  %v1865_v32 = vld [vmem:[%s2065_s0 + $0x10] sm:$0xff] }
  0x22   :  { %v1471_v33 = vld [vmem:[%s2064_s1 + $0x210] ss:$8 sps:$4 sm:$0xff]  }
  0x23   :  { %933 = vmatpush2.bf16.msra.mxu0 %v1387_v34  ;;  %v1474_v34 = vld [vmem:[%s2064_s1 + $0x310] ss:$8 sps:$4 sm:$0xff]  }
  0x24   :  { %974 = vmatpush2.bf16.msra.mxu1 %v1388_v35  ;;  %934 = vmatprep.subr.bf16.mxu0 %v1389_v36  ;;  %v1184_v35 = vcombine.high %v1865_v32, %v1865_v32  ;;  %v1878_v36 = vld [vmem:[%s2065_s0 + $0x18] sm:$0xff] }
  0x25   :  { %975 = vmatprep.subr.bf16.mxu1 %v1391_v37  ;;  %v1479_v37 = vld [vmem:[%s2064_s1 + $0x204] ss:$8 sps:$4 sm:$0xff]  }
  0x27   :  { %935 = vmatpush2.bf16.msra.mxu0 %v1393_v38  ;;  %v1186_v38 = vcombine.high %v1878_v36, %v1878_v36 }
  0x28   :  { %976 = vmatpush2.bf16.msra.mxu1 %v1394_v39  ;;  %936 = vmatprep.subr.bf16.mxu0 %v1395_v40  ;;  %v1482_v39 = vld [vmem:[%s2064_s1 + $0x304] ss:$8 sps:$4 sm:$0xff]   ;;  %v1477_v40 = vld [vmem:[%s2064_s1 + $0x200] ss:$8 sps:$4 sm:$0xff]  }
  0x29   :  { %977 = vmatprep.subr.bf16.mxu1 %v1397_v41  ;;  %v1480_v41 = vld [vmem:[%s2064_s1 + $0x300] ss:$8 sps:$4 sm:$0xff]  }
  0x2b   :  { %937 = vmatpush2.bf16.msra.mxu0 %v1399_v42  ;;  %v1485_v42 = vld [vmem:[%s2064_s1 + $0x2f4] ss:$8 sps:$4 sm:$0xff]  }
  0x2c   :  { %978 = vmatpush2.bf16.msra.mxu1 %v1400_v43  ;;  %938 = vmatprep.subr.bf16.mxu0 %v1401_v44  ;;  %v1488_v43 = vld [vmem:[%s2064_s1 + $0x3f4] ss:$8 sps:$4 sm:$0xff]   ;;  %v1483_v44 = vld [vmem:[%s2064_s1 + $0x2f0] ss:$8 sps:$4 sm:$0xff]  }
  0x2d   :  { %979 = vmatprep.subr.bf16.mxu1 %v1403_v45  ;;  %v1486_v45 = vld [vmem:[%s2064_s1 + $0x3f0] ss:$8 sps:$4 sm:$0xff]  }
  0x2f   :  { %939 = vmatpush2.bf16.msra.mxu0 %v1405_v49  ;;  %v1492_v49 = vld [vmem:[%s2064_s1 + $0x3e0] ss:$8 sps:$4 sm:$0xff]  }
  0x30   :  { %980 = vmatpush2.bf16.msra.mxu1 %v1406_v50  ;;  %940 = vmatprep.subr.bf16.mxu0 %v1407_v52  ;;  %v1497_v50 = vld [vmem:[%s2064_s1 + $0x2d4] ss:$8 sps:$4 sm:$0xff]   ;;  %v1495_v52 = vld [vmem:[%s2064_s1 + $0x2d0] ss:$8 sps:$4 sm:$0xff]  }
  0x31   :  { %981 = vmatprep.subr.bf16.mxu1 %v1409_v53  ;;  %v1498_v53 = vld [vmem:[%s2064_s1 + $0x3d0] ss:$8 sps:$4 sm:$0xff]  }
  0x33   :  { %941 = vmatpush2.bf16.msra.mxu0 %v1411_v54  ;;  %v1503_v54 = vld [vmem:[%s2064_s1 + $0x2c4] ss:$8 sps:$4 sm:$0xff]  }
  0x34   :  { %982 = vmatpush2.bf16.msra.mxu1 %v1412_v55  ;;  %942 = vmatprep.subr.bf16.mxu0 %v1413_v56  ;;  %v1506_v55 = vld [vmem:[%s2064_s1 + $0x3c4] ss:$8 sps:$4 sm:$0xff]   ;;  %v1501_v56 = vld [vmem:[%s2064_s1 + $0x2c0] ss:$8 sps:$4 sm:$0xff]  }
  0x35   :  { %983 = vmatprep.subr.bf16.mxu1 %v1415_v57  ;;  %v1504_v57 = vld [vmem:[%s2064_s1 + $0x3c0] ss:$8 sps:$4 sm:$0xff]  }
  0x37   :  { %943 = vmatpush2.bf16.msra.mxu0 %v1417_v58  ;;  %v1509_v58 = vld [vmem:[%s2064_s1 + $0x2b4] ss:$8 sps:$4 sm:$0xff]  }
  0x38   :  { %984 = vmatpush2.bf16.msra.mxu1 %v1418_v59  ;;  %944 = vmatprep.subr.bf16.mxu0 %v1419_v60  ;;  %v1512_v59 = vld [vmem:[%s2064_s1 + $0x3b4] ss:$8 sps:$4 sm:$0xff]   ;;  %v1507_v60 = vld [vmem:[%s2064_s1 + $0x2b0] ss:$8 sps:$4 sm:$0xff]  }
  0x39   :  { %985 = vmatprep.subr.bf16.mxu1 %v1421_v61  ;;  %v1510_v61 = vld [vmem:[%s2064_s1 + $0x3b0] ss:$8 sps:$4 sm:$0xff]  }
  0x3b   :  { %945 = vmatpush2.bf16.msra.mxu0 %v1423_v62  ;;  %v1515_v62 = vld [vmem:[%s2064_s1 + $0x2a4] ss:$8 sps:$4 sm:$0xff]  }
  0x3c   :  { %986 = vmatpush2.bf16.msra.mxu1 %v1424_v63  ;;  %946 = vmatprep.subr.bf16.mxu0 %v1425_v0  ;;  %v1518_v63 = vld [vmem:[%s2064_s1 + $0x3a4] ss:$8 sps:$4 sm:$0xff]   ;;  %v1513_v0 = vld [vmem:[%s2064_s1 + $0x2a0] ss:$8 sps:$4 sm:$0xff]  }
  0x3d   :  { %987 = vmatprep.subr.bf16.mxu1 %v1427_v1  ;;  %v1516_v1 = vld [vmem:[%s2064_s1 + $0x3a0] ss:$8 sps:$4 sm:$0xff]  }
  0x3f   :  { %947 = vmatpush2.bf16.msra.mxu0 %v1429_v2  ;;  %v1521_v2 = vld [vmem:[%s2064_s1 + $0x294] ss:$8 sps:$4 sm:$0xff]  }
  0x40   :  { %988 = vmatpush2.bf16.msra.mxu1 %v1430_v3  ;;  %998 = vmatprep.subr.bf16.mxu0 %v1437_v4  ;;  %v1524_v3 = vld [vmem:[%s2064_s1 + $0x394] ss:$8 sps:$4 sm:$0xff]   ;;  %v1519_v4 = vld [vmem:[%s2064_s1 + $0x290] ss:$8 sps:$4 sm:$0xff]  }
  0x41   :  { %1039 = vmatprep.subr.bf16.mxu1 %v1440_v5  ;;  %v1522_v5 = vld [vmem:[%s2064_s1 + $0x390] ss:$8 sps:$4 sm:$0xff]  }
  0x42   :  { %949 = vmatmul.mubr.bf16.vlgmr.msra.gmra.mxu0 %v1179_v6  ;;  %v1527_v6 = vld [vmem:[%s2064_s1 + $0x284] ss:$8 sps:$4 sm:$0xff]  }
  0x43   :  { %990 = vmatmul.mubr.bf16.vlgmr.msra.gmra.mxu1 %v1181_v7  ;;  %999 = vmatpush1.bf16.msra.mxu0 %v1435_v8  ;;  %v1530_v7 = vld [vmem:[%s2064_s1 + $0x384] ss:$8 sps:$4 sm:$0xff]   ;;  %v1525_v8 = vld [vmem:[%s2064_s1 + $0x280] ss:$8 sps:$4 sm:$0xff]  }
  0x44   :  { %1040 = vmatpush1.bf16.msra.mxu1 %v1438_v9  ;;  %1000 = vmatprep.subr.bf16.mxu0 %v1443_v10  ;;  %v1528_v9 = vld [vmem:[%s2064_s1 + $0x380] ss:$8 sps:$4 sm:$0xff]   ;;  %v1535_v10 = vld [vmem:[%s2064_s1 + $0x474] ss:$8 sps:$4 sm:$0xff]  }
  0x45   :  { %1041 = vmatprep.subr.bf16.mxu1 %v1446_v11  ;;  %1030 = vmatprep.mubr.bf16.mxu0 %v1184_v35  ;;  %v1183_v11 = vcombine.low %v1865_v32, %v1865_v32 }
  0x46   :  { %1071 = vmatprep.mubr.bf16.mxu1 %v1186_v38 }
  0x47   :  { %1001 = vmatpush1.bf16.msra.mxu0 %v1441_v12  ;;  %v1185_v12 = vcombine.low %v1878_v36, %v1878_v36 }
  0x48   :  { %1042 = vmatpush1.bf16.msra.mxu1 %v1444_v13  ;;  %1002 = vmatprep.subr.bf16.mxu0 %v1449_v14  ;;  %v1533_v13 = vld [vmem:[%s2064_s1 + $0x470] ss:$8 sps:$4 sm:$0xff]   ;;  %v1540_v14 = vld [vmem:[%s2064_s1 + $0x464] ss:$8 sps:$4 sm:$0xff]  }
  0x49   :  { %1043 = vmatprep.subr.bf16.mxu1 %v1452_v15  ;;  %v1538_v15 = vld [vmem:[%s2064_s1 + $0x460] ss:$8 sps:$4 sm:$0xff]  }
  0x4b   :  { %1003 = vmatpush1.bf16.msra.mxu0 %v1447_v16  ;;  %v1560_v16 = vmov 0  }
  0x4c   :  { %1044 = vmatpush1.bf16.msra.mxu1 %v1450_v17  ;;  %1004 = vmatprep.subr.bf16.mxu0 %v1455_v18  ;;  %v1543_v17 = vld [vmem:[%s2064_s1 + $0x454] ss:$8 sps:$4 sm:$0xff]   ;;  %v1541_v18 = vld [vmem:[%s2064_s1 + $0x450] ss:$8 sps:$4 sm:$0xff]  }
  0x4d   :  { %1045 = vmatprep.subr.bf16.mxu1 %v1458_v19  ;;  %v1546_v19 = vld [vmem:[%s2064_s1 + $0x444] ss:$8 sps:$4 sm:$0xff]  }
  0x4f   :  { %1005 = vmatpush1.bf16.msra.mxu0 %v1453_v20  ;;  %v1544_v20 = vld [vmem:[%s2064_s1 + $0x440] ss:$8 sps:$4 sm:$0xff]  }
  0x50   :  { %1046 = vmatpush1.bf16.msra.mxu1 %v1456_v21  ;;  %1006 = vmatprep.subr.bf16.mxu0 %v1461_v22  ;;  %v1549_v21 = vld [vmem:[%s2064_s1 + $0x434] ss:$8 sps:$4 sm:$0xff]   ;;  %v1547_v22 = vld [vmem:[%s2064_s1 + $0x430] ss:$8 sps:$4 sm:$0xff]  }
  0x51   :  { %1047 = vmatprep.subr.bf16.mxu1 %v1464_v23  ;;  %v1552_v23 = vld [vmem:[%s2064_s1 + $0x424] ss:$8 sps:$4 sm:$0xff]  }
  0x53   :  { %1007 = vmatpush1.bf16.msra.mxu0 %v1459_v24  ;;  %v1550_v24 = vld [vmem:[%s2064_s1 + $0x420] ss:$8 sps:$4 sm:$0xff]  }
  0x54   :  { %1048 = vmatpush1.bf16.msra.mxu1 %v1462_v25  ;;  %1008 = vmatprep.subr.bf16.mxu0 %v1467_v26  ;;  %v1555_v25 = vld [vmem:[%s2064_s1 + $0x414] ss:$8 sps:$4 sm:$0xff]   ;;  %v1553_v26 = vld [vmem:[%s2064_s1 + $0x410] ss:$8 sps:$4 sm:$0xff]  }
  0x55   :  { %1049 = vmatprep.subr.bf16.mxu1 %v1470_v27  ;;  %v1558_v27 = vld [vmem:[%s2064_s1 + $0x404] ss:$8 sps:$4 sm:$0xff]  }
  0x57   :  { %1009 = vmatpush1.bf16.msra.mxu0 %v1465_v28  ;;  %v1556_v28 = vld [vmem:[%s2064_s1 + $0x400] ss:$8 sps:$4 sm:$0xff]  }
  0x58   :  { %1050 = vmatpush1.bf16.msra.mxu1 %v1468_v29  ;;  %1010 = vmatprep.subr.bf16.mxu0 %v1473_v30  ;;  %v1559_v29 = vld [vmem:[%s2065_s0 + $0x20] ss:$0 sps:$4 sm:$0xff]  }
  0x59   :  { %1051 = vmatprep.subr.bf16.mxu1 %v1476_v31 }
  0x5b   :  { %1011 = vmatpush1.bf16.msra.mxu0 %v1471_v33 }
  0x5c   :  { %1052 = vmatpush1.bf16.msra.mxu1 %v1474_v34  ;;  %1012 = vmatprep.subr.bf16.mxu0 %v1479_v37 }
  0x5d   :  { %1053 = vmatprep.subr.bf16.mxu1 %v1482_v39 }
  0x5f   :  { %1013 = vmatpush1.bf16.msra.mxu0 %v1477_v40 }
  0x60   :  { %1054 = vmatpush1.bf16.msra.mxu1 %v1480_v41  ;;  %1014 = vmatprep.subr.bf16.mxu0 %v1485_v42 }
  0x61   :  { %1055 = vmatprep.subr.bf16.mxu1 %v1488_v43 }
  0x63   :  { %1015 = vmatpush2.bf16.msra.mxu0 %v1483_v44 }
  0x64   :  { %1056 = vmatpush2.bf16.msra.mxu1 %v1486_v45  ;;  %1016 = vmatprep.subr.bf16.mxu0 %v1491_v46 }
  0x65   :  { %1057 = vmatprep.subr.bf16.mxu1 %v1494_v47 }
  0x67   :  { %1017 = vmatpush2.bf16.msra.mxu0 %v1489_v48 }
  0x68   :  { %1058 = vmatpush2.bf16.msra.mxu1 %v1492_v49  ;;  %1018 = vmatprep.subr.bf16.mxu0 %v1497_v50 }
  0x69   :  { %1059 = vmatprep.subr.bf16.mxu1 %v1500_v51 }
  0x6b   :  { %1019 = vmatpush2.bf16.msra.mxu0 %v1495_v52 }
  0x6c   :  { %1060 = vmatpush2.bf16.msra.mxu1 %v1498_v53  ;;  %1020 = vmatprep.subr.bf16.mxu0 %v1503_v54 }
  0x6d   :  { %1061 = vmatprep.subr.bf16.mxu1 %v1506_v55 }
  0x6f   :  { %1021 = vmatpush2.bf16.msra.mxu0 %v1501_v56 }
  0x70   :  { %1062 = vmatpush2.bf16.msra.mxu1 %v1504_v57  ;;  %1022 = vmatprep.subr.bf16.mxu0 %v1509_v58  ;;  %v1156_v58 = vlaneseq }
  0x71   :  { %1063 = vmatprep.subr.bf16.mxu1 %v1512_v59 }
  0x73   :  { %1023 = vmatpush2.bf16.msra.mxu0 %v1507_v60 }
  0x74   :  { %1064 = vmatpush2.bf16.msra.mxu1 %v1510_v61  ;;  %1024 = vmatprep.subr.bf16.mxu0 %v1515_v62 }
  0x75   :  { %1065 = vmatprep.subr.bf16.mxu1 %v1518_v63 }
  0x77   :  { %1025 = vmatpush2.bf16.msra.mxu0 %v1513_v0 }
  0x78   :  { %1066 = vmatpush2.bf16.msra.mxu1 %v1516_v1  ;;  %1026 = vmatprep.subr.bf16.mxu0 %v1521_v2 }
  0x79   :  { %1067 = vmatprep.subr.bf16.mxu1 %v1524_v3 }
  0x7b   :  { %1027 = vmatpush2.bf16.msra.mxu0 %v1519_v4 }
  0x7c   :  { %1068 = vmatpush2.bf16.msra.mxu1 %v1522_v5  ;;  %1028 = vmatprep.subr.bf16.mxu0 %v1527_v6  ;;  %v1157_v5 = vshrl.u32 %v1156_v58, 7 }
  0x7d   :  { %1069 = vmatprep.subr.bf16.mxu1 %v1530_v7 }
  0x7e   :  { %vm1158_vm0 = vcmp.eq.s32.totalorder %v1157_v5, 0 }
  0x7f   :  { %1029 = vmatpush2.bf16.msra.mxu0 %v1525_v8 }
  0x80   :  { %1070 = vmatpush2.bf16.msra.mxu1 %v1528_v9  ;;  %1080 = vmatprep.subr.bf16.mxu0 %v1535_v10 }
  0x82   :  { %1031 = vmatmul.mubr.bf16.vlgmr.msra.gmra.mxu0 %v1183_v11 }
  0x83   :  { %1072 = vmatmul.mubr.bf16.vlgmr.msra.gmra.mxu1 %v1185_v12  ;;  %1081 = vmatpush1.bf16.msra.mxu0 %v1533_v13 }
  0x84   :  { %1112 = vmatprep.mubr.bf16.mxu0 %v1560_v16  ;;  %1082 = vmatprep.subr.bf16.mxu0 %v1540_v14 }
  0x87   :  { %1083 = vmatpush1.bf16.msra.mxu0 %v1538_v15 }
  0x88   :  { %1084 = vmatprep.subr.bf16.mxu0 %v1543_v17 }
  0x8b   :  { %1085 = vmatpush1.bf16.msra.mxu0 %v1541_v18 }
  0x8c   :  { %1086 = vmatprep.subr.bf16.mxu0 %v1546_v19 }
  0x8f   :  { %1087 = vmatpush1.bf16.msra.mxu0 %v1544_v20 }
  0x90   :  { %1088 = vmatprep.subr.bf16.mxu0 %v1549_v21 }
  0x93   :  { %1089 = vmatpush1.bf16.msra.mxu0 %v1547_v22 }
  0x94   :  { %1090 = vmatprep.subr.bf16.mxu0 %v1552_v23 }
  0x97   :  { %1091 = vmatpush1.bf16.msra.mxu0 %v1550_v24 }
  0x98   :  { %1092 = vmatprep.subr.bf16.mxu0 %v1555_v25 }
  0x9b   :  { %1093 = vmatpush1.bf16.msra.mxu0 %v1553_v26 }
  0x9c   :  { %1094 = vmatprep.subr.bf16.mxu0 %v1558_v27 }
  0x9f   :  { %1095 = vmatpush1.bf16.msra.mxu0 %v1556_v28 }
  0xa2   :  { %1113 = vmatmul.mubr.bf16.vlgmr.msra.gmra.mxu0 %v1559_v29 }
 0x102   :  { %v950_v30 = vpop.f32.mrf.mxu0 }
 0x103   :  { %v991_v31 = vpop.f32.mrf.mxu1 }
 0x104   :  { %v992_v32 = vadd.f32 %v991_v31, %v950_v30  ;;  %v952_v33 = vpop.f32.mrf.mxu0 }
 0x105   :  { %v993_v34 = vpop.f32.mrf.mxu1 }
 0x106   :  { %v994_v35 = vadd.f32 %v993_v34, %v952_v33  ;;  %v954_v36 = vpop.f32.mrf.mxu0 }
 0x107   :  { %v995_v37 = vpop.f32.mrf.mxu1 }
 0x108   :  { %v955_v38 = vpop.f32.mrf.mxu0 }
 0x109   :  { %v996_v39 = vpop.f32.mrf.mxu1 }
 0x142   :  { %v1032_v40 = vpop.f32.mrf.mxu0 }
 0x143   :  { %v1073_v41 = vpop.f32.mrf.mxu1  ;;  %v1033_v48 = vadd.f32 %v1032_v40, %v992_v32 }
 0x144   :  { %v1034_v42 = vpop.f32.mrf.mxu0 }
 0x145   :  { %v1075_v43 = vpop.f32.mrf.mxu1  ;;  %v1035_v49 = vadd.f32 %v1034_v42, %v994_v35  ;;  %v1074_v50 = vadd.f32 %v1073_v41, %v1033_v48 }
 0x146   :  { %v1036_v44 = vpop.f32.mrf.mxu0 }
 0x147   :  { %v1077_v45 = vpop.f32.mrf.mxu1  ;;  %v1076_v52 = vadd.f32 %v1075_v43, %v1035_v49 }
 0x148   :  { %v1037_v46 = vpop.f32.mrf.mxu0 }
 0x149   :  { %v1078_v47 = vpop.f32.mrf.mxu1 }
 0x162   :  { %v1114_v51 = vpop.f32.mrf.mxu0 }
 0x163   :  { %v1115_v53 = vadd.f32 %v1114_v51, %v1074_v50 }
 0x164   :  { %v1116_v54 = vpop.f32.mrf.mxu0 }
 0x165   :  { %v1130_v55 = vrot.slane %v1115_v53, 4  ;;  %v1142_v56 = vmul.f32 %v1115_v53, %v1115_v53  ;;  %v1117_v57 = vadd.f32 %v1116_v54, %v1076_v52 }
 0x166   :  { %v1118_v59 = vpop.f32.mrf.mxu0 }
 0x167   :  { %v1131_v60 = vadd.f32 %v1130_v55, %v1115_v53  ;;  %v1144_v61 = vrot.slane %v1142_v56, 4  ;;  %v1333_v62 = vpack.c.bf16 %v1117_v57, %v1115_v53  ;;  %v1136_v63 = vrot.slane %v1117_v57, 4 }
 0x168   :  { %v1143_v0 = vmul.f32 %v1117_v57, %v1117_v57  ;;  %v1119_v1 = vpop.f32.mrf.mxu0 }
 0x169   :  { %v1132_v2 = vrot.slane %v1131_v60, 2  ;;  %v1145_v3 = vadd.f32 %v1144_v61, %v1142_v56  ;;  %1129 = vst [vmem:[%s2066_s2] sm:$0xff] %v1333_v62  ;;  %v1137_v4 = vadd.f32 %v1136_v63, %v1117_v57 }
 0x16a   :  { %v1150_v6 = vrot.slane %v1143_v0, 4 }
 0x16b   :  { %v1133_v7 = vadd.f32 %v1132_v2, %v1131_v60  ;;  %v1146_v8 = vrot.slane %v1145_v3, 2  ;;  %v1138_v9 = vrot.slane %v1137_v4, 2 }
 0x16c   :  { %v1151_v10 = vadd.f32 %v1150_v6, %v1143_v0 }
 0x16d   :  { %v1134_v11 = vrot.slane %v1133_v7, 1  ;;  %v1147_v12 = vadd.f32 %v1146_v8, %v1145_v3  ;;  %v1139_v13 = vadd.f32 %v1138_v9, %v1137_v4 }
 0x16e   :  { %v1152_v14 = vrot.slane %v1151_v10, 2 }
 0x16f   :  { %v1135_v15 = vadd.f32 %v1134_v11, %v1133_v7  ;;  %v1148_v16 = vrot.slane %v1147_v12, 1  ;;  %v1140_v17 = vrot.slane %v1139_v13, 1 }
 0x170   :  { %v1153_v18 = vadd.f32 %v1152_v14, %v1151_v10 }
 0x171   :  { %v1149_v19 = vadd.f32 %v1148_v16, %v1147_v12  ;;  %v1159_v20 = vsel %vm1158_vm0, %v1135_v15, 0.0  ;;  %v1141_v21 = vadd.f32 %v1140_v17, %v1139_v13 }
 0x172   :  { %1161 = vst [vmem:[%s2067_s3] sm:$0xff] %v1159_v20  ;;  %v1154_v22 = vrot.slane %v1153_v18, 1 }
 0x173   :  { %v1163_v23 = vsel %vm1158_vm0, %v1149_v19, 0.0  ;;  %v1160_v24 = vsel %vm1158_vm0, %v1141_v21, 0.0 }
 0x174   :  { %1165 = vst [vmem:[%s2068_s4] sm:$0xff] %v1163_v23  ;;  %v1155_v25 = vadd.f32 %v1154_v22, %v1153_v18  ;;  %1162 = vst [vmem:[%s2067_s3 + $0x8] sm:$0xff] %v1160_v24 }
 0x176   :  { %v1164_v26 = vsel %vm1158_vm0, %v1155_v25, 0.0 }
 0x177   :  { %1166 = vst [vmem:[%s2068_s4 + $0x8] sm:$0xff] %v1164_v26 }

// kernel: resnet_forward.99
= control target key start
LH: loop header
LB: loop body
LE: loop exit
PB: predicated region body
PF: predicated region fallthrough
CT: control target
= control target key end

     0   :  { %v22_v0 = vlaneseq  ;;  %s110_s0 = inlined_call_operand.vmem [shape: bf16[8,256], index: 0, kind: input, shape index: {}]   ;;  %s111_s2 = inlined_call_operand.vmem [shape: f32[1,256], index: 2, kind: input, shape index: {}]   ;;  %s112_s3 = inlined_call_operand.vmem [shape: f32[1,256], index: 3, kind: input, shape index: {}]   ;;  %s113_s1 = inlined_call_operand.vmem [shape: bf16[8,256], index: 1, kind: input, shape index: {}]   ;;  %s114_s4 = inlined_call_operand.vmem [shape: bf16[8,256], index: 4, kind: output, shape index: {}]  }
   0x1   :  { %v17_v1 = vld [vmem:[%s110_s0] sm:$0xff] }
   0x2   :  { %v23_v2 = vshrl.u32 %v22_v0, 7  ;;  %v20_v3 = vld [vmem:[%s111_s2] sm:$0x3]  ;;  %v18_v5 = vunpack.c.l.bf16 %v17_v1  ;;  %v19_v6 = vunpack.c.h.bf16 %v17_v1 }
   0x3   :  { %v34_v4 = vld [vmem:[%s112_s3] sm:$0x3] }
   0x4   :  { %v24_v7 = vsub.s32 0, %v23_v2  ;;  %v28_v8 = vsub.s32 1, %v23_v2  ;;  %v48_v9 = vld [vmem:[%s113_s1] sm:$0xff] }
   0x5   :  { %v49_v16 = vunpack.c.l.bf16 %v48_v9  ;;  %v50_v17 = vunpack.c.h.bf16 %v48_v9 }
   0x6   :  { %v25_v10 = vrot.slane %v20_v3, %v24_v7  ;;  %v29_v11 = vrot.slane %v20_v3, %v28_v8  ;;  %v39_v12 = vrot.slane %v34_v4, %v24_v7  ;;  %v43_v13 = vrot.slane %v34_v4, %v28_v8 }
   0x8   :  { %v32_v14 = vmul.f32 %v25_v10, %v18_v5  ;;  %v33_v15 = vmul.f32 %v29_v11, %v19_v6 }
   0xa   :  { %v46_v18 = vadd.f32 %v39_v12, %v32_v14  ;;  %v47_v19 = vadd.f32 %v43_v13, %v33_v15 }
   0xc   :  { %v51_v20 = vadd.f32 %v49_v16, %v46_v18  ;;  %v52_v21 = vadd.f32 %v50_v17, %v47_v19 }
   0xe   :  { %v53_v22 = vmax.f32 %v51_v20, 0.0  ;;  %v54_v23 = vmax.f32 %v52_v21, 0.0 }
  0x10   :  { %v69_v24 = vpack.c.bf16 %v54_v23, %v53_v22 }
  0x12   :  { %63 = vst [vmem:[%s114_s4] sm:$0xff] %v69_v24 }

// kernel: resnet_forward.93
= control target key start
LH: loop header
LB: loop body
LE: loop exit
PB: predicated region body
PF: predicated region fallthrough
CT: control target
= control target key end

     0   :  { %s3982_s1 = inlined_call_operand.vmem [shape: bf16[2304,256], index: 1, kind: input, shape index: {}]   ;;  %s3983_s0 = inlined_call_operand.vmem [shape: bf16[8,2304], index: 0, kind: input, shape index: {}]   ;;  %s3984_s2 = inlined_call_operand.vmem [shape: bf16[8,256], index: 2, kind: output, shape index: {0}]   ;;  %s3985_s3 = inlined_call_operand.vmem [shape: f32[8,256], index: 3, kind: output, shape index: {1}]   ;;  %s3986_s4 = inlined_call_operand.vmem [shape: f32[8,256], index: 4, kind: output, shape index: {2}]  }
   0x1   :  { %v2549_v0 = vld [vmem:[%s3982_s1 + $0x74] ss:$8 sps:$4 sm:$0xff]   ;;  %v2553_v2 = vld [vmem:[%s3982_s1 + $0x70] ss:$8 sps:$4 sm:$0xff]   ;;  %v2555_v4 = vld [vmem:[%s3982_s1 + $0x64] ss:$8 sps:$4 sm:$0xff]  }
   0x2   :  { %v2551_v1 = vld [vmem:[%s3982_s1 + $0x174] ss:$8 sps:$4 sm:$0xff]   ;;  %1814 = vmatprep.subr.bf16.mxu0 %v2549_v0  ;;  %v2554_v3 = vld [vmem:[%s3982_s1 + $0x170] ss:$8 sps:$4 sm:$0xff]   ;;  %v2557_v5 = vld [vmem:[%s3982_s1 + $0x164] ss:$8 sps:$4 sm:$0xff]  }
   0x3   :  { %1855 = vmatprep.subr.bf16.mxu1 %v2551_v1  ;;  %1815 = vmatpush1.bf16.msra.mxu0 %v2553_v2  ;;  %v2559_v6 = vld [vmem:[%s3982_s1 + $0x60] ss:$8 sps:$4 sm:$0xff]   ;;  %v2561_v8 = vld [vmem:[%s3982_s1 + $0x54] ss:$8 sps:$4 sm:$0xff]   ;;  %v2565_v10 = vld [vmem:[%s3982_s1 + $0x50] ss:$8 sps:$4 sm:$0xff]  }
   0x4   :  { %1856 = vmatpush1.bf16.msra.mxu1 %v2554_v3  ;;  %1816 = vmatprep.subr.bf16.mxu0 %v2555_v4  ;;  %v2560_v7 = vld [vmem:[%s3982_s1 + $0x160] ss:$8 sps:$4 sm:$0xff]   ;;  %v2563_v9 = vld [vmem:[%s3982_s1 + $0x154] ss:$8 sps:$4 sm:$0xff]   ;;  %v2566_v11 = vld [vmem:[%s3982_s1 + $0x150] ss:$8 sps:$4 sm:$0xff]  }
   0x5   :  { %1857 = vmatprep.subr.bf16.mxu1 %v2557_v5  ;;  %v2567_v12 = vld [vmem:[%s3982_s1 + $0x44] ss:$8 sps:$4 sm:$0xff]   ;;  %v2571_v14 = vld [vmem:[%s3982_s1 + $0x40] ss:$8 sps:$4 sm:$0xff]   ;;  %v2573_v16 = vld [vmem:[%s3982_s1 + $0x34] ss:$8 sps:$4 sm:$0xff]  }
   0x6   :  { %v2569_v13 = vld [vmem:[%s3982_s1 + $0x144] ss:$8 sps:$4 sm:$0xff]   ;;  %v2572_v15 = vld [vmem:[%s3982_s1 + $0x140] ss:$8 sps:$4 sm:$0xff]   ;;  %v2575_v17 = vld [vmem:[%s3982_s1 + $0x134] ss:$8 sps:$4 sm:$0xff]  }
   0x7   :  { %1817 = vmatpush1.bf16.msra.mxu0 %v2559_v6  ;;  %v2577_v18 = vld [vmem:[%s3982_s1 + $0x30] ss:$8 sps:$4 sm:$0xff]   ;;  %v2579_v20 = vld [vmem:[%s3982_s1 + $0x24] ss:$8 sps:$4 sm:$0xff]   ;;  %v2583_v22 = vld [vmem:[%s3982_s1 + $0x20] ss:$8 sps:$4 sm:$0xff]  }
   0x8   :  { %1858 = vmatpush1.bf16.msra.mxu1 %v2560_v7  ;;  %1818 = vmatprep.subr.bf16.mxu0 %v2561_v8  ;;  %v2578_v19 = vld [vmem:[%s3982_s1 + $0x130] ss:$8 sps:$4 sm:$0xff]   ;;  %v2581_v21 = vld [vmem:[%s3982_s1 + $0x124] ss:$8 sps:$4 sm:$0xff]   ;;  %v2584_v23 = vld [vmem:[%s3982_s1 + $0x120] ss:$8 sps:$4 sm:$0xff]  }
   0x9   :  { %1859 = vmatprep.subr.bf16.mxu1 %v2563_v9  ;;  %v2585_v24 = vld [vmem:[%s3982_s1 + $0x14] ss:$8 sps:$4 sm:$0xff]   ;;  %v2589_v26 = vld [vmem:[%s3982_s1 + $0x10] ss:$8 sps:$4 sm:$0xff]   ;;  %v2591_v28 = vld [vmem:[%s3982_s1 + $0x4] ss:$8 sps:$4 sm:$0xff]  }
   0xa   :  { %v2587_v25 = vld [vmem:[%s3982_s1 + $0x114] ss:$8 sps:$4 sm:$0xff]   ;;  %v2590_v27 = vld [vmem:[%s3982_s1 + $0x110] ss:$8 sps:$4 sm:$0xff]   ;;  %v2593_v29 = vld [vmem:[%s3982_s1 + $0x104] ss:$8 sps:$4 sm:$0xff]  }
   0xb   :  { %1819 = vmatpush1.bf16.msra.mxu0 %v2565_v10  ;;  %v2595_v30 = vld [vmem:[%s3982_s1] ss:$8 sps:$4 sm:$0xff]   ;;  %v2597_v32 = vld [vmem:[%s3982_s1 + $0xf4] ss:$8 sps:$4 sm:$0xff]   ;;  %v2601_v34 = vld [vmem:[%s3982_s1 + $0xf0] ss:$8 sps:$4 sm:$0xff]  }
   0xc   :  { %1860 = vmatpush1.bf16.msra.mxu1 %v2566_v11  ;;  %1820 = vmatprep.subr.bf16.mxu0 %v2567_v12  ;;  %v2596_v31 = vld [vmem:[%s3982_s1 + $0x100] ss:$8 sps:$4 sm:$0xff]   ;;  %v2599_v33 = vld [vmem:[%s3982_s1 + $0x1f4] ss:$8 sps:$4 sm:$0xff]   ;;  %v2602_v35 = vld [vmem:[%s3982_s1 + $0x1f0] ss:$8 sps:$4 sm:$0xff]  }
   0xd   :  { %1861 = vmatprep.subr.bf16.mxu1 %v2569_v13  ;;  %v2603_v36 = vld [vmem:[%s3982_s1 + $0xe4] ss:$8 sps:$4 sm:$0xff]   ;;  %v2607_v38 = vld [vmem:[%s3982_s1 + $0xe0] ss:$8 sps:$4 sm:$0xff]   ;;  %v2609_v40 = vld [vmem:[%s3982_s1 + $0xd4] ss:$8 sps:$4 sm:$0xff]  }
   0xe   :  { %v2605_v37 = vld [vmem:[%s3982_s1 + $0x1e4] ss:$8 sps:$4 sm:$0xff]   ;;  %v2608_v39 = vld [vmem:[%s3982_s1 + $0x1e0] ss:$8 sps:$4 sm:$0xff]   ;;  %v2611_v41 = vld [vmem:[%s3982_s1 + $0x1d4] ss:$8 sps:$4 sm:$0xff]  }
   0xf   :  { %1821 = vmatpush1.bf16.msra.mxu0 %v2571_v14  ;;  %v2613_v42 = vld [vmem:[%s3982_s1 + $0xd0] ss:$8 sps:$4 sm:$0xff]   ;;  %v2615_v44 = vld [vmem:[%s3982_s1 + $0xc4] ss:$8 sps:$4 sm:$0xff]   ;;  %v2619_v49 = vld [vmem:[%s3982_s1 + $0xc0] ss:$8 sps:$4 sm:$0xff]  }
  0x10   :  { %1862 = vmatpush1.bf16.msra.mxu1 %v2572_v15  ;;  %1822 = vmatprep.subr.bf16.mxu0 %v2573_v16  ;;  %v2614_v43 = vld [vmem:[%s3982_s1 + $0x1d0] ss:$8 sps:$4 sm:$0xff]   ;;  %v2617_v45 = vld [vmem:[%s3982_s1 + $0x1c4] ss:$8 sps:$4 sm:$0xff]   ;;  %v2620_v50 = vld [vmem:[%s3982_s1 + $0x1c0] ss:$8 sps:$4 sm:$0xff]  }
  0x11   :  { %1863 = vmatprep.subr.bf16.mxu1 %v2575_v17  ;;  %v14_v46 = vld [vmem:[%s3983_s0] sm:$0xff]  ;;  %v15_v48 = vld [vmem:[%s3983_s0 + $0x8] sm:$0xff]  ;;  %v2621_v52 = vld [vmem:[%s3982_s1 + $0xb4] ss:$8 sps:$4 sm:$0xff]  }
  0x12   :  { %v2242_v47 = vcombine.high %v14_v46, %v14_v46  ;;  %v2244_v51 = vcombine.high %v15_v48, %v15_v48  ;;  %v2623_v53 = vld [vmem:[%s3982_s1 + $0x1b4] ss:$8 sps:$4 sm:$0xff]   ;;  %v2625_v54 = vld [vmem:[%s3982_s1 + $0xb0] ss:$8 sps:$4 sm:$0xff]   ;;  %v2627_v56 = vld [vmem:[%s3982_s1 + $0xa4] ss:$8 sps:$4 sm:$0xff]   ;;  %v2241_v6 = vcombine.low %v14_v46, %v14_v46  ;;  %v2243_v7 = vcombine.low %v15_v48, %v15_v48 }
  0x13   :  { %1823 = vmatpush1.bf16.msra.mxu0 %v2577_v18  ;;  %v2626_v55 = vld [vmem:[%s3982_s1 + $0x1b0] ss:$8 sps:$4 sm:$0xff]   ;;  %v2629_v57 = vld [vmem:[%s3982_s1 + $0x1a4] ss:$8 sps:$4 sm:$0xff]   ;;  %v2631_v58 = vld [vmem:[%s3982_s1 + $0xa0] ss:$8 sps:$4 sm:$0xff]  }
  0x14   :  { %1864 = vmatpush1.bf16.msra.mxu1 %v2578_v19  ;;  %1824 = vmatprep.subr.bf16.mxu0 %v2579_v20  ;;  %v2632_v59 = vld [vmem:[%s3982_s1 + $0x1a0] ss:$8 sps:$4 sm:$0xff]   ;;  %v2633_v60 = vld [vmem:[%s3982_s1 + $0x94] ss:$8 sps:$4 sm:$0xff]   ;;  %v2637_v62 = vld [vmem:[%s3982_s1 + $0x90] ss:$8 sps:$4 sm:$0xff]  }
  0x15   :  { %1865 = vmatprep.subr.bf16.mxu1 %v2581_v21  ;;  %1846 = vmatprep.mubr.bf16.mxu0 %v2242_v47  ;;  %v2635_v61 = vld [vmem:[%s3982_s1 + $0x194] ss:$8 sps:$4 sm:$0xff]   ;;  %v2638_v63 = vld [vmem:[%s3982_s1 + $0x190] ss:$8 sps:$4 sm:$0xff]   ;;  %v2639_v0 = vld [vmem:[%s3982_s1 + $0x84] ss:$8 sps:$4 sm:$0xff]  }
  0x16   :  { %1887 = vmatprep.mubr.bf16.mxu1 %v2244_v51  ;;  %v2641_v1 = vld [vmem:[%s3982_s1 + $0x184] ss:$8 sps:$4 sm:$0xff]   ;;  %v2643_v2 = vld [vmem:[%s3982_s1 + $0x80] ss:$8 sps:$4 sm:$0xff]   ;;  %v2651_v4 = vld [vmem:[%s3982_s1 + $0x274] ss:$8 sps:$4 sm:$0xff]  }
  0x17   :  { %1825 = vmatpush1.bf16.msra.mxu0 %v2583_v22  ;;  %v2644_v3 = vld [vmem:[%s3982_s1 + $0x180] ss:$8 sps:$4 sm:$0xff]   ;;  %v2654_v5 = vld [vmem:[%s3982_s1 + $0x374] ss:$8 sps:$4 sm:$0xff]   ;;  %v2649_v8 = vld [vmem:[%s3982_s1 + $0x270] ss:$8 sps:$4 sm:$0xff]  }
  0x18   :  { %1866 = vmatpush1.bf16.msra.mxu1 %v2584_v23  ;;  %1826 = vmatprep.subr.bf16.mxu0 %v2585_v24  ;;  %v2652_v9 = vld [vmem:[%s3982_s1 + $0x370] ss:$8 sps:$4 sm:$0xff]   ;;  %v2657_v10 = vld [vmem:[%s3982_s1 + $0x264] ss:$8 sps:$4 sm:$0xff]   ;;  %v2655_v12 = vld [vmem:[%s3982_s1 + $0x260] ss:$8 sps:$4 sm:$0xff]  }
  0x19   :  { %1867 = vmatprep.subr.bf16.mxu1 %v2587_v25  ;;  %v2660_v11 = vld [vmem:[%s3982_s1 + $0x364] ss:$8 sps:$4 sm:$0xff]   ;;  %v2658_v13 = vld [vmem:[%s3982_s1 + $0x360] ss:$8 sps:$4 sm:$0xff]   ;;  %v2663_v14 = vld [vmem:[%s3982_s1 + $0x254] ss:$8 sps:$4 sm:$0xff]  }
  0x1a   :  { %v2666_v15 = vld [vmem:[%s3982_s1 + $0x354] ss:$8 sps:$4 sm:$0xff]   ;;  %v2661_v16 = vld [vmem:[%s3982_s1 + $0x250] ss:$8 sps:$4 sm:$0xff]   ;;  %v2669_v18 = vld [vmem:[%s3982_s1 + $0x244] ss:$8 sps:$4 sm:$0xff]  }
  0x1b   :  { %1827 = vmatpush1.bf16.msra.mxu0 %v2589_v26  ;;  %v2664_v17 = vld [vmem:[%s3982_s1 + $0x350] ss:$8 sps:$4 sm:$0xff]   ;;  %v2672_v19 = vld [vmem:[%s3982_s1 + $0x344] ss:$8 sps:$4 sm:$0xff]   ;;  %v2667_v20 = vld [vmem:[%s3982_s1 + $0x240] ss:$8 sps:$4 sm:$0xff]  }
  0x1c   :  { %1868 = vmatpush1.bf16.msra.mxu1 %v2590_v27  ;;  %1828 = vmatprep.subr.bf16.mxu0 %v2591_v28  ;;  %v2670_v21 = vld [vmem:[%s3982_s1 + $0x340] ss:$8 sps:$4 sm:$0xff]   ;;  %v2675_v22 = vld [vmem:[%s3982_s1 + $0x234] ss:$8 sps:$4 sm:$0xff]   ;;  %v2673_v24 = vld [vmem:[%s3982_s1 + $0x230] ss:$8 sps:$4 sm:$0xff]  }
  0x1d   :  { %1869 = vmatprep.subr.bf16.mxu1 %v2593_v29  ;;  %v2678_v23 = vld [vmem:[%s3982_s1 + $0x334] ss:$8 sps:$4 sm:$0xff]   ;;  %v2676_v25 = vld [vmem:[%s3982_s1 + $0x330] ss:$8 sps:$4 sm:$0xff]   ;;  %v2681_v26 = vld [vmem:[%s3982_s1 + $0x224] ss:$8 sps:$4 sm:$0xff]  }
  0x1e   :  { %v2684_v27 = vld [vmem:[%s3982_s1 + $0x324] ss:$8 sps:$4 sm:$0xff]   ;;  %v2679_v28 = vld [vmem:[%s3982_s1 + $0x220] ss:$8 sps:$4 sm:$0xff]   ;;  %v2714_v51 = vld [vmem:[%s3982_s1 + $0x3d4] ss:$8 sps:$4 sm:$0xff]  }
  0x1f   :  { %1829 = vmatpush1.bf16.msra.mxu0 %v2595_v30  ;;  %v2682_v29 = vld [vmem:[%s3982_s1 + $0x320] ss:$8 sps:$4 sm:$0xff]   ;;  %v2687_v30 = vld [vmem:[%s3982_s1 + $0x214] ss:$8 sps:$4 sm:$0xff]   ;;  %v2705_v46 = vld [vmem:[%s3982_s1 + $0x2e4] ss:$8 sps:$4 sm:$0xff]  }
  0x20   :  { %1870 = vmatpush1.bf16.msra.mxu1 %v2596_v31  ;;  %1830 = vmatprep.subr.bf16.mxu0 %v2597_v32  ;;  %v2690_v31 = vld [vmem:[%s3982_s1 + $0x314] ss:$8 sps:$4 sm:$0xff]   ;;  %v2708_v47 = vld [vmem:[%s3982_s1 + $0x3e4] ss:$8 sps:$4 sm:$0xff]   ;;  %v2703_v48 = vld [vmem:[%s3982_s1 + $0x2e0] ss:$8 sps:$4 sm:$0xff]  }
  0x21   :  { %1871 = vmatprep.subr.bf16.mxu1 %v2599_v33  ;;  %v3303_v32 = vld [vmem:[%s3983_s0 + $0x10] sm:$0xff] }
  0x22   :  { %v2685_v33 = vld [vmem:[%s3982_s1 + $0x210] ss:$8 sps:$4 sm:$0xff]  }
  0x23   :  { %1831 = vmatpush2.bf16.msra.mxu0 %v2601_v34  ;;  %v2688_v34 = vld [vmem:[%s3982_s1 + $0x310] ss:$8 sps:$4 sm:$0xff]  }
  0x24   :  { %1872 = vmatpush2.bf16.msra.mxu1 %v2602_v35  ;;  %1832 = vmatprep.subr.bf16.mxu0 %v2603_v36  ;;  %v2246_v35 = vcombine.high %v3303_v32, %v3303_v32  ;;  %v3316_v36 = vld [vmem:[%s3983_s0 + $0x18] sm:$0xff] }
  0x25   :  { %1873 = vmatprep.subr.bf16.mxu1 %v2605_v37  ;;  %v2693_v37 = vld [vmem:[%s3982_s1 + $0x204] ss:$8 sps:$4 sm:$0xff]  }
  0x27   :  { %1833 = vmatpush2.bf16.msra.mxu0 %v2607_v38  ;;  %v2248_v38 = vcombine.high %v3316_v36, %v3316_v36 }
  0x28   :  { %1874 = vmatpush2.bf16.msra.mxu1 %v2608_v39  ;;  %1834 = vmatprep.subr.bf16.mxu0 %v2609_v40  ;;  %v2696_v39 = vld [vmem:[%s3982_s1 + $0x304] ss:$8 sps:$4 sm:$0xff]   ;;  %v2691_v40 = vld [vmem:[%s3982_s1 + $0x200] ss:$8 sps:$4 sm:$0xff]  }
  0x29   :  { %1875 = vmatprep.subr.bf16.mxu1 %v2611_v41  ;;  %v2694_v41 = vld [vmem:[%s3982_s1 + $0x300] ss:$8 sps:$4 sm:$0xff]  }
  0x2b   :  { %1835 = vmatpush2.bf16.msra.mxu0 %v2613_v42  ;;  %v2699_v42 = vld [vmem:[%s3982_s1 + $0x2f4] ss:$8 sps:$4 sm:$0xff]  }
  0x2c   :  { %1876 = vmatpush2.bf16.msra.mxu1 %v2614_v43  ;;  %1836 = vmatprep.subr.bf16.mxu0 %v2615_v44  ;;  %v2702_v43 = vld [vmem:[%s3982_s1 + $0x3f4] ss:$8 sps:$4 sm:$0xff]   ;;  %v2697_v44 = vld [vmem:[%s3982_s1 + $0x2f0] ss:$8 sps:$4 sm:$0xff]  }
  0x2d   :  { %1877 = vmatprep.subr.bf16.mxu1 %v2617_v45  ;;  %v2700_v45 = vld [vmem:[%s3982_s1 + $0x3f0] ss:$8 sps:$4 sm:$0xff]  }
  0x2f   :  { %1837 = vmatpush2.bf16.msra.mxu0 %v2619_v49  ;;  %v2706_v49 = vld [vmem:[%s3982_s1 + $0x3e0] ss:$8 sps:$4 sm:$0xff]  }
  0x30   :  { %1878 = vmatpush2.bf16.msra.mxu1 %v2620_v50  ;;  %1838 = vmatprep.subr.bf16.mxu0 %v2621_v52  ;;  %v2711_v50 = vld [vmem:[%s3982_s1 + $0x2d4] ss:$8 sps:$4 sm:$0xff]   ;;  %v2709_v52 = vld [vmem:[%s3982_s1 + $0x2d0] ss:$8 sps:$4 sm:$0xff]  }
  0x31   :  { %1879 = vmatprep.subr.bf16.mxu1 %v2623_v53  ;;  %v2712_v53 = vld [vmem:[%s3982_s1 + $0x3d0] ss:$8 sps:$4 sm:$0xff]  }
  0x33   :  { %1839 = vmatpush2.bf16.msra.mxu0 %v2625_v54  ;;  %v2717_v54 = vld [vmem:[%s3982_s1 + $0x2c4] ss:$8 sps:$4 sm:$0xff]  }
  0x34   :  { %1880 = vmatpush2.bf16.msra.mxu1 %v2626_v55  ;;  %1840 = vmatprep.subr.bf16.mxu0 %v2627_v56  ;;  %v2720_v55 = vld [vmem:[%s3982_s1 + $0x3c4] ss:$8 sps:$4 sm:$0xff]   ;;  %v2715_v56 = vld [vmem:[%s3982_s1 + $0x2c0] ss:$8 sps:$4 sm:$0xff]  }
  0x35   :  { %1881 = vmatprep.subr.bf16.mxu1 %v2629_v57  ;;  %v2718_v57 = vld [vmem:[%s3982_s1 + $0x3c0] ss:$8 sps:$4 sm:$0xff]  }
  0x37   :  { %1841 = vmatpush2.bf16.msra.mxu0 %v2631_v58  ;;  %v2723_v58 = vld [vmem:[%s3982_s1 + $0x2b4] ss:$8 sps:$4 sm:$0xff]  }
  0x38   :  { %1882 = vmatpush2.bf16.msra.mxu1 %v2632_v59  ;;  %1842 = vmatprep.subr.bf16.mxu0 %v2633_v60  ;;  %v2726_v59 = vld [vmem:[%s3982_s1 + $0x3b4] ss:$8 sps:$4 sm:$0xff]   ;;  %v2721_v60 = vld [vmem:[%s3982_s1 + $0x2b0] ss:$8 sps:$4 sm:$0xff]  }
  0x39   :  { %1883 = vmatprep.subr.bf16.mxu1 %v2635_v61  ;;  %v2724_v61 = vld [vmem:[%s3982_s1 + $0x3b0] ss:$8 sps:$4 sm:$0xff]  }
  0x3b   :  { %1843 = vmatpush2.bf16.msra.mxu0 %v2637_v62  ;;  %v2729_v62 = vld [vmem:[%s3982_s1 + $0x2a4] ss:$8 sps:$4 sm:$0xff]  }
  0x3c   :  { %1884 = vmatpush2.bf16.msra.mxu1 %v2638_v63  ;;  %1844 = vmatprep.subr.bf16.mxu0 %v2639_v0  ;;  %v2732_v63 = vld [vmem:[%s3982_s1 + $0x3a4] ss:$8 sps:$4 sm:$0xff]   ;;  %v2727_v0 = vld [vmem:[%s3982_s1 + $0x2a0] ss:$8 sps:$4 sm:$0xff]  }
  0x3d   :  { %1885 = vmatprep.subr.bf16.mxu1 %v2641_v1  ;;  %v2730_v1 = vld [vmem:[%s3982_s1 + $0x3a0] ss:$8 sps:$4 sm:$0xff]  }
  0x3f   :  { %1845 = vmatpush2.bf16.msra.mxu0 %v2643_v2  ;;  %v2735_v2 = vld [vmem:[%s3982_s1 + $0x294] ss:$8 sps:$4 sm:$0xff]  }
  0x40   :  { %1886 = vmatpush2.bf16.msra.mxu1 %v2644_v3  ;;  %1896 = vmatprep.subr.bf16.mxu0 %v2651_v4  ;;  %v2738_v3 = vld [vmem:[%s3982_s1 + $0x394] ss:$8 sps:$4 sm:$0xff]   ;;  %v2733_v4 = vld [vmem:[%s3982_s1 + $0x290] ss:$8 sps:$4 sm:$0xff]  }
  0x41   :  { %1937 = vmatprep.subr.bf16.mxu1 %v2654_v5  ;;  %v2736_v5 = vld [vmem:[%s3982_s1 + $0x390] ss:$8 sps:$4 sm:$0xff]  }
  0x42   :  { %1847 = vmatmul.mubr.bf16.vlgmr.msra.gmra.mxu0 %v2241_v6  ;;  %v2741_v6 = vld [vmem:[%s3982_s1 + $0x284] ss:$8 sps:$4 sm:$0xff]  }
  0x43   :  { %1888 = vmatmul.mubr.bf16.vlgmr.msra.gmra.mxu1 %v2243_v7  ;;  %1897 = vmatpush1.bf16.msra.mxu0 %v2649_v8  ;;  %v2744_v7 = vld [vmem:[%s3982_s1 + $0x384] ss:$8 sps:$4 sm:$0xff]   ;;  %v2739_v8 = vld [vmem:[%s3982_s1 + $0x280] ss:$8 sps:$4 sm:$0xff]  }
  0x44   :  { %1938 = vmatpush1.bf16.msra.mxu1 %v2652_v9  ;;  %1898 = vmatprep.subr.bf16.mxu0 %v2657_v10  ;;  %v2742_v9 = vld [vmem:[%s3982_s1 + $0x380] ss:$8 sps:$4 sm:$0xff]   ;;  %v2749_v10 = vld [vmem:[%s3982_s1 + $0x474] ss:$8 sps:$4 sm:$0xff]  }
  0x45   :  { %1939 = vmatprep.subr.bf16.mxu1 %v2660_v11  ;;  %1928 = vmatprep.mubr.bf16.mxu0 %v2246_v35  ;;  %v2754_v11 = vld [vmem:[%s3982_s1 + $0x574] ss:$8 sps:$4 sm:$0xff]   ;;  %v2776_v35 = vld [vmem:[%s3982_s1 + $0x530] ss:$8 sps:$4 sm:$0xff]  }
  0x46   :  { %1969 = vmatprep.mubr.bf16.mxu1 %v2248_v38  ;;  %v2779_v38 = vld [vmem:[%s3982_s1 + $0x420] ss:$8 sps:$4 sm:$0xff]  }
  0x47   :  { %1899 = vmatpush1.bf16.msra.mxu0 %v2655_v12  ;;  %v2245_v12 = vcombine.low %v3303_v32, %v3303_v32  ;;  %v2775_v32 = vld [vmem:[%s3982_s1 + $0x434] ss:$8 sps:$4 sm:$0xff]  }
  0x48   :  { %1940 = vmatpush1.bf16.msra.mxu1 %v2658_v13  ;;  %1900 = vmatprep.subr.bf16.mxu0 %v2663_v14  ;;  %v2747_v13 = vld [vmem:[%s3982_s1 + $0x470] ss:$8 sps:$4 sm:$0xff]   ;;  %v2247_v14 = vcombine.low %v3316_v36, %v3316_v36  ;;  %v2781_v36 = vld [vmem:[%s3982_s1 + $0x424] ss:$8 sps:$4 sm:$0xff]  }
  0x49   :  { %1941 = vmatprep.subr.bf16.mxu1 %v2666_v15  ;;  %v2752_v15 = vld [vmem:[%s3982_s1 + $0x570] ss:$8 sps:$4 sm:$0xff]  }
  0x4b   :  { %1901 = vmatpush1.bf16.msra.mxu0 %v2661_v16  ;;  %v2757_v16 = vld [vmem:[%s3982_s1 + $0x464] ss:$8 sps:$4 sm:$0xff]  }
  0x4c   :  { %1942 = vmatpush1.bf16.msra.mxu1 %v2664_v17  ;;  %1902 = vmatprep.subr.bf16.mxu0 %v2669_v18  ;;  %v2760_v17 = vld [vmem:[%s3982_s1 + $0x564] ss:$8 sps:$4 sm:$0xff]  }
  0x4d   :  { %1943 = vmatprep.subr.bf16.mxu1 %v2672_v19  ;;  %v3453_v18 = vld [vmem:[%s3983_s0 + $0x20] sm:$0xff] }
  0x4e   :  { %v2250_v19 = vcombine.high %v3453_v18, %v3453_v18 }
  0x4f   :  { %1903 = vmatpush1.bf16.msra.mxu0 %v2667_v20  ;;  %v3460_v20 = vld [vmem:[%s3983_s0 + $0x28] sm:$0xff] }
  0x50   :  { %1944 = vmatpush1.bf16.msra.mxu1 %v2670_v21  ;;  %1904 = vmatprep.subr.bf16.mxu0 %v2675_v22  ;;  %v2755_v21 = vld [vmem:[%s3982_s1 + $0x460] ss:$8 sps:$4 sm:$0xff]  }
  0x51   :  { %1945 = vmatprep.subr.bf16.mxu1 %v2678_v23  ;;  %v2758_v22 = vld [vmem:[%s3982_s1 + $0x560] ss:$8 sps:$4 sm:$0xff]   ;;  %v2252_v23 = vcombine.high %v3460_v20, %v3460_v20 }
  0x53   :  { %1905 = vmatpush1.bf16.msra.mxu0 %v2673_v24  ;;  %v2763_v24 = vld [vmem:[%s3982_s1 + $0x454] ss:$8 sps:$4 sm:$0xff]  }
  0x54   :  { %1946 = vmatpush1.bf16.msra.mxu1 %v2676_v25  ;;  %1906 = vmatprep.subr.bf16.mxu0 %v2681_v26  ;;  %v2766_v25 = vld [vmem:[%s3982_s1 + $0x554] ss:$8 sps:$4 sm:$0xff]   ;;  %v2761_v26 = vld [vmem:[%s3982_s1 + $0x450] ss:$8 sps:$4 sm:$0xff]  }
  0x55   :  { %1947 = vmatprep.subr.bf16.mxu1 %v2684_v27  ;;  %v2764_v27 = vld [vmem:[%s3982_s1 + $0x550] ss:$8 sps:$4 sm:$0xff]  }
  0x57   :  { %1907 = vmatpush1.bf16.msra.mxu0 %v2679_v28  ;;  %v2769_v28 = vld [vmem:[%s3982_s1 + $0x444] ss:$8 sps:$4 sm:$0xff]  }
  0x58   :  { %1948 = vmatpush1.bf16.msra.mxu1 %v2682_v29  ;;  %1908 = vmatprep.subr.bf16.mxu0 %v2687_v30  ;;  %v2772_v29 = vld [vmem:[%s3982_s1 + $0x544] ss:$8 sps:$4 sm:$0xff]   ;;  %v2767_v30 = vld [vmem:[%s3982_s1 + $0x440] ss:$8 sps:$4 sm:$0xff]  }
  0x59   :  { %1949 = vmatprep.subr.bf16.mxu1 %v2690_v31  ;;  %v2770_v31 = vld [vmem:[%s3982_s1 + $0x540] ss:$8 sps:$4 sm:$0xff]  }
  0x5b   :  { %1909 = vmatpush1.bf16.msra.mxu0 %v2685_v33  ;;  %v2778_v33 = vld [vmem:[%s3982_s1 + $0x534] ss:$8 sps:$4 sm:$0xff]  }
  0x5c   :  { %1950 = vmatpush1.bf16.msra.mxu1 %v2688_v34  ;;  %1910 = vmatprep.subr.bf16.mxu0 %v2693_v37  ;;  %v2773_v34 = vld [vmem:[%s3982_s1 + $0x430] ss:$8 sps:$4 sm:$0xff]   ;;  %v2784_v37 = vld [vmem:[%s3982_s1 + $0x524] ss:$8 sps:$4 sm:$0xff]  }
  0x5d   :  { %1951 = vmatprep.subr.bf16.mxu1 %v2696_v39  ;;  %v2782_v39 = vld [vmem:[%s3982_s1 + $0x520] ss:$8 sps:$4 sm:$0xff]  }
  0x5f   :  { %1911 = vmatpush1.bf16.msra.mxu0 %v2691_v40  ;;  %v2787_v40 = vld [vmem:[%s3982_s1 + $0x414] ss:$8 sps:$4 sm:$0xff]  }
  0x60   :  { %1952 = vmatpush1.bf16.msra.mxu1 %v2694_v41  ;;  %1912 = vmatprep.subr.bf16.mxu0 %v2699_v42  ;;  %v2790_v41 = vld [vmem:[%s3982_s1 + $0x514] ss:$8 sps:$4 sm:$0xff]   ;;  %v2785_v42 = vld [vmem:[%s3982_s1 + $0x410] ss:$8 sps:$4 sm:$0xff]  }
  0x61   :  { %1953 = vmatprep.subr.bf16.mxu1 %v2702_v43  ;;  %v2788_v43 = vld [vmem:[%s3982_s1 + $0x510] ss:$8 sps:$4 sm:$0xff]  }
  0x63   :  { %1913 = vmatpush2.bf16.msra.mxu0 %v2697_v44  ;;  %v2793_v44 = vld [vmem:[%s3982_s1 + $0x404] ss:$8 sps:$4 sm:$0xff]  }
  0x64   :  { %1954 = vmatpush2.bf16.msra.mxu1 %v2700_v45  ;;  %1914 = vmatprep.subr.bf16.mxu0 %v2705_v46  ;;  %v2796_v45 = vld [vmem:[%s3982_s1 + $0x504] ss:$8 sps:$4 sm:$0xff]   ;;  %v2791_v46 = vld [vmem:[%s3982_s1 + $0x400] ss:$8 sps:$4 sm:$0xff]  }
  0x65   :  { %1955 = vmatprep.subr.bf16.mxu1 %v2708_v47  ;;  %v2794_v47 = vld [vmem:[%s3982_s1 + $0x500] ss:$8 sps:$4 sm:$0xff]  }
  0x67   :  { %1915 = vmatpush2.bf16.msra.mxu0 %v2703_v48  ;;  %v2799_v48 = vld [vmem:[%s3982_s1 + $0x4f4] ss:$8 sps:$4 sm:$0xff]  }
  0x68   :  { %1956 = vmatpush2.bf16.msra.mxu1 %v2706_v49  ;;  %1916 = vmatprep.subr.bf16.mxu0 %v2711_v50  ;;  %v2802_v49 = vld [vmem:[%s3982_s1 + $0x5f4] ss:$8 sps:$4 sm:$0xff]   ;;  %v2797_v50 = vld [vmem:[%s3982_s1 + $0x4f0] ss:$8 sps:$4 sm:$0xff]  }
  0x69   :  { %1957 = vmatprep.subr.bf16.mxu1 %v2714_v51  ;;  %v2800_v51 = vld [vmem:[%s3982_s1 + $0x5f0] ss:$8 sps:$4 sm:$0xff]  }
  0x6b   :  { %1917 = vmatpush2.bf16.msra.mxu0 %v2709_v52  ;;  %v2805_v52 = vld [vmem:[%s3982_s1 + $0x4e4] ss:$8 sps:$4 sm:$0xff]  }
  0x6c   :  { %1958 = vmatpush2.bf16.msra.mxu1 %v2712_v53  ;;  %1918 = vmatprep.subr.bf16.mxu0 %v2717_v54  ;;  %v2808_v53 = vld [vmem:[%s3982_s1 + $0x5e4] ss:$8 sps:$4 sm:$0xff]   ;;  %v2803_v54 = vld [vmem:[%s3982_s1 + $0x4e0] ss:$8 sps:$4 sm:$0xff]  }
  0x6d   :  { %1959 = vmatprep.subr.bf16.mxu1 %v2720_v55  ;;  %v2806_v55 = vld [vmem:[%s3982_s1 + $0x5e0] ss:$8 sps:$4 sm:$0xff]  }
  0x6f   :  { %1919 = vmatpush2.bf16.msra.mxu0 %v2715_v56  ;;  %v2811_v56 = vld [vmem:[%s3982_s1 + $0x4d4] ss:$8 sps:$4 sm:$0xff]  }
  0x70   :  { %1960 = vmatpush2.bf16.msra.mxu1 %v2718_v57  ;;  %1920 = vmatprep.subr.bf16.mxu0 %v2723_v58  ;;  %v2814_v57 = vld [vmem:[%s3982_s1 + $0x5d4] ss:$8 sps:$4 sm:$0xff]   ;;  %v2809_v58 = vld [vmem:[%s3982_s1 + $0x4d0] ss:$8 sps:$4 sm:$0xff]  }
  0x71   :  { %1961 = vmatprep.subr.bf16.mxu1 %v2726_v59  ;;  %v2812_v59 = vld [vmem:[%s3982_s1 + $0x5d0] ss:$8 sps:$4 sm:$0xff]  }
  0x73   :  { %1921 = vmatpush2.bf16.msra.mxu0 %v2721_v60  ;;  %v2817_v60 = vld [vmem:[%s3982_s1 + $0x4c4] ss:$8 sps:$4 sm:$0xff]  }
  0x74   :  { %1962 = vmatpush2.bf16.msra.mxu1 %v2724_v61  ;;  %1922 = vmatprep.subr.bf16.mxu0 %v2729_v62  ;;  %v2820_v61 = vld [vmem:[%s3982_s1 + $0x5c4] ss:$8 sps:$4 sm:$0xff]   ;;  %v2815_v62 = vld [vmem:[%s3982_s1 + $0x4c0] ss:$8 sps:$4 sm:$0xff]  }
  0x75   :  { %1963 = vmatprep.subr.bf16.mxu1 %v2732_v63  ;;  %v2818_v63 = vld [vmem:[%s3982_s1 + $0x5c0] ss:$8 sps:$4 sm:$0xff]  }
  0x77   :  { %1923 = vmatpush2.bf16.msra.mxu0 %v2727_v0  ;;  %v2823_v0 = vld [vmem:[%s3982_s1 + $0x4b4] ss:$8 sps:$4 sm:$0xff]  }
  0x78   :  { %1964 = vmatpush2.bf16.msra.mxu1 %v2730_v1  ;;  %1924 = vmatprep.subr.bf16.mxu0 %v2735_v2  ;;  %v2826_v1 = vld [vmem:[%s3982_s1 + $0x5b4] ss:$8 sps:$4 sm:$0xff]   ;;  %v2821_v2 = vld [vmem:[%s3982_s1 + $0x4b0] ss:$8 sps:$4 sm:$0xff]  }
  0x79   :  { %1965 = vmatprep.subr.bf16.mxu1 %v2738_v3  ;;  %v2824_v3 = vld [vmem:[%s3982_s1 + $0x5b0] ss:$8 sps:$4 sm:$0xff]  }
  0x7b   :  { %1925 = vmatpush2.bf16.msra.mxu0 %v2733_v4  ;;  %v2829_v4 = vld [vmem:[%s3982_s1 + $0x4a4] ss:$8 sps:$4 sm:$0xff]  }
  0x7c   :  { %1966 = vmatpush2.bf16.msra.mxu1 %v2736_v5  ;;  %1926 = vmatprep.subr.bf16.mxu0 %v2741_v6  ;;  %v2832_v5 = vld [vmem:[%s3982_s1 + $0x5a4] ss:$8 sps:$4 sm:$0xff]   ;;  %v2827_v6 = vld [vmem:[%s3982_s1 + $0x4a0] ss:$8 sps:$4 sm:$0xff]  }
  0x7d   :  { %1967 = vmatprep.subr.bf16.mxu1 %v2744_v7  ;;  %v2830_v7 = vld [vmem:[%s3982_s1 + $0x5a0] ss:$8 sps:$4 sm:$0xff]  }
  0x7f   :  { %1927 = vmatpush2.bf16.msra.mxu0 %v2739_v8  ;;  %v2835_v8 = vld [vmem:[%s3982_s1 + $0x494] ss:$8 sps:$4 sm:$0xff]  }
  0x80   :  { %1968 = vmatpush2.bf16.msra.mxu1 %v2742_v9  ;;  %1978 = vmatprep.subr.bf16.mxu0 %v2749_v10  ;;  %v2838_v9 = vld [vmem:[%s3982_s1 + $0x594] ss:$8 sps:$4 sm:$0xff]   ;;  %v2833_v10 = vld [vmem:[%s3982_s1 + $0x490] ss:$8 sps:$4 sm:$0xff]  }
  0x81   :  { %2019 = vmatprep.subr.bf16.mxu1 %v2754_v11  ;;  %v2836_v11 = vld [vmem:[%s3982_s1 + $0x590] ss:$8 sps:$4 sm:$0xff]  }
  0x82   :  { %1929 = vmatmul.mubr.bf16.vlgmr.msra.gmra.mxu0 %v2245_v12  ;;  %v2841_v12 = vld [vmem:[%s3982_s1 + $0x484] ss:$8 sps:$4 sm:$0xff]  }
  0x83   :  { %1970 = vmatmul.mubr.bf16.vlgmr.msra.gmra.mxu1 %v2247_v14  ;;  %1979 = vmatpush1.bf16.msra.mxu0 %v2747_v13  ;;  %v2844_v13 = vld [vmem:[%s3982_s1 + $0x584] ss:$8 sps:$4 sm:$0xff]   ;;  %v2839_v14 = vld [vmem:[%s3982_s1 + $0x480] ss:$8 sps:$4 sm:$0xff]  }
  0x84   :  { %2020 = vmatpush1.bf16.msra.mxu1 %v2752_v15  ;;  %1980 = vmatprep.subr.bf16.mxu0 %v2757_v16  ;;  %v2842_v15 = vld [vmem:[%s3982_s1 + $0x580] ss:$8 sps:$4 sm:$0xff]   ;;  %v2849_v16 = vld [vmem:[%s3982_s1 + $0x674] ss:$8 sps:$4 sm:$0xff]  }
  0x85   :  { %2021 = vmatprep.subr.bf16.mxu1 %v2760_v17  ;;  %2010 = vmatprep.mubr.bf16.mxu0 %v2250_v19  ;;  %v2854_v17 = vld [vmem:[%s3982_s1 + $0x774] ss:$8 sps:$4 sm:$0xff]   ;;  %v2847_v19 = vld [vmem:[%s3982_s1 + $0x670] ss:$8 sps:$4 sm:$0xff]  }
  0x86   :  { %2051 = vmatprep.mubr.bf16.mxu1 %v2252_v23  ;;  %v2251_v23 = vcombine.low %v3460_v20, %v3460_v20 }
  0x87   :  { %1981 = vmatpush1.bf16.msra.mxu0 %v2755_v21  ;;  %v2852_v21 = vld [vmem:[%s3982_s1 + $0x770] ss:$8 sps:$4 sm:$0xff]  }
  0x88   :  { %2022 = vmatpush1.bf16.msra.mxu1 %v2758_v22  ;;  %1982 = vmatprep.subr.bf16.mxu0 %v2763_v24  ;;  %v2249_v22 = vcombine.low %v3453_v18, %v3453_v18  ;;  %v3657_v24 = vld [vmem:[%s3983_s0 + $0x30] sm:$0xff]  ;;  %v2860_v18 = vld [vmem:[%s3982_s1 + $0x764] ss:$8 sps:$4 sm:$0xff]  }
  0x89   :  { %2023 = vmatprep.subr.bf16.mxu1 %v2766_v25  ;;  %v3662_v25 = vld [vmem:[%s3983_s0 + $0x38] sm:$0xff]  ;;  %v2254_v20 = vcombine.high %v3657_v24, %v3657_v24 }
  0x8b   :  { %1983 = vmatpush1.bf16.msra.mxu0 %v2761_v26  ;;  %v2857_v26 = vld [vmem:[%s3982_s1 + $0x664] ss:$8 sps:$4 sm:$0xff]  }
  0x8c   :  { %2024 = vmatpush1.bf16.msra.mxu1 %v2764_v27  ;;  %1984 = vmatprep.subr.bf16.mxu0 %v2769_v28  ;;  %v2256_v27 = vcombine.high %v3662_v25, %v3662_v25  ;;  %v2855_v28 = vld [vmem:[%s3982_s1 + $0x660] ss:$8 sps:$4 sm:$0xff]  }
  0x8d   :  { %2025 = vmatprep.subr.bf16.mxu1 %v2772_v29  ;;  %v2858_v29 = vld [vmem:[%s3982_s1 + $0x760] ss:$8 sps:$4 sm:$0xff]  }
  0x8f   :  { %1985 = vmatpush1.bf16.msra.mxu0 %v2767_v30  ;;  %v2863_v30 = vld [vmem:[%s3982_s1 + $0x654] ss:$8 sps:$4 sm:$0xff]  }
  0x90   :  { %2026 = vmatpush1.bf16.msra.mxu1 %v2770_v31  ;;  %1986 = vmatprep.subr.bf16.mxu0 %v2775_v32  ;;  %v2866_v31 = vld [vmem:[%s3982_s1 + $0x754] ss:$8 sps:$4 sm:$0xff]   ;;  %v2861_v32 = vld [vmem:[%s3982_s1 + $0x650] ss:$8 sps:$4 sm:$0xff]  }
  0x91   :  { %2027 = vmatprep.subr.bf16.mxu1 %v2778_v33  ;;  %v2864_v33 = vld [vmem:[%s3982_s1 + $0x750] ss:$8 sps:$4 sm:$0xff]  }
  0x93   :  { %1987 = vmatpush1.bf16.msra.mxu0 %v2773_v34  ;;  %v2869_v34 = vld [vmem:[%s3982_s1 + $0x644] ss:$8 sps:$4 sm:$0xff]  }
  0x94   :  { %2028 = vmatpush1.bf16.msra.mxu1 %v2776_v35  ;;  %1988 = vmatprep.subr.bf16.mxu0 %v2781_v36  ;;  %v2872_v35 = vld [vmem:[%s3982_s1 + $0x744] ss:$8 sps:$4 sm:$0xff]   ;;  %v2867_v36 = vld [vmem:[%s3982_s1 + $0x640] ss:$8 sps:$4 sm:$0xff]  }
  0x95   :  { %2029 = vmatprep.subr.bf16.mxu1 %v2784_v37  ;;  %v2870_v37 = vld [vmem:[%s3982_s1 + $0x740] ss:$8 sps:$4 sm:$0xff]  }
  0x97   :  { %1989 = vmatpush1.bf16.msra.mxu0 %v2779_v38  ;;  %v2875_v38 = vld [vmem:[%s3982_s1 + $0x634] ss:$8 sps:$4 sm:$0xff]  }
  0x98   :  { %2030 = vmatpush1.bf16.msra.mxu1 %v2782_v39  ;;  %1990 = vmatprep.subr.bf16.mxu0 %v2787_v40  ;;  %v2878_v39 = vld [vmem:[%s3982_s1 + $0x734] ss:$8 sps:$4 sm:$0xff]   ;;  %v2873_v40 = vld [vmem:[%s3982_s1 + $0x630] ss:$8 sps:$4 sm:$0xff]  }
  0x99   :  { %2031 = vmatprep.subr.bf16.mxu1 %v2790_v41  ;;  %v2876_v41 = vld [vmem:[%s3982_s1 + $0x730] ss:$8 sps:$4 sm:$0xff]  }
  0x9b   :  { %1991 = vmatpush1.bf16.msra.mxu0 %v2785_v42  ;;  %v2881_v42 = vld [vmem:[%s3982_s1 + $0x624] ss:$8 sps:$4 sm:$0xff]  }
  0x9c   :  { %2032 = vmatpush1.bf16.msra.mxu1 %v2788_v43  ;;  %1992 = vmatprep.subr.bf16.mxu0 %v2793_v44  ;;  %v2884_v43 = vld [vmem:[%s3982_s1 + $0x724] ss:$8 sps:$4 sm:$0xff]   ;;  %v2879_v44 = vld [vmem:[%s3982_s1 + $0x620] ss:$8 sps:$4 sm:$0xff]  }
  0x9d   :  { %2033 = vmatprep.subr.bf16.mxu1 %v2796_v45  ;;  %v2882_v45 = vld [vmem:[%s3982_s1 + $0x720] ss:$8 sps:$4 sm:$0xff]  }
  0x9f   :  { %1993 = vmatpush1.bf16.msra.mxu0 %v2791_v46  ;;  %v2887_v46 = vld [vmem:[%s3982_s1 + $0x614] ss:$8 sps:$4 sm:$0xff]  }
  0xa0   :  { %2034 = vmatpush1.bf16.msra.mxu1 %v2794_v47  ;;  %1994 = vmatprep.subr.bf16.mxu0 %v2799_v48  ;;  %v2890_v47 = vld [vmem:[%s3982_s1 + $0x714] ss:$8 sps:$4 sm:$0xff]   ;;  %v2885_v48 = vld [vmem:[%s3982_s1 + $0x610] ss:$8 sps:$4 sm:$0xff]  }
  0xa1   :  { %2035 = vmatprep.subr.bf16.mxu1 %v2802_v49  ;;  %v2888_v49 = vld [vmem:[%s3982_s1 + $0x710] ss:$8 sps:$4 sm:$0xff]  }
  0xa3   :  { %1995 = vmatpush2.bf16.msra.mxu0 %v2797_v50  ;;  %v2893_v50 = vld [vmem:[%s3982_s1 + $0x604] ss:$8 sps:$4 sm:$0xff]  }
  0xa4   :  { %2036 = vmatpush2.bf16.msra.mxu1 %v2800_v51  ;;  %1996 = vmatprep.subr.bf16.mxu0 %v2805_v52  ;;  %v2896_v51 = vld [vmem:[%s3982_s1 + $0x704] ss:$8 sps:$4 sm:$0xff]   ;;  %v2891_v52 = vld [vmem:[%s3982_s1 + $0x600] ss:$8 sps:$4 sm:$0xff]  }
  0xa5   :  { %2037 = vmatprep.subr.bf16.mxu1 %v2808_v53  ;;  %v2894_v53 = vld [vmem:[%s3982_s1 + $0x700] ss:$8 sps:$4 sm:$0xff]  }
  0xa7   :  { %1997 = vmatpush2.bf16.msra.mxu0 %v2803_v54  ;;  %v2899_v54 = vld [vmem:[%s3982_s1 + $0x6f4] ss:$8 sps:$4 sm:$0xff]  }
  0xa8   :  { %2038 = vmatpush2.bf16.msra.mxu1 %v2806_v55  ;;  %1998 = vmatprep.subr.bf16.mxu0 %v2811_v56  ;;  %v2902_v55 = vld [vmem:[%s3982_s1 + $0x7f4] ss:$8 sps:$4 sm:$0xff]   ;;  %v2897_v56 = vld [vmem:[%s3982_s1 + $0x6f0] ss:$8 sps:$4 sm:$0xff]  }
  0xa9   :  { %2039 = vmatprep.subr.bf16.mxu1 %v2814_v57  ;;  %v2900_v57 = vld [vmem:[%s3982_s1 + $0x7f0] ss:$8 sps:$4 sm:$0xff]  }
  0xab   :  { %1999 = vmatpush2.bf16.msra.mxu0 %v2809_v58  ;;  %v2905_v58 = vld [vmem:[%s3982_s1 + $0x6e4] ss:$8 sps:$4 sm:$0xff]  }
  0xac   :  { %2040 = vmatpush2.bf16.msra.mxu1 %v2812_v59  ;;  %2000 = vmatprep.subr.bf16.mxu0 %v2817_v60  ;;  %v2908_v59 = vld [vmem:[%s3982_s1 + $0x7e4] ss:$8 sps:$4 sm:$0xff]   ;;  %v2903_v60 = vld [vmem:[%s3982_s1 + $0x6e0] ss:$8 sps:$4 sm:$0xff]  }
  0xad   :  { %2041 = vmatprep.subr.bf16.mxu1 %v2820_v61  ;;  %v2906_v61 = vld [vmem:[%s3982_s1 + $0x7e0] ss:$8 sps:$4 sm:$0xff]  }
  0xaf   :  { %2001 = vmatpush2.bf16.msra.mxu0 %v2815_v62  ;;  %v2911_v62 = vld [vmem:[%s3982_s1 + $0x6d4] ss:$8 sps:$4 sm:$0xff]  }
  0xb0   :  { %2042 = vmatpush2.bf16.msra.mxu1 %v2818_v63  ;;  %2002 = vmatprep.subr.bf16.mxu0 %v2823_v0  ;;  %v2914_v63 = vld [vmem:[%s3982_s1 + $0x7d4] ss:$8 sps:$4 sm:$0xff]   ;;  %v2909_v0 = vld [vmem:[%s3982_s1 + $0x6d0] ss:$8 sps:$4 sm:$0xff]  }
  0xb1   :  { %2043 = vmatprep.subr.bf16.mxu1 %v2826_v1  ;;  %v2912_v1 = vld [vmem:[%s3982_s1 + $0x7d0] ss:$8 sps:$4 sm:$0xff]  }
  0xb3   :  { %2003 = vmatpush2.bf16.msra.mxu0 %v2821_v2  ;;  %v2917_v2 = vld [vmem:[%s3982_s1 + $0x6c4] ss:$8 sps:$4 sm:$0xff]  }
  0xb4   :  { %2044 = vmatpush2.bf16.msra.mxu1 %v2824_v3  ;;  %2004 = vmatprep.subr.bf16.mxu0 %v2829_v4  ;;  %v2920_v3 = vld [vmem:[%s3982_s1 + $0x7c4] ss:$8 sps:$4 sm:$0xff]   ;;  %v2915_v4 = vld [vmem:[%s3982_s1 + $0x6c0] ss:$8 sps:$4 sm:$0xff]  }
  0xb5   :  { %2045 = vmatprep.subr.bf16.mxu1 %v2832_v5  ;;  %v2918_v5 = vld [vmem:[%s3982_s1 + $0x7c0] ss:$8 sps:$4 sm:$0xff]  }
  0xb7   :  { %2005 = vmatpush2.bf16.msra.mxu0 %v2827_v6  ;;  %v2923_v6 = vld [vmem:[%s3982_s1 + $0x6b4] ss:$8 sps:$4 sm:$0xff]  }
  0xb8   :  { %2046 = vmatpush2.bf16.msra.mxu1 %v2830_v7  ;;  %2006 = vmatprep.subr.bf16.mxu0 %v2835_v8  ;;  %v2926_v7 = vld [vmem:[%s3982_s1 + $0x7b4] ss:$8 sps:$4 sm:$0xff]   ;;  %v2921_v8 = vld [vmem:[%s3982_s1 + $0x6b0] ss:$8 sps:$4 sm:$0xff]  }
  0xb9   :  { %2047 = vmatprep.subr.bf16.mxu1 %v2838_v9  ;;  %v2924_v9 = vld [vmem:[%s3982_s1 + $0x7b0] ss:$8 sps:$4 sm:$0xff]  }
  0xbb   :  { %2007 = vmatpush2.bf16.msra.mxu0 %v2833_v10  ;;  %v2929_v10 = vld [vmem:[%s3982_s1 + $0x6a4] ss:$8 sps:$4 sm:$0xff]  }
  0xbc   :  { %2048 = vmatpush2.bf16.msra.mxu1 %v2836_v11  ;;  %2008 = vmatprep.subr.bf16.mxu0 %v2841_v12  ;;  %v2932_v11 = vld [vmem:[%s3982_s1 + $0x7a4] ss:$8 sps:$4 sm:$0xff]   ;;  %v2927_v12 = vld [vmem:[%s3982_s1 + $0x6a0] ss:$8 sps:$4 sm:$0xff]  }
  0xbd   :  { %2049 = vmatprep.subr.bf16.mxu1 %v2844_v13  ;;  %v2930_v13 = vld [vmem:[%s3982_s1 + $0x7a0] ss:$8 sps:$4 sm:$0xff]  }
  0xbf   :  { %2009 = vmatpush2.bf16.msra.mxu0 %v2839_v14  ;;  %v2935_v14 = vld [vmem:[%s3982_s1 + $0x694] ss:$8 sps:$4 sm:$0xff]  }
  0xc0   :  { %2050 = vmatpush2.bf16.msra.mxu1 %v2842_v15  ;;  %2060 = vmatprep.subr.bf16.mxu0 %v2849_v16  ;;  %v2938_v15 = vld [vmem:[%s3982_s1 + $0x794] ss:$8 sps:$4 sm:$0xff]   ;;  %v2933_v16 = vld [vmem:[%s3982_s1 + $0x690] ss:$8 sps:$4 sm:$0xff]  }
  0xc1   :  { %2101 = vmatprep.subr.bf16.mxu1 %v2854_v17  ;;  %v2936_v17 = vld [vmem:[%s3982_s1 + $0x790] ss:$8 sps:$4 sm:$0xff]  }
  0xc2   :  { %2011 = vmatmul.mubr.bf16.vlgmr.msra.gmra.mxu0 %v2249_v22  ;;  %v2939_v22 = vld [vmem:[%s3982_s1 + $0x680] ss:$8 sps:$4 sm:$0xff]  }
  0xc3   :  { %2052 = vmatmul.mubr.bf16.vlgmr.msra.gmra.mxu1 %v2251_v23  ;;  %2061 = vmatpush1.bf16.msra.mxu0 %v2847_v19  ;;  %v2941_v19 = vld [vmem:[%s3982_s1 + $0x684] ss:$8 sps:$4 sm:$0xff]   ;;  %v2942_v23 = vld [vmem:[%s3982_s1 + $0x780] ss:$8 sps:$4 sm:$0xff]  }
  0xc4   :  { %2102 = vmatpush1.bf16.msra.mxu1 %v2852_v21  ;;  %2062 = vmatprep.subr.bf16.mxu0 %v2857_v26  ;;  %v2944_v21 = vld [vmem:[%s3982_s1 + $0x784] ss:$8 sps:$4 sm:$0xff]   ;;  %v2949_v26 = vld [vmem:[%s3982_s1 + $0x874] ss:$8 sps:$4 sm:$0xff]  }
  0xc5   :  { %2103 = vmatprep.subr.bf16.mxu1 %v2860_v18  ;;  %2092 = vmatprep.mubr.bf16.mxu0 %v2254_v20  ;;  %v3854_v18 = vld [vmem:[%s3983_s0 + $0x40] sm:$0xff]  ;;  %v2253_v20 = vcombine.low %v3657_v24, %v3657_v24 }
  0xc6   :  { %2133 = vmatprep.mubr.bf16.mxu1 %v2256_v27  ;;  %v2255_v27 = vcombine.low %v3662_v25, %v3662_v25  ;;  %v2952_v25 = vld [vmem:[%s3982_s1 + $0x860] ss:$8 sps:$4 sm:$0xff]  }
  0xc7   :  { %2063 = vmatpush1.bf16.msra.mxu0 %v2855_v28  ;;  %v2947_v28 = vld [vmem:[%s3982_s1 + $0x870] ss:$8 sps:$4 sm:$0xff]  }
  0xc8   :  { %2104 = vmatpush1.bf16.msra.mxu1 %v2858_v29  ;;  %2064 = vmatprep.subr.bf16.mxu0 %v2863_v30  ;;  %v2258_v29 = vcombine.high %v3854_v18, %v3854_v18  ;;  %v2954_v30 = vld [vmem:[%s3982_s1 + $0x864] ss:$8 sps:$4 sm:$0xff]  }
  0xc9   :  { %2105 = vmatprep.subr.bf16.mxu1 %v2866_v31 }
  0xcb   :  { %2065 = vmatpush1.bf16.msra.mxu0 %v2861_v32 }
  0xcc   :  { %2106 = vmatpush1.bf16.msra.mxu1 %v2864_v33  ;;  %2066 = vmatprep.subr.bf16.mxu0 %v2869_v34 }
  0xcd   :  { %2107 = vmatprep.subr.bf16.mxu1 %v2872_v35  ;;  %v2957_v35 = vld [vmem:[%s3982_s1 + $0x854] ss:$8 sps:$4 sm:$0xff]  }
  0xcf   :  { %2067 = vmatpush1.bf16.msra.mxu0 %v2867_v36 }
  0xd0   :  { %2108 = vmatpush1.bf16.msra.mxu1 %v2870_v37  ;;  %2068 = vmatprep.subr.bf16.mxu0 %v2875_v38 }
  0xd1   :  { %2109 = vmatprep.subr.bf16.mxu1 %v2878_v39  ;;  %v2955_v39 = vld [vmem:[%s3982_s1 + $0x850] ss:$8 sps:$4 sm:$0xff]  }
  0xd3   :  { %2069 = vmatpush1.bf16.msra.mxu0 %v2873_v40 }
  0xd4   :  { %2110 = vmatpush1.bf16.msra.mxu1 %v2876_v41  ;;  %2070 = vmatprep.subr.bf16.mxu0 %v2881_v42  ;;  %v2960_v41 = vld [vmem:[%s3982_s1 + $0x844] ss:$8 sps:$4 sm:$0xff]  }
  0xd5   :  { %2111 = vmatprep.subr.bf16.mxu1 %v2884_v43  ;;  %v2958_v43 = vld [vmem:[%s3982_s1 + $0x840] ss:$8 sps:$4 sm:$0xff]  }
  0xd7   :  { %2071 = vmatpush1.bf16.msra.mxu0 %v2879_v44  ;;  %v2963_v44 = vld [vmem:[%s3982_s1 + $0x834] ss:$8 sps:$4 sm:$0xff]  }
  0xd8   :  { %2112 = vmatpush1.bf16.msra.mxu1 %v2882_v45  ;;  %2072 = vmatprep.subr.bf16.mxu0 %v2887_v46  ;;  %v2961_v45 = vld [vmem:[%s3982_s1 + $0x830] ss:$8 sps:$4 sm:$0xff]   ;;  %v2966_v46 = vld [vmem:[%s3982_s1 + $0x824] ss:$8 sps:$4 sm:$0xff]  }
  0xd9   :  { %2113 = vmatprep.subr.bf16.mxu1 %v2890_v47  ;;  %v2964_v47 = vld [vmem:[%s3982_s1 + $0x820] ss:$8 sps:$4 sm:$0xff]  }
  0xdb   :  { %2073 = vmatpush1.bf16.msra.mxu0 %v2885_v48  ;;  %v2969_v48 = vld [vmem:[%s3982_s1 + $0x814] ss:$8 sps:$4 sm:$0xff]  }
  0xdc   :  { %2114 = vmatpush1.bf16.msra.mxu1 %v2888_v49  ;;  %2074 = vmatprep.subr.bf16.mxu0 %v2893_v50  ;;  %v2967_v49 = vld [vmem:[%s3982_s1 + $0x810] ss:$8 sps:$4 sm:$0xff]   ;;  %v2972_v50 = vld [vmem:[%s3982_s1 + $0x804] ss:$8 sps:$4 sm:$0xff]  }
  0xdd   :  { %2115 = vmatprep.subr.bf16.mxu1 %v2896_v51  ;;  %v2970_v51 = vld [vmem:[%s3982_s1 + $0x800] ss:$8 sps:$4 sm:$0xff]  }
  0xdf   :  { %2075 = vmatpush1.bf16.msra.mxu0 %v2891_v52  ;;  %v2975_v52 = vld [vmem:[%s3982_s1 + $0x8f4] ss:$8 sps:$4 sm:$0xff]  }
  0xe0   :  { %2116 = vmatpush1.bf16.msra.mxu1 %v2894_v53  ;;  %2076 = vmatprep.subr.bf16.mxu0 %v2899_v54  ;;  %v2973_v53 = vld [vmem:[%s3982_s1 + $0x8f0] ss:$8 sps:$4 sm:$0xff]   ;;  %v2978_v54 = vld [vmem:[%s3982_s1 + $0x8e4] ss:$8 sps:$4 sm:$0xff]  }
  0xe1   :  { %2117 = vmatprep.subr.bf16.mxu1 %v2902_v55  ;;  %v2976_v55 = vld [vmem:[%s3982_s1 + $0x8e0] ss:$8 sps:$4 sm:$0xff]  }
  0xe3   :  { %2077 = vmatpush2.bf16.msra.mxu0 %v2897_v56  ;;  %v2981_v56 = vld [vmem:[%s3982_s1 + $0x8d4] ss:$8 sps:$4 sm:$0xff]  }
  0xe4   :  { %2118 = vmatpush2.bf16.msra.mxu1 %v2900_v57  ;;  %2078 = vmatprep.subr.bf16.mxu0 %v2905_v58  ;;  %v2979_v57 = vld [vmem:[%s3982_s1 + $0x8d0] ss:$8 sps:$4 sm:$0xff]   ;;  %v2984_v58 = vld [vmem:[%s3982_s1 + $0x8c4] ss:$8 sps:$4 sm:$0xff]  }
  0xe5   :  { %2119 = vmatprep.subr.bf16.mxu1 %v2908_v59  ;;  %v2982_v59 = vld [vmem:[%s3982_s1 + $0x8c0] ss:$8 sps:$4 sm:$0xff]  }
  0xe7   :  { %2079 = vmatpush2.bf16.msra.mxu0 %v2903_v60  ;;  %v2987_v60 = vld [vmem:[%s3982_s1 + $0x8b4] ss:$8 sps:$4 sm:$0xff]  }
  0xe8   :  { %2120 = vmatpush2.bf16.msra.mxu1 %v2906_v61  ;;  %2080 = vmatprep.subr.bf16.mxu0 %v2911_v62  ;;  %v2985_v61 = vld [vmem:[%s3982_s1 + $0x8b0] ss:$8 sps:$4 sm:$0xff]   ;;  %v2990_v62 = vld [vmem:[%s3982_s1 + $0x8a4] ss:$8 sps:$4 sm:$0xff]  }
  0xe9   :  { %2121 = vmatprep.subr.bf16.mxu1 %v2914_v63  ;;  %v2988_v63 = vld [vmem:[%s3982_s1 + $0x8a0] ss:$8 sps:$4 sm:$0xff]  }
  0xeb   :  { %2081 = vmatpush2.bf16.msra.mxu0 %v2909_v0  ;;  %v2993_v0 = vld [vmem:[%s3982_s1 + $0x894] ss:$8 sps:$4 sm:$0xff]  }
  0xec   :  { %2122 = vmatpush2.bf16.msra.mxu1 %v2912_v1  ;;  %2082 = vmatprep.subr.bf16.mxu0 %v2917_v2  ;;  %v2991_v1 = vld [vmem:[%s3982_s1 + $0x890] ss:$8 sps:$4 sm:$0xff]   ;;  %v2996_v2 = vld [vmem:[%s3982_s1 + $0x884] ss:$8 sps:$4 sm:$0xff]  }
  0xed   :  { %2123 = vmatprep.subr.bf16.mxu1 %v2920_v3  ;;  %v2994_v3 = vld [vmem:[%s3982_s1 + $0x880] ss:$8 sps:$4 sm:$0xff]  }
  0xef   :  { %2083 = vmatpush2.bf16.msra.mxu0 %v2915_v4  ;;  %v2257_v4 = vcombine.low %v3854_v18, %v3854_v18 }
  0xf0   :  { %2124 = vmatpush2.bf16.msra.mxu1 %v2918_v5  ;;  %2084 = vmatprep.subr.bf16.mxu0 %v2923_v6 }
  0xf1   :  { %2125 = vmatprep.subr.bf16.mxu1 %v2926_v7 }
  0xf3   :  { %2085 = vmatpush2.bf16.msra.mxu0 %v2921_v8 }
  0xf4   :  { %2126 = vmatpush2.bf16.msra.mxu1 %v2924_v9  ;;  %2086 = vmatprep.subr.bf16.mxu0 %v2929_v10 }
  0xf5   :  { %2127 = vmatprep.subr.bf16.mxu1 %v2932_v11 }
  0xf7   :  { %2087 = vmatpush2.bf16.msra.mxu0 %v2927_v12 }
  0xf8   :  { %2128 = vmatpush2.bf16.msra.mxu1 %v2930_v13  ;;  %2088 = vmatprep.subr.bf16.mxu0 %v2935_v14 }
  0xf9   :  { %2129 = vmatprep.subr.bf16.mxu1 %v2938_v15 }
  0xfb   :  { %2089 = vmatpush2.bf16.msra.mxu0 %v2933_v16 }
  0xfc   :  { %2130 = vmatpush2.bf16.msra.mxu1 %v2936_v17  ;;  %2090 = vmatprep.subr.bf16.mxu0 %v2941_v19 }
  0xfd   :  { %2131 = vmatprep.subr.bf16.mxu1 %v2944_v21 }
  0xff   :  { %2091 = vmatpush2.bf16.msra.mxu0 %v2939_v22 }
 0x100   :  { %2132 = vmatpush2.bf16.msra.mxu1 %v2942_v23  ;;  %2142 = vmatprep.subr.bf16.mxu0 %v2949_v26 }
 0x102   :  { %v1848_v31 = vpop.f32.mrf.mxu0  ;;  %2093 = vmatmul.mubr.bf16.vlgmr.msra.gmra.mxu0 %v2253_v20 }
 0x103   :  { %v1889_v32 = vpop.f32.mrf.mxu1  ;;  %2134 = vmatmul.mubr.bf16.vlgmr.msra.gmra.mxu1 %v2255_v27  ;;  %2143 = vmatpush1.bf16.msra.mxu0 %v2947_v28 }
 0x104   :  { %v3868_v24 = vadd.f32 %v1889_v32, %v1848_v31  ;;  %2174 = vmatprep.mubr.bf16.mxu0 %v2258_v29  ;;  %v1850_v33 = vpop.f32.mrf.mxu0  ;;  %2144 = vmatprep.subr.bf16.mxu0 %v2954_v30 }
 0x105   :  { %v1891_v34 = vpop.f32.mrf.mxu1 }
 0x106   :  { %v3876_v36 = vadd.f32 %v1891_v34, %v1850_v33  ;;  %v1852_v37 = vpop.f32.mrf.mxu0 }
 0x107   :  { %v1893_v38 = vpop.f32.mrf.mxu1  ;;  %2145 = vmatpush1.bf16.msra.mxu0 %v2952_v25 }
 0x108   :  { %v1853_v40 = vpop.f32.mrf.mxu0  ;;  %2146 = vmatprep.subr.bf16.mxu0 %v2957_v35 }
 0x109   :  { %v1894_v42 = vpop.f32.mrf.mxu1 }
 0x10b   :  { %2147 = vmatpush1.bf16.msra.mxu0 %v2955_v39 }
 0x10c   :  { %2148 = vmatprep.subr.bf16.mxu0 %v2960_v41 }
 0x10f   :  { %2149 = vmatpush1.bf16.msra.mxu0 %v2958_v43 }
 0x110   :  { %2150 = vmatprep.subr.bf16.mxu0 %v2963_v44 }
 0x113   :  { %2151 = vmatpush1.bf16.msra.mxu0 %v2961_v45 }
 0x114   :  { %2152 = vmatprep.subr.bf16.mxu0 %v2966_v46 }
 0x117   :  { %2153 = vmatpush1.bf16.msra.mxu0 %v2964_v47  ;;  %v2218_v47 = vlaneseq }
 0x118   :  { %2154 = vmatprep.subr.bf16.mxu0 %v2969_v48 }
 0x11b   :  { %2155 = vmatpush1.bf16.msra.mxu0 %v2967_v49 }
 0x11c   :  { %2156 = vmatprep.subr.bf16.mxu0 %v2972_v50 }
 0x11f   :  { %2157 = vmatpush1.bf16.msra.mxu0 %v2970_v51 }
 0x120   :  { %2158 = vmatprep.subr.bf16.mxu0 %v2975_v52 }
 0x123   :  { %2159 = vmatpush2.bf16.msra.mxu0 %v2973_v53 }
 0x124   :  { %2160 = vmatprep.subr.bf16.mxu0 %v2978_v54 }
 0x127   :  { %2161 = vmatpush2.bf16.msra.mxu0 %v2976_v55 }
 0x128   :  { %2162 = vmatprep.subr.bf16.mxu0 %v2981_v56 }
 0x12b   :  { %2163 = vmatpush2.bf16.msra.mxu0 %v2979_v57 }
 0x12c   :  { %2164 = vmatprep.subr.bf16.mxu0 %v2984_v58  ;;  %v2219_v58 = vshrl.u32 %v2218_v47, 7 }
 0x12e   :  { %vm2220_vm0 = vcmp.eq.s32.totalorder %v2219_v58, 0 }
 0x12f   :  { %2165 = vmatpush2.bf16.msra.mxu0 %v2982_v59 }
 0x130   :  { %2166 = vmatprep.subr.bf16.mxu0 %v2987_v60 }
 0x133   :  { %2167 = vmatpush2.bf16.msra.mxu0 %v2985_v61 }
 0x134   :  { %2168 = vmatprep.subr.bf16.mxu0 %v2990_v62 }
 0x137   :  { %2169 = vmatpush2.bf16.msra.mxu0 %v2988_v63 }
 0x138   :  { %2170 = vmatprep.subr.bf16.mxu0 %v2993_v0 }
 0x13b   :  { %2171 = vmatpush2.bf16.msra.mxu0 %v2991_v1 }
 0x13c   :  { %2172 = vmatprep.subr.bf16.mxu0 %v2996_v2 }
 0x13f   :  { %2173 = vmatpush2.bf16.msra.mxu0 %v2994_v3 }
 0x142   :  { %v1930_v5 = vpop.f32.mrf.mxu0  ;;  %2175 = vmatmul.mubr.bf16.vlgmr.msra.gmra.mxu0 %v2257_v4 }
 0x143   :  { %v1971_v6 = vpop.f32.mrf.mxu1  ;;  %v1931_v7 = vadd.f32 %v1930_v5, %v3868_v24 }
 0x144   :  { %v1932_v8 = vpop.f32.mrf.mxu0 }
 0x145   :  { %v1973_v9 = vpop.f32.mrf.mxu1  ;;  %v1933_v10 = vadd.f32 %v1932_v8, %v3876_v36  ;;  %v1972_v11 = vadd.f32 %v1971_v6, %v1931_v7 }
 0x146   :  { %v1934_v12 = vpop.f32.mrf.mxu0 }
 0x147   :  { %v1975_v13 = vpop.f32.mrf.mxu1  ;;  %v1974_v14 = vadd.f32 %v1973_v9, %v1933_v10 }
 0x148   :  { %v1935_v15 = vpop.f32.mrf.mxu0 }
 0x149   :  { %v1976_v16 = vpop.f32.mrf.mxu1 }
 0x182   :  { %v2012_v17 = vpop.f32.mrf.mxu0 }
 0x183   :  { %v2053_v19 = vpop.f32.mrf.mxu1  ;;  %v2013_v21 = vadd.f32 %v2012_v17, %v1972_v11 }
 0x184   :  { %v2014_v22 = vpop.f32.mrf.mxu0 }
 0x185   :  { %v2055_v23 = vpop.f32.mrf.mxu1  ;;  %v2015_v26 = vadd.f32 %v2014_v22, %v1974_v14  ;;  %v2054_v18 = vadd.f32 %v2053_v19, %v2013_v21 }
 0x186   :  { %v2016_v20 = vpop.f32.mrf.mxu0 }
 0x187   :  { %v2057_v27 = vpop.f32.mrf.mxu1  ;;  %v2056_v28 = vadd.f32 %v2055_v23, %v2015_v26 }
 0x188   :  { %v2017_v29 = vpop.f32.mrf.mxu0 }
 0x189   :  { %v2058_v30 = vpop.f32.mrf.mxu1 }
 0x1c2   :  { %v2094_v31 = vpop.f32.mrf.mxu0 }
 0x1c3   :  { %v2135_v32 = vpop.f32.mrf.mxu1  ;;  %v2095_v37 = vadd.f32 %v2094_v31, %v2054_v18 }
 0x1c4   :  { %v2096_v24 = vpop.f32.mrf.mxu0 }
 0x1c5   :  { %v2137_v25 = vpop.f32.mrf.mxu1  ;;  %v2097_v38 = vadd.f32 %v2096_v24, %v2056_v28  ;;  %v2136_v39 = vadd.f32 %v2135_v32, %v2095_v37 }
 0x1c6   :  { %v2098_v33 = vpop.f32.mrf.mxu0 }
 0x1c7   :  { %v2139_v34 = vpop.f32.mrf.mxu1  ;;  %v2138_v41 = vadd.f32 %v2137_v25, %v2097_v38 }
 0x1c8   :  { %v2099_v35 = vpop.f32.mrf.mxu0 }
 0x1c9   :  { %v2140_v36 = vpop.f32.mrf.mxu1 }
 0x202   :  { %v2176_v40 = vpop.f32.mrf.mxu0 }
 0x203   :  { %v2177_v42 = vadd.f32 %v2176_v40, %v2136_v39 }
 0x204   :  { %v2178_v43 = vpop.f32.mrf.mxu0 }
 0x205   :  { %v2192_v44 = vrot.slane %v2177_v42, 4  ;;  %v2204_v45 = vmul.f32 %v2177_v42, %v2177_v42  ;;  %v2179_v46 = vadd.f32 %v2178_v43, %v2138_v41 }
 0x206   :  { %v2180_v48 = vpop.f32.mrf.mxu0 }
 0x207   :  { %v2193_v49 = vadd.f32 %v2192_v44, %v2177_v42  ;;  %v2206_v50 = vrot.slane %v2204_v45, 4  ;;  %v2548_v51 = vpack.c.bf16 %v2179_v46, %v2177_v42  ;;  %v2198_v52 = vrot.slane %v2179_v46, 4 }
 0x208   :  { %v2205_v53 = vmul.f32 %v2179_v46, %v2179_v46  ;;  %v2181_v54 = vpop.f32.mrf.mxu0 }
 0x209   :  { %v2194_v55 = vrot.slane %v2193_v49, 2  ;;  %v2207_v56 = vadd.f32 %v2206_v50, %v2204_v45  ;;  %2191 = vst [vmem:[%s3984_s2] sm:$0xff] %v2548_v51  ;;  %v2199_v57 = vadd.f32 %v2198_v52, %v2179_v46 }
 0x20a   :  { %v2212_v59 = vrot.slane %v2205_v53, 4 }
 0x20b   :  { %v2195_v60 = vadd.f32 %v2194_v55, %v2193_v49  ;;  %v2208_v61 = vrot.slane %v2207_v56, 2  ;;  %v2200_v62 = vrot.slane %v2199_v57, 2 }
 0x20c   :  { %v2213_v63 = vadd.f32 %v2212_v59, %v2205_v53 }
 0x20d   :  { %v2196_v0 = vrot.slane %v2195_v60, 1  ;;  %v2209_v1 = vadd.f32 %v2208_v61, %v2207_v56  ;;  %v2201_v2 = vadd.f32 %v2200_v62, %v2199_v57 }
 0x20e   :  { %v2214_v3 = vrot.slane %v2213_v63, 2 }
 0x20f   :  { %v2197_v4 = vadd.f32 %v2196_v0, %v2195_v60  ;;  %v2210_v5 = vrot.slane %v2209_v1, 1  ;;  %v2202_v6 = vrot.slane %v2201_v2, 1 }
 0x210   :  { %v2215_v7 = vadd.f32 %v2214_v3, %v2213_v63 }
 0x211   :  { %v2211_v8 = vadd.f32 %v2210_v5, %v2209_v1  ;;  %v2221_v9 = vsel %vm2220_vm0, %v2197_v4, 0.0  ;;  %v2203_v10 = vadd.f32 %v2202_v6, %v2201_v2 }
 0x212   :  { %2223 = vst [vmem:[%s3985_s3] sm:$0xff] %v2221_v9  ;;  %v2216_v11 = vrot.slane %v2215_v7, 1 }
 0x213   :  { %v2225_v12 = vsel %vm2220_vm0, %v2211_v8, 0.0  ;;  %v2222_v13 = vsel %vm2220_vm0, %v2203_v10, 0.0 }
 0x214   :  { %2227 = vst [vmem:[%s3986_s4] sm:$0xff] %v2225_v12  ;;  %v2217_v14 = vadd.f32 %v2216_v11, %v2215_v7  ;;  %2224 = vst [vmem:[%s3985_s3 + $0x8] sm:$0xff] %v2222_v13 }
 0x216   :  { %v2226_v15 = vsel %vm2220_vm0, %v2217_v14, 0.0 }
 0x217   :  { %2228 = vst [vmem:[%s3986_s4 + $0x8] sm:$0xff] %v2226_v15 }

</bundles_post_ra>
